<compile_context>
chip_gen: v5e
topology: v5e:2x2
jax: 0.10.0
libtpu: 0.0.40
codegen_flags: <defaults>
</compile_context>

<pallas_src>
import functools
import math

import numpy as np
import jax
import jax.numpy as jnp
from jax.experimental import pallas as pl
from jax.experimental.pallas import tpu as pltpu

BN_EPS = 1e-5
PP_SIZES = (1, 3, 6, 8)


def _round_up(x, m):
    return ((x + m - 1) // m) * m


# ---------------------------------------------------------------------------
# Pallas kernels
# ---------------------------------------------------------------------------

def _matmul_kernel(*refs, act, has_skip):
    """Tiled matmul with K-accumulation + fused shift / skip-add / ReLU."""
    acc_ref = refs[-1]          # VMEM scratch (tm, tn) f32
    out_ref = refs[-2]
    x_ref, w_ref, shift_ref = refs[0], refs[1], refs[2]
    skip_ref = refs[3] if has_skip else None

    kidx = pl.program_id(2)

    @pl.when(kidx == 0)
    def _init():
        acc_ref[...] = jnp.zeros_like(acc_ref)

    acc_ref[...] += jnp.dot(x_ref[...], w_ref[...],
                            preferred_element_type=jnp.float32)

    @pl.when(kidx == pl.num_programs(2) - 1)
    def _finalize():
        y = acc_ref[...] + shift_ref[...]
        if has_skip:
            y = y + skip_ref[...]
        if act == "relu":
            y = jnp.maximum(y, 0.0)
        out_ref[...] = y.astype(out_ref.dtype)


def matmul_affine(x, w, shift, act=None, skip=None, tm=512, tn=256, tk=512):
    """(M,K)@(K,N) in bf16 on the MXU, f32 accum, epilogue: +shift(+skip)(ReLU).

    Inputs are zero-padded to tile multiples (padded K contributes 0 to the
    dot; padded rows/cols are sliced off), so the kernel always sees aligned,
    lane-dense (>=128) blocks.
    """
    M, K = x.shape
    N = w.shape[1]
    tm = min(tm, _round_up(M, 16))     # bf16 sublane alignment
    tn = min(tn, _round_up(N, 128))    # lane-dense output
    tk = min(tk, _round_up(K, 128))
    Mp, Np, Kp = _round_up(M, tm), _round_up(N, tn), _round_up(K, tk)

    xb = jnp.pad(x.astype(jnp.bfloat16), ((0, Mp - M), (0, Kp - K)))
    wb = jnp.pad(w.astype(jnp.bfloat16), ((0, Kp - K), (0, Np - N)))
    sb = jnp.pad(shift.reshape(1, N).astype(jnp.float32), ((0, 0), (0, Np - N)))

    args = [xb, wb, sb]
    in_specs = [
        pl.BlockSpec((tm, tk), lambda i, j, k: (i, k)),
        pl.BlockSpec((tk, tn), lambda i, j, k: (k, j)),
        pl.BlockSpec((1, tn), lambda i, j, k: (0, j)),
    ]
    has_skip = skip is not None
    if has_skip:
        skb = jnp.pad(skip.astype(jnp.float32), ((0, Mp - M), (0, Np - N)))
        args.append(skb)
        in_specs.append(pl.BlockSpec((tm, tn), lambda i, j, k: (i, j)))

    out = pl.pallas_call(
        functools.partial(_matmul_kernel, act=act, has_skip=has_skip),
        grid=(Mp // tm, Np // tn, Kp // tk),
        in_specs=in_specs,
        out_specs=pl.BlockSpec((tm, tn), lambda i, j, k: (i, j)),
        out_shape=jax.ShapeDtypeStruct((Mp, Np), jnp.float32),
        scratch_shapes=[pltpu.VMEM((tm, tn), jnp.float32)],
        compiler_params=pltpu.CompilerParams(
            dimension_semantics=("parallel", "parallel", "arbitrary")),
    )(*args)
    return out[:M, :N]


def _bmm_kernel(a_ref, b_ref, o_ref):
    o_ref[...] = jnp.dot(a_ref[...], b_ref[...],
                         preferred_element_type=jnp.float32)


def bmm(a, b, tm=256, tn=256):
    """Batched matmul (B,M,K)@(B,K,N)->(B,M,N); squeezed batch dim, tiled M/N."""
    B, M, K = a.shape
    N = b.shape[2]
    tm = min(tm, _round_up(M, 16))
    tn = min(tn, _round_up(N, 128))
    Kp = _round_up(K, 128)
    Mp, Np = _round_up(M, tm), _round_up(N, tn)

    ab = jnp.pad(a.astype(jnp.bfloat16), ((0, 0), (0, Mp - M), (0, Kp - K)))
    bb = jnp.pad(b.astype(jnp.bfloat16), ((0, 0), (0, Kp - K), (0, Np - N)))

    out = pl.pallas_call(
        _bmm_kernel,
        grid=(B, Mp // tm, Np // tn),
        in_specs=[
            pl.BlockSpec((pl.Squeezed(), tm, Kp), lambda bi, i, j: (bi, i, 0)),
            pl.BlockSpec((pl.Squeezed(), Kp, tn), lambda bi, i, j: (bi, 0, j)),
        ],
        out_specs=pl.BlockSpec((pl.Squeezed(), tm, tn),
                               lambda bi, i, j: (bi, i, j)),
        out_shape=jax.ShapeDtypeStruct((B, Mp, Np), jnp.float32),
        compiler_params=pltpu.CompilerParams(
            dimension_semantics=("parallel", "parallel", "parallel")),
    )(ab, bb)
    return out[:, :M, :N]


def _softmax_kernel(x_ref, o_ref):
    x = x_ref[...]
    m = jnp.max(x, axis=-1, keepdims=True)
    e = jnp.exp(x - m)
    s = jnp.sum(e, axis=-1, keepdims=True)
    o_ref[...] = e * pl.reciprocal(s, approx=True)


def softmax_last(x, tm=512):
    """Row-tiled softmax over the last axis; lane dim padded with -1e30 so the
    padded columns contribute 0 to the denominator."""
    shape = x.shape
    L = shape[-1]
    x2 = x.reshape(-1, L).astype(jnp.float32)
    R = x2.shape[0]
    tm = min(tm, _round_up(R, 8))
    Rp, Lp = _round_up(R, tm), _round_up(L, 128)
    xp = jnp.pad(x2, ((0, Rp - R), (0, Lp - L)), constant_values=-1e30)

    out = pl.pallas_call(
        _softmax_kernel,
        grid=(Rp // tm,),
        in_specs=[pl.BlockSpec((tm, Lp), lambda i: (i, 0))],
        out_specs=pl.BlockSpec((tm, Lp), lambda i: (i, 0)),
        out_shape=jax.ShapeDtypeStruct((Rp, Lp), jnp.float32),
        compiler_params=pltpu.CompilerParams(
            dimension_semantics=("parallel",)),
    )(xp)
    return out[:R, :L].reshape(shape)


# ---------------------------------------------------------------------------
# Conv / Deconv / pooling glue (channels-last; matmuls run in Pallas)
# ---------------------------------------------------------------------------

def _im2col(x, k, stride, pad):
    """(B,D,H,W,C) -> (B*Do*Ho*Wo, k^3*C) bf16 patches, tap-major / channel-minor."""
    B, D, H, W, C = x.shape
    Do = (D + 2 * pad - k) // stride + 1
    Ho = (H + 2 * pad - k) // stride + 1
    Wo = (W + 2 * pad - k) // stride + 1
    xp = jnp.pad(x, ((0, 0), (pad, pad), (pad, pad), (pad, pad), (0, 0)))
    xp = xp.astype(jnp.bfloat16)
    cols = []
    for kd in range(k):
        for kh in range(k):
            for kw in range(k):
                cols.append(xp[:, kd:kd + stride * Do:stride,
                               kh:kh + stride * Ho:stride,
                               kw:kw + stride * Wo:stride, :])
    patches = jnp.concatenate(cols, axis=-1)            # (B,Do,Ho,Wo, k^3*C)
    return patches.reshape(B * Do * Ho * Wo, k * k * k * C), (B, Do, Ho, Wo)


def conv3d_bn(x, params, stride, pad, act):
    """Conv3d(bias=False) + BatchNorm3d(eval) + optional ReLU, channels-last."""
    w, scale, shift = params["w"], params["scale"], params["shift"]
    Cout, Cin, k = w.shape[0], w.shape[1], w.shape[2]
    if k == 1 and stride == 1 and pad == 0:
        B, D, H, W, _ = x.shape
        wm = w.reshape(Cout, Cin).T * scale[None, :]        # BN scale folded
        y = matmul_affine(x.reshape(-1, Cin), wm, shift, act=act)
        return y.reshape(B, D, H, W, Cout)
    patches, (B, Do, Ho, Wo) = _im2col(x, k, stride, pad)
    wm = w.transpose(2, 3, 4, 1, 0).reshape(k * k * k * Cin, Cout)
    wm = wm * scale[None, :]                                # BN scale folded
    y = matmul_affine(patches, wm, shift, act=act)
    return y.reshape(B, Do, Ho, Wo, Cout)


def deconv3d_bn_phase(x, params, act=None, skip=None):
    """ConvTranspose3d(k=3, stride=2, pad=1, out_pad=1) + BN via sub-pixel
    (phase) decomposition: 8 stride-1 matmuls, outputs interleaved.  The skip
    branch (if given, channels-last, already at output resolution) and the
    ReLU are fused into the matmul epilogue."""
    w, scale, shift = params["w"], params["scale"], params["shift"]  # (Cin,Cout,3,3,3)
    Cin, Cout = w.shape[0], w.shape[1]
    B, D, H, W, _ = x.shape
    # output index o = 2*i - 1 + k  (k in 0..2):
    #   phase 0 (o=2m):   k=1, i=m
    #   phase 1 (o=2m+1): k=2, i=m   and  k=0, i=m+1
    taps = {0: [(1, 0)], 1: [(2, 0), (0, 1)]}
    xp = jnp.pad(x, ((0, 0), (0, 1), (0, 1), (0, 1), (0, 0)))
    xp = xp.astype(jnp.bfloat16)

    phase_out = {}
    for rd in range(2):
        for rh in range(2):
            for rw in range(2):
                cols, wparts = [], []
                for (kd, sd) in taps[rd]:
                    for (kh, sh) in taps[rh]:
                        for (kw, sw) in taps[rw]:
                            cols.append(xp[:, sd:sd + D, sh:sh + H, sw:sw + W, :])
                            wparts.append(w[:, :, kd, kh, kw])      # (Cin, Cout)
                patches = jnp.concatenate(cols, axis=-1).reshape(B * D * H * W, -1)
                wm = jnp.concatenate(wparts, axis=0) * scale[None, :]
                sk = None
                if skip is not None:
                    sk = skip[:, rd::2, rh::2, rw::2, :].reshape(B * D * H * W, Cout)
                y = matmul_affine(patches, wm, shift, act=act, skip=sk)
                phase_out[(rd, rh, rw)] = y.reshape(B, D, H, W, Cout)

    rows0 = []
    for rd in range(2):
        rows1 = []
        for rh in range(2):
            rows1.append(jnp.stack([phase_out[(rd, rh, rw)] for rw in range(2)],
                                   axis=4))               # (B,D,H,W,2,C)
        rows0.append(jnp.stack(rows1, axis=3))            # (B,D,H,2,W,2,C)
    y = jnp.stack(rows0, axis=2)                          # (B,D,2,H,2,W,2,C)
    return y.reshape(B, 2 * D, 2 * H, 2 * W, Cout)


def _adaptive_pool_matrix(in_size, out_size):
    P = np.zeros((out_size, in_size), np.float32)
    for i in range(out_size):
        s = (i * in_size) // out_size
        e = -(-((i + 1) * in_size) // out_size)           # ceil
        P[i, s:e] = 1.0 / (e - s)
    return P


def pyramid_pool(x):
    """AdaptiveAvgPool3d pyramid, separable (pool D, then H, then W).
    x: (B,D,H,W,C) -> (B, L, C) with L = sum(s^3) in PyTorch's (d,h,w) order."""
    B, D, H, W, C = x.shape
    outs = []
    for s in PP_SIZES:
        Pd = jnp.asarray(_adaptive_pool_matrix(D, s))
        Ph = jnp.asarray(_adaptive_pool_matrix(H, s))
        Pw = jnp.asarray(_adaptive_pool_matrix(W, s))
        y = jnp.einsum("bdhwc,ad->bahwc", x, Pd)
        y = jnp.einsum("bahwc,eh->baewc", y, Ph)
        y = jnp.einsum("baewc,fw->baefc", y, Pw)
        outs.append(y.reshape(B, s * s * s, C))
    return jnp.concatenate(outs, axis=1)


# ---------------------------------------------------------------------------
# Module forward passes (channels-last internally)
# ---------------------------------------------------------------------------

def channel_propagate_fwd(x, params):
    B, D, H, W, C = x.shape
    q = pyramid_pool(conv3d_bn(x, params["cp_q"], 1, 0, None))      # (B,L,C)
    k = pyramid_pool(conv3d_bn(x, params["cp_k"], 1, 0, None))      # (B,L,C)
    v = conv3d_bn(x, params["cp_v"], 1, 0, None)                    # (B,D,H,W,C)
    aff = bmm(jnp.transpose(q, (0, 2, 1)), k)                       # (B,C,C)
    aff = softmax_last(aff)
    vmat = jnp.transpose(v.reshape(B, D * H * W, C), (0, 2, 1))     # (B,C,DHW)
    ctx = bmm(aff, vmat)                                            # (B,C,DHW)
    ctx = jnp.transpose(ctx, (0, 2, 1)).reshape(B, D, H, W, C)
    return ctx, aff


def spatial_propagate_fwd(x, params, scale_div=4):
    B, D, H, W, C = x.shape
    ch = C // scale_div
    q = conv3d_bn(x, params["sp_q"], 1, 0, None).reshape(B, D * H * W, ch)
    k = pyramid_pool(conv3d_bn(x, params["sp_k"], 1, 0, None))      # (B,L,ch)
    v = pyramid_pool(conv3d_bn(x, params["sp_v"], 1, 0, None))      # (B,L,ch)
    q = q * (ch ** -0.5)                # fold 1/sqrt(d) into q (cheaper side)
    aff = bmm(q, jnp.transpose(k, (0, 2, 1)))                       # (B,DHW,L)
    aff = softmax_last(aff)
    ctx = bmm(aff, v).reshape(B, D, H, W, ch)                       # (B,DHW,ch)
    ctx = conv3d_bn(ctx, params["sp_conv"], 1, 0, None)
    return ctx, aff.reshape(B, D, H, W, -1)


def hourglass_fwd(x_ncdhw, params):
    x = jnp.transpose(x_ncdhw, (0, 2, 3, 4, 1))          # -> channels-last
    conv1 = conv3d_bn(x, params["conv1"], 2, 1, "relu")
    conv2 = conv3d_bn(conv1, params["conv2"], 1, 1, "relu")
    conv3 = conv3d_bn(conv2, params["conv3"], 2, 1, "relu")
    conv4 = conv3d_bn(conv3, params["conv4"], 1, 1, "relu")

    cp, acc = channel_propagate_fwd(conv4, params)
    conv_cp = conv3d_bn(jnp.concatenate((conv4, cp), axis=-1),
                        params["conv_cp"], 1, 0, "relu")

    sp, ass = spatial_propagate_fwd(conv4, params)
    conv_sp = conv3d_bn(jnp.concatenate((conv4, sp), axis=-1),
                        params["conv_sp"], 1, 0, "relu")

    # skip branches computed first; their add + ReLU is fused into the
    # deconv matmul epilogues (no separate add_relu pass over HBM).
    redir2 = conv3d_bn(conv2, params["redir2"], 1, 0, None)
    conv5 = deconv3d_bn_phase(conv_cp + conv_sp, params["conv5"],
                              act="relu", skip=redir2)
    redir1 = conv3d_bn(x, params["redir1"], 1, 0, None)
    conv6 = deconv3d_bn_phase(conv5, params["conv6"], act="relu", skip=redir1)

    conv6 = jnp.transpose(conv6, (0, 4, 1, 2, 3))        # back to NCDHW
    return conv6, acc, ass


# ---------------------------------------------------------------------------
# Deterministic parameter construction
# ---------------------------------------------------------------------------

def _conv_params(key, cout, cin, k):
    kw, kg, kb, km, kv = jax.random.split(key, 5)
    fan_in = cin * k ** 3
    w = jax.random.normal(kw, (cout, cin, k, k, k), jnp.float32) / math.sqrt(fan_in)
    gamma = 1.0 + 0.1 * jax.random.normal(kg, (cout,), jnp.float32)
    beta = 0.1 * jax.random.normal(kb, (cout,), jnp.float32)
    mean = 0.1 * jax.random.normal(km, (cout,), jnp.float32)
    var = 1.0 + 0.1 * jax.random.uniform(kv, (cout,), jnp.float32)
    scale = gamma / jnp.sqrt(var + BN_EPS)
    shift = beta - mean * scale
    return {"w": w, "scale": scale, "shift": shift}


def _deconv_params(key, cin, cout, k):
    p = _conv_params(key, cout, cin, k)
    # ConvTranspose3d weight layout is (Cin, Cout, k, k, k)
    return {"w": p["w"].transpose(1, 0, 2, 3, 4),
            "scale": p["scale"], "shift": p["shift"]}


def init_hourglass_params(key, c):
    names = [
        ("conv1", (2 * c, c, 3)), ("conv2", (2 * c, 2 * c, 3)),
        ("conv3", (4 * c, 2 * c, 3)), ("conv4", (4 * c, 4 * c, 3)),
        ("cp_q", (4 * c, 4 * c, 1)), ("cp_k", (4 * c, 4 * c, 1)),
        ("cp_v", (4 * c, 4 * c, 1)),
        ("conv_cp", (4 * c, 8 * c, 1)),
        ("sp_q", (c, 4 * c, 1)), ("sp_k", (c, 4 * c, 1)), ("sp_v", (c, 4 * c, 1)),
        ("sp_conv", (4 * c, c, 1)),
        ("conv_sp", (4 * c, 8 * c, 1)),
        ("redir1", (c, c, 1)), ("redir2", (2 * c, 2 * c, 1)),
    ]
    keys = jax.random.split(key, len(names) + 2)
    params = {}
    for (name, (co, ci, k)), kk in zip(names, keys[:len(names)]):
        params[name] = _conv_params(kk, co, ci, k)
    params["conv5"] = _deconv_params(keys[-2], 4 * c, 2 * c, 3)
    params["conv6"] = _deconv_params(keys[-1], 2 * c, c, 3)
    return params


# ---------------------------------------------------------------------------

if __name__ == "__main__":
    key = jax.random.PRNGKey(0)
    kx, kp = jax.random.split(key)

    B, C, D, H, W = 2, 4, 16, 16, 16            # small NCDHW input
    x = jax.random.normal(kx, (B, C, D, H, W), jnp.float32)
    params = init_hourglass_params(kp, C)

    fwd = jax.jit(hourglass_fwd)
    conv6, acc, ass = fwd(x, params)
    jax.block_until_ready((conv6, acc, ass))

    L = sum(s ** 3 for s in PP_SIZES)           # 756
    assert conv6.shape == (B, C, D, H, W)
    assert acc.shape == (B, 4 * C, 4 * C)
    assert ass.shape == (B, D // 4, H // 4, W // 4, L)
    assert bool(jnp.all(jnp.isfinite(conv6)))
    assert bool(jnp.all(jnp.isfinite(acc)))
    assert bool(jnp.all(jnp.isfinite(ass)))
    print("KERNEL_OK")
</pallas_src>

<mosaic_0001>
module attributes {stable_mosaic.version = 11 : i64} {
  func.func @_matmul_kernel(%arg0: i32, %arg1: i32, %arg2: i32, %arg3: memref<512x128xbf16, #tpu.memory_space<vmem>>, %arg4: memref<128x128xbf16, #tpu.memory_space<vmem>>, %arg5: memref<1x128xf32, #tpu.memory_space<vmem>>, %arg6: memref<512x128xf32, #tpu.memory_space<vmem>>, %arg7: memref<512x128xf32, #tpu.memory_space<vmem>>) attributes {dimension_semantics = [#tpu.dimension_semantics<parallel>, #tpu.dimension_semantics<parallel>, #tpu.dimension_semantics<arbitrary>], iteration_bounds = array<i64: 2, 1, 1>, scalar_prefetch = 0 : i64, scratch_operands = 1 : i64, tpu.core_type = #tpu.core_type<tc>, window_params = [{transform_indices = @transform_0, window_bounds = array<i64: 512, 128>}, {transform_indices = @transform_1, window_bounds = array<i64: 128, 128>}, {transform_indices = @transform_2, window_bounds = array<i64: 1, 128>}, {transform_indices = @transform_3, window_bounds = array<i64: 512, 128>}]} {
    %c0_i32 = arith.constant 0 : i32
    %0 = arith.cmpi eq, %arg2, %c0_i32 : i32
    %1 = arith.extui %0 : i1 to i32
    %c0_i32_0 = arith.constant 0 : i32
    %2 = arith.cmpi ne, %1, %c0_i32_0 : i32
    scf.if %2 {
      %cst_10 = arith.constant 0.000000e+00 : f32
      %12 = vector.broadcast %cst_10 : f32 to vector<512x128xf32>
      %c0_11 = arith.constant 0 : index
      %c0_12 = arith.constant 0 : index
      %13 = vector.load %arg7[%c0_11, %c0_12] : memref<512x128xf32, #tpu.memory_space<vmem>>, vector<512x128xf32>
      tpu.vector_store %arg7[%c0_11, %c0_12], %12 {strides = array<i32>} : memref<512x128xf32, #tpu.memory_space<vmem>>, vector<512x128xf32>,
    } else {
    }
    %c0 = arith.constant 0 : index
    %c0_1 = arith.constant 0 : index
    %3 = vector.load %arg7[%c0, %c0_1] : memref<512x128xf32, #tpu.memory_space<vmem>>, vector<512x128xf32>
    %c0_2 = arith.constant 0 : index
    %c0_3 = arith.constant 0 : index
    %4 = vector.load %arg3[%c0_2, %c0_3] : memref<512x128xbf16, #tpu.memory_space<vmem>>, vector<512x128xbf16>
    %c0_4 = arith.constant 0 : index
    %c0_5 = arith.constant 0 : index
    %5 = vector.load %arg4[%c0_4, %c0_5] : memref<128x128xbf16, #tpu.memory_space<vmem>>, vector<128x128xbf16>
    %cst = arith.constant dense<0.000000e+00> : vector<512x128xf32>
    %6 = tpu.matmul %4, %5, %cst {dimension_numbers = #tpu.dot_dimension_numbers<[1], [0], [0], [1], [0, 0, 1, 1], [], []>} : vector<512x128xbf16>, vector<128x128xbf16>, vector<512x128xf32> -> vector<512x128xf32>
    %7 = arith.addf %3, %6 : vector<512x128xf32>
    %c0_6 = arith.constant 0 : index
    %c0_7 = arith.constant 0 : index
    %8 = vector.load %arg7[%c0_6, %c0_7] : memref<512x128xf32, #tpu.memory_space<vmem>>, vector<512x128xf32>
    tpu.vector_store %arg7[%c0_6, %c0_7], %7 {strides = array<i32>} : memref<512x128xf32, #tpu.memory_space<vmem>>, vector<512x128xf32>,
    %c0_i32_8 = arith.constant 0 : i32
    %9 = arith.cmpi eq, %arg2, %c0_i32_8 : i32
    %10 = arith.extui %9 : i1 to i32
    %c0_i32_9 = arith.constant 0 : i32
    %11 = arith.cmpi ne, %10, %c0_i32_9 : i32
    scf.if %11 {
      %c0_10 = arith.constant 0 : index
      %c0_11 = arith.constant 0 : index
      %12 = vector.load %arg7[%c0_10, %c0_11] : memref<512x128xf32, #tpu.memory_space<vmem>>, vector<512x128xf32>
      %c0_12 = arith.constant 0 : index
      %c0_13 = arith.constant 0 : index
      %13 = vector.load %arg5[%c0_12, %c0_13] : memref<1x128xf32, #tpu.memory_space<vmem>>, vector<1x128xf32>
      %14 = vector.broadcast %13 : vector<1x128xf32> to vector<512x128xf32>
      %15 = arith.addf %12, %14 : vector<512x128xf32>
      %cst_14 = arith.constant 0.000000e+00 : f32
      %16 = vector.broadcast %cst_14 : f32 to vector<512x128xf32>
      %17 = arith.maximumf %15, %16 : vector<512x128xf32>
      %c0_15 = arith.constant 0 : index
      %c0_16 = arith.constant 0 : index
      %18 = vector.load %arg6[%c0_15, %c0_16] : memref<512x128xf32, #tpu.memory_space<vmem>>, vector<512x128xf32>
      tpu.vector_store %arg6[%c0_15, %c0_16], %17 {strides = array<i32>} : memref<512x128xf32, #tpu.memory_space<vmem>>, vector<512x128xf32>,
    } else {
    }
    return
  }
  func.func @transform_0(%arg0: i32, %arg1: i32, %arg2: i32) -> (i32, i32) {
    %c0_i32 = arith.constant 0 : i32
    return %arg0, %arg2 : i32, i32
  }
  func.func @transform_1(%arg0: i32, %arg1: i32, %arg2: i32) -> (i32, i32) {
    %c0_i32 = arith.constant 0 : i32
    return %arg2, %arg1 : i32, i32
  }
  func.func @transform_2(%arg0: i32, %arg1: i32, %arg2: i32) -> (i32, i32) {
    %c0_i32 = arith.constant 0 : i32
    %c0_i32_0 = arith.constant 0 : i32
    return %c0_i32, %arg1 : i32, i32
  }
  func.func @transform_3(%arg0: i32, %arg1: i32, %arg2: i32) -> (i32, i32) {
    %c0_i32 = arith.constant 0 : i32
    return %arg0, %arg1 : i32, i32
  }
}

module attributes {stable_mosaic.version = 11 : i64} {
  func.func @_matmul_kernel(%arg0: i32, %arg1: i32, %arg2: i32, %arg3: memref<512x256xbf16, #tpu.memory_space<vmem>>, %arg4: memref<256x128xbf16, #tpu.memory_space<vmem>>, %arg5: memref<1x128xf32, #tpu.memory_space<vmem>>, %arg6: memref<512x128xf32, #tpu.memory_space<vmem>>, %arg7: memref<512x128xf32, #tpu.memory_space<vmem>>) attributes {dimension_semantics = [#tpu.dimension_semantics<parallel>, #tpu.dimension_semantics<parallel>, #tpu.dimension_semantics<arbitrary>], iteration_bounds = array<i64: 2, 1, 1>, scalar_prefetch = 0 : i64, scratch_operands = 1 : i64, tpu.core_type = #tpu.core_type<tc>, window_params = [{transform_indices = @transform_0, window_bounds = array<i64: 512, 256>}, {transform_indices = @transform_1, window_bounds = array<i64: 256, 128>}, {transform_indices = @transform_2, window_bounds = array<i64: 1, 128>}, {transform_indices = @transform_3, window_bounds = array<i64: 512, 128>}]} {
    %c0_i32 = arith.constant 0 : i32
    %0 = arith.cmpi eq, %arg2, %c0_i32 : i32
    %1 = arith.extui %0 : i1 to i32
    %c0_i32_0 = arith.constant 0 : i32
    %2 = arith.cmpi ne, %1, %c0_i32_0 : i32
    scf.if %2 {
      %cst_10 = arith.constant 0.000000e+00 : f32
      %12 = vector.broadcast %cst_10 : f32 to vector<512x128xf32>
      %c0_11 = arith.constant 0 : index
      %c0_12 = arith.constant 0 : index
      %13 = vector.load %arg7[%c0_11, %c0_12] : memref<512x128xf32, #tpu.memory_space<vmem>>, vector<512x128xf32>
      tpu.vector_store %arg7[%c0_11, %c0_12], %12 {strides = array<i32>} : memref<512x128xf32, #tpu.memory_space<vmem>>, vector<512x128xf32>,
    } else {
    }
    %c0 = arith.constant 0 : index
    %c0_1 = arith.constant 0 : index
    %3 = vector.load %arg7[%c0, %c0_1] : memref<512x128xf32, #tpu.memory_space<vmem>>, vector<512x128xf32>
    %c0_2 = arith.constant 0 : index
    %c0_3 = arith.constant 0 : index
    %4 = vector.load %arg3[%c0_2, %c0_3] : memref<512x256xbf16, #tpu.memory_space<vmem>>, vector<512x256xbf16>
    %c0_4 = arith.constant 0 : index
    %c0_5 = arith.constant 0 : index
    %5 = vector.load %arg4[%c0_4, %c0_5] : memref<256x128xbf16, #tpu.memory_space<vmem>>, vector<256x128xbf16>
    %cst = arith.constant dense<0.000000e+00> : vector<512x128xf32>
    %6 = tpu.matmul %4, %5, %cst {dimension_numbers = #tpu.dot_dimension_numbers<[1], [0], [0], [1], [0, 0, 1, 1], [], []>} : vector<512x256xbf16>, vector<256x128xbf16>, vector<512x128xf32> -> vector<512x128xf32>
    %7 = arith.addf %3, %6 : vector<512x128xf32>
    %c0_6 = arith.constant 0 : index
    %c0_7 = arith.constant 0 : index
    %8 = vector.load %arg7[%c0_6, %c0_7] : memref<512x128xf32, #tpu.memory_space<vmem>>, vector<512x128xf32>
    tpu.vector_store %arg7[%c0_6, %c0_7], %7 {strides = array<i32>} : memref<512x128xf32, #tpu.memory_space<vmem>>, vector<512x128xf32>,
    %c0_i32_8 = arith.constant 0 : i32
    %9 = arith.cmpi eq, %arg2, %c0_i32_8 : i32
    %10 = arith.extui %9 : i1 to i32
    %c0_i32_9 = arith.constant 0 : i32
    %11 = arith.cmpi ne, %10, %c0_i32_9 : i32
    scf.if %11 {
      %c0_10 = arith.constant 0 : index
      %c0_11 = arith.constant 0 : index
      %12 = vector.load %arg7[%c0_10, %c0_11] : memref<512x128xf32, #tpu.memory_space<vmem>>, vector<512x128xf32>
      %c0_12 = arith.constant 0 : index
      %c0_13 = arith.constant 0 : index
      %13 = vector.load %arg5[%c0_12, %c0_13] : memref<1x128xf32, #tpu.memory_space<vmem>>, vector<1x128xf32>
      %14 = vector.broadcast %13 : vector<1x128xf32> to vector<512x128xf32>
      %15 = arith.addf %12, %14 : vector<512x128xf32>
      %cst_14 = arith.constant 0.000000e+00 : f32
      %16 = vector.broadcast %cst_14 : f32 to vector<512x128xf32>
      %17 = arith.maximumf %15, %16 : vector<512x128xf32>
      %c0_15 = arith.constant 0 : index
      %c0_16 = arith.constant 0 : index
      %18 = vector.load %arg6[%c0_15, %c0_16] : memref<512x128xf32, #tpu.memory_space<vmem>>, vector<512x128xf32>
      tpu.vector_store %arg6[%c0_15, %c0_16], %17 {strides = array<i32>} : memref<512x128xf32, #tpu.memory_space<vmem>>, vector<512x128xf32>,
    } else {
    }
    return
  }
  func.func @transform_0(%arg0: i32, %arg1: i32, %arg2: i32) -> (i32, i32) {
    %c0_i32 = arith.constant 0 : i32
    return %arg0, %arg2 : i32, i32
  }
  func.func @transform_1(%arg0: i32, %arg1: i32, %arg2: i32) -> (i32, i32) {
    %c0_i32 = arith.constant 0 : i32
    return %arg2, %arg1 : i32, i32
  }
  func.func @transform_2(%arg0: i32, %arg1: i32, %arg2: i32) -> (i32, i32) {
    %c0_i32 = arith.constant 0 : i32
    %c0_i32_0 = arith.constant 0 : i32
    return %c0_i32, %arg1 : i32, i32
  }
  func.func @transform_3(%arg0: i32, %arg1: i32, %arg2: i32) -> (i32, i32) {
    %c0_i32 = arith.constant 0 : i32
    return %arg0, %arg1 : i32, i32
  }
}

module attributes {stable_mosaic.version = 11 : i64} {
  func.func @_matmul_kernel(%arg0: i32, %arg1: i32, %arg2: i32, %arg3: memref<128x256xbf16, #tpu.memory_space<vmem>>, %arg4: memref<256x128xbf16, #tpu.memory_space<vmem>>, %arg5: memref<1x128xf32, #tpu.memory_space<vmem>>, %arg6: memref<128x128xf32, #tpu.memory_space<vmem>>, %arg7: memref<128x128xf32, #tpu.memory_space<vmem>>) attributes {dimension_semantics = [#tpu.dimension_semantics<parallel>, #tpu.dimension_semantics<parallel>, #tpu.dimension_semantics<arbitrary>], iteration_bounds = array<i64: 1, 1, 1>, scalar_prefetch = 0 : i64, scratch_operands = 1 : i64, tpu.core_type = #tpu.core_type<tc>, window_params = [{transform_indices = @transform_0, window_bounds = array<i64: 128, 256>}, {transform_indices = @transform_1, window_bounds = array<i64: 256, 128>}, {transform_indices = @transform_2, window_bounds = array<i64: 1, 128>}, {transform_indices = @transform_3, window_bounds = array<i64: 128, 128>}]} {
    %c0_i32 = arith.constant 0 : i32
    %0 = arith.cmpi eq, %arg2, %c0_i32 : i32
    %1 = arith.extui %0 : i1 to i32
    %c0_i32_0 = arith.constant 0 : i32
    %2 = arith.cmpi ne, %1, %c0_i32_0 : i32
    scf.if %2 {
      %cst_10 = arith.constant 0.000000e+00 : f32
      %12 = vector.broadcast %cst_10 : f32 to vector<128x128xf32>
      %c0_11 = arith.constant 0 : index
      %c0_12 = arith.constant 0 : index
      %13 = vector.load %arg7[%c0_11, %c0_12] : memref<128x128xf32, #tpu.memory_space<vmem>>, vector<128x128xf32>
      tpu.vector_store %arg7[%c0_11, %c0_12], %12 {strides = array<i32>} : memref<128x128xf32, #tpu.memory_space<vmem>>, vector<128x128xf32>,
    } else {
    }
    %c0 = arith.constant 0 : index
    %c0_1 = arith.constant 0 : index
    %3 = vector.load %arg7[%c0, %c0_1] : memref<128x128xf32, #tpu.memory_space<vmem>>, vector<128x128xf32>
    %c0_2 = arith.constant 0 : index
    %c0_3 = arith.constant 0 : index
    %4 = vector.load %arg3[%c0_2, %c0_3] : memref<128x256xbf16, #tpu.memory_space<vmem>>, vector<128x256xbf16>
    %c0_4 = arith.constant 0 : index
    %c0_5 = arith.constant 0 : index
    %5 = vector.load %arg4[%c0_4, %c0_5] : memref<256x128xbf16, #tpu.memory_space<vmem>>, vector<256x128xbf16>
    %cst = arith.constant dense<0.000000e+00> : vector<128x128xf32>
    %6 = tpu.matmul %4, %5, %cst {dimension_numbers = #tpu.dot_dimension_numbers<[1], [0], [0], [1], [0, 0, 1, 1], [], []>} : vector<128x256xbf16>, vector<256x128xbf16>, vector<128x128xf32> -> vector<128x128xf32>
    %7 = arith.addf %3, %6 : vector<128x128xf32>
    %c0_6 = arith.constant 0 : index
    %c0_7 = arith.constant 0 : index
    %8 = vector.load %arg7[%c0_6, %c0_7] : memref<128x128xf32, #tpu.memory_space<vmem>>, vector<128x128xf32>
    tpu.vector_store %arg7[%c0_6, %c0_7], %7 {strides = array<i32>} : memref<128x128xf32, #tpu.memory_space<vmem>>, vector<128x128xf32>,
    %c0_i32_8 = arith.constant 0 : i32
    %9 = arith.cmpi eq, %arg2, %c0_i32_8 : i32
    %10 = arith.extui %9 : i1 to i32
    %c0_i32_9 = arith.constant 0 : i32
    %11 = arith.cmpi ne, %10, %c0_i32_9 : i32
    scf.if %11 {
      %c0_10 = arith.constant 0 : index
      %c0_11 = arith.constant 0 : index
      %12 = vector.load %arg7[%c0_10, %c0_11] : memref<128x128xf32, #tpu.memory_space<vmem>>, vector<128x128xf32>
      %c0_12 = arith.constant 0 : index
      %c0_13 = arith.constant 0 : index
      %13 = vector.load %arg5[%c0_12, %c0_13] : memref<1x128xf32, #tpu.memory_space<vmem>>, vector<1x128xf32>
      %14 = vector.broadcast %13 : vector<1x128xf32> to vector<128x128xf32>
      %15 = arith.addf %12, %14 : vector<128x128xf32>
      %cst_14 = arith.constant 0.000000e+00 : f32
      %16 = vector.broadcast %cst_14 : f32 to vector<128x128xf32>
      %17 = arith.maximumf %15, %16 : vector<128x128xf32>
      %c0_15 = arith.constant 0 : index
      %c0_16 = arith.constant 0 : index
      %18 = vector.load %arg6[%c0_15, %c0_16] : memref<128x128xf32, #tpu.memory_space<vmem>>, vector<128x128xf32>
      tpu.vector_store %arg6[%c0_15, %c0_16], %17 {strides = array<i32>} : memref<128x128xf32, #tpu.memory_space<vmem>>, vector<128x128xf32>,
    } else {
    }
    return
  }
  func.func @transform_0(%arg0: i32, %arg1: i32, %arg2: i32) -> (i32, i32) {
    %c0_i32 = arith.constant 0 : i32
    return %arg0, %arg2 : i32, i32
  }
  func.func @transform_1(%arg0: i32, %arg1: i32, %arg2: i32) -> (i32, i32) {
    %c0_i32 = arith.constant 0 : i32
    return %arg2, %arg1 : i32, i32
  }
  func.func @transform_2(%arg0: i32, %arg1: i32, %arg2: i32) -> (i32, i32) {
    %c0_i32 = arith.constant 0 : i32
    %c0_i32_0 = arith.constant 0 : i32
    return %c0_i32, %arg1 : i32, i32
  }
  func.func @transform_3(%arg0: i32, %arg1: i32, %arg2: i32) -> (i32, i32) {
    %c0_i32 = arith.constant 0 : i32
    return %arg0, %arg1 : i32, i32
  }
}

module attributes {stable_mosaic.version = 11 : i64} {
  func.func @_matmul_kernel(%arg0: i32, %arg1: i32, %arg2: i32, %arg3: memref<128x512xbf16, #tpu.memory_space<vmem>>, %arg4: memref<512x128xbf16, #tpu.memory_space<vmem>>, %arg5: memref<1x128xf32, #tpu.memory_space<vmem>>, %arg6: memref<128x128xf32, #tpu.memory_space<vmem>>, %arg7: memref<128x128xf32, #tpu.memory_space<vmem>>) attributes {dimension_semantics = [#tpu.dimension_semantics<parallel>, #tpu.dimension_semantics<parallel>, #tpu.dimension_semantics<arbitrary>], iteration_bounds = array<i64: 1, 1, 1>, scalar_prefetch = 0 : i64, scratch_operands = 1 : i64, tpu.core_type = #tpu.core_type<tc>, window_params = [{transform_indices = @transform_0, window_bounds = array<i64: 128, 512>}, {transform_indices = @transform_1, window_bounds = array<i64: 512, 128>}, {transform_indices = @transform_2, window_bounds = array<i64: 1, 128>}, {transform_indices = @transform_3, window_bounds = array<i64: 128, 128>}]} {
    %c0_i32 = arith.constant 0 : i32
    %0 = arith.cmpi eq, %arg2, %c0_i32 : i32
    %1 = arith.extui %0 : i1 to i32
    %c0_i32_0 = arith.constant 0 : i32
    %2 = arith.cmpi ne, %1, %c0_i32_0 : i32
    scf.if %2 {
      %cst_10 = arith.constant 0.000000e+00 : f32
      %12 = vector.broadcast %cst_10 : f32 to vector<128x128xf32>
      %c0_11 = arith.constant 0 : index
      %c0_12 = arith.constant 0 : index
      %13 = vector.load %arg7[%c0_11, %c0_12] : memref<128x128xf32, #tpu.memory_space<vmem>>, vector<128x128xf32>
      tpu.vector_store %arg7[%c0_11, %c0_12], %12 {strides = array<i32>} : memref<128x128xf32, #tpu.memory_space<vmem>>, vector<128x128xf32>,
    } else {
    }
    %c0 = arith.constant 0 : index
    %c0_1 = arith.constant 0 : index
    %3 = vector.load %arg7[%c0, %c0_1] : memref<128x128xf32, #tpu.memory_space<vmem>>, vector<128x128xf32>
    %c0_2 = arith.constant 0 : index
    %c0_3 = arith.constant 0 : index
    %4 = vector.load %arg3[%c0_2, %c0_3] : memref<128x512xbf16, #tpu.memory_space<vmem>>, vector<128x512xbf16>
    %c0_4 = arith.constant 0 : index
    %c0_5 = arith.constant 0 : index
    %5 = vector.load %arg4[%c0_4, %c0_5] : memref<512x128xbf16, #tpu.memory_space<vmem>>, vector<512x128xbf16>
    %cst = arith.constant dense<0.000000e+00> : vector<128x128xf32>
    %6 = tpu.matmul %4, %5, %cst {dimension_numbers = #tpu.dot_dimension_numbers<[1], [0], [0], [1], [0, 0, 1, 1], [], []>} : vector<128x512xbf16>, vector<512x128xbf16>, vector<128x128xf32> -> vector<128x128xf32>
    %7 = arith.addf %3, %6 : vector<128x128xf32>
    %c0_6 = arith.constant 0 : index
    %c0_7 = arith.constant 0 : index
    %8 = vector.load %arg7[%c0_6, %c0_7] : memref<128x128xf32, #tpu.memory_space<vmem>>, vector<128x128xf32>
    tpu.vector_store %arg7[%c0_6, %c0_7], %7 {strides = array<i32>} : memref<128x128xf32, #tpu.memory_space<vmem>>, vector<128x128xf32>,
    %c0_i32_8 = arith.constant 0 : i32
    %9 = arith.cmpi eq, %arg2, %c0_i32_8 : i32
    %10 = arith.extui %9 : i1 to i32
    %c0_i32_9 = arith.constant 0 : i32
    %11 = arith.cmpi ne, %10, %c0_i32_9 : i32
    scf.if %11 {
      %c0_10 = arith.constant 0 : index
      %c0_11 = arith.constant 0 : index
      %12 = vector.load %arg7[%c0_10, %c0_11] : memref<128x128xf32, #tpu.memory_space<vmem>>, vector<128x128xf32>
      %c0_12 = arith.constant 0 : index
      %c0_13 = arith.constant 0 : index
      %13 = vector.load %arg5[%c0_12, %c0_13] : memref<1x128xf32, #tpu.memory_space<vmem>>, vector<1x128xf32>
      %14 = vector.broadcast %13 : vector<1x128xf32> to vector<128x128xf32>
      %15 = arith.addf %12, %14 : vector<128x128xf32>
      %cst_14 = arith.constant 0.000000e+00 : f32
      %16 = vector.broadcast %cst_14 : f32 to vector<128x128xf32>
      %17 = arith.maximumf %15, %16 : vector<128x128xf32>
      %c0_15 = arith.constant 0 : index
      %c0_16 = arith.constant 0 : index
      %18 = vector.load %arg6[%c0_15, %c0_16] : memref<128x128xf32, #tpu.memory_space<vmem>>, vector<128x128xf32>
      tpu.vector_store %arg6[%c0_15, %c0_16], %17 {strides = array<i32>} : memref<128x128xf32, #tpu.memory_space<vmem>>, vector<128x128xf32>,
    } else {
    }
    return
  }
  func.func @transform_0(%arg0: i32, %arg1: i32, %arg2: i32) -> (i32, i32) {
    %c0_i32 = arith.constant 0 : i32
    return %arg0, %arg2 : i32, i32
  }
  func.func @transform_1(%arg0: i32, %arg1: i32, %arg2: i32) -> (i32, i32) {
    %c0_i32 = arith.constant 0 : i32
    return %arg2, %arg1 : i32, i32
  }
  func.func @transform_2(%arg0: i32, %arg1: i32, %arg2: i32) -> (i32, i32) {
    %c0_i32 = arith.constant 0 : i32
    %c0_i32_0 = arith.constant 0 : i32
    return %c0_i32, %arg1 : i32, i32
  }
  func.func @transform_3(%arg0: i32, %arg1: i32, %arg2: i32) -> (i32, i32) {
    %c0_i32 = arith.constant 0 : i32
    return %arg0, %arg1 : i32, i32
  }
}

module attributes {stable_mosaic.version = 11 : i64} {
  func.func @_matmul_kernel(%arg0: i32, %arg1: i32, %arg2: i32, %arg3: memref<128x128xbf16, #tpu.memory_space<vmem>>, %arg4: memref<128x128xbf16, #tpu.memory_space<vmem>>, %arg5: memref<1x128xf32, #tpu.memory_space<vmem>>, %arg6: memref<128x128xf32, #tpu.memory_space<vmem>>, %arg7: memref<128x128xf32, #tpu.memory_space<vmem>>) attributes {dimension_semantics = [#tpu.dimension_semantics<parallel>, #tpu.dimension_semantics<parallel>, #tpu.dimension_semantics<arbitrary>], iteration_bounds = array<i64: 1, 1, 1>, scalar_prefetch = 0 : i64, scratch_operands = 1 : i64, tpu.core_type = #tpu.core_type<tc>, window_params = [{transform_indices = @transform_0, window_bounds = array<i64: 128, 128>}, {transform_indices = @transform_1, window_bounds = array<i64: 128, 128>}, {transform_indices = @transform_2, window_bounds = array<i64: 1, 128>}, {transform_indices = @transform_3, window_bounds = array<i64: 128, 128>}]} {
    %c0_i32 = arith.constant 0 : i32
    %0 = arith.cmpi eq, %arg2, %c0_i32 : i32
    %1 = arith.extui %0 : i1 to i32
    %c0_i32_0 = arith.constant 0 : i32
    %2 = arith.cmpi ne, %1, %c0_i32_0 : i32
    scf.if %2 {
      %cst_10 = arith.constant 0.000000e+00 : f32
      %12 = vector.broadcast %cst_10 : f32 to vector<128x128xf32>
      %c0_11 = arith.constant 0 : index
      %c0_12 = arith.constant 0 : index
      %13 = vector.load %arg7[%c0_11, %c0_12] : memref<128x128xf32, #tpu.memory_space<vmem>>, vector<128x128xf32>
      tpu.vector_store %arg7[%c0_11, %c0_12], %12 {strides = array<i32>} : memref<128x128xf32, #tpu.memory_space<vmem>>, vector<128x128xf32>,
    } else {
    }
    %c0 = arith.constant 0 : index
    %c0_1 = arith.constant 0 : index
    %3 = vector.load %arg7[%c0, %c0_1] : memref<128x128xf32, #tpu.memory_space<vmem>>, vector<128x128xf32>
    %c0_2 = arith.constant 0 : index
    %c0_3 = arith.constant 0 : index
    %4 = vector.load %arg3[%c0_2, %c0_3] : memref<128x128xbf16, #tpu.memory_space<vmem>>, vector<128x128xbf16>
    %c0_4 = arith.constant 0 : index
    %c0_5 = arith.constant 0 : index
    %5 = vector.load %arg4[%c0_4, %c0_5] : memref<128x128xbf16, #tpu.memory_space<vmem>>, vector<128x128xbf16>
    %cst = arith.constant dense<0.000000e+00> : vector<128x128xf32>
    %6 = tpu.matmul %4, %5, %cst {dimension_numbers = #tpu.dot_dimension_numbers<[1], [0], [0], [1], [0, 0, 1, 1], [], []>} : vector<128x128xbf16>, vector<128x128xbf16>, vector<128x128xf32> -> vector<128x128xf32>
    %7 = arith.addf %3, %6 : vector<128x128xf32>
    %c0_6 = arith.constant 0 : index
    %c0_7 = arith.constant 0 : index
    %8 = vector.load %arg7[%c0_6, %c0_7] : memref<128x128xf32, #tpu.memory_space<vmem>>, vector<128x128xf32>
    tpu.vector_store %arg7[%c0_6, %c0_7], %7 {strides = array<i32>} : memref<128x128xf32, #tpu.memory_space<vmem>>, vector<128x128xf32>,
    %c0_i32_8 = arith.constant 0 : i32
    %9 = arith.cmpi eq, %arg2, %c0_i32_8 : i32
    %10 = arith.extui %9 : i1 to i32
    %c0_i32_9 = arith.constant 0 : i32
    %11 = arith.cmpi ne, %10, %c0_i32_9 : i32
    scf.if %11 {
      %c0_10 = arith.constant 0 : index
      %c0_11 = arith.constant 0 : index
      %12 = vector.load %arg7[%c0_10, %c0_11] : memref<128x128xf32, #tpu.memory_space<vmem>>, vector<128x128xf32>
      %c0_12 = arith.constant 0 : index
      %c0_13 = arith.constant 0 : index
      %13 = vector.load %arg5[%c0_12, %c0_13] : memref<1x128xf32, #tpu.memory_space<vmem>>, vector<1x128xf32>
      %14 = vector.broadcast %13 : vector<1x128xf32> to vector<128x128xf32>
      %15 = arith.addf %12, %14 : vector<128x128xf32>
      %c0_14 = arith.constant 0 : index
      %c0_15 = arith.constant 0 : index
      %16 = vector.load %arg6[%c0_14, %c0_15] : memref<128x128xf32, #tpu.memory_space<vmem>>, vector<128x128xf32>
      tpu.vector_store %arg6[%c0_14, %c0_15], %15 {strides = array<i32>} : memref<128x128xf32, #tpu.memory_space<vmem>>, vector<128x128xf32>,
    } else {
    }
    return
  }
  func.func @transform_0(%arg0: i32, %arg1: i32, %arg2: i32) -> (i32, i32) {
    %c0_i32 = arith.constant 0 : i32
    return %arg0, %arg2 : i32, i32
  }
  func.func @transform_1(%arg0: i32, %arg1: i32, %arg2: i32) -> (i32, i32) {
    %c0_i32 = arith.constant 0 : i32
    return %arg2, %arg1 : i32, i32
  }
  func.func @transform_2(%arg0: i32, %arg1: i32, %arg2: i32) -> (i32, i32) {
    %c0_i32 = arith.constant 0 : i32
    %c0_i32_0 = arith.constant 0 : i32
    return %c0_i32, %arg1 : i32, i32
  }
  func.func @transform_3(%arg0: i32, %arg1: i32, %arg2: i32) -> (i32, i32) {
    %c0_i32 = arith.constant 0 : i32
    return %arg0, %arg1 : i32, i32
  }
}

module attributes {stable_mosaic.version = 11 : i64} {
  func.func @_bmm_kernel(%arg0: i32, %arg1: i32, %arg2: i32, %arg3: memref<1x16x768xbf16, #tpu.memory_space<vmem>>, %arg4: memref<1x768x128xbf16, #tpu.memory_space<vmem>>, %arg5: memref<1x16x128xf32, #tpu.memory_space<vmem>>) attributes {dimension_semantics = [#tpu.dimension_semantics<parallel>, #tpu.dimension_semantics<parallel>, #tpu.dimension_semantics<parallel>], iteration_bounds = array<i64: 2, 1, 1>, scalar_prefetch = 0 : i64, scratch_operands = 0 : i64, tpu.core_type = #tpu.core_type<tc>, window_params = [{transform_indices = @transform_0, window_bounds = array<i64: 1, 16, 768>}, {transform_indices = @transform_1, window_bounds = array<i64: 1, 768, 128>}, {transform_indices = @transform_2, window_bounds = array<i64: 1, 16, 128>}]} {
    %c0 = arith.constant 0 : index
    %c0_0 = arith.constant 0 : index
    %c0_1 = arith.constant 0 : index
    %0 = vector.load %arg3[%c0, %c0_0, %c0_1] : memref<1x16x768xbf16, #tpu.memory_space<vmem>>, vector<1x16x768xbf16>
    %1 = vector.shape_cast %0 : vector<1x16x768xbf16> to vector<16x768xbf16>
    %c0_2 = arith.constant 0 : index
    %c0_3 = arith.constant 0 : index
    %c0_4 = arith.constant 0 : index
    %2 = vector.load %arg4[%c0_2, %c0_3, %c0_4] : memref<1x768x128xbf16, #tpu.memory_space<vmem>>, vector<1x768x128xbf16>
    %3 = vector.shape_cast %2 : vector<1x768x128xbf16> to vector<768x128xbf16>
    %cst = arith.constant dense<0.000000e+00> : vector<16x128xf32>
    %4 = tpu.matmul %1, %3, %cst {dimension_numbers = #tpu.dot_dimension_numbers<[1], [0], [0], [1], [0, 0, 1, 1], [], []>} : vector<16x768xbf16>, vector<768x128xbf16>, vector<16x128xf32> -> vector<16x128xf32>
    %c0_5 = arith.constant 0 : index
    %c0_6 = arith.constant 0 : index
    %c0_7 = arith.constant 0 : index
    %5 = vector.load %arg5[%c0_5, %c0_6, %c0_7] : memref<1x16x128xf32, #tpu.memory_space<vmem>>, vector<1x16x128xf32>
    %6 = vector.shape_cast %5 : vector<1x16x128xf32> to vector<16x128xf32>
    %7 = vector.shape_cast %4 : vector<16x128xf32> to vector<1x16x128xf32>
    tpu.vector_store %arg5[%c0_5, %c0_6, %c0_7], %7 {strides = array<i32>} : memref<1x16x128xf32, #tpu.memory_space<vmem>>, vector<1x16x128xf32>,
    return
  }
  func.func @transform_0(%arg0: i32, %arg1: i32, %arg2: i32) -> (i32, i32, i32) {
    %c0_i32 = arith.constant 0 : i32
    %c0_i32_0 = arith.constant 0 : i32
    return %arg0, %arg1, %c0_i32 : i32, i32, i32
  }
  func.func @transform_1(%arg0: i32, %arg1: i32, %arg2: i32) -> (i32, i32, i32) {
    %c0_i32 = arith.constant 0 : i32
    %c0_i32_0 = arith.constant 0 : i32
    return %arg0, %c0_i32, %arg2 : i32, i32, i32
  }
  func.func @transform_2(%arg0: i32, %arg1: i32, %arg2: i32) -> (i32, i32, i32) {
    %c0_i32 = arith.constant 0 : i32
    return %arg0, %arg1, %arg2 : i32, i32, i32
  }
}

module attributes {stable_mosaic.version = 11 : i64} {
  func.func @_softmax_kernel(%arg0: i32, %arg1: memref<32x128xf32, #tpu.memory_space<vmem>>, %arg2: memref<32x128xf32, #tpu.memory_space<vmem>>) attributes {dimension_semantics = [#tpu.dimension_semantics<parallel>], iteration_bounds = array<i64: 1>, scalar_prefetch = 0 : i64, scratch_operands = 0 : i64, tpu.core_type = #tpu.core_type<tc>, window_params = [{transform_indices = @transform_0, window_bounds = array<i64: 32, 128>}, {transform_indices = @transform_1, window_bounds = array<i64: 32, 128>}]} {
    %c0 = arith.constant 0 : index
    %c0_0 = arith.constant 0 : index
    %0 = vector.load %arg1[%c0, %c0_0] : memref<32x128xf32, #tpu.memory_space<vmem>>, vector<32x128xf32>
    %cst = arith.constant dense<0xFF800000> : vector<32xf32>
    %1 = vector.multi_reduction <maximumf>, %0, %cst [1] : vector<32x128xf32> to vector<32xf32>
    %2 = vector.shape_cast %1 : vector<32xf32> to vector<32x1xf32>
    %3 = vector.broadcast %2 : vector<32x1xf32> to vector<32x128xf32>
    %4 = arith.subf %0, %3 : vector<32x128xf32>
    %5 = math.exp %4 : vector<32x128xf32>
    %cst_1 = arith.constant dense<0.000000e+00> : vector<32xf32>
    %6 = vector.multi_reduction <add>, %5, %cst_1 [1] : vector<32x128xf32> to vector<32xf32>
    %7 = vector.shape_cast %6 : vector<32xf32> to vector<32x1xf32>
    %8 = tpu.reciprocal %7 {approx = true} : vector<32x1xf32> -> vector<32x1xf32>
    %9 = vector.broadcast %8 : vector<32x1xf32> to vector<32x128xf32>
    %10 = arith.mulf %5, %9 : vector<32x128xf32>
    %c0_2 = arith.constant 0 : index
    %c0_3 = arith.constant 0 : index
    %11 = vector.load %arg2[%c0_2, %c0_3] : memref<32x128xf32, #tpu.memory_space<vmem>>, vector<32x128xf32>
    tpu.vector_store %arg2[%c0_2, %c0_3], %10 {strides = array<i32>} : memref<32x128xf32, #tpu.memory_space<vmem>>, vector<32x128xf32>,
    return
  }
  func.func @transform_0(%arg0: i32) -> (i32, i32) {
    %c0_i32 = arith.constant 0 : i32
    %c0_i32_0 = arith.constant 0 : i32
    return %arg0, %c0_i32 : i32, i32
  }
  func.func @transform_1(%arg0: i32) -> (i32, i32) {
    %c0_i32 = arith.constant 0 : i32
    %c0_i32_0 = arith.constant 0 : i32
    return %arg0, %c0_i32 : i32, i32
  }
}

module attributes {stable_mosaic.version = 11 : i64} {
  func.func @_bmm_kernel(%arg0: i32, %arg1: i32, %arg2: i32, %arg3: memref<1x16x128xbf16, #tpu.memory_space<vmem>>, %arg4: memref<1x128x128xbf16, #tpu.memory_space<vmem>>, %arg5: memref<1x16x128xf32, #tpu.memory_space<vmem>>) attributes {dimension_semantics = [#tpu.dimension_semantics<parallel>, #tpu.dimension_semantics<parallel>, #tpu.dimension_semantics<parallel>], iteration_bounds = array<i64: 2, 1, 1>, scalar_prefetch = 0 : i64, scratch_operands = 0 : i64, tpu.core_type = #tpu.core_type<tc>, window_params = [{transform_indices = @transform_0, window_bounds = array<i64: 1, 16, 128>}, {transform_indices = @transform_1, window_bounds = array<i64: 1, 128, 128>}, {transform_indices = @transform_2, window_bounds = array<i64: 1, 16, 128>}]} {
    %c0 = arith.constant 0 : index
    %c0_0 = arith.constant 0 : index
    %c0_1 = arith.constant 0 : index
    %0 = vector.load %arg3[%c0, %c0_0, %c0_1] : memref<1x16x128xbf16, #tpu.memory_space<vmem>>, vector<1x16x128xbf16>
    %1 = vector.shape_cast %0 : vector<1x16x128xbf16> to vector<16x128xbf16>
    %c0_2 = arith.constant 0 : index
    %c0_3 = arith.constant 0 : index
    %c0_4 = arith.constant 0 : index
    %2 = vector.load %arg4[%c0_2, %c0_3, %c0_4] : memref<1x128x128xbf16, #tpu.memory_space<vmem>>, vector<1x128x128xbf16>
    %3 = vector.shape_cast %2 : vector<1x128x128xbf16> to vector<128x128xbf16>
    %cst = arith.constant dense<0.000000e+00> : vector<16x128xf32>
    %4 = tpu.matmul %1, %3, %cst {dimension_numbers = #tpu.dot_dimension_numbers<[1], [0], [0], [1], [0, 0, 1, 1], [], []>} : vector<16x128xbf16>, vector<128x128xbf16>, vector<16x128xf32> -> vector<16x128xf32>
    %c0_5 = arith.constant 0 : index
    %c0_6 = arith.constant 0 : index
    %c0_7 = arith.constant 0 : index
    %5 = vector.load %arg5[%c0_5, %c0_6, %c0_7] : memref<1x16x128xf32, #tpu.memory_space<vmem>>, vector<1x16x128xf32>
    %6 = vector.shape_cast %5 : vector<1x16x128xf32> to vector<16x128xf32>
    %7 = vector.shape_cast %4 : vector<16x128xf32> to vector<1x16x128xf32>
    tpu.vector_store %arg5[%c0_5, %c0_6, %c0_7], %7 {strides = array<i32>} : memref<1x16x128xf32, #tpu.memory_space<vmem>>, vector<1x16x128xf32>,
    return
  }
  func.func @transform_0(%arg0: i32, %arg1: i32, %arg2: i32) -> (i32, i32, i32) {
    %c0_i32 = arith.constant 0 : i32
    %c0_i32_0 = arith.constant 0 : i32
    return %arg0, %arg1, %c0_i32 : i32, i32, i32
  }
  func.func @transform_1(%arg0: i32, %arg1: i32, %arg2: i32) -> (i32, i32, i32) {
    %c0_i32 = arith.constant 0 : i32
    %c0_i32_0 = arith.constant 0 : i32
    return %arg0, %c0_i32, %arg2 : i32, i32, i32
  }
  func.func @transform_2(%arg0: i32, %arg1: i32, %arg2: i32) -> (i32, i32, i32) {
    %c0_i32 = arith.constant 0 : i32
    return %arg0, %arg1, %arg2 : i32, i32, i32
  }
}

module attributes {stable_mosaic.version = 11 : i64} {
  func.func @_softmax_kernel(%arg0: i32, %arg1: memref<128x768xf32, #tpu.memory_space<vmem>>, %arg2: memref<128x768xf32, #tpu.memory_space<vmem>>) attributes {dimension_semantics = [#tpu.dimension_semantics<parallel>], iteration_bounds = array<i64: 1>, scalar_prefetch = 0 : i64, scratch_operands = 0 : i64, tpu.core_type = #tpu.core_type<tc>, window_params = [{transform_indices = @transform_0, window_bounds = array<i64: 128, 768>}, {transform_indices = @transform_1, window_bounds = array<i64: 128, 768>}]} {
    %c0 = arith.constant 0 : index
    %c0_0 = arith.constant 0 : index
    %0 = vector.load %arg1[%c0, %c0_0] : memref<128x768xf32, #tpu.memory_space<vmem>>, vector<128x768xf32>
    %cst = arith.constant dense<0xFF800000> : vector<128xf32>
    %1 = vector.multi_reduction <maximumf>, %0, %cst [1] : vector<128x768xf32> to vector<128xf32>
    %2 = vector.shape_cast %1 : vector<128xf32> to vector<128x1xf32>
    %3 = vector.broadcast %2 : vector<128x1xf32> to vector<128x768xf32>
    %4 = arith.subf %0, %3 : vector<128x768xf32>
    %5 = math.exp %4 : vector<128x768xf32>
    %cst_1 = arith.constant dense<0.000000e+00> : vector<128xf32>
    %6 = vector.multi_reduction <add>, %5, %cst_1 [1] : vector<128x768xf32> to vector<128xf32>
    %7 = vector.shape_cast %6 : vector<128xf32> to vector<128x1xf32>
    %8 = tpu.reciprocal %7 {approx = true} : vector<128x1xf32> -> vector<128x1xf32>
    %9 = vector.broadcast %8 : vector<128x1xf32> to vector<128x768xf32>
    %10 = arith.mulf %5, %9 : vector<128x768xf32>
    %c0_2 = arith.constant 0 : index
    %c0_3 = arith.constant 0 : index
    %11 = vector.load %arg2[%c0_2, %c0_3] : memref<128x768xf32, #tpu.memory_space<vmem>>, vector<128x768xf32>
    tpu.vector_store %arg2[%c0_2, %c0_3], %10 {strides = array<i32>} : memref<128x768xf32, #tpu.memory_space<vmem>>, vector<128x768xf32>,
    return
  }
  func.func @transform_0(%arg0: i32) -> (i32, i32) {
    %c0_i32 = arith.constant 0 : i32
    %c0_i32_0 = arith.constant 0 : i32
    return %arg0, %c0_i32 : i32, i32
  }
  func.func @transform_1(%arg0: i32) -> (i32, i32) {
    %c0_i32 = arith.constant 0 : i32
    %c0_i32_0 = arith.constant 0 : i32
    return %arg0, %c0_i32 : i32, i32
  }
}

module attributes {stable_mosaic.version = 11 : i64} {
  func.func @_bmm_kernel(%arg0: i32, %arg1: i32, %arg2: i32, %arg3: memref<1x64x128xbf16, #tpu.memory_space<vmem>>, %arg4: memref<1x128x256xbf16, #tpu.memory_space<vmem>>, %arg5: memref<1x64x256xf32, #tpu.memory_space<vmem>>) attributes {dimension_semantics = [#tpu.dimension_semantics<parallel>, #tpu.dimension_semantics<parallel>, #tpu.dimension_semantics<parallel>], iteration_bounds = array<i64: 2, 1, 3>, scalar_prefetch = 0 : i64, scratch_operands = 0 : i64, tpu.core_type = #tpu.core_type<tc>, window_params = [{transform_indices = @transform_0, window_bounds = array<i64: 1, 64, 128>}, {transform_indices = @transform_1, window_bounds = array<i64: 1, 128, 256>}, {transform_indices = @transform_2, window_bounds = array<i64: 1, 64, 256>}]} {
    %c0 = arith.constant 0 : index
    %c0_0 = arith.constant 0 : index
    %c0_1 = arith.constant 0 : index
    %0 = vector.load %arg3[%c0, %c0_0, %c0_1] : memref<1x64x128xbf16, #tpu.memory_space<vmem>>, vector<1x64x128xbf16>
    %1 = vector.shape_cast %0 : vector<1x64x128xbf16> to vector<64x128xbf16>
    %c0_2 = arith.constant 0 : index
    %c0_3 = arith.constant 0 : index
    %c0_4 = arith.constant 0 : index
    %2 = vector.load %arg4[%c0_2, %c0_3, %c0_4] : memref<1x128x256xbf16, #tpu.memory_space<vmem>>, vector<1x128x256xbf16>
    %3 = vector.shape_cast %2 : vector<1x128x256xbf16> to vector<128x256xbf16>
    %cst = arith.constant dense<0.000000e+00> : vector<64x256xf32>
    %4 = tpu.matmul %1, %3, %cst {dimension_numbers = #tpu.dot_dimension_numbers<[1], [0], [0], [1], [0, 0, 1, 1], [], []>} : vector<64x128xbf16>, vector<128x256xbf16>, vector<64x256xf32> -> vector<64x256xf32>
    %c0_5 = arith.constant 0 : index
    %c0_6 = arith.constant 0 : index
    %c0_7 = arith.constant 0 : index
    %5 = vector.load %arg5[%c0_5, %c0_6, %c0_7] : memref<1x64x256xf32, #tpu.memory_space<vmem>>, vector<1x64x256xf32>
    %6 = vector.shape_cast %5 : vector<1x64x256xf32> to vector<64x256xf32>
    %7 = vector.shape_cast %4 : vector<64x256xf32> to vector<1x64x256xf32>
    tpu.vector_store %arg5[%c0_5, %c0_6, %c0_7], %7 {strides = array<i32>} : memref<1x64x256xf32, #tpu.memory_space<vmem>>, vector<1x64x256xf32>,
    return
  }
  func.func @transform_0(%arg0: i32, %arg1: i32, %arg2: i32) -> (i32, i32, i32) {
    %c0_i32 = arith.constant 0 : i32
    %c0_i32_0 = arith.constant 0 : i32
    return %arg0, %arg1, %c0_i32 : i32, i32, i32
  }
  func.func @transform_1(%arg0: i32, %arg1: i32, %arg2: i32) -> (i32, i32, i32) {
    %c0_i32 = arith.constant 0 : i32
    %c0_i32_0 = arith.constant 0 : i32
    return %arg0, %c0_i32, %arg2 : i32, i32, i32
  }
  func.func @transform_2(%arg0: i32, %arg1: i32, %arg2: i32) -> (i32, i32, i32) {
    %c0_i32 = arith.constant 0 : i32
    return %arg0, %arg1, %arg2 : i32, i32, i32
  }
}

module attributes {stable_mosaic.version = 11 : i64} {
  func.func @_bmm_kernel(%arg0: i32, %arg1: i32, %arg2: i32, %arg3: memref<1x64x768xbf16, #tpu.memory_space<vmem>>, %arg4: memref<1x768x128xbf16, #tpu.memory_space<vmem>>, %arg5: memref<1x64x128xf32, #tpu.memory_space<vmem>>) attributes {dimension_semantics = [#tpu.dimension_semantics<parallel>, #tpu.dimension_semantics<parallel>, #tpu.dimension_semantics<parallel>], iteration_bounds = array<i64: 2, 1, 1>, scalar_prefetch = 0 : i64, scratch_operands = 0 : i64, tpu.core_type = #tpu.core_type<tc>, window_params = [{transform_indices = @transform_0, window_bounds = array<i64: 1, 64, 768>}, {transform_indices = @transform_1, window_bounds = array<i64: 1, 768, 128>}, {transform_indices = @transform_2, window_bounds = array<i64: 1, 64, 128>}]} {
    %c0 = arith.constant 0 : index
    %c0_0 = arith.constant 0 : index
    %c0_1 = arith.constant 0 : index
    %0 = vector.load %arg3[%c0, %c0_0, %c0_1] : memref<1x64x768xbf16, #tpu.memory_space<vmem>>, vector<1x64x768xbf16>
    %1 = vector.shape_cast %0 : vector<1x64x768xbf16> to vector<64x768xbf16>
    %c0_2 = arith.constant 0 : index
    %c0_3 = arith.constant 0 : index
    %c0_4 = arith.constant 0 : index
    %2 = vector.load %arg4[%c0_2, %c0_3, %c0_4] : memref<1x768x128xbf16, #tpu.memory_space<vmem>>, vector<1x768x128xbf16>
    %3 = vector.shape_cast %2 : vector<1x768x128xbf16> to vector<768x128xbf16>
    %cst = arith.constant dense<0.000000e+00> : vector<64x128xf32>
    %4 = tpu.matmul %1, %3, %cst {dimension_numbers = #tpu.dot_dimension_numbers<[1], [0], [0], [1], [0, 0, 1, 1], [], []>} : vector<64x768xbf16>, vector<768x128xbf16>, vector<64x128xf32> -> vector<64x128xf32>
    %c0_5 = arith.constant 0 : index
    %c0_6 = arith.constant 0 : index
    %c0_7 = arith.constant 0 : index
    %5 = vector.load %arg5[%c0_5, %c0_6, %c0_7] : memref<1x64x128xf32, #tpu.memory_space<vmem>>, vector<1x64x128xf32>
    %6 = vector.shape_cast %5 : vector<1x64x128xf32> to vector<64x128xf32>
    %7 = vector.shape_cast %4 : vector<64x128xf32> to vector<1x64x128xf32>
    tpu.vector_store %arg5[%c0_5, %c0_6, %c0_7], %7 {strides = array<i32>} : memref<1x64x128xf32, #tpu.memory_space<vmem>>, vector<1x64x128xf32>,
    return
  }
  func.func @transform_0(%arg0: i32, %arg1: i32, %arg2: i32) -> (i32, i32, i32) {
    %c0_i32 = arith.constant 0 : i32
    %c0_i32_0 = arith.constant 0 : i32
    return %arg0, %arg1, %c0_i32 : i32, i32, i32
  }
  func.func @transform_1(%arg0: i32, %arg1: i32, %arg2: i32) -> (i32, i32, i32) {
    %c0_i32 = arith.constant 0 : i32
    %c0_i32_0 = arith.constant 0 : i32
    return %arg0, %c0_i32, %arg2 : i32, i32, i32
  }
  func.func @transform_2(%arg0: i32, %arg1: i32, %arg2: i32) -> (i32, i32, i32) {
    %c0_i32 = arith.constant 0 : i32
    return %arg0, %arg1, %arg2 : i32, i32, i32
  }
}

module attributes {stable_mosaic.version = 11 : i64} {
  func.func @_matmul_kernel(%arg0: i32, %arg1: i32, %arg2: i32, %arg3: memref<128x128xbf16, #tpu.memory_space<vmem>>, %arg4: memref<128x128xbf16, #tpu.memory_space<vmem>>, %arg5: memref<1x128xf32, #tpu.memory_space<vmem>>, %arg6: memref<128x128xf32, #tpu.memory_space<vmem>>, %arg7: memref<128x128xf32, #tpu.memory_space<vmem>>) attributes {dimension_semantics = [#tpu.dimension_semantics<parallel>, #tpu.dimension_semantics<parallel>, #tpu.dimension_semantics<arbitrary>], iteration_bounds = array<i64: 1, 1, 1>, scalar_prefetch = 0 : i64, scratch_operands = 1 : i64, tpu.core_type = #tpu.core_type<tc>, window_params = [{transform_indices = @transform_0, window_bounds = array<i64: 128, 128>}, {transform_indices = @transform_1, window_bounds = array<i64: 128, 128>}, {transform_indices = @transform_2, window_bounds = array<i64: 1, 128>}, {transform_indices = @transform_3, window_bounds = array<i64: 128, 128>}]} {
    %c0_i32 = arith.constant 0 : i32
    %0 = arith.cmpi eq, %arg2, %c0_i32 : i32
    %1 = arith.extui %0 : i1 to i32
    %c0_i32_0 = arith.constant 0 : i32
    %2 = arith.cmpi ne, %1, %c0_i32_0 : i32
    scf.if %2 {
      %cst_10 = arith.constant 0.000000e+00 : f32
      %12 = vector.broadcast %cst_10 : f32 to vector<128x128xf32>
      %c0_11 = arith.constant 0 : index
      %c0_12 = arith.constant 0 : index
      %13 = vector.load %arg7[%c0_11, %c0_12] : memref<128x128xf32, #tpu.memory_space<vmem>>, vector<128x128xf32>
      tpu.vector_store %arg7[%c0_11, %c0_12], %12 {strides = array<i32>} : memref<128x128xf32, #tpu.memory_space<vmem>>, vector<128x128xf32>,
    } else {
    }
    %c0 = arith.constant 0 : index
    %c0_1 = arith.constant 0 : index
    %3 = vector.load %arg7[%c0, %c0_1] : memref<128x128xf32, #tpu.memory_space<vmem>>, vector<128x128xf32>
    %c0_2 = arith.constant 0 : index
    %c0_3 = arith.constant 0 : index
    %4 = vector.load %arg3[%c0_2, %c0_3] : memref<128x128xbf16, #tpu.memory_space<vmem>>, vector<128x128xbf16>
    %c0_4 = arith.constant 0 : index
    %c0_5 = arith.constant 0 : index
    %5 = vector.load %arg4[%c0_4, %c0_5] : memref<128x128xbf16, #tpu.memory_space<vmem>>, vector<128x128xbf16>
    %cst = arith.constant dense<0.000000e+00> : vector<128x128xf32>
    %6 = tpu.matmul %4, %5, %cst {dimension_numbers = #tpu.dot_dimension_numbers<[1], [0], [0], [1], [0, 0, 1, 1], [], []>} : vector<128x128xbf16>, vector<128x128xbf16>, vector<128x128xf32> -> vector<128x128xf32>
    %7 = arith.addf %3, %6 : vector<128x128xf32>
    %c0_6 = arith.constant 0 : index
    %c0_7 = arith.constant 0 : index
    %8 = vector.load %arg7[%c0_6, %c0_7] : memref<128x128xf32, #tpu.memory_space<vmem>>, vector<128x128xf32>
    tpu.vector_store %arg7[%c0_6, %c0_7], %7 {strides = array<i32>} : memref<128x128xf32, #tpu.memory_space<vmem>>, vector<128x128xf32>,
    %c0_i32_8 = arith.constant 0 : i32
    %9 = arith.cmpi eq, %arg2, %c0_i32_8 : i32
    %10 = arith.extui %9 : i1 to i32
    %c0_i32_9 = arith.constant 0 : i32
    %11 = arith.cmpi ne, %10, %c0_i32_9 : i32
    scf.if %11 {
      %c0_10 = arith.constant 0 : index
      %c0_11 = arith.constant 0 : index
      %12 = vector.load %arg7[%c0_10, %c0_11] : memref<128x128xf32, #tpu.memory_space<vmem>>, vector<128x128xf32>
      %c0_12 = arith.constant 0 : index
      %c0_13 = arith.constant 0 : index
      %13 = vector.load %arg5[%c0_12, %c0_13] : memref<1x128xf32, #tpu.memory_space<vmem>>, vector<1x128xf32>
      %14 = vector.broadcast %13 : vector<1x128xf32> to vector<128x128xf32>
      %15 = arith.addf %12, %14 : vector<128x128xf32>
      %cst_14 = arith.constant 0.000000e+00 : f32
      %16 = vector.broadcast %cst_14 : f32 to vector<128x128xf32>
      %17 = arith.maximumf %15, %16 : vector<128x128xf32>
      %c0_15 = arith.constant 0 : index
      %c0_16 = arith.constant 0 : index
      %18 = vector.load %arg6[%c0_15, %c0_16] : memref<128x128xf32, #tpu.memory_space<vmem>>, vector<128x128xf32>
      tpu.vector_store %arg6[%c0_15, %c0_16], %17 {strides = array<i32>} : memref<128x128xf32, #tpu.memory_space<vmem>>, vector<128x128xf32>,
    } else {
    }
    return
  }
  func.func @transform_0(%arg0: i32, %arg1: i32, %arg2: i32) -> (i32, i32) {
    %c0_i32 = arith.constant 0 : i32
    return %arg0, %arg2 : i32, i32
  }
  func.func @transform_1(%arg0: i32, %arg1: i32, %arg2: i32) -> (i32, i32) {
    %c0_i32 = arith.constant 0 : i32
    return %arg2, %arg1 : i32, i32
  }
  func.func @transform_2(%arg0: i32, %arg1: i32, %arg2: i32) -> (i32, i32) {
    %c0_i32 = arith.constant 0 : i32
    %c0_i32_0 = arith.constant 0 : i32
    return %c0_i32, %arg1 : i32, i32
  }
  func.func @transform_3(%arg0: i32, %arg1: i32, %arg2: i32) -> (i32, i32) {
    %c0_i32 = arith.constant 0 : i32
    return %arg0, %arg1 : i32, i32
  }
}

module attributes {stable_mosaic.version = 11 : i64} {
  func.func @_matmul_kernel(%arg0: i32, %arg1: i32, %arg2: i32, %arg3: memref<512x128xbf16, #tpu.memory_space<vmem>>, %arg4: memref<128x128xbf16, #tpu.memory_space<vmem>>, %arg5: memref<1x128xf32, #tpu.memory_space<vmem>>, %arg6: memref<512x128xf32, #tpu.memory_space<vmem>>, %arg7: memref<512x128xf32, #tpu.memory_space<vmem>>) attributes {dimension_semantics = [#tpu.dimension_semantics<parallel>, #tpu.dimension_semantics<parallel>, #tpu.dimension_semantics<arbitrary>], iteration_bounds = array<i64: 2, 1, 1>, scalar_prefetch = 0 : i64, scratch_operands = 1 : i64, tpu.core_type = #tpu.core_type<tc>, window_params = [{transform_indices = @transform_0, window_bounds = array<i64: 512, 128>}, {transform_indices = @transform_1, window_bounds = array<i64: 128, 128>}, {transform_indices = @transform_2, window_bounds = array<i64: 1, 128>}, {transform_indices = @transform_3, window_bounds = array<i64: 512, 128>}]} {
    %c0_i32 = arith.constant 0 : i32
    %0 = arith.cmpi eq, %arg2, %c0_i32 : i32
    %1 = arith.extui %0 : i1 to i32
    %c0_i32_0 = arith.constant 0 : i32
    %2 = arith.cmpi ne, %1, %c0_i32_0 : i32
    scf.if %2 {
      %cst_10 = arith.constant 0.000000e+00 : f32
      %12 = vector.broadcast %cst_10 : f32 to vector<512x128xf32>
      %c0_11 = arith.constant 0 : index
      %c0_12 = arith.constant 0 : index
      %13 = vector.load %arg7[%c0_11, %c0_12] : memref<512x128xf32, #tpu.memory_space<vmem>>, vector<512x128xf32>
      tpu.vector_store %arg7[%c0_11, %c0_12], %12 {strides = array<i32>} : memref<512x128xf32, #tpu.memory_space<vmem>>, vector<512x128xf32>,
    } else {
    }
    %c0 = arith.constant 0 : index
    %c0_1 = arith.constant 0 : index
    %3 = vector.load %arg7[%c0, %c0_1] : memref<512x128xf32, #tpu.memory_space<vmem>>, vector<512x128xf32>
    %c0_2 = arith.constant 0 : index
    %c0_3 = arith.constant 0 : index
    %4 = vector.load %arg3[%c0_2, %c0_3] : memref<512x128xbf16, #tpu.memory_space<vmem>>, vector<512x128xbf16>
    %c0_4 = arith.constant 0 : index
    %c0_5 = arith.constant 0 : index
    %5 = vector.load %arg4[%c0_4, %c0_5] : memref<128x128xbf16, #tpu.memory_space<vmem>>, vector<128x128xbf16>
    %cst = arith.constant dense<0.000000e+00> : vector<512x128xf32>
    %6 = tpu.matmul %4, %5, %cst {dimension_numbers = #tpu.dot_dimension_numbers<[1], [0], [0], [1], [0, 0, 1, 1], [], []>} : vector<512x128xbf16>, vector<128x128xbf16>, vector<512x128xf32> -> vector<512x128xf32>
    %7 = arith.addf %3, %6 : vector<512x128xf32>
    %c0_6 = arith.constant 0 : index
    %c0_7 = arith.constant 0 : index
    %8 = vector.load %arg7[%c0_6, %c0_7] : memref<512x128xf32, #tpu.memory_space<vmem>>, vector<512x128xf32>
    tpu.vector_store %arg7[%c0_6, %c0_7], %7 {strides = array<i32>} : memref<512x128xf32, #tpu.memory_space<vmem>>, vector<512x128xf32>,
    %c0_i32_8 = arith.constant 0 : i32
    %9 = arith.cmpi eq, %arg2, %c0_i32_8 : i32
    %10 = arith.extui %9 : i1 to i32
    %c0_i32_9 = arith.constant 0 : i32
    %11 = arith.cmpi ne, %10, %c0_i32_9 : i32
    scf.if %11 {
      %c0_10 = arith.constant 0 : index
      %c0_11 = arith.constant 0 : index
      %12 = vector.load %arg7[%c0_10, %c0_11] : memref<512x128xf32, #tpu.memory_space<vmem>>, vector<512x128xf32>
      %c0_12 = arith.constant 0 : index
      %c0_13 = arith.constant 0 : index
      %13 = vector.load %arg5[%c0_12, %c0_13] : memref<1x128xf32, #tpu.memory_space<vmem>>, vector<1x128xf32>
      %14 = vector.broadcast %13 : vector<1x128xf32> to vector<512x128xf32>
      %15 = arith.addf %12, %14 : vector<512x128xf32>
      %c0_14 = arith.constant 0 : index
      %c0_15 = arith.constant 0 : index
      %16 = vector.load %arg6[%c0_14, %c0_15] : memref<512x128xf32, #tpu.memory_space<vmem>>, vector<512x128xf32>
      tpu.vector_store %arg6[%c0_14, %c0_15], %15 {strides = array<i32>} : memref<512x128xf32, #tpu.memory_space<vmem>>, vector<512x128xf32>,
    } else {
    }
    return
  }
  func.func @transform_0(%arg0: i32, %arg1: i32, %arg2: i32) -> (i32, i32) {
    %c0_i32 = arith.constant 0 : i32
    return %arg0, %arg2 : i32, i32
  }
  func.func @transform_1(%arg0: i32, %arg1: i32, %arg2: i32) -> (i32, i32) {
    %c0_i32 = arith.constant 0 : i32
    return %arg2, %arg1 : i32, i32
  }
  func.func @transform_2(%arg0: i32, %arg1: i32, %arg2: i32) -> (i32, i32) {
    %c0_i32 = arith.constant 0 : i32
    %c0_i32_0 = arith.constant 0 : i32
    return %c0_i32, %arg1 : i32, i32
  }
  func.func @transform_3(%arg0: i32, %arg1: i32, %arg2: i32) -> (i32, i32) {
    %c0_i32 = arith.constant 0 : i32
    return %arg0, %arg1 : i32, i32
  }
}

module attributes {stable_mosaic.version = 11 : i64} {
  func.func @_matmul_kernel(%arg0: i32, %arg1: i32, %arg2: i32, %arg3: memref<128x128xbf16, #tpu.memory_space<vmem>>, %arg4: memref<128x128xbf16, #tpu.memory_space<vmem>>, %arg5: memref<1x128xf32, #tpu.memory_space<vmem>>, %arg6: memref<128x128xf32, #tpu.memory_space<vmem>>, %arg7: memref<128x128xf32, #tpu.memory_space<vmem>>, %arg8: memref<128x128xf32, #tpu.memory_space<vmem>>) attributes {dimension_semantics = [#tpu.dimension_semantics<parallel>, #tpu.dimension_semantics<parallel>, #tpu.dimension_semantics<arbitrary>], iteration_bounds = array<i64: 1, 1, 1>, scalar_prefetch = 0 : i64, scratch_operands = 1 : i64, tpu.core_type = #tpu.core_type<tc>, window_params = [{transform_indices = @transform_0, window_bounds = array<i64: 128, 128>}, {transform_indices = @transform_1, window_bounds = array<i64: 128, 128>}, {transform_indices = @transform_2, window_bounds = array<i64: 1, 128>}, {transform_indices = @transform_3, window_bounds = array<i64: 128, 128>}, {transform_indices = @transform_4, window_bounds = array<i64: 128, 128>}]} {
    %c0_i32 = arith.constant 0 : i32
    %0 = arith.cmpi eq, %arg2, %c0_i32 : i32
    %1 = arith.extui %0 : i1 to i32
    %c0_i32_0 = arith.constant 0 : i32
    %2 = arith.cmpi ne, %1, %c0_i32_0 : i32
    scf.if %2 {
      %cst_10 = arith.constant 0.000000e+00 : f32
      %12 = vector.broadcast %cst_10 : f32 to vector<128x128xf32>
      %c0_11 = arith.constant 0 : index
      %c0_12 = arith.constant 0 : index
      %13 = vector.load %arg8[%c0_11, %c0_12] : memref<128x128xf32, #tpu.memory_space<vmem>>, vector<128x128xf32>
      tpu.vector_store %arg8[%c0_11, %c0_12], %12 {strides = array<i32>} : memref<128x128xf32, #tpu.memory_space<vmem>>, vector<128x128xf32>,
    } else {
    }
    %c0 = arith.constant 0 : index
    %c0_1 = arith.constant 0 : index
    %3 = vector.load %arg8[%c0, %c0_1] : memref<128x128xf32, #tpu.memory_space<vmem>>, vector<128x128xf32>
    %c0_2 = arith.constant 0 : index
    %c0_3 = arith.constant 0 : index
    %4 = vector.load %arg3[%c0_2, %c0_3] : memref<128x128xbf16, #tpu.memory_space<vmem>>, vector<128x128xbf16>
    %c0_4 = arith.constant 0 : index
    %c0_5 = arith.constant 0 : index
    %5 = vector.load %arg4[%c0_4, %c0_5] : memref<128x128xbf16, #tpu.memory_space<vmem>>, vector<128x128xbf16>
    %cst = arith.constant dense<0.000000e+00> : vector<128x128xf32>
    %6 = tpu.matmul %4, %5, %cst {dimension_numbers = #tpu.dot_dimension_numbers<[1], [0], [0], [1], [0, 0, 1, 1], [], []>} : vector<128x128xbf16>, vector<128x128xbf16>, vector<128x128xf32> -> vector<128x128xf32>
    %7 = arith.addf %3, %6 : vector<128x128xf32>
    %c0_6 = arith.constant 0 : index
    %c0_7 = arith.constant 0 : index
    %8 = vector.load %arg8[%c0_6, %c0_7] : memref<128x128xf32, #tpu.memory_space<vmem>>, vector<128x128xf32>
    tpu.vector_store %arg8[%c0_6, %c0_7], %7 {strides = array<i32>} : memref<128x128xf32, #tpu.memory_space<vmem>>, vector<128x128xf32>,
    %c0_i32_8 = arith.constant 0 : i32
    %9 = arith.cmpi eq, %arg2, %c0_i32_8 : i32
    %10 = arith.extui %9 : i1 to i32
    %c0_i32_9 = arith.constant 0 : i32
    %11 = arith.cmpi ne, %10, %c0_i32_9 : i32
    scf.if %11 {
      %c0_10 = arith.constant 0 : index
      %c0_11 = arith.constant 0 : index
      %12 = vector.load %arg8[%c0_10, %c0_11] : memref<128x128xf32, #tpu.memory_space<vmem>>, vector<128x128xf32>
      %c0_12 = arith.constant 0 : index
      %c0_13 = arith.constant 0 : index
      %13 = vector.load %arg5[%c0_12, %c0_13] : memref<1x128xf32, #tpu.memory_space<vmem>>, vector<1x128xf32>
      %14 = vector.broadcast %13 : vector<1x128xf32> to vector<128x128xf32>
      %15 = arith.addf %12, %14 : vector<128x128xf32>
      %c0_14 = arith.constant 0 : index
      %c0_15 = arith.constant 0 : index
      %16 = vector.load %arg6[%c0_14, %c0_15] : memref<128x128xf32, #tpu.memory_space<vmem>>, vector<128x128xf32>
      %17 = arith.addf %15, %16 : vector<128x128xf32>
      %cst_16 = arith.constant 0.000000e+00 : f32
      %18 = vector.broadcast %cst_16 : f32 to vector<128x128xf32>
      %19 = arith.maximumf %17, %18 : vector<128x128xf32>
      %c0_17 = arith.constant 0 : index
      %c0_18 = arith.constant 0 : index
      %20 = vector.load %arg7[%c0_17, %c0_18] : memref<128x128xf32, #tpu.memory_space<vmem>>, vector<128x128xf32>
      tpu.vector_store %arg7[%c0_17, %c0_18], %19 {strides = array<i32>} : memref<128x128xf32, #tpu.memory_space<vmem>>, vector<128x128xf32>,
    } else {
    }
    return
  }
  func.func @transform_0(%arg0: i32, %arg1: i32, %arg2: i32) -> (i32, i32) {
    %c0_i32 = arith.constant 0 : i32
    return %arg0, %arg2 : i32, i32
  }
  func.func @transform_1(%arg0: i32, %arg1: i32, %arg2: i32) -> (i32, i32) {
    %c0_i32 = arith.constant 0 : i32
    return %arg2, %arg1 : i32, i32
  }
  func.func @transform_2(%arg0: i32, %arg1: i32, %arg2: i32) -> (i32, i32) {
    %c0_i32 = arith.constant 0 : i32
    %c0_i32_0 = arith.constant 0 : i32
    return %c0_i32, %arg1 : i32, i32
  }
  func.func @transform_3(%arg0: i32, %arg1: i32, %arg2: i32) -> (i32, i32) {
    %c0_i32 = arith.constant 0 : i32
    return %arg0, %arg1 : i32, i32
  }
  func.func @transform_4(%arg0: i32, %arg1: i32, %arg2: i32) -> (i32, i32) {
    %c0_i32 = arith.constant 0 : i32
    return %arg0, %arg1 : i32, i32
  }
}

module attributes {stable_mosaic.version = 11 : i64} {
  func.func @_matmul_kernel(%arg0: i32, %arg1: i32, %arg2: i32, %arg3: memref<512x128xbf16, #tpu.memory_space<vmem>>, %arg4: memref<128x128xbf16, #tpu.memory_space<vmem>>, %arg5: memref<1x128xf32, #tpu.memory_space<vmem>>, %arg6: memref<512x128xf32, #tpu.memory_space<vmem>>, %arg7: memref<512x128xf32, #tpu.memory_space<vmem>>) attributes {dimension_semantics = [#tpu.dimension_semantics<parallel>, #tpu.dimension_semantics<parallel>, #tpu.dimension_semantics<arbitrary>], iteration_bounds = array<i64: 16, 1, 1>, scalar_prefetch = 0 : i64, scratch_operands = 1 : i64, tpu.core_type = #tpu.core_type<tc>, window_params = [{transform_indices = @transform_0, window_bounds = array<i64: 512, 128>}, {transform_indices = @transform_1, window_bounds = array<i64: 128, 128>}, {transform_indices = @transform_2, window_bounds = array<i64: 1, 128>}, {transform_indices = @transform_3, window_bounds = array<i64: 512, 128>}]} {
    %c0_i32 = arith.constant 0 : i32
    %0 = arith.cmpi eq, %arg2, %c0_i32 : i32
    %1 = arith.extui %0 : i1 to i32
    %c0_i32_0 = arith.constant 0 : i32
    %2 = arith.cmpi ne, %1, %c0_i32_0 : i32
    scf.if %2 {
      %cst_10 = arith.constant 0.000000e+00 : f32
      %12 = vector.broadcast %cst_10 : f32 to vector<512x128xf32>
      %c0_11 = arith.constant 0 : index
      %c0_12 = arith.constant 0 : index
      %13 = vector.load %arg7[%c0_11, %c0_12] : memref<512x128xf32, #tpu.memory_space<vmem>>, vector<512x128xf32>
      tpu.vector_store %arg7[%c0_11, %c0_12], %12 {strides = array<i32>} : memref<512x128xf32, #tpu.memory_space<vmem>>, vector<512x128xf32>,
    } else {
    }
    %c0 = arith.constant 0 : index
    %c0_1 = arith.constant 0 : index
    %3 = vector.load %arg7[%c0, %c0_1] : memref<512x128xf32, #tpu.memory_space<vmem>>, vector<512x128xf32>
    %c0_2 = arith.constant 0 : index
    %c0_3 = arith.constant 0 : index
    %4 = vector.load %arg3[%c0_2, %c0_3] : memref<512x128xbf16, #tpu.memory_space<vmem>>, vector<512x128xbf16>
    %c0_4 = arith.constant 0 : index
    %c0_5 = arith.constant 0 : index
    %5 = vector.load %arg4[%c0_4, %c0_5] : memref<128x128xbf16, #tpu.memory_space<vmem>>, vector<128x128xbf16>
    %cst = arith.constant dense<0.000000e+00> : vector<512x128xf32>
    %6 = tpu.matmul %4, %5, %cst {dimension_numbers = #tpu.dot_dimension_numbers<[1], [0], [0], [1], [0, 0, 1, 1], [], []>} : vector<512x128xbf16>, vector<128x128xbf16>, vector<512x128xf32> -> vector<512x128xf32>
    %7 = arith.addf %3, %6 : vector<512x128xf32>
    %c0_6 = arith.constant 0 : index
    %c0_7 = arith.constant 0 : index
    %8 = vector.load %arg7[%c0_6, %c0_7] : memref<512x128xf32, #tpu.memory_space<vmem>>, vector<512x128xf32>
    tpu.vector_store %arg7[%c0_6, %c0_7], %7 {strides = array<i32>} : memref<512x128xf32, #tpu.memory_space<vmem>>, vector<512x128xf32>,
    %c0_i32_8 = arith.constant 0 : i32
    %9 = arith.cmpi eq, %arg2, %c0_i32_8 : i32
    %10 = arith.extui %9 : i1 to i32
    %c0_i32_9 = arith.constant 0 : i32
    %11 = arith.cmpi ne, %10, %c0_i32_9 : i32
    scf.if %11 {
      %c0_10 = arith.constant 0 : index
      %c0_11 = arith.constant 0 : index
      %12 = vector.load %arg7[%c0_10, %c0_11] : memref<512x128xf32, #tpu.memory_space<vmem>>, vector<512x128xf32>
      %c0_12 = arith.constant 0 : index
      %c0_13 = arith.constant 0 : index
      %13 = vector.load %arg5[%c0_12, %c0_13] : memref<1x128xf32, #tpu.memory_space<vmem>>, vector<1x128xf32>
      %14 = vector.broadcast %13 : vector<1x128xf32> to vector<512x128xf32>
      %15 = arith.addf %12, %14 : vector<512x128xf32>
      %c0_14 = arith.constant 0 : index
      %c0_15 = arith.constant 0 : index
      %16 = vector.load %arg6[%c0_14, %c0_15] : memref<512x128xf32, #tpu.memory_space<vmem>>, vector<512x128xf32>
      tpu.vector_store %arg6[%c0_14, %c0_15], %15 {strides = array<i32>} : memref<512x128xf32, #tpu.memory_space<vmem>>, vector<512x128xf32>,
    } else {
    }
    return
  }
  func.func @transform_0(%arg0: i32, %arg1: i32, %arg2: i32) -> (i32, i32) {
    %c0_i32 = arith.constant 0 : i32
    return %arg0, %arg2 : i32, i32
  }
  func.func @transform_1(%arg0: i32, %arg1: i32, %arg2: i32) -> (i32, i32) {
    %c0_i32 = arith.constant 0 : i32
    return %arg2, %arg1 : i32, i32
  }
  func.func @transform_2(%arg0: i32, %arg1: i32, %arg2: i32) -> (i32, i32) {
    %c0_i32 = arith.constant 0 : i32
    %c0_i32_0 = arith.constant 0 : i32
    return %c0_i32, %arg1 : i32, i32
  }
  func.func @transform_3(%arg0: i32, %arg1: i32, %arg2: i32) -> (i32, i32) {
    %c0_i32 = arith.constant 0 : i32
    return %arg0, %arg1 : i32, i32
  }
}

module attributes {stable_mosaic.version = 11 : i64} {
  func.func @_matmul_kernel(%arg0: i32, %arg1: i32, %arg2: i32, %arg3: memref<512x128xbf16, #tpu.memory_space<vmem>>, %arg4: memref<128x128xbf16, #tpu.memory_space<vmem>>, %arg5: memref<1x128xf32, #tpu.memory_space<vmem>>, %arg6: memref<512x128xf32, #tpu.memory_space<vmem>>, %arg7: memref<512x128xf32, #tpu.memory_space<vmem>>, %arg8: memref<512x128xf32, #tpu.memory_space<vmem>>) attributes {dimension_semantics = [#tpu.dimension_semantics<parallel>, #tpu.dimension_semantics<parallel>, #tpu.dimension_semantics<arbitrary>], iteration_bounds = array<i64: 2, 1, 1>, scalar_prefetch = 0 : i64, scratch_operands = 1 : i64, tpu.core_type = #tpu.core_type<tc>, window_params = [{transform_indices = @transform_0, window_bounds = array<i64: 512, 128>}, {transform_indices = @transform_1, window_bounds = array<i64: 128, 128>}, {transform_indices = @transform_2, window_bounds = array<i64: 1, 128>}, {transform_indices = @transform_3, window_bounds = array<i64: 512, 128>}, {transform_indices = @transform_4, window_bounds = array<i64: 512, 128>}]} {
    %c0_i32 = arith.constant 0 : i32
    %0 = arith.cmpi eq, %arg2, %c0_i32 : i32
    %1 = arith.extui %0 : i1 to i32
    %c0_i32_0 = arith.constant 0 : i32
    %2 = arith.cmpi ne, %1, %c0_i32_0 : i32
    scf.if %2 {
      %cst_10 = arith.constant 0.000000e+00 : f32
      %12 = vector.broadcast %cst_10 : f32 to vector<512x128xf32>
      %c0_11 = arith.constant 0 : index
      %c0_12 = arith.constant 0 : index
      %13 = vector.load %arg8[%c0_11, %c0_12] : memref<512x128xf32, #tpu.memory_space<vmem>>, vector<512x128xf32>
      tpu.vector_store %arg8[%c0_11, %c0_12], %12 {strides = array<i32>} : memref<512x128xf32, #tpu.memory_space<vmem>>, vector<512x128xf32>,
    } else {
    }
    %c0 = arith.constant 0 : index
    %c0_1 = arith.constant 0 : index
    %3 = vector.load %arg8[%c0, %c0_1] : memref<512x128xf32, #tpu.memory_space<vmem>>, vector<512x128xf32>
    %c0_2 = arith.constant 0 : index
    %c0_3 = arith.constant 0 : index
    %4 = vector.load %arg3[%c0_2, %c0_3] : memref<512x128xbf16, #tpu.memory_space<vmem>>, vector<512x128xbf16>
    %c0_4 = arith.constant 0 : index
    %c0_5 = arith.constant 0 : index
    %5 = vector.load %arg4[%c0_4, %c0_5] : memref<128x128xbf16, #tpu.memory_space<vmem>>, vector<128x128xbf16>
    %cst = arith.constant dense<0.000000e+00> : vector<512x128xf32>
    %6 = tpu.matmul %4, %5, %cst {dimension_numbers = #tpu.dot_dimension_numbers<[1], [0], [0], [1], [0, 0, 1, 1], [], []>} : vector<512x128xbf16>, vector<128x128xbf16>, vector<512x128xf32> -> vector<512x128xf32>
    %7 = arith.addf %3, %6 : vector<512x128xf32>
    %c0_6 = arith.constant 0 : index
    %c0_7 = arith.constant 0 : index
    %8 = vector.load %arg8[%c0_6, %c0_7] : memref<512x128xf32, #tpu.memory_space<vmem>>, vector<512x128xf32>
    tpu.vector_store %arg8[%c0_6, %c0_7], %7 {strides = array<i32>} : memref<512x128xf32, #tpu.memory_space<vmem>>, vector<512x128xf32>,
    %c0_i32_8 = arith.constant 0 : i32
    %9 = arith.cmpi eq, %arg2, %c0_i32_8 : i32
    %10 = arith.extui %9 : i1 to i32
    %c0_i32_9 = arith.constant 0 : i32
    %11 = arith.cmpi ne, %10, %c0_i32_9 : i32
    scf.if %11 {
      %c0_10 = arith.constant 0 : index
      %c0_11 = arith.constant 0 : index
      %12 = vector.load %arg8[%c0_10, %c0_11] : memref<512x128xf32, #tpu.memory_space<vmem>>, vector<512x128xf32>
      %c0_12 = arith.constant 0 : index
      %c0_13 = arith.constant 0 : index
      %13 = vector.load %arg5[%c0_12, %c0_13] : memref<1x128xf32, #tpu.memory_space<vmem>>, vector<1x128xf32>
      %14 = vector.broadcast %13 : vector<1x128xf32> to vector<512x128xf32>
      %15 = arith.addf %12, %14 : vector<512x128xf32>
      %c0_14 = arith.constant 0 : index
      %c0_15 = arith.constant 0 : index
      %16 = vector.load %arg6[%c0_14, %c0_15] : memref<512x128xf32, #tpu.memory_space<vmem>>, vector<512x128xf32>
      %17 = arith.addf %15, %16 : vector<512x128xf32>
      %cst_16 = arith.constant 0.000000e+00 : f32
      %18 = vector.broadcast %cst_16 : f32 to vector<512x128xf32>
      %19 = arith.maximumf %17, %18 : vector<512x128xf32>
      %c0_17 = arith.constant 0 : index
      %c0_18 = arith.constant 0 : index
      %20 = vector.load %arg7[%c0_17, %c0_18] : memref<512x128xf32, #tpu.memory_space<vmem>>, vector<512x128xf32>
      tpu.vector_store %arg7[%c0_17, %c0_18], %19 {strides = array<i32>} : memref<512x128xf32, #tpu.memory_space<vmem>>, vector<512x128xf32>,
    } else {
    }
    return
  }
  func.func @transform_0(%arg0: i32, %arg1: i32, %arg2: i32) -> (i32, i32) {
    %c0_i32 = arith.constant 0 : i32
    return %arg0, %arg2 : i32, i32
  }
  func.func @transform_1(%arg0: i32, %arg1: i32, %arg2: i32) -> (i32, i32) {
    %c0_i32 = arith.constant 0 : i32
    return %arg2, %arg1 : i32, i32
  }
  func.func @transform_2(%arg0: i32, %arg1: i32, %arg2: i32) -> (i32, i32) {
    %c0_i32 = arith.constant 0 : i32
    %c0_i32_0 = arith.constant 0 : i32
    return %c0_i32, %arg1 : i32, i32
  }
  func.func @transform_3(%arg0: i32, %arg1: i32, %arg2: i32) -> (i32, i32) {
    %c0_i32 = arith.constant 0 : i32
    return %arg0, %arg1 : i32, i32
  }
  func.func @transform_4(%arg0: i32, %arg1: i32, %arg2: i32) -> (i32, i32) {
    %c0_i32 = arith.constant 0 : i32
    return %arg0, %arg1 : i32, i32
  }
}

</mosaic_0001>

<bundles_post_ra>
// kernel: hourglass_fwd.37
= control target key start
LH: loop header
LB: loop body
LE: loop exit
PB: predicated region body
PF: predicated region fallthrough
CT: control target
= control target key end

     0   :  { %s1688_s12 = smov 0   ;;  %s1690_s13 = smov 0   ;;  %s1921_s0 = inlined_call_operand.vmem [shape: bf16[1024,128], index: 0, kind: input, shape index: {}]   ;;  %s1922_s1 = inlined_call_operand.vmem [shape: bf16[128,128], index: 1, kind: input, shape index: {}]   ;;  %s1923_s2 = inlined_call_operand.vmem [shape: f32[1,128], index: 2, kind: input, shape index: {}]   ;;  %s1924_s3 = inlined_call_operand.vmem [shape: f32[1024,128], index: 3, kind: output, shape index: {}]  }
   0x1   :  { %s1692_s14 = smov 0  }
   0x2 LB: > { %s32_s15 = sadd.s32 1, %s1662_s13  ;;  %p1388_p0 = scmp.ge.s32.totalorder %s1666_s14, 1  ;;  %s1666_s14 = sphi %s1692_s14, %s13_s14   ;;  %s1662_s13 = sphi %s1690_s13, %s1926_s13   ;;  %s1658_s12 = sphi %s1688_s12, %s1925_s12  }
   0x3   : > { %p34_p1 = scmp.ge.s32.totalorder %s32_s15, 2  ;;  %p188_p2 = scmp.lt.s32.totalorder %s1666_s14, 3 }
   0x5   : > { %s1928_s15 = smov (%p34_p1, %s32_s15), 0  ;;  %p189_p3 = pnand %p1388_p0, %p188_p2 }
   0x6   : > { %s1389_s24 = sshll.u32 (!%p189_p3), %s1658_s12, 6 }
   0x7   : > { %192 = sbr.rel (%p189_p3) target bundleno = 303 (0x12f), region = 32  ;;  %p230_p4 = scmp.lt.s32.totalorder (!%p189_p3), %s1389_s24, 127 }
   0xc   : > { %v1594_v0 = vld [vmem:[%s1922_s1 + $0x38] sm:$0xff]  ;;  %v1593_v1 = vld [vmem:[%s1922_s1 + $0x30] sm:$0xff]  ;;  %v1592_v2 = vld [vmem:[%s1922_s1 + $0x28] sm:$0xff]  ;;  %s1930_s24 = smov (!%p230_p4, %s1389_s24), 127 }
   0xd   : > { %711 = vmatpush.bf16.msra.mxu0 %v1594_v0  ;;  %1595 = vmatpush.bf16.msra.mxu1 %v1594_v0  ;;  %v1591_v3 = vld [vmem:[%s1922_s1 + $0x20] sm:$0xff]  ;;  %v1590_v4 = vld [vmem:[%s1922_s1 + $0x18] sm:$0xff]  ;;  %v1589_v5 = vld [vmem:[%s1922_s1 + $0x10] sm:$0xff]  ;;  %s1390_s4 = sshll.u32 %s1930_s24, 2  ;;  %s1392_s12 = sshll.u32 %s1930_s24, 3 }
   0xe   : > { %1596 = vmatpush.bf16.msra.mxu2 %v1594_v0  ;;  %1597 = vmatpush.bf16.msra.mxu3 %v1594_v0  ;;  %v1588_v6 = vld [vmem:[%s1922_s1 + $0x8] sm:$0xff]  ;;  %v1587_v7 = vld [vmem:[%s1922_s1] sm:$0xff]  ;;  %s1739_s9 = scalar_lea.vmem %s1921_s0, %s1390_s4  ;;  %s1784_s18 = scalar_lea.vmem %s1924_s3, %s1392_s12 }
   0xf   : > { %v1555_v8 = vld [vmem:[%s1739_s9] sm:$0xff]  ;;  %v1556_v12 = vld [vmem:[%s1739_s9 + $0x8] sm:$0xff]  ;;  %v1557_v16 = vld [vmem:[%s1739_s9 + $0x10] sm:$0xff] }
  0x10   : > { %v1563_v9 = vld [vmem:[%s1739_s9 + $0x40] sm:$0xff]  ;;  %v1564_v13 = vld [vmem:[%s1739_s9 + $0x48] sm:$0xff]  ;;  %v1565_v17 = vld [vmem:[%s1739_s9 + $0x50] sm:$0xff] }
  0x11   : > { %712 = vmatpush.bf16.msra.mxu0 %v1593_v1  ;;  %1598 = vmatpush.bf16.msra.mxu1 %v1593_v1  ;;  %v1571_v10 = vld [vmem:[%s1739_s9 + $0x80] sm:$0xff]  ;;  %v1572_v14 = vld [vmem:[%s1739_s9 + $0x88] sm:$0xff]  ;;  %v1573_v18 = vld [vmem:[%s1739_s9 + $0x90] sm:$0xff] }
  0x12   : > { %1599 = vmatpush.bf16.msra.mxu2 %v1593_v1  ;;  %1600 = vmatpush.bf16.msra.mxu3 %v1593_v1  ;;  %v1579_v11 = vld [vmem:[%s1739_s9 + $0xc0] sm:$0xff]  ;;  %v1580_v15 = vld [vmem:[%s1739_s9 + $0xc8] sm:$0xff]  ;;  %v1581_v19 = vld [vmem:[%s1739_s9 + $0xd0] sm:$0xff] }
  0x13   : > { %v1558_v20 = vld [vmem:[%s1739_s9 + $0x18] sm:$0xff]  ;;  %v1559_v24 = vld [vmem:[%s1739_s9 + $0x20] sm:$0xff]  ;;  %v1560_v28 = vld [vmem:[%s1739_s9 + $0x28] sm:$0xff] }
  0x14   : > { %v1566_v21 = vld [vmem:[%s1739_s9 + $0x58] sm:$0xff]  ;;  %v1567_v25 = vld [vmem:[%s1739_s9 + $0x60] sm:$0xff]  ;;  %v1568_v29 = vld [vmem:[%s1739_s9 + $0x68] sm:$0xff] }
  0x15   : > { %713 = vmatpush.bf16.msra.mxu0 %v1592_v2  ;;  %1601 = vmatpush.bf16.msra.mxu1 %v1592_v2  ;;  %v1574_v22 = vld [vmem:[%s1739_s9 + $0x98] sm:$0xff]  ;;  %v1575_v26 = vld [vmem:[%s1739_s9 + $0xa0] sm:$0xff]  ;;  %v1576_v30 = vld [vmem:[%s1739_s9 + $0xa8] sm:$0xff] }
  0x16   : > { %1602 = vmatpush.bf16.msra.mxu2 %v1592_v2  ;;  %1603 = vmatpush.bf16.msra.mxu3 %v1592_v2  ;;  %v1582_v23 = vld [vmem:[%s1739_s9 + $0xd8] sm:$0xff]  ;;  %v1583_v27 = vld [vmem:[%s1739_s9 + $0xe0] sm:$0xff]  ;;  %v1584_v31 = vld [vmem:[%s1739_s9 + $0xe8] sm:$0xff] }
  0x17   : > { %v1561_v32 = vld [vmem:[%s1739_s9 + $0x30] sm:$0xff]  ;;  %v1562_v36 = vld [vmem:[%s1739_s9 + $0x38] sm:$0xff]  ;;  %v1776_v40 = vld [vmem:[%s1923_s2] ss:$0 sm:$0xff] }
  0x18   : > { %v1569_v33 = vld [vmem:[%s1739_s9 + $0x70] sm:$0xff]  ;;  %v1570_v37 = vld [vmem:[%s1739_s9 + $0x78] sm:$0xff] }
  0x19   : > { %714 = vmatpush.bf16.msra.mxu0 %v1591_v3  ;;  %1604 = vmatpush.bf16.msra.mxu1 %v1591_v3  ;;  %v1577_v34 = vld [vmem:[%s1739_s9 + $0xb0] sm:$0xff]  ;;  %v1578_v38 = vld [vmem:[%s1739_s9 + $0xb8] sm:$0xff] }
  0x1a   : > { %1605 = vmatpush.bf16.msra.mxu2 %v1591_v3  ;;  %1606 = vmatpush.bf16.msra.mxu3 %v1591_v3  ;;  %v1585_v35 = vld [vmem:[%s1739_s9 + $0xf0] sm:$0xff]  ;;  %v1586_v39 = vld [vmem:[%s1739_s9 + $0xf8] sm:$0xff] }
  0x1d   : > { %715 = vmatpush.bf16.msra.mxu0 %v1590_v4  ;;  %1607 = vmatpush.bf16.msra.mxu1 %v1590_v4 }
  0x1e   : > { %1608 = vmatpush.bf16.msra.mxu2 %v1590_v4  ;;  %1609 = vmatpush.bf16.msra.mxu3 %v1590_v4 }
  0x21   : > { %716 = vmatpush.bf16.msra.mxu0 %v1589_v5  ;;  %1610 = vmatpush.bf16.msra.mxu1 %v1589_v5 }
  0x22   : > { %1611 = vmatpush.bf16.msra.mxu2 %v1589_v5  ;;  %1612 = vmatpush.bf16.msra.mxu3 %v1589_v5 }
  0x25   : > { %717 = vmatpush.bf16.msra.mxu0 %v1588_v6  ;;  %1613 = vmatpush.bf16.msra.mxu1 %v1588_v6 }
  0x26   : > { %1614 = vmatpush.bf16.msra.mxu2 %v1588_v6  ;;  %1615 = vmatpush.bf16.msra.mxu3 %v1588_v6 }
  0x29   : > { %718 = vmatpush.bf16.msra.mxu0 %v1587_v7  ;;  %1616 = vmatpush.bf16.msra.mxu1 %v1587_v7 }
  0x2a   : > { %1617 = vmatpush.bf16.msra.mxu2 %v1587_v7  ;;  %1618 = vmatpush.bf16.msra.mxu3 %v1587_v7 }
  0x2c   : > { %719 = vmatmul.bf16.vlgmr.msra.gmra.mxu0 %v1555_v8  ;;  %759 = vmatmul.bf16.vlgmr.msra.gmra.mxu1 %v1563_v9 }
  0x2d   : > { %799 = vmatmul.bf16.vlgmr.msra.gmra.mxu2 %v1571_v10  ;;  %839 = vmatmul.bf16.vlgmr.msra.gmra.mxu3 %v1579_v11 }
  0x3c   : > { %724 = vmatmul.bf16.gmra.mxu0 %v1556_v12  ;;  %764 = vmatmul.bf16.gmra.mxu1 %v1564_v13 }
  0x3d   : > { %804 = vmatmul.bf16.gmra.mxu2 %v1572_v14  ;;  %844 = vmatmul.bf16.gmra.mxu3 %v1580_v15 }
  0x4c   : > { %729 = vmatmul.bf16.gmra.mxu0 %v1557_v16  ;;  %769 = vmatmul.bf16.gmra.mxu1 %v1565_v17 }
  0x4d   : > { %809 = vmatmul.bf16.gmra.mxu2 %v1573_v18  ;;  %849 = vmatmul.bf16.gmra.mxu3 %v1581_v19 }
  0x5c   : > { %734 = vmatmul.bf16.gmra.mxu0 %v1558_v20  ;;  %774 = vmatmul.bf16.gmra.mxu1 %v1566_v21 }
  0x5d   : > { %814 = vmatmul.bf16.gmra.mxu2 %v1574_v22  ;;  %854 = vmatmul.bf16.gmra.mxu3 %v1582_v23 }
  0x6c   : > { %739 = vmatmul.bf16.gmra.mxu0 %v1559_v24  ;;  %779 = vmatmul.bf16.gmra.mxu1 %v1567_v25 }
  0x6d   : > { %819 = vmatmul.bf16.gmra.mxu2 %v1575_v26  ;;  %859 = vmatmul.bf16.gmra.mxu3 %v1583_v27 }
  0x7c   : > { %744 = vmatmul.bf16.gmra.mxu0 %v1560_v28  ;;  %784 = vmatmul.bf16.gmra.mxu1 %v1568_v29 }
  0x7d   : > { %824 = vmatmul.bf16.gmra.mxu2 %v1576_v30  ;;  %864 = vmatmul.bf16.gmra.mxu3 %v1584_v31 }
  0x8c   : > { %749 = vmatmul.bf16.gmra.mxu0 %v1561_v32  ;;  %789 = vmatmul.bf16.gmra.mxu1 %v1569_v33 }
  0x8d   : > { %829 = vmatmul.bf16.gmra.mxu2 %v1577_v34  ;;  %869 = vmatmul.bf16.gmra.mxu3 %v1585_v35 }
  0x9c   : > { %754 = vmatmul.bf16.gmra.mxu0 %v1562_v36  ;;  %794 = vmatmul.bf16.gmra.mxu1 %v1570_v37 }
  0x9d   : > { %834 = vmatmul.bf16.gmra.mxu2 %v1578_v38  ;;  %874 = vmatmul.bf16.gmra.mxu3 %v1586_v39 }
  0xa9   : > { %v720_v41 = vpop.f32.mrf.mxu0  ;;  %v760_v42 = vpop.f32.mrf.mxu1 }
  0xaa   : > { %v1079_v43 = vadd.f32 %v1776_v40, %v720_v41  ;;  %v1095_v44 = vadd.f32 %v1776_v40, %v760_v42 }
  0xac   : > { %v1143_v45 = vmax.f32 %v1079_v43, 0.0  ;;  %v1159_v46 = vmax.f32 %v1095_v44, 0.0 }
  0xae   : > { %1207 = vst [vmem:[%s1784_s18] sm:$0xff] %v1143_v45 }
  0xaf   : > { %1223 = vst [vmem:[%s1784_s18 + $0x80] sm:$0xff] %v1159_v46 }
  0xb0   : > { %v800_v47 = vpop.f32.mrf.mxu2  ;;  %v840_v48 = vpop.f32.mrf.mxu3 }
  0xb1   : > { %v1111_v49 = vadd.f32 %v1776_v40, %v800_v47  ;;  %v1127_v50 = vadd.f32 %v1776_v40, %v840_v48  ;;  %v722_v51 = vpop.f32.mrf.mxu0  ;;  %v762_v52 = vpop.f32.mrf.mxu1 }
  0xb2   : > { %v1080_v53 = vadd.f32 %v1776_v40, %v722_v51  ;;  %v1096_v54 = vadd.f32 %v1776_v40, %v762_v52 }
  0xb3   : > { %v1175_v55 = vmax.f32 %v1111_v49, 0.0  ;;  %v1191_v56 = vmax.f32 %v1127_v50, 0.0 }
  0xb4   : > { %v1144_v57 = vmax.f32 %v1080_v53, 0.0  ;;  %v1160_v58 = vmax.f32 %v1096_v54, 0.0 }
  0xb5   : > { %1239 = vst [vmem:[%s1784_s18 + $0x100] sm:$0xff] %v1175_v55 }
  0xb6   : > { %1255 = vst [vmem:[%s1784_s18 + $0x180] sm:$0xff] %v1191_v56 }
  0xb7   : > { %1208 = vst [vmem:[%s1784_s18 + $0x8] sm:$0xff] %v1144_v57 }
  0xb8   : > { %1224 = vst [vmem:[%s1784_s18 + $0x88] sm:$0xff] %v1160_v58  ;;  %v802_v59 = vpop.f32.mrf.mxu2  ;;  %v842_v60 = vpop.f32.mrf.mxu3 }
  0xb9   : > { %v1112_v61 = vadd.f32 %v1776_v40, %v802_v59  ;;  %v1128_v62 = vadd.f32 %v1776_v40, %v842_v60  ;;  %v725_v63 = vpop.f32.mrf.mxu0  ;;  %v765_v0 = vpop.f32.mrf.mxu1 }
  0xba   : > { %v1081_v1 = vadd.f32 %v1776_v40, %v725_v63  ;;  %v1097_v2 = vadd.f32 %v1776_v40, %v765_v0 }
  0xbb   : > { %v1176_v3 = vmax.f32 %v1112_v61, 0.0  ;;  %v1192_v4 = vmax.f32 %v1128_v62, 0.0 }
  0xbc   : > { %v1145_v5 = vmax.f32 %v1081_v1, 0.0  ;;  %v1161_v6 = vmax.f32 %v1097_v2, 0.0 }
  0xbd   : > { %1240 = vst [vmem:[%s1784_s18 + $0x108] sm:$0xff] %v1176_v3 }
  0xbe   : > { %1256 = vst [vmem:[%s1784_s18 + $0x188] sm:$0xff] %v1192_v4 }
  0xbf   : > { %1209 = vst [vmem:[%s1784_s18 + $0x10] sm:$0xff] %v1145_v5 }
  0xc0   : > { %1225 = vst [vmem:[%s1784_s18 + $0x90] sm:$0xff] %v1161_v6  ;;  %v805_v7 = vpop.f32.mrf.mxu2  ;;  %v845_v8 = vpop.f32.mrf.mxu3 }
  0xc1   : > { %v1113_v9 = vadd.f32 %v1776_v40, %v805_v7  ;;  %v1129_v10 = vadd.f32 %v1776_v40, %v845_v8  ;;  %v727_v11 = vpop.f32.mrf.mxu0  ;;  %v767_v12 = vpop.f32.mrf.mxu1 }
  0xc2   : > { %v1082_v13 = vadd.f32 %v1776_v40, %v727_v11  ;;  %v1098_v14 = vadd.f32 %v1776_v40, %v767_v12 }
  0xc3   : > { %v1177_v15 = vmax.f32 %v1113_v9, 0.0  ;;  %v1193_v16 = vmax.f32 %v1129_v10, 0.0 }
  0xc4   : > { %v1146_v17 = vmax.f32 %v1082_v13, 0.0  ;;  %v1162_v18 = vmax.f32 %v1098_v14, 0.0 }
  0xc5   : > { %1241 = vst [vmem:[%s1784_s18 + $0x110] sm:$0xff] %v1177_v15 }
  0xc6   : > { %1257 = vst [vmem:[%s1784_s18 + $0x190] sm:$0xff] %v1193_v16 }
  0xc7   : > { %1210 = vst [vmem:[%s1784_s18 + $0x18] sm:$0xff] %v1146_v17 }
  0xc8   : > { %1226 = vst [vmem:[%s1784_s18 + $0x98] sm:$0xff] %v1162_v18  ;;  %v807_v19 = vpop.f32.mrf.mxu2  ;;  %v847_v20 = vpop.f32.mrf.mxu3 }
  0xc9   : > { %v1114_v21 = vadd.f32 %v1776_v40, %v807_v19  ;;  %v1130_v22 = vadd.f32 %v1776_v40, %v847_v20  ;;  %v730_v23 = vpop.f32.mrf.mxu0  ;;  %v770_v24 = vpop.f32.mrf.mxu1 }
  0xca   : > { %v1083_v25 = vadd.f32 %v1776_v40, %v730_v23  ;;  %v1099_v26 = vadd.f32 %v1776_v40, %v770_v24 }
  0xcb   : > { %v1178_v27 = vmax.f32 %v1114_v21, 0.0  ;;  %v1194_v28 = vmax.f32 %v1130_v22, 0.0 }
  0xcc   : > { %v1147_v29 = vmax.f32 %v1083_v25, 0.0  ;;  %v1163_v30 = vmax.f32 %v1099_v26, 0.0 }
  0xcd   : > { %1242 = vst [vmem:[%s1784_s18 + $0x118] sm:$0xff] %v1178_v27 }
  0xce   : > { %1258 = vst [vmem:[%s1784_s18 + $0x198] sm:$0xff] %v1194_v28 }
  0xcf   : > { %1211 = vst [vmem:[%s1784_s18 + $0x20] sm:$0xff] %v1147_v29 }
  0xd0   : > { %1227 = vst [vmem:[%s1784_s18 + $0xa0] sm:$0xff] %v1163_v30  ;;  %v810_v31 = vpop.f32.mrf.mxu2  ;;  %v850_v32 = vpop.f32.mrf.mxu3 }
  0xd1   : > { %v1115_v33 = vadd.f32 %v1776_v40, %v810_v31  ;;  %v1131_v34 = vadd.f32 %v1776_v40, %v850_v32  ;;  %v732_v35 = vpop.f32.mrf.mxu0  ;;  %v772_v36 = vpop.f32.mrf.mxu1 }
  0xd2   : > { %v1084_v37 = vadd.f32 %v1776_v40, %v732_v35  ;;  %v1100_v38 = vadd.f32 %v1776_v40, %v772_v36 }
  0xd3   : > { %v1179_v39 = vmax.f32 %v1115_v33, 0.0  ;;  %v1195_v41 = vmax.f32 %v1131_v34, 0.0 }
  0xd4   : > { %v1148_v42 = vmax.f32 %v1084_v37, 0.0  ;;  %v1164_v43 = vmax.f32 %v1100_v38, 0.0 }
  0xd5   : > { %1243 = vst [vmem:[%s1784_s18 + $0x120] sm:$0xff] %v1179_v39 }
  0xd6   : > { %1259 = vst [vmem:[%s1784_s18 + $0x1a0] sm:$0xff] %v1195_v41 }
  0xd7   : > { %1212 = vst [vmem:[%s1784_s18 + $0x28] sm:$0xff] %v1148_v42 }
  0xd8   : > { %1228 = vst [vmem:[%s1784_s18 + $0xa8] sm:$0xff] %v1164_v43  ;;  %v812_v44 = vpop.f32.mrf.mxu2  ;;  %v852_v45 = vpop.f32.mrf.mxu3 }
  0xd9   : > { %v1116_v46 = vadd.f32 %v1776_v40, %v812_v44  ;;  %v1132_v47 = vadd.f32 %v1776_v40, %v852_v45  ;;  %v735_v48 = vpop.f32.mrf.mxu0  ;;  %v775_v49 = vpop.f32.mrf.mxu1 }
  0xda   : > { %v1085_v50 = vadd.f32 %v1776_v40, %v735_v48  ;;  %v1101_v51 = vadd.f32 %v1776_v40, %v775_v49 }
  0xdb   : > { %v1180_v52 = vmax.f32 %v1116_v46, 0.0  ;;  %v1196_v53 = vmax.f32 %v1132_v47, 0.0 }
  0xdc   : > { %v1149_v54 = vmax.f32 %v1085_v50, 0.0  ;;  %v1165_v55 = vmax.f32 %v1101_v51, 0.0 }
  0xdd   : > { %1244 = vst [vmem:[%s1784_s18 + $0x128] sm:$0xff] %v1180_v52 }
  0xde   : > { %1260 = vst [vmem:[%s1784_s18 + $0x1a8] sm:$0xff] %v1196_v53 }
  0xdf   : > { %1213 = vst [vmem:[%s1784_s18 + $0x30] sm:$0xff] %v1149_v54 }
  0xe0   : > { %1229 = vst [vmem:[%s1784_s18 + $0xb0] sm:$0xff] %v1165_v55  ;;  %v815_v56 = vpop.f32.mrf.mxu2  ;;  %v855_v57 = vpop.f32.mrf.mxu3 }
  0xe1   : > { %v1117_v58 = vadd.f32 %v1776_v40, %v815_v56  ;;  %v1133_v59 = vadd.f32 %v1776_v40, %v855_v57  ;;  %v737_v60 = vpop.f32.mrf.mxu0  ;;  %v777_v61 = vpop.f32.mrf.mxu1 }
  0xe2   : > { %v1086_v62 = vadd.f32 %v1776_v40, %v737_v60  ;;  %v1102_v63 = vadd.f32 %v1776_v40, %v777_v61 }
  0xe3   : > { %v1181_v0 = vmax.f32 %v1117_v58, 0.0  ;;  %v1197_v1 = vmax.f32 %v1133_v59, 0.0 }
  0xe4   : > { %v1150_v2 = vmax.f32 %v1086_v62, 0.0  ;;  %v1166_v3 = vmax.f32 %v1102_v63, 0.0 }
  0xe5   : > { %1245 = vst [vmem:[%s1784_s18 + $0x130] sm:$0xff] %v1181_v0 }
  0xe6   : > { %1261 = vst [vmem:[%s1784_s18 + $0x1b0] sm:$0xff] %v1197_v1 }
  0xe7   : > { %1214 = vst [vmem:[%s1784_s18 + $0x38] sm:$0xff] %v1150_v2 }
  0xe8   : > { %1230 = vst [vmem:[%s1784_s18 + $0xb8] sm:$0xff] %v1166_v3  ;;  %v817_v4 = vpop.f32.mrf.mxu2  ;;  %v857_v5 = vpop.f32.mrf.mxu3 }
  0xe9   : > { %v1118_v6 = vadd.f32 %v1776_v40, %v817_v4  ;;  %v1134_v7 = vadd.f32 %v1776_v40, %v857_v5  ;;  %v740_v8 = vpop.f32.mrf.mxu0  ;;  %v780_v9 = vpop.f32.mrf.mxu1 }
  0xea   : > { %v1087_v10 = vadd.f32 %v1776_v40, %v740_v8  ;;  %v1103_v11 = vadd.f32 %v1776_v40, %v780_v9 }
  0xeb   : > { %v1182_v12 = vmax.f32 %v1118_v6, 0.0  ;;  %v1198_v13 = vmax.f32 %v1134_v7, 0.0 }
  0xec   : > { %v1151_v14 = vmax.f32 %v1087_v10, 0.0  ;;  %v1167_v15 = vmax.f32 %v1103_v11, 0.0 }
  0xed   : > { %1246 = vst [vmem:[%s1784_s18 + $0x138] sm:$0xff] %v1182_v12 }
  0xee   : > { %1262 = vst [vmem:[%s1784_s18 + $0x1b8] sm:$0xff] %v1198_v13 }
  0xef   : > { %1215 = vst [vmem:[%s1784_s18 + $0x40] sm:$0xff] %v1151_v14 }
  0xf0   : > { %1231 = vst [vmem:[%s1784_s18 + $0xc0] sm:$0xff] %v1167_v15  ;;  %v820_v16 = vpop.f32.mrf.mxu2  ;;  %v860_v17 = vpop.f32.mrf.mxu3 }
  0xf1   : > { %v1119_v18 = vadd.f32 %v1776_v40, %v820_v16  ;;  %v1135_v19 = vadd.f32 %v1776_v40, %v860_v17  ;;  %v742_v20 = vpop.f32.mrf.mxu0  ;;  %v782_v21 = vpop.f32.mrf.mxu1 }
  0xf2   : > { %v1088_v22 = vadd.f32 %v1776_v40, %v742_v20  ;;  %v1104_v23 = vadd.f32 %v1776_v40, %v782_v21 }
  0xf3   : > { %v1183_v24 = vmax.f32 %v1119_v18, 0.0  ;;  %v1199_v25 = vmax.f32 %v1135_v19, 0.0 }
  0xf4   : > { %v1152_v26 = vmax.f32 %v1088_v22, 0.0  ;;  %v1168_v27 = vmax.f32 %v1104_v23, 0.0 }
  0xf5   : > { %1247 = vst [vmem:[%s1784_s18 + $0x140] sm:$0xff] %v1183_v24 }
  0xf6   : > { %1263 = vst [vmem:[%s1784_s18 + $0x1c0] sm:$0xff] %v1199_v25 }
  0xf7   : > { %1216 = vst [vmem:[%s1784_s18 + $0x48] sm:$0xff] %v1152_v26 }
  0xf8   : > { %1232 = vst [vmem:[%s1784_s18 + $0xc8] sm:$0xff] %v1168_v27  ;;  %v822_v28 = vpop.f32.mrf.mxu2  ;;  %v862_v29 = vpop.f32.mrf.mxu3 }
  0xf9   : > { %v1120_v30 = vadd.f32 %v1776_v40, %v822_v28  ;;  %v1136_v31 = vadd.f32 %v1776_v40, %v862_v29  ;;  %v745_v32 = vpop.f32.mrf.mxu0  ;;  %v785_v33 = vpop.f32.mrf.mxu1 }
  0xfa   : > { %v1089_v34 = vadd.f32 %v1776_v40, %v745_v32  ;;  %v1105_v35 = vadd.f32 %v1776_v40, %v785_v33 }
  0xfb   : > { %v1184_v36 = vmax.f32 %v1120_v30, 0.0  ;;  %v1200_v37 = vmax.f32 %v1136_v31, 0.0 }
  0xfc   : > { %v1153_v38 = vmax.f32 %v1089_v34, 0.0  ;;  %v1169_v39 = vmax.f32 %v1105_v35, 0.0 }
  0xfd   : > { %1248 = vst [vmem:[%s1784_s18 + $0x148] sm:$0xff] %v1184_v36 }
  0xfe   : > { %1264 = vst [vmem:[%s1784_s18 + $0x1c8] sm:$0xff] %v1200_v37 }
  0xff   : > { %1217 = vst [vmem:[%s1784_s18 + $0x50] sm:$0xff] %v1153_v38 }
 0x100   : > { %1233 = vst [vmem:[%s1784_s18 + $0xd0] sm:$0xff] %v1169_v39  ;;  %v825_v41 = vpop.f32.mrf.mxu2  ;;  %v865_v42 = vpop.f32.mrf.mxu3 }
 0x101   : > { %v1121_v43 = vadd.f32 %v1776_v40, %v825_v41  ;;  %v1137_v44 = vadd.f32 %v1776_v40, %v865_v42  ;;  %v747_v45 = vpop.f32.mrf.mxu0  ;;  %v787_v46 = vpop.f32.mrf.mxu1 }
 0x102   : > { %v1090_v47 = vadd.f32 %v1776_v40, %v747_v45  ;;  %v1106_v48 = vadd.f32 %v1776_v40, %v787_v46 }
 0x103   : > { %v1185_v49 = vmax.f32 %v1121_v43, 0.0  ;;  %v1201_v50 = vmax.f32 %v1137_v44, 0.0 }
 0x104   : > { %v1154_v51 = vmax.f32 %v1090_v47, 0.0  ;;  %v1170_v52 = vmax.f32 %v1106_v48, 0.0 }
 0x105   : > { %1249 = vst [vmem:[%s1784_s18 + $0x150] sm:$0xff] %v1185_v49 }
 0x106   : > { %1265 = vst [vmem:[%s1784_s18 + $0x1d0] sm:$0xff] %v1201_v50 }
 0x107   : > { %1218 = vst [vmem:[%s1784_s18 + $0x58] sm:$0xff] %v1154_v51 }
 0x108   : > { %1234 = vst [vmem:[%s1784_s18 + $0xd8] sm:$0xff] %v1170_v52  ;;  %v827_v53 = vpop.f32.mrf.mxu2  ;;  %v867_v54 = vpop.f32.mrf.mxu3 }
 0x109   : > { %v1122_v55 = vadd.f32 %v1776_v40, %v827_v53  ;;  %v1138_v56 = vadd.f32 %v1776_v40, %v867_v54  ;;  %v750_v57 = vpop.f32.mrf.mxu0  ;;  %v790_v58 = vpop.f32.mrf.mxu1 }
 0x10a   : > { %v1091_v59 = vadd.f32 %v1776_v40, %v750_v57  ;;  %v1107_v60 = vadd.f32 %v1776_v40, %v790_v58 }
 0x10b   : > { %v1186_v61 = vmax.f32 %v1122_v55, 0.0  ;;  %v1202_v62 = vmax.f32 %v1138_v56, 0.0 }
 0x10c   : > { %v1155_v63 = vmax.f32 %v1091_v59, 0.0  ;;  %v1171_v0 = vmax.f32 %v1107_v60, 0.0 }
 0x10d   : > { %1250 = vst [vmem:[%s1784_s18 + $0x158] sm:$0xff] %v1186_v61 }
 0x10e   : > { %1266 = vst [vmem:[%s1784_s18 + $0x1d8] sm:$0xff] %v1202_v62 }
 0x10f   : > { %1219 = vst [vmem:[%s1784_s18 + $0x60] sm:$0xff] %v1155_v63 }
 0x110   : > { %1235 = vst [vmem:[%s1784_s18 + $0xe0] sm:$0xff] %v1171_v0  ;;  %v830_v1 = vpop.f32.mrf.mxu2  ;;  %v870_v2 = vpop.f32.mrf.mxu3 }
 0x111   : > { %v1123_v3 = vadd.f32 %v1776_v40, %v830_v1  ;;  %v1139_v4 = vadd.f32 %v1776_v40, %v870_v2  ;;  %v752_v5 = vpop.f32.mrf.mxu0  ;;  %v792_v6 = vpop.f32.mrf.mxu1 }
 0x112   : > { %v1092_v7 = vadd.f32 %v1776_v40, %v752_v5  ;;  %v1108_v8 = vadd.f32 %v1776_v40, %v792_v6 }
 0x113   : > { %v1187_v9 = vmax.f32 %v1123_v3, 0.0  ;;  %v1203_v10 = vmax.f32 %v1139_v4, 0.0 }
 0x114   : > { %v1156_v11 = vmax.f32 %v1092_v7, 0.0  ;;  %v1172_v12 = vmax.f32 %v1108_v8, 0.0 }
 0x115   : > { %1251 = vst [vmem:[%s1784_s18 + $0x160] sm:$0xff] %v1187_v9 }
 0x116   : > { %1267 = vst [vmem:[%s1784_s18 + $0x1e0] sm:$0xff] %v1203_v10 }
 0x117   : > { %1220 = vst [vmem:[%s1784_s18 + $0x68] sm:$0xff] %v1156_v11 }
 0x118   : > { %1236 = vst [vmem:[%s1784_s18 + $0xe8] sm:$0xff] %v1172_v12  ;;  %v832_v13 = vpop.f32.mrf.mxu2  ;;  %v872_v14 = vpop.f32.mrf.mxu3 }
 0x119   : > { %v1124_v15 = vadd.f32 %v1776_v40, %v832_v13  ;;  %v1140_v16 = vadd.f32 %v1776_v40, %v872_v14  ;;  %v755_v17 = vpop.f32.mrf.mxu0  ;;  %v795_v18 = vpop.f32.mrf.mxu1 }
 0x11a   : > { %v1093_v19 = vadd.f32 %v1776_v40, %v755_v17  ;;  %v1109_v20 = vadd.f32 %v1776_v40, %v795_v18 }
 0x11b   : > { %v1188_v21 = vmax.f32 %v1124_v15, 0.0  ;;  %v1204_v22 = vmax.f32 %v1140_v16, 0.0 }
 0x11c   : > { %v1157_v23 = vmax.f32 %v1093_v19, 0.0  ;;  %v1173_v24 = vmax.f32 %v1109_v20, 0.0 }
 0x11d   : > { %1252 = vst [vmem:[%s1784_s18 + $0x168] sm:$0xff] %v1188_v21 }
 0x11e   : > { %1268 = vst [vmem:[%s1784_s18 + $0x1e8] sm:$0xff] %v1204_v22 }
 0x11f   : > { %1221 = vst [vmem:[%s1784_s18 + $0x70] sm:$0xff] %v1157_v23 }
 0x120   : > { %1237 = vst [vmem:[%s1784_s18 + $0xf0] sm:$0xff] %v1173_v24  ;;  %v835_v25 = vpop.f32.mrf.mxu2  ;;  %v875_v26 = vpop.f32.mrf.mxu3 }
 0x121   : > { %v1125_v27 = vadd.f32 %v1776_v40, %v835_v25  ;;  %v1141_v28 = vadd.f32 %v1776_v40, %v875_v26  ;;  %v757_v29 = vpop.f32.mrf.mxu0  ;;  %v797_v30 = vpop.f32.mrf.mxu1 }
 0x122   : > { %v1094_v31 = vadd.f32 %v1776_v40, %v757_v29  ;;  %v1110_v32 = vadd.f32 %v1776_v40, %v797_v30 }
 0x123   : > { %v1189_v33 = vmax.f32 %v1125_v27, 0.0  ;;  %v1205_v34 = vmax.f32 %v1141_v28, 0.0 }
 0x124   : > { %v1158_v35 = vmax.f32 %v1094_v31, 0.0  ;;  %v1174_v36 = vmax.f32 %v1110_v32, 0.0 }
 0x125   : > { %1253 = vst [vmem:[%s1784_s18 + $0x170] sm:$0xff] %v1189_v33 }
 0x126   : > { %1269 = vst [vmem:[%s1784_s18 + $0x1f0] sm:$0xff] %v1205_v34 }
 0x127   : > { %1222 = vst [vmem:[%s1784_s18 + $0x78] sm:$0xff] %v1158_v35 }
 0x128   : > { %1238 = vst [vmem:[%s1784_s18 + $0xf8] sm:$0xff] %v1174_v36  ;;  %v837_v37 = vpop.f32.mrf.mxu2  ;;  %v877_v38 = vpop.f32.mrf.mxu3 }
 0x129   : > { %v1126_v39 = vadd.f32 %v1776_v40, %v837_v37  ;;  %v1142_v41 = vadd.f32 %v1776_v40, %v877_v38 }
 0x12b   : > { %v1190_v42 = vmax.f32 %v1126_v39, 0.0  ;;  %v1206_v43 = vmax.f32 %v1142_v41, 0.0 }
 0x12d   : > { %1254 = vst [vmem:[%s1784_s18 + $0x178] sm:$0xff] %v1190_v42 }
 0x12e   : > { %1270 = vst [vmem:[%s1784_s18 + $0x1f8] sm:$0xff] %v1206_v43 }
 0x12f PF: > { %s13_s14 = sadd.s32 1, %s1666_s14   ;;  %s1925_s12 = smov %s1662_s13 }
 0x130   : > { %p10_p5 = scmp.ge.s32.totalorder %s13_s14, 4   ;;  %s1926_s13 = smov %s1928_s15 }
 0x132   :  { %12 = sbr.rel (!%p10_p5) target bundleno = 2 (0x2), region = 76 }

// kernel: hourglass_fwd.38
= control target key start
LH: loop header
LB: loop body
LE: loop exit
PB: predicated region body
PF: predicated region fallthrough
CT: control target
= control target key end

     0   :  { %s2254_s12 = smov 0   ;;  %s2256_s13 = smov 0   ;;  %s2610_s0 = inlined_call_operand.vmem [shape: bf16[1024,256], index: 0, kind: input, shape index: {}]   ;;  %s2611_s1 = inlined_call_operand.vmem [shape: bf16[256,128], index: 1, kind: input, shape index: {}]   ;;  %s2612_s2 = inlined_call_operand.vmem [shape: f32[1,128], index: 2, kind: input, shape index: {}]   ;;  %s2613_s3 = inlined_call_operand.vmem [shape: f32[1024,128], index: 3, kind: output, shape index: {}]  }
   0x1   :  { %s2258_s14 = smov 0  }
   0x2 LB: > { %s32_s15 = sadd.s32 1, %s2228_s13  ;;  %p1760_p0 = scmp.ge.s32.totalorder %s2232_s14, 1  ;;  %s2232_s14 = sphi %s2258_s14, %s13_s14   ;;  %s2228_s13 = sphi %s2256_s13, %s2615_s13   ;;  %s2224_s12 = sphi %s2254_s12, %s2614_s12  }
   0x3   : > { %p34_p1 = scmp.ge.s32.totalorder %s32_s15, 2  ;;  %p191_p2 = scmp.lt.s32.totalorder %s2232_s14, 3 }
   0x5   : > { %s2617_s15 = smov (%p34_p1, %s32_s15), 0  ;;  %p192_p3 = pnand %p1760_p0, %p191_p2 }
   0x6   : > { %s1761_s28 = sshll.u32 (!%p192_p3), %s2224_s12, 6 }
   0x7   : > { %195 = sbr.rel (%p192_p3) target bundleno = 432 (0x1b0), region = 32  ;;  %p236_p4 = scmp.lt.s32.totalorder (!%p192_p3), %s1761_s28, 127 }
   0xc   : > { %v2160_v0 = vld [vmem:[%s2611_s1 + $0x38] sm:$0xff]  ;;  %v2159_v2 = vld [vmem:[%s2611_s1 + $0x30] sm:$0xff]  ;;  %v2158_v4 = vld [vmem:[%s2611_s1 + $0x28] sm:$0xff]  ;;  %s2619_s28 = smov (!%p236_p4, %s1761_s28), 127 }
   0xd   : > { %v2168_v1 = vld [vmem:[%s2611_s1 + $0x78] sm:$0xff]  ;;  %911 = vmatpush.bf16.msra.mxu0 %v2160_v0  ;;  %2169 = vmatpush.bf16.msra.mxu2 %v2160_v0  ;;  %v2167_v3 = vld [vmem:[%s2611_s1 + $0x70] sm:$0xff]  ;;  %v2166_v5 = vld [vmem:[%s2611_s1 + $0x68] sm:$0xff]  ;;  %s2088_s17 = sshll.u32 %s2619_s28, 3 }
   0xe   : > { %1080 = vmatpush.bf16.msra.mxu1 %v2168_v1  ;;  %2177 = vmatpush.bf16.msra.mxu3 %v2168_v1  ;;  %v2157_v6 = vld [vmem:[%s2611_s1 + $0x20] sm:$0xff]  ;;  %v2156_v8 = vld [vmem:[%s2611_s1 + $0x18] sm:$0xff]  ;;  %v2155_v10 = vld [vmem:[%s2611_s1 + $0x10] sm:$0xff]  ;;  %s2322_s22 = scalar_lea.vmem %s2610_s0, %s2088_s17  ;;  %s2416_s7 = scalar_lea.vmem %s2613_s3, %s2088_s17 }
   0xf   : > { %v2165_v7 = vld [vmem:[%s2611_s1 + $0x60] sm:$0xff]  ;;  %v2164_v9 = vld [vmem:[%s2611_s1 + $0x58] sm:$0xff]  ;;  %v2163_v11 = vld [vmem:[%s2611_s1 + $0x50] sm:$0xff] }
  0x10   : > { %v2154_v12 = vld [vmem:[%s2611_s1 + $0x8] sm:$0xff]  ;;  %v2153_v14 = vld [vmem:[%s2611_s1] sm:$0xff]  ;;  %v1776_v28 = vld [vmem:[%s2322_s22 + $0x10] sm:$0xf] }
  0x11   : > { %912 = vmatpush.bf16.msra.mxu0 %v2159_v2  ;;  %2170 = vmatpush.bf16.msra.mxu2 %v2159_v2  ;;  %v2162_v13 = vld [vmem:[%s2611_s1 + $0x48] sm:$0xff]  ;;  %v2161_v15 = vld [vmem:[%s2611_s1 + $0x40] sm:$0xff]  ;;  %v2092_v29 = vld [vmem:[%s2322_s22 + $0x14] sm:$0xf0] }
  0x12   : > { %1081 = vmatpush.bf16.msra.mxu1 %v2167_v3  ;;  %2178 = vmatpush.bf16.msra.mxu3 %v2167_v3  ;;  %v1768_v16 = vld [vmem:[%s2322_s22] sm:$0xf]  ;;  %v2090_v17 = vld [vmem:[%s2322_s22 + $0x4] sm:$0xf0]  ;;  %v2089_v20 = vld [vmem:[%s2322_s22 + $0x4] sm:$0xf]  ;;  %v1777_v36 = vor.u32 %v2092_v29, %v1776_v28 }
  0x13   : > { %v1896_v18 = vld [vmem:[%s2322_s22 + $0x100] sm:$0xf]  ;;  %v2122_v19 = vld [vmem:[%s2322_s22 + $0x104] sm:$0xf0]  ;;  %v1770_v21 = vld [vmem:[%s2322_s22 + $0x8] sm:$0xf0]  ;;  %v1769_v24 = vor.u32 %v2090_v17, %v1768_v16 }
  0x14   : > { %v2121_v22 = vld [vmem:[%s2322_s22 + $0x104] sm:$0xf]  ;;  %v1898_v23 = vld [vmem:[%s2322_s22 + $0x108] sm:$0xf0]  ;;  %v1897_v25 = vor.u32 %v2122_v19, %v1896_v18  ;;  %v1773_v26 = vor.u32 %v2089_v20, %v1770_v21  ;;  %v1904_v30 = vld [vmem:[%s2322_s22 + $0x110] sm:$0xf] }
  0x15   : > { %913 = vmatpush.bf16.msra.mxu0 %v2158_v4  ;;  %2171 = vmatpush.bf16.msra.mxu2 %v2158_v4  ;;  %v1901_v27 = vor.u32 %v2121_v22, %v1898_v23  ;;  %v2124_v31 = vld [vmem:[%s2322_s22 + $0x114] sm:$0xf0]  ;;  %v2091_v32 = vld [vmem:[%s2322_s22 + $0x14] sm:$0xf]  ;;  %v1778_v33 = vld [vmem:[%s2322_s22 + $0x18] sm:$0xf0] }
  0x16   : > { %1082 = vmatpush.bf16.msra.mxu1 %v2166_v5  ;;  %2179 = vmatpush.bf16.msra.mxu3 %v2166_v5  ;;  %v2123_v34 = vld [vmem:[%s2322_s22 + $0x114] sm:$0xf]  ;;  %v1906_v35 = vld [vmem:[%s2322_s22 + $0x118] sm:$0xf0]  ;;  %v1905_v37 = vor.u32 %v2124_v31, %v1904_v30  ;;  %v1781_v38 = vor.u32 %v2091_v32, %v1778_v33  ;;  %v1784_v40 = vld [vmem:[%s2322_s22 + $0x20] sm:$0xf] }
  0x17   : > { %v1909_v39 = vor.u32 %v2123_v34, %v1906_v35  ;;  %v2094_v41 = vld [vmem:[%s2322_s22 + $0x24] sm:$0xf0]  ;;  %v1912_v42 = vld [vmem:[%s2322_s22 + $0x120] sm:$0xf]  ;;  %v2093_v44 = vld [vmem:[%s2322_s22 + $0x24] sm:$0xf] }
  0x18   : > { %v2126_v43 = vld [vmem:[%s2322_s22 + $0x124] sm:$0xf0]  ;;  %v1786_v45 = vld [vmem:[%s2322_s22 + $0x28] sm:$0xf0]  ;;  %v2125_v46 = vld [vmem:[%s2322_s22 + $0x124] sm:$0xf]  ;;  %v1785_v48 = vor.u32 %v2094_v41, %v1784_v40 }
  0x19   : > { %914 = vmatpush.bf16.msra.mxu0 %v2157_v6  ;;  %2172 = vmatpush.bf16.msra.mxu2 %v2157_v6  ;;  %v1914_v47 = vld [vmem:[%s2322_s22 + $0x128] sm:$0xf0]  ;;  %v1913_v49 = vor.u32 %v2126_v43, %v1912_v42  ;;  %v1789_v50 = vor.u32 %v2093_v44, %v1786_v45  ;;  %v1792_v52 = vld [vmem:[%s2322_s22 + $0x30] sm:$0xf]  ;;  %v2096_v53 = vld [vmem:[%s2322_s22 + $0x34] sm:$0xf0] }
  0x1a   : > { %1083 = vmatpush.bf16.msra.mxu1 %v2165_v7  ;;  %2180 = vmatpush.bf16.msra.mxu3 %v2165_v7  ;;  %v1917_v51 = vor.u32 %v2125_v46, %v1914_v47  ;;  %v1920_v54 = vld [vmem:[%s2322_s22 + $0x130] sm:$0xf]  ;;  %v2128_v55 = vld [vmem:[%s2322_s22 + $0x134] sm:$0xf0]  ;;  %v2095_v56 = vld [vmem:[%s2322_s22 + $0x34] sm:$0xf]  ;;  %v1793_v60 = vor.u32 %v2096_v53, %v1792_v52 }
  0x1b   : > { %v1794_v57 = vld [vmem:[%s2322_s22 + $0x38] sm:$0xf0]  ;;  %v2127_v58 = vld [vmem:[%s2322_s22 + $0x134] sm:$0xf]  ;;  %v1921_v61 = vor.u32 %v2128_v55, %v1920_v54  ;;  %v1800_v0 = vld [vmem:[%s2322_s22 + $0x40] sm:$0xf] }
  0x1c   : > { %v1922_v59 = vld [vmem:[%s2322_s22 + $0x138] sm:$0xf0]  ;;  %v1797_v62 = vor.u32 %v2095_v56, %v1794_v57  ;;  %v2098_v1 = vld [vmem:[%s2322_s22 + $0x44] sm:$0xf0]  ;;  %v1928_v2 = vld [vmem:[%s2322_s22 + $0x140] sm:$0xf] }
  0x1d   : > { %915 = vmatpush.bf16.msra.mxu0 %v2156_v8  ;;  %2173 = vmatpush.bf16.msra.mxu2 %v2156_v8  ;;  %v1925_v63 = vor.u32 %v2127_v58, %v1922_v59  ;;  %v2130_v3 = vld [vmem:[%s2322_s22 + $0x144] sm:$0xf0]  ;;  %v2097_v4 = vld [vmem:[%s2322_s22 + $0x44] sm:$0xf]  ;;  %v1802_v5 = vld [vmem:[%s2322_s22 + $0x48] sm:$0xf0]  ;;  %v1801_v8 = vor.u32 %v2098_v1, %v1800_v0 }
  0x1e   : > { %1084 = vmatpush.bf16.msra.mxu1 %v2164_v9  ;;  %2181 = vmatpush.bf16.msra.mxu3 %v2164_v9  ;;  %v2129_v6 = vld [vmem:[%s2322_s22 + $0x144] sm:$0xf]  ;;  %v1930_v7 = vld [vmem:[%s2322_s22 + $0x148] sm:$0xf0]  ;;  %v1929_v9 = vor.u32 %v2130_v3, %v1928_v2  ;;  %v2099_v16 = vld [vmem:[%s2322_s22 + $0x54] sm:$0xf] }
  0x1f   : > { %v1810_v17 = vld [vmem:[%s2322_s22 + $0x58] sm:$0xf0]  ;;  %v2131_v18 = vld [vmem:[%s2322_s22 + $0x154] sm:$0xf]  ;;  %v2101_v28 = vld [vmem:[%s2322_s22 + $0x64] sm:$0xf] }
  0x20   : > { %v1938_v19 = vld [vmem:[%s2322_s22 + $0x158] sm:$0xf0]  ;;  %v1813_v22 = vor.u32 %v2099_v16, %v1810_v17  ;;  %v1818_v29 = vld [vmem:[%s2322_s22 + $0x68] sm:$0xf0]  ;;  %v2133_v30 = vld [vmem:[%s2322_s22 + $0x164] sm:$0xf] }
  0x21   : > { %916 = vmatpush.bf16.msra.mxu0 %v2155_v10  ;;  %2174 = vmatpush.bf16.msra.mxu2 %v2155_v10  ;;  %v1805_v10 = vor.u32 %v2097_v4, %v1802_v5  ;;  %v1941_v23 = vor.u32 %v2131_v18, %v1938_v19  ;;  %v1946_v31 = vld [vmem:[%s2322_s22 + $0x168] sm:$0xf0]  ;;  %v1821_v34 = vor.u32 %v2101_v28, %v1818_v29  ;;  %v2103_v40 = vld [vmem:[%s2322_s22 + $0x74] sm:$0xf]  ;;  %v1826_v41 = vld [vmem:[%s2322_s22 + $0x78] sm:$0xf0] }
  0x22   : > { %1085 = vmatpush.bf16.msra.mxu1 %v2163_v11  ;;  %2182 = vmatpush.bf16.msra.mxu3 %v2163_v11  ;;  %v1933_v11 = vor.u32 %v2129_v6, %v1930_v7  ;;  %v1949_v35 = vor.u32 %v2133_v30, %v1946_v31  ;;  %v2135_v42 = vld [vmem:[%s2322_s22 + $0x174] sm:$0xf]  ;;  %v1954_v43 = vld [vmem:[%s2322_s22 + $0x178] sm:$0xf0]  ;;  %v1829_v46 = vor.u32 %v2103_v40, %v1826_v41  ;;  %v2105_v52 = vld [vmem:[%s2322_s22 + $0x84] sm:$0xf] }
  0x23   : > { %v1957_v47 = vor.u32 %v2135_v42, %v1954_v43  ;;  %v1834_v53 = vld [vmem:[%s2322_s22 + $0x88] sm:$0xf0]  ;;  %v2137_v54 = vld [vmem:[%s2322_s22 + $0x184] sm:$0xf]  ;;  %v2408_v59 = vld [vmem:[%s2612_s2] ss:$0 sm:$0xff] }
  0x24   : > { %v1962_v55 = vld [vmem:[%s2322_s22 + $0x188] sm:$0xf0]  ;;  %v1842_v16 = vld [vmem:[%s2322_s22 + $0x98] sm:$0xf0]  ;;  %v2139_v17 = vld [vmem:[%s2322_s22 + $0x194] sm:$0xf] }
  0x25   : > { %917 = vmatpush.bf16.msra.mxu0 %v2154_v12  ;;  %2175 = vmatpush.bf16.msra.mxu2 %v2154_v12  ;;  %v1808_v12 = vld [vmem:[%s2322_s22 + $0x50] sm:$0xf]  ;;  %v1970_v18 = vld [vmem:[%s2322_s22 + $0x198] sm:$0xf0]  ;;  %v1848_v41 = vld [vmem:[%s2322_s22 + $0xa0] sm:$0xf] }
  0x26   : > { %1086 = vmatpush.bf16.msra.mxu1 %v2162_v13  ;;  %2183 = vmatpush.bf16.msra.mxu3 %v2162_v13  ;;  %v2100_v13 = vld [vmem:[%s2322_s22 + $0x54] sm:$0xf0]  ;;  %v2110_v42 = vld [vmem:[%s2322_s22 + $0xa4] sm:$0xf0]  ;;  %v1976_v43 = vld [vmem:[%s2322_s22 + $0x1a0] sm:$0xf] }
  0x27   : > { %v1809_v20 = vor.u32 %v2100_v13, %v1808_v12 }
  0x29   : > { %918 = vmatpush.bf16.msra.mxu0 %v2153_v14  ;;  %2176 = vmatpush.bf16.msra.mxu2 %v2153_v14  ;;  %v1936_v14 = vld [vmem:[%s2322_s22 + $0x150] sm:$0xf] }
  0x2a   : > { %1087 = vmatpush.bf16.msra.mxu1 %v2161_v15  ;;  %2184 = vmatpush.bf16.msra.mxu3 %v2161_v15  ;;  %v2132_v15 = vld [vmem:[%s2322_s22 + $0x154] sm:$0xf0] }
  0x2b   : > { %v1937_v21 = vor.u32 %v2132_v15, %v1936_v14  ;;  %v2140_v14 = vld [vmem:[%s2322_s22 + $0x194] sm:$0xf0]  ;;  %v2107_v15 = vld [vmem:[%s2322_s22 + $0x94] sm:$0xf] }
  0x2c   : > { %919 = vmatmul.bf16.vlgmr.msra.gmra.mxu0 %v1769_v24  ;;  %999 = vmatmul.bf16.vlgmr.msra.gmra.mxu2 %v1897_v25  ;;  %v1816_v24 = vld [vmem:[%s2322_s22 + $0x60] sm:$0xf]  ;;  %v2102_v25 = vld [vmem:[%s2322_s22 + $0x64] sm:$0xf0] }
  0x2d   : > { %1088 = vmatmul.bf16.vlgmr.msra.gmra.mxu1 %v1773_v26  ;;  %1168 = vmatmul.bf16.vlgmr.msra.gmra.mxu3 %v1901_v27  ;;  %v1944_v26 = vld [vmem:[%s2322_s22 + $0x160] sm:$0xf]  ;;  %v2134_v27 = vld [vmem:[%s2322_s22 + $0x164] sm:$0xf0]  ;;  %v1817_v32 = vor.u32 %v2102_v25, %v1816_v24 }
  0x2e   : > { %v1945_v33 = vor.u32 %v2134_v27, %v1944_v26  ;;  %v1845_v26 = vor.u32 %v2107_v15, %v1842_v16  ;;  %v1973_v27 = vor.u32 %v2139_v17, %v1970_v18  ;;  %v2144_v15 = vld [vmem:[%s2322_s22 + $0x1b4] sm:$0xf0]  ;;  %v2111_v16 = vld [vmem:[%s2322_s22 + $0xb4] sm:$0xf]  ;;  %v1858_v17 = vld [vmem:[%s2322_s22 + $0xb8] sm:$0xf0] }
  0x2f   : > { %v2143_v18 = vld [vmem:[%s2322_s22 + $0x1b4] sm:$0xf] }
  0x3c   : > { %924 = vmatmul.bf16.gmra.mxu0 %v1777_v36  ;;  %1004 = vmatmul.bf16.gmra.mxu2 %v1905_v37  ;;  %v1824_v36 = vld [vmem:[%s2322_s22 + $0x70] sm:$0xf]  ;;  %v2104_v37 = vld [vmem:[%s2322_s22 + $0x74] sm:$0xf0] }
  0x3d   : > { %1093 = vmatmul.bf16.gmra.mxu1 %v1781_v38  ;;  %1173 = vmatmul.bf16.gmra.mxu3 %v1909_v39  ;;  %v1952_v38 = vld [vmem:[%s2322_s22 + $0x170] sm:$0xf]  ;;  %v2136_v39 = vld [vmem:[%s2322_s22 + $0x174] sm:$0xf0]  ;;  %v1825_v44 = vor.u32 %v2104_v37, %v1824_v36 }
  0x3e   : > { %v1953_v45 = vor.u32 %v2136_v39, %v1952_v38 }
  0x4c   : > { %929 = vmatmul.bf16.gmra.mxu0 %v1785_v48  ;;  %1009 = vmatmul.bf16.gmra.mxu2 %v1913_v49  ;;  %v1832_v48 = vld [vmem:[%s2322_s22 + $0x80] sm:$0xf]  ;;  %v2106_v49 = vld [vmem:[%s2322_s22 + $0x84] sm:$0xf0] }
  0x4d   : > { %1098 = vmatmul.bf16.gmra.mxu1 %v1789_v50  ;;  %1178 = vmatmul.bf16.gmra.mxu3 %v1917_v51  ;;  %v1960_v50 = vld [vmem:[%s2322_s22 + $0x180] sm:$0xf]  ;;  %v2138_v51 = vld [vmem:[%s2322_s22 + $0x184] sm:$0xf0]  ;;  %v1833_v56 = vor.u32 %v2106_v49, %v1832_v48  ;;  %v1850_v48 = vld [vmem:[%s2322_s22 + $0xa8] sm:$0xf0] }
  0x4e   : > { %v1961_v57 = vor.u32 %v2138_v51, %v1960_v50  ;;  %v2141_v49 = vld [vmem:[%s2322_s22 + $0x1a4] sm:$0xf]  ;;  %v1978_v50 = vld [vmem:[%s2322_s22 + $0x1a8] sm:$0xf0] }
  0x5c   : > { %934 = vmatmul.bf16.gmra.mxu0 %v1793_v60  ;;  %1014 = vmatmul.bf16.gmra.mxu2 %v1921_v61  ;;  %v1837_v60 = vor.u32 %v2105_v52, %v1834_v53  ;;  %v1965_v61 = vor.u32 %v2137_v54, %v1962_v55  ;;  %v1849_v54 = vor.u32 %v2110_v42, %v1848_v41  ;;  %v1864_v42 = vld [vmem:[%s2322_s22 + $0xc0] sm:$0xf] }
  0x5d   : > { %1103 = vmatmul.bf16.gmra.mxu1 %v1797_v62  ;;  %1183 = vmatmul.bf16.gmra.mxu3 %v1925_v63 }
  0x6c   : > { %939 = vmatmul.bf16.gmra.mxu0 %v1801_v8  ;;  %1019 = vmatmul.bf16.gmra.mxu2 %v1929_v9  ;;  %v1840_v9 = vld [vmem:[%s2322_s22 + $0x90] sm:$0xf] }
  0x6d   : > { %1108 = vmatmul.bf16.gmra.mxu1 %v1805_v10  ;;  %1188 = vmatmul.bf16.gmra.mxu3 %v1933_v11  ;;  %v2108_v10 = vld [vmem:[%s2322_s22 + $0x94] sm:$0xf0]  ;;  %v1968_v11 = vld [vmem:[%s2322_s22 + $0x190] sm:$0xf] }
  0x7c   : > { %944 = vmatmul.bf16.gmra.mxu0 %v1809_v20  ;;  %1024 = vmatmul.bf16.gmra.mxu2 %v1937_v21 }
  0x7d   : > { %1113 = vmatmul.bf16.gmra.mxu1 %v1813_v22  ;;  %1193 = vmatmul.bf16.gmra.mxu3 %v1941_v23  ;;  %v1841_v22 = vor.u32 %v2108_v10, %v1840_v9  ;;  %v1969_v23 = vor.u32 %v2140_v14, %v1968_v11  ;;  %v1856_v10 = vld [vmem:[%s2322_s22 + $0xb0] sm:$0xf]  ;;  %v2112_v11 = vld [vmem:[%s2322_s22 + $0xb4] sm:$0xf0] }
  0x8c   : > { %949 = vmatmul.bf16.gmra.mxu0 %v1817_v32  ;;  %1029 = vmatmul.bf16.gmra.mxu2 %v1945_v33 }
  0x8d   : > { %1118 = vmatmul.bf16.gmra.mxu1 %v1821_v34  ;;  %1198 = vmatmul.bf16.gmra.mxu3 %v1949_v35 }
  0x9c   : > { %954 = vmatmul.bf16.gmra.mxu0 %v1825_v44  ;;  %1034 = vmatmul.bf16.gmra.mxu2 %v1953_v45 }
  0x9d   : > { %1123 = vmatmul.bf16.gmra.mxu1 %v1829_v46  ;;  %1203 = vmatmul.bf16.gmra.mxu3 %v1957_v47  ;;  %v2142_v46 = vld [vmem:[%s2322_s22 + $0x1a4] sm:$0xf0]  ;;  %v2109_v47 = vld [vmem:[%s2322_s22 + $0xa4] sm:$0xf] }
  0x9e   : > { %v1977_v55 = vor.u32 %v2142_v46, %v1976_v43  ;;  %v2114_v43 = vld [vmem:[%s2322_s22 + $0xc4] sm:$0xf0] }
  0xa9   : > { %v920_v58 = vpop.f32.mrf.mxu0 }
  0xaa   : > { %v1089_v62 = vpop.f32.mrf.mxu1 }
  0xab   : > { %v1090_v63 = vadd.f32 %v1089_v62, %v920_v58  ;;  %v1853_v58 = vor.u32 %v2109_v47, %v1850_v48  ;;  %v2146_v47 = vld [vmem:[%s2322_s22 + $0x1c4] sm:$0xf0]  ;;  %v2113_v48 = vld [vmem:[%s2322_s22 + $0xc4] sm:$0xf] }
  0xac   : > { %959 = vmatmul.bf16.gmra.mxu0 %v1833_v56  ;;  %1039 = vmatmul.bf16.gmra.mxu2 %v1961_v57 }
  0xad   : > { %v1448_v0 = vadd.f32 %v2408_v59, %v1090_v63  ;;  %1128 = vmatmul.bf16.gmra.mxu1 %v1837_v60  ;;  %1208 = vmatmul.bf16.gmra.mxu3 %v1965_v61  ;;  %v1981_v60 = vor.u32 %v2141_v49, %v1978_v50  ;;  %v1866_v49 = vld [vmem:[%s2322_s22 + $0xc8] sm:$0xf0]  ;;  %v2145_v50 = vld [vmem:[%s2322_s22 + $0x1c4] sm:$0xf] }
  0xaf   : > { %v1512_v1 = vmax.f32 %v1448_v0, 0.0  ;;  %v1000_v2 = vpop.f32.mrf.mxu2 }
  0xb0   : > { %v1169_v3 = vpop.f32.mrf.mxu3 }
  0xb1   : > { %1576 = vst [vmem:[%s2416_s7] sm:$0xff] %v1512_v1  ;;  %v1170_v4 = vadd.f32 %v1169_v3, %v1000_v2  ;;  %v922_v5 = vpop.f32.mrf.mxu0 }
  0xb2   : > { %v1091_v6 = vpop.f32.mrf.mxu1 }
  0xb3   : > { %v1480_v7 = vadd.f32 %v2408_v59, %v1170_v4  ;;  %v1092_v8 = vadd.f32 %v1091_v6, %v922_v5 }
  0xb5   : > { %v1544_v12 = vmax.f32 %v1480_v7, 0.0  ;;  %v1449_v13 = vadd.f32 %v2408_v59, %v1092_v8 }
  0xb7   : > { %1608 = vst [vmem:[%s2416_s7 + $0x100] sm:$0xff] %v1544_v12  ;;  %v1513_v19 = vmax.f32 %v1449_v13, 0.0  ;;  %v1002_v20 = vpop.f32.mrf.mxu2  ;;  %v1984_v12 = vld [vmem:[%s2322_s22 + $0x1b0] sm:$0xf] }
  0xb8   : > { %v1171_v21 = vpop.f32.mrf.mxu3 }
  0xb9   : > { %1577 = vst [vmem:[%s2416_s7 + $0x8] sm:$0xff] %v1513_v19  ;;  %v1172_v24 = vadd.f32 %v1171_v21, %v1002_v20  ;;  %v925_v25 = vpop.f32.mrf.mxu0  ;;  %v1986_v19 = vld [vmem:[%s2322_s22 + $0x1b8] sm:$0xf0] }
  0xba   : > { %v1094_v28 = vpop.f32.mrf.mxu1 }
  0xbb   : > { %v1481_v29 = vadd.f32 %v2408_v59, %v1172_v24  ;;  %v1095_v30 = vadd.f32 %v1094_v28, %v925_v25  ;;  %v1985_v24 = vor.u32 %v2144_v15, %v1984_v12  ;;  %v1989_v28 = vor.u32 %v2143_v18, %v1986_v19  ;;  %v2116_v12 = vld [vmem:[%s2322_s22 + $0xd4] sm:$0xf0]  ;;  %v1874_v18 = vld [vmem:[%s2322_s22 + $0xd8] sm:$0xf0]  ;;  %v2147_v19 = vld [vmem:[%s2322_s22 + $0x1d4] sm:$0xf] }
  0xbc   : > { %964 = vmatmul.bf16.gmra.mxu0 %v1841_v22  ;;  %1044 = vmatmul.bf16.gmra.mxu2 %v1969_v23  ;;  %v1857_v23 = vor.u32 %v2112_v11, %v1856_v10  ;;  %v1872_v11 = vld [vmem:[%s2322_s22 + $0xd0] sm:$0xf] }
  0xbd   : > { %v1545_v31 = vmax.f32 %v1481_v29, 0.0  ;;  %v1450_v32 = vadd.f32 %v2408_v59, %v1095_v30  ;;  %1133 = vmatmul.bf16.gmra.mxu1 %v1845_v26  ;;  %1213 = vmatmul.bf16.gmra.mxu3 %v1973_v27  ;;  %v1861_v27 = vor.u32 %v2111_v16, %v1858_v17  ;;  %v2148_v16 = vld [vmem:[%s2322_s22 + $0x1d4] sm:$0xf0]  ;;  %v2115_v17 = vld [vmem:[%s2322_s22 + $0xd4] sm:$0xf] }
  0xbf   : > { %1609 = vst [vmem:[%s2416_s7 + $0x108] sm:$0xff] %v1545_v31  ;;  %v1514_v33 = vmax.f32 %v1450_v32, 0.0  ;;  %v1005_v34 = vpop.f32.mrf.mxu2 }
  0xc0   : > { %v1174_v35 = vpop.f32.mrf.mxu3 }
  0xc1   : > { %1578 = vst [vmem:[%s2416_s7 + $0x10] sm:$0xff] %v1514_v33  ;;  %v1175_v36 = vadd.f32 %v1174_v35, %v1005_v34  ;;  %v927_v37 = vpop.f32.mrf.mxu0 }
  0xc2   : > { %v1096_v38 = vpop.f32.mrf.mxu1 }
  0xc3   : > { %v1482_v39 = vadd.f32 %v2408_v59, %v1175_v36  ;;  %v1097_v40 = vadd.f32 %v1096_v38, %v927_v37 }
  0xc5   : > { %v1546_v44 = vmax.f32 %v1482_v39, 0.0  ;;  %v1451_v45 = vadd.f32 %v2408_v59, %v1097_v40 }
  0xc7   : > { %1610 = vst [vmem:[%s2416_s7 + $0x110] sm:$0xff] %v1546_v44  ;;  %v1515_v51 = vmax.f32 %v1451_v45, 0.0  ;;  %v1007_v52 = vpop.f32.mrf.mxu2  ;;  %v1992_v44 = vld [vmem:[%s2322_s22 + $0x1c0] sm:$0xf] }
  0xc8   : > { %v1176_v53 = vpop.f32.mrf.mxu3 }
  0xc9   : > { %1579 = vst [vmem:[%s2416_s7 + $0x18] sm:$0xff] %v1515_v51  ;;  %v1177_v56 = vadd.f32 %v1176_v53, %v1007_v52  ;;  %v930_v57 = vpop.f32.mrf.mxu0  ;;  %v1994_v51 = vld [vmem:[%s2322_s22 + $0x1c8] sm:$0xf0] }
  0xca   : > { %v1099_v61 = vpop.f32.mrf.mxu1 }
  0xcb   : > { %v1483_v62 = vadd.f32 %v2408_v59, %v1177_v56  ;;  %v1100_v63 = vadd.f32 %v1099_v61, %v930_v57  ;;  %v1993_v56 = vor.u32 %v2146_v47, %v1992_v44  ;;  %v1997_v61 = vor.u32 %v2145_v50, %v1994_v51  ;;  %v2118_v44 = vld [vmem:[%s2322_s22 + $0xe4] sm:$0xf0]  ;;  %v1882_v50 = vld [vmem:[%s2322_s22 + $0xe8] sm:$0xf0]  ;;  %v2149_v51 = vld [vmem:[%s2322_s22 + $0x1e4] sm:$0xf] }
  0xcc   : > { %969 = vmatmul.bf16.gmra.mxu0 %v1849_v54  ;;  %1049 = vmatmul.bf16.gmra.mxu2 %v1977_v55  ;;  %v1865_v55 = vor.u32 %v2114_v43, %v1864_v42  ;;  %v1880_v43 = vld [vmem:[%s2322_s22 + $0xe0] sm:$0xf] }
  0xcd   : > { %v1547_v0 = vmax.f32 %v1483_v62, 0.0  ;;  %v1452_v1 = vadd.f32 %v2408_v59, %v1100_v63  ;;  %1138 = vmatmul.bf16.gmra.mxu1 %v1853_v58  ;;  %1218 = vmatmul.bf16.gmra.mxu3 %v1981_v60  ;;  %v1869_v60 = vor.u32 %v2113_v48, %v1866_v49  ;;  %v2150_v48 = vld [vmem:[%s2322_s22 + $0x1e4] sm:$0xf0]  ;;  %v2117_v49 = vld [vmem:[%s2322_s22 + $0xe4] sm:$0xf] }
  0xcf   : > { %1611 = vst [vmem:[%s2416_s7 + $0x118] sm:$0xff] %v1547_v0  ;;  %v1516_v2 = vmax.f32 %v1452_v1, 0.0  ;;  %v1010_v3 = vpop.f32.mrf.mxu2 }
  0xd0   : > { %v1179_v4 = vpop.f32.mrf.mxu3 }
  0xd1   : > { %1580 = vst [vmem:[%s2416_s7 + $0x20] sm:$0xff] %v1516_v2  ;;  %v1180_v5 = vadd.f32 %v1179_v4, %v1010_v3  ;;  %v932_v6 = vpop.f32.mrf.mxu0 }
  0xd2   : > { %v1101_v7 = vpop.f32.mrf.mxu1 }
  0xd3   : > { %v1484_v8 = vadd.f32 %v2408_v59, %v1180_v5  ;;  %v1102_v9 = vadd.f32 %v1101_v7, %v932_v6 }
  0xd5   : > { %v1548_v13 = vmax.f32 %v1484_v8, 0.0  ;;  %v1453_v14 = vadd.f32 %v2408_v59, %v1102_v9 }
  0xd7   : > { %1612 = vst [vmem:[%s2416_s7 + $0x120] sm:$0xff] %v1548_v13  ;;  %v1517_v20 = vmax.f32 %v1453_v14, 0.0  ;;  %v1012_v21 = vpop.f32.mrf.mxu2  ;;  %v2000_v13 = vld [vmem:[%s2322_s22 + $0x1d0] sm:$0xf] }
  0xd8   : > { %v1181_v22 = vpop.f32.mrf.mxu3 }
  0xd9   : > { %1581 = vst [vmem:[%s2416_s7 + $0x28] sm:$0xff] %v1517_v20  ;;  %v1182_v25 = vadd.f32 %v1181_v22, %v1012_v21  ;;  %v935_v26 = vpop.f32.mrf.mxu0  ;;  %v2002_v20 = vld [vmem:[%s2322_s22 + $0x1d8] sm:$0xf0] }
  0xda   : > { %v1104_v29 = vpop.f32.mrf.mxu1 }
  0xdb   : > { %v1485_v30 = vadd.f32 %v2408_v59, %v1182_v25  ;;  %v1105_v31 = vadd.f32 %v1104_v29, %v935_v26  ;;  %v2001_v25 = vor.u32 %v2148_v16, %v2000_v13  ;;  %v2005_v29 = vor.u32 %v2147_v19, %v2002_v20  ;;  %v2120_v13 = vld [vmem:[%s2322_s22 + $0xf4] sm:$0xf0]  ;;  %v1890_v19 = vld [vmem:[%s2322_s22 + $0xf8] sm:$0xf0]  ;;  %v2151_v20 = vld [vmem:[%s2322_s22 + $0x1f4] sm:$0xf] }
  0xdc   : > { %974 = vmatmul.bf16.gmra.mxu0 %v1857_v23  ;;  %1054 = vmatmul.bf16.gmra.mxu2 %v1985_v24  ;;  %v1873_v24 = vor.u32 %v2116_v12, %v1872_v11  ;;  %v1888_v12 = vld [vmem:[%s2322_s22 + $0xf0] sm:$0xf] }
  0xdd   : > { %v1549_v32 = vmax.f32 %v1485_v30, 0.0  ;;  %v1454_v33 = vadd.f32 %v2408_v59, %v1105_v31  ;;  %1143 = vmatmul.bf16.gmra.mxu1 %v1861_v27  ;;  %1223 = vmatmul.bf16.gmra.mxu3 %v1989_v28  ;;  %v1877_v28 = vor.u32 %v2115_v17, %v1874_v18  ;;  %v2152_v17 = vld [vmem:[%s2322_s22 + $0x1f4] sm:$0xf0]  ;;  %v2119_v18 = vld [vmem:[%s2322_s22 + $0xf4] sm:$0xf] }
  0xdf   : > { %1613 = vst [vmem:[%s2416_s7 + $0x128] sm:$0xff] %v1549_v32  ;;  %v1518_v34 = vmax.f32 %v1454_v33, 0.0  ;;  %v1015_v35 = vpop.f32.mrf.mxu2 }
  0xe0   : > { %v1184_v36 = vpop.f32.mrf.mxu3 }
  0xe1   : > { %1582 = vst [vmem:[%s2416_s7 + $0x30] sm:$0xff] %v1518_v34  ;;  %v1185_v37 = vadd.f32 %v1184_v36, %v1015_v35  ;;  %v937_v38 = vpop.f32.mrf.mxu0 }
  0xe2   : > { %v1106_v39 = vpop.f32.mrf.mxu1 }
  0xe3   : > { %v1486_v40 = vadd.f32 %v2408_v59, %v1185_v37  ;;  %v1107_v41 = vadd.f32 %v1106_v39, %v937_v38 }
  0xe5   : > { %v1550_v45 = vmax.f32 %v1486_v40, 0.0  ;;  %v1455_v46 = vadd.f32 %v2408_v59, %v1107_v41 }
  0xe7   : > { %1614 = vst [vmem:[%s2416_s7 + $0x130] sm:$0xff] %v1550_v45  ;;  %v1519_v52 = vmax.f32 %v1455_v46, 0.0  ;;  %v1017_v53 = vpop.f32.mrf.mxu2  ;;  %v2008_v45 = vld [vmem:[%s2322_s22 + $0x1e0] sm:$0xf] }
  0xe8   : > { %v1186_v54 = vpop.f32.mrf.mxu3 }
  0xe9   : > { %1583 = vst [vmem:[%s2416_s7 + $0x38] sm:$0xff] %v1519_v52  ;;  %v1187_v57 = vadd.f32 %v1186_v54, %v1017_v53  ;;  %v940_v58 = vpop.f32.mrf.mxu0  ;;  %v2010_v52 = vld [vmem:[%s2322_s22 + $0x1e8] sm:$0xf0] }
  0xea   : > { %v1109_v62 = vpop.f32.mrf.mxu1 }
  0xeb   : > { %v1487_v63 = vadd.f32 %v2408_v59, %v1187_v57  ;;  %v1110_v0 = vadd.f32 %v1109_v62, %v940_v58  ;;  %v2009_v57 = vor.u32 %v2150_v48, %v2008_v45  ;;  %v2013_v62 = vor.u32 %v2149_v51, %v2010_v52 }
  0xec   : > { %979 = vmatmul.bf16.gmra.mxu0 %v1865_v55  ;;  %1059 = vmatmul.bf16.gmra.mxu2 %v1993_v56  ;;  %v1881_v56 = vor.u32 %v2118_v44, %v1880_v43 }
  0xed   : > { %v1551_v1 = vmax.f32 %v1487_v63, 0.0  ;;  %v1456_v2 = vadd.f32 %v2408_v59, %v1110_v0  ;;  %1148 = vmatmul.bf16.gmra.mxu1 %v1869_v60  ;;  %1228 = vmatmul.bf16.gmra.mxu3 %v1997_v61  ;;  %v1885_v61 = vor.u32 %v2117_v49, %v1882_v50 }
  0xef   : > { %1615 = vst [vmem:[%s2416_s7 + $0x138] sm:$0xff] %v1551_v1  ;;  %v1520_v3 = vmax.f32 %v1456_v2, 0.0  ;;  %v1020_v4 = vpop.f32.mrf.mxu2 }
  0xf0   : > { %v1189_v5 = vpop.f32.mrf.mxu3 }
  0xf1   : > { %1584 = vst [vmem:[%s2416_s7 + $0x40] sm:$0xff] %v1520_v3  ;;  %v1190_v6 = vadd.f32 %v1189_v5, %v1020_v4  ;;  %v942_v7 = vpop.f32.mrf.mxu0 }
  0xf2   : > { %v1111_v8 = vpop.f32.mrf.mxu1 }
  0xf3   : > { %v1488_v9 = vadd.f32 %v2408_v59, %v1190_v6  ;;  %v1112_v10 = vadd.f32 %v1111_v8, %v942_v7 }
  0xf5   : > { %v1552_v14 = vmax.f32 %v1488_v9, 0.0  ;;  %v1457_v15 = vadd.f32 %v2408_v59, %v1112_v10 }
  0xf7   : > { %1616 = vst [vmem:[%s2416_s7 + $0x140] sm:$0xff] %v1552_v14  ;;  %v1521_v21 = vmax.f32 %v1457_v15, 0.0  ;;  %v1022_v22 = vpop.f32.mrf.mxu2  ;;  %v2016_v14 = vld [vmem:[%s2322_s22 + $0x1f0] sm:$0xf] }
  0xf8   : > { %v1191_v23 = vpop.f32.mrf.mxu3 }
  0xf9   : > { %1585 = vst [vmem:[%s2416_s7 + $0x48] sm:$0xff] %v1521_v21  ;;  %v1192_v26 = vadd.f32 %v1191_v23, %v1022_v22  ;;  %v945_v27 = vpop.f32.mrf.mxu0  ;;  %v2018_v21 = vld [vmem:[%s2322_s22 + $0x1f8] sm:$0xf0] }
  0xfa   : > { %v1114_v30 = vpop.f32.mrf.mxu1 }
  0xfb   : > { %v1489_v31 = vadd.f32 %v2408_v59, %v1192_v26  ;;  %v1115_v32 = vadd.f32 %v1114_v30, %v945_v27  ;;  %v2017_v26 = vor.u32 %v2152_v17, %v2016_v14  ;;  %v2021_v30 = vor.u32 %v2151_v20, %v2018_v21 }
  0xfc   : > { %984 = vmatmul.bf16.gmra.mxu0 %v1873_v24  ;;  %1064 = vmatmul.bf16.gmra.mxu2 %v2001_v25  ;;  %v1889_v25 = vor.u32 %v2120_v13, %v1888_v12 }
  0xfd   : > { %v1553_v33 = vmax.f32 %v1489_v31, 0.0  ;;  %v1458_v34 = vadd.f32 %v2408_v59, %v1115_v32  ;;  %1153 = vmatmul.bf16.gmra.mxu1 %v1877_v28  ;;  %1233 = vmatmul.bf16.gmra.mxu3 %v2005_v29  ;;  %v1893_v29 = vor.u32 %v2119_v18, %v1890_v19 }
  0xff   : > { %1617 = vst [vmem:[%s2416_s7 + $0x148] sm:$0xff] %v1553_v33  ;;  %v1522_v35 = vmax.f32 %v1458_v34, 0.0  ;;  %v1025_v36 = vpop.f32.mrf.mxu2 }
 0x100   : > { %v1194_v37 = vpop.f32.mrf.mxu3 }
 0x101   : > { %1586 = vst [vmem:[%s2416_s7 + $0x50] sm:$0xff] %v1522_v35  ;;  %v1195_v38 = vadd.f32 %v1194_v37, %v1025_v36  ;;  %v947_v39 = vpop.f32.mrf.mxu0 }
 0x102   : > { %v1116_v40 = vpop.f32.mrf.mxu1 }
 0x103   : > { %v1490_v41 = vadd.f32 %v2408_v59, %v1195_v38  ;;  %v1117_v42 = vadd.f32 %v1116_v40, %v947_v39 }
 0x105   : > { %v1554_v46 = vmax.f32 %v1490_v41, 0.0  ;;  %v1459_v47 = vadd.f32 %v2408_v59, %v1117_v42 }
 0x107   : > { %1618 = vst [vmem:[%s2416_s7 + $0x150] sm:$0xff] %v1554_v46  ;;  %v1523_v53 = vmax.f32 %v1459_v47, 0.0  ;;  %v1027_v54 = vpop.f32.mrf.mxu2 }
 0x108   : > { %v1196_v55 = vpop.f32.mrf.mxu3 }
 0x109   : > { %1587 = vst [vmem:[%s2416_s7 + $0x58] sm:$0xff] %v1523_v53  ;;  %v1197_v58 = vadd.f32 %v1196_v55, %v1027_v54  ;;  %v950_v60 = vpop.f32.mrf.mxu0 }
 0x10a   : > { %v1119_v63 = vpop.f32.mrf.mxu1 }
 0x10b   : > { %v1491_v0 = vadd.f32 %v2408_v59, %v1197_v58  ;;  %v1120_v1 = vadd.f32 %v1119_v63, %v950_v60 }
 0x10c   : > { %989 = vmatmul.bf16.gmra.mxu0 %v1881_v56  ;;  %1069 = vmatmul.bf16.gmra.mxu2 %v2009_v57 }
 0x10d   : > { %v1555_v2 = vmax.f32 %v1491_v0, 0.0  ;;  %v1460_v3 = vadd.f32 %v2408_v59, %v1120_v1  ;;  %1158 = vmatmul.bf16.gmra.mxu1 %v1885_v61  ;;  %1238 = vmatmul.bf16.gmra.mxu3 %v2013_v62 }
 0x10f   : > { %1619 = vst [vmem:[%s2416_s7 + $0x158] sm:$0xff] %v1555_v2  ;;  %v1524_v4 = vmax.f32 %v1460_v3, 0.0  ;;  %v1030_v5 = vpop.f32.mrf.mxu2 }
 0x110   : > { %v1199_v6 = vpop.f32.mrf.mxu3 }
 0x111   : > { %1588 = vst [vmem:[%s2416_s7 + $0x60] sm:$0xff] %v1524_v4  ;;  %v1200_v7 = vadd.f32 %v1199_v6, %v1030_v5  ;;  %v952_v8 = vpop.f32.mrf.mxu0 }
 0x112   : > { %v1121_v9 = vpop.f32.mrf.mxu1 }
 0x113   : > { %v1492_v10 = vadd.f32 %v2408_v59, %v1200_v7  ;;  %v1122_v11 = vadd.f32 %v1121_v9, %v952_v8 }
 0x115   : > { %v1556_v15 = vmax.f32 %v1492_v10, 0.0  ;;  %v1461_v16 = vadd.f32 %v2408_v59, %v1122_v11 }
 0x117   : > { %1620 = vst [vmem:[%s2416_s7 + $0x160] sm:$0xff] %v1556_v15  ;;  %v1525_v22 = vmax.f32 %v1461_v16, 0.0  ;;  %v1032_v23 = vpop.f32.mrf.mxu2 }
 0x118   : > { %v1201_v24 = vpop.f32.mrf.mxu3 }
 0x119   : > { %1589 = vst [vmem:[%s2416_s7 + $0x68] sm:$0xff] %v1525_v22  ;;  %v1202_v27 = vadd.f32 %v1201_v24, %v1032_v23  ;;  %v955_v28 = vpop.f32.mrf.mxu0 }
 0x11a   : > { %v1124_v31 = vpop.f32.mrf.mxu1 }
 0x11b   : > { %v1493_v32 = vadd.f32 %v2408_v59, %v1202_v27  ;;  %v1125_v33 = vadd.f32 %v1124_v31, %v955_v28 }
 0x11c   : > { %994 = vmatmul.bf16.gmra.mxu0 %v1889_v25  ;;  %1074 = vmatmul.bf16.gmra.mxu2 %v2017_v26 }
 0x11d   : > { %v1557_v34 = vmax.f32 %v1493_v32, 0.0  ;;  %v1462_v35 = vadd.f32 %v2408_v59, %v1125_v33  ;;  %1163 = vmatmul.bf16.gmra.mxu1 %v1893_v29  ;;  %1243 = vmatmul.bf16.gmra.mxu3 %v2021_v30 }
 0x11f   : > { %1621 = vst [vmem:[%s2416_s7 + $0x168] sm:$0xff] %v1557_v34  ;;  %v1526_v36 = vmax.f32 %v1462_v35, 0.0  ;;  %v1035_v37 = vpop.f32.mrf.mxu2 }
 0x120   : > { %v1204_v38 = vpop.f32.mrf.mxu3 }
 0x121   : > { %1590 = vst [vmem:[%s2416_s7 + $0x70] sm:$0xff] %v1526_v36  ;;  %v1205_v39 = vadd.f32 %v1204_v38, %v1035_v37  ;;  %v957_v40 = vpop.f32.mrf.mxu0 }
 0x122   : > { %v1126_v41 = vpop.f32.mrf.mxu1 }
 0x123   : > { %v1494_v42 = vadd.f32 %v2408_v59, %v1205_v39  ;;  %v1127_v43 = vadd.f32 %v1126_v41, %v957_v40 }
 0x125   : > { %v1558_v44 = vmax.f32 %v1494_v42, 0.0  ;;  %v1463_v45 = vadd.f32 %v2408_v59, %v1127_v43 }
 0x127   : > { %1622 = vst [vmem:[%s2416_s7 + $0x170] sm:$0xff] %v1558_v44  ;;  %v1527_v46 = vmax.f32 %v1463_v45, 0.0  ;;  %v1037_v47 = vpop.f32.mrf.mxu2 }
 0x128   : > { %v1206_v48 = vpop.f32.mrf.mxu3 }
 0x129   : > { %1591 = vst [vmem:[%s2416_s7 + $0x78] sm:$0xff] %v1527_v46  ;;  %v1207_v49 = vadd.f32 %v1206_v48, %v1037_v47  ;;  %v960_v50 = vpop.f32.mrf.mxu0 }
 0x12a   : > { %v1129_v51 = vpop.f32.mrf.mxu1 }
 0x12b   : > { %v1495_v52 = vadd.f32 %v2408_v59, %v1207_v49  ;;  %v1130_v53 = vadd.f32 %v1129_v51, %v960_v50 }
 0x12d   : > { %v1559_v54 = vmax.f32 %v1495_v52, 0.0  ;;  %v1464_v55 = vadd.f32 %v2408_v59, %v1130_v53 }
 0x12f   : > { %1623 = vst [vmem:[%s2416_s7 + $0x178] sm:$0xff] %v1559_v54  ;;  %v1528_v56 = vmax.f32 %v1464_v55, 0.0  ;;  %v1040_v57 = vpop.f32.mrf.mxu2 }
 0x130   : > { %v1209_v58 = vpop.f32.mrf.mxu3 }
 0x131   : > { %1592 = vst [vmem:[%s2416_s7 + $0x80] sm:$0xff] %v1528_v56  ;;  %v1210_v60 = vadd.f32 %v1209_v58, %v1040_v57  ;;  %v962_v61 = vpop.f32.mrf.mxu0 }
 0x132   : > { %v1131_v62 = vpop.f32.mrf.mxu1 }
 0x133   : > { %v1496_v63 = vadd.f32 %v2408_v59, %v1210_v60  ;;  %v1132_v0 = vadd.f32 %v1131_v62, %v962_v61 }
 0x135   : > { %v1560_v1 = vmax.f32 %v1496_v63, 0.0  ;;  %v1465_v2 = vadd.f32 %v2408_v59, %v1132_v0 }
 0x137   : > { %1624 = vst [vmem:[%s2416_s7 + $0x180] sm:$0xff] %v1560_v1  ;;  %v1529_v3 = vmax.f32 %v1465_v2, 0.0  ;;  %v1042_v4 = vpop.f32.mrf.mxu2 }
 0x138   : > { %v1211_v5 = vpop.f32.mrf.mxu3 }
 0x139   : > { %1593 = vst [vmem:[%s2416_s7 + $0x88] sm:$0xff] %v1529_v3  ;;  %v1212_v6 = vadd.f32 %v1211_v5, %v1042_v4  ;;  %v965_v7 = vpop.f32.mrf.mxu0 }
 0x13a   : > { %v1134_v8 = vpop.f32.mrf.mxu1 }
 0x13b   : > { %v1497_v9 = vadd.f32 %v2408_v59, %v1212_v6  ;;  %v1135_v10 = vadd.f32 %v1134_v8, %v965_v7 }
 0x13d   : > { %v1561_v11 = vmax.f32 %v1497_v9, 0.0  ;;  %v1466_v12 = vadd.f32 %v2408_v59, %v1135_v10 }
 0x13f   : > { %1625 = vst [vmem:[%s2416_s7 + $0x188] sm:$0xff] %v1561_v11  ;;  %v1530_v13 = vmax.f32 %v1466_v12, 0.0  ;;  %v1045_v14 = vpop.f32.mrf.mxu2 }
 0x140   : > { %v1214_v15 = vpop.f32.mrf.mxu3 }
 0x141   : > { %1594 = vst [vmem:[%s2416_s7 + $0x90] sm:$0xff] %v1530_v13  ;;  %v1215_v16 = vadd.f32 %v1214_v15, %v1045_v14  ;;  %v967_v17 = vpop.f32.mrf.mxu0 }
 0x142   : > { %v1136_v18 = vpop.f32.mrf.mxu1 }
 0x143   : > { %v1498_v19 = vadd.f32 %v2408_v59, %v1215_v16  ;;  %v1137_v20 = vadd.f32 %v1136_v18, %v967_v17 }
 0x145   : > { %v1562_v21 = vmax.f32 %v1498_v19, 0.0  ;;  %v1467_v22 = vadd.f32 %v2408_v59, %v1137_v20 }
 0x147   : > { %1626 = vst [vmem:[%s2416_s7 + $0x190] sm:$0xff] %v1562_v21  ;;  %v1531_v23 = vmax.f32 %v1467_v22, 0.0  ;;  %v1047_v24 = vpop.f32.mrf.mxu2 }
 0x148   : > { %v1216_v25 = vpop.f32.mrf.mxu3 }
 0x149   : > { %1595 = vst [vmem:[%s2416_s7 + $0x98] sm:$0xff] %v1531_v23  ;;  %v1217_v26 = vadd.f32 %v1216_v25, %v1047_v24  ;;  %v970_v27 = vpop.f32.mrf.mxu0 }
 0x14a   : > { %v1139_v28 = vpop.f32.mrf.mxu1 }
 0x14b   : > { %v1499_v29 = vadd.f32 %v2408_v59, %v1217_v26  ;;  %v1140_v30 = vadd.f32 %v1139_v28, %v970_v27 }
 0x14d   : > { %v1563_v31 = vmax.f32 %v1499_v29, 0.0  ;;  %v1468_v32 = vadd.f32 %v2408_v59, %v1140_v30 }
 0x14f   : > { %1627 = vst [vmem:[%s2416_s7 + $0x198] sm:$0xff] %v1563_v31  ;;  %v1532_v33 = vmax.f32 %v1468_v32, 0.0  ;;  %v1050_v34 = vpop.f32.mrf.mxu2 }
 0x150   : > { %v1219_v35 = vpop.f32.mrf.mxu3 }
 0x151   : > { %1596 = vst [vmem:[%s2416_s7 + $0xa0] sm:$0xff] %v1532_v33  ;;  %v1220_v36 = vadd.f32 %v1219_v35, %v1050_v34  ;;  %v972_v37 = vpop.f32.mrf.mxu0 }
 0x152   : > { %v1141_v38 = vpop.f32.mrf.mxu1 }
 0x153   : > { %v1500_v39 = vadd.f32 %v2408_v59, %v1220_v36  ;;  %v1142_v40 = vadd.f32 %v1141_v38, %v972_v37 }
 0x155   : > { %v1564_v41 = vmax.f32 %v1500_v39, 0.0  ;;  %v1469_v42 = vadd.f32 %v2408_v59, %v1142_v40 }
 0x157   : > { %1628 = vst [vmem:[%s2416_s7 + $0x1a0] sm:$0xff] %v1564_v41  ;;  %v1533_v43 = vmax.f32 %v1469_v42, 0.0  ;;  %v1052_v44 = vpop.f32.mrf.mxu2 }
 0x158   : > { %v1221_v45 = vpop.f32.mrf.mxu3 }
 0x159   : > { %1597 = vst [vmem:[%s2416_s7 + $0xa8] sm:$0xff] %v1533_v43  ;;  %v1222_v46 = vadd.f32 %v1221_v45, %v1052_v44  ;;  %v975_v47 = vpop.f32.mrf.mxu0 }
 0x15a   : > { %v1144_v48 = vpop.f32.mrf.mxu1 }
 0x15b   : > { %v1501_v49 = vadd.f32 %v2408_v59, %v1222_v46  ;;  %v1145_v50 = vadd.f32 %v1144_v48, %v975_v47 }
 0x15d   : > { %v1565_v51 = vmax.f32 %v1501_v49, 0.0  ;;  %v1470_v52 = vadd.f32 %v2408_v59, %v1145_v50 }
 0x15f   : > { %1629 = vst [vmem:[%s2416_s7 + $0x1a8] sm:$0xff] %v1565_v51  ;;  %v1534_v53 = vmax.f32 %v1470_v52, 0.0  ;;  %v1055_v54 = vpop.f32.mrf.mxu2 }
 0x160   : > { %v1224_v55 = vpop.f32.mrf.mxu3 }
 0x161   : > { %1598 = vst [vmem:[%s2416_s7 + $0xb0] sm:$0xff] %v1534_v53  ;;  %v1225_v56 = vadd.f32 %v1224_v55, %v1055_v54  ;;  %v977_v57 = vpop.f32.mrf.mxu0 }
 0x162   : > { %v1146_v58 = vpop.f32.mrf.mxu1 }
 0x163   : > { %v1502_v60 = vadd.f32 %v2408_v59, %v1225_v56  ;;  %v1147_v61 = vadd.f32 %v1146_v58, %v977_v57 }
 0x165   : > { %v1566_v62 = vmax.f32 %v1502_v60, 0.0  ;;  %v1471_v63 = vadd.f32 %v2408_v59, %v1147_v61 }
 0x167   : > { %1630 = vst [vmem:[%s2416_s7 + $0x1b0] sm:$0xff] %v1566_v62  ;;  %v1535_v0 = vmax.f32 %v1471_v63, 0.0  ;;  %v1057_v1 = vpop.f32.mrf.mxu2 }
 0x168   : > { %v1226_v2 = vpop.f32.mrf.mxu3 }
 0x169   : > { %1599 = vst [vmem:[%s2416_s7 + $0xb8] sm:$0xff] %v1535_v0  ;;  %v1227_v3 = vadd.f32 %v1226_v2, %v1057_v1  ;;  %v980_v4 = vpop.f32.mrf.mxu0 }
 0x16a   : > { %v1149_v5 = vpop.f32.mrf.mxu1 }
 0x16b   : > { %v1503_v6 = vadd.f32 %v2408_v59, %v1227_v3  ;;  %v1150_v7 = vadd.f32 %v1149_v5, %v980_v4 }
 0x16d   : > { %v1567_v8 = vmax.f32 %v1503_v6, 0.0  ;;  %v1472_v9 = vadd.f32 %v2408_v59, %v1150_v7 }
 0x16f   : > { %1631 = vst [vmem:[%s2416_s7 + $0x1b8] sm:$0xff] %v1567_v8  ;;  %v1536_v10 = vmax.f32 %v1472_v9, 0.0  ;;  %v1060_v11 = vpop.f32.mrf.mxu2 }
 0x170   : > { %v1229_v12 = vpop.f32.mrf.mxu3 }
 0x171   : > { %1600 = vst [vmem:[%s2416_s7 + $0xc0] sm:$0xff] %v1536_v10  ;;  %v1230_v13 = vadd.f32 %v1229_v12, %v1060_v11  ;;  %v982_v14 = vpop.f32.mrf.mxu0 }
 0x172   : > { %v1151_v15 = vpop.f32.mrf.mxu1 }
 0x173   : > { %v1504_v16 = vadd.f32 %v2408_v59, %v1230_v13  ;;  %v1152_v17 = vadd.f32 %v1151_v15, %v982_v14 }
 0x175   : > { %v1568_v18 = vmax.f32 %v1504_v16, 0.0  ;;  %v1473_v19 = vadd.f32 %v2408_v59, %v1152_v17 }
 0x177   : > { %1632 = vst [vmem:[%s2416_s7 + $0x1c0] sm:$0xff] %v1568_v18  ;;  %v1537_v20 = vmax.f32 %v1473_v19, 0.0  ;;  %v1062_v21 = vpop.f32.mrf.mxu2 }
 0x178   : > { %v1231_v22 = vpop.f32.mrf.mxu3 }
 0x179   : > { %1601 = vst [vmem:[%s2416_s7 + $0xc8] sm:$0xff] %v1537_v20  ;;  %v1232_v23 = vadd.f32 %v1231_v22, %v1062_v21  ;;  %v985_v24 = vpop.f32.mrf.mxu0 }
 0x17a   : > { %v1154_v25 = vpop.f32.mrf.mxu1 }
 0x17b   : > { %v1505_v26 = vadd.f32 %v2408_v59, %v1232_v23  ;;  %v1155_v27 = vadd.f32 %v1154_v25, %v985_v24 }
 0x17d   : > { %v1569_v28 = vmax.f32 %v1505_v26, 0.0  ;;  %v1474_v29 = vadd.f32 %v2408_v59, %v1155_v27 }
 0x17f   : > { %1633 = vst [vmem:[%s2416_s7 + $0x1c8] sm:$0xff] %v1569_v28  ;;  %v1538_v30 = vmax.f32 %v1474_v29, 0.0  ;;  %v1065_v31 = vpop.f32.mrf.mxu2 }
 0x180   : > { %v1234_v32 = vpop.f32.mrf.mxu3 }
 0x181   : > { %1602 = vst [vmem:[%s2416_s7 + $0xd0] sm:$0xff] %v1538_v30  ;;  %v1235_v33 = vadd.f32 %v1234_v32, %v1065_v31  ;;  %v987_v34 = vpop.f32.mrf.mxu0 }
 0x182   : > { %v1156_v35 = vpop.f32.mrf.mxu1 }
 0x183   : > { %v1506_v36 = vadd.f32 %v2408_v59, %v1235_v33  ;;  %v1157_v37 = vadd.f32 %v1156_v35, %v987_v34 }
 0x185   : > { %v1570_v38 = vmax.f32 %v1506_v36, 0.0  ;;  %v1475_v39 = vadd.f32 %v2408_v59, %v1157_v37 }
 0x187   : > { %1634 = vst [vmem:[%s2416_s7 + $0x1d0] sm:$0xff] %v1570_v38  ;;  %v1539_v40 = vmax.f32 %v1475_v39, 0.0  ;;  %v1067_v41 = vpop.f32.mrf.mxu2 }
 0x188   : > { %v1236_v42 = vpop.f32.mrf.mxu3 }
 0x189   : > { %1603 = vst [vmem:[%s2416_s7 + $0xd8] sm:$0xff] %v1539_v40  ;;  %v1237_v43 = vadd.f32 %v1236_v42, %v1067_v41  ;;  %v990_v44 = vpop.f32.mrf.mxu0 }
 0x18a   : > { %v1159_v45 = vpop.f32.mrf.mxu1 }
 0x18b   : > { %v1507_v46 = vadd.f32 %v2408_v59, %v1237_v43  ;;  %v1160_v47 = vadd.f32 %v1159_v45, %v990_v44 }
 0x18d   : > { %v1571_v48 = vmax.f32 %v1507_v46, 0.0  ;;  %v1476_v49 = vadd.f32 %v2408_v59, %v1160_v47 }
 0x18f   : > { %1635 = vst [vmem:[%s2416_s7 + $0x1d8] sm:$0xff] %v1571_v48  ;;  %v1540_v50 = vmax.f32 %v1476_v49, 0.0  ;;  %v1070_v51 = vpop.f32.mrf.mxu2 }
 0x190   : > { %v1239_v52 = vpop.f32.mrf.mxu3 }
 0x191   : > { %1604 = vst [vmem:[%s2416_s7 + $0xe0] sm:$0xff] %v1540_v50  ;;  %v1240_v53 = vadd.f32 %v1239_v52, %v1070_v51  ;;  %v992_v54 = vpop.f32.mrf.mxu0 }
 0x192   : > { %v1161_v55 = vpop.f32.mrf.mxu1 }
 0x193   : > { %v1508_v56 = vadd.f32 %v2408_v59, %v1240_v53  ;;  %v1162_v57 = vadd.f32 %v1161_v55, %v992_v54 }
 0x195   : > { %v1572_v58 = vmax.f32 %v1508_v56, 0.0  ;;  %v1477_v60 = vadd.f32 %v2408_v59, %v1162_v57 }
 0x197   : > { %1636 = vst [vmem:[%s2416_s7 + $0x1e0] sm:$0xff] %v1572_v58  ;;  %v1541_v61 = vmax.f32 %v1477_v60, 0.0  ;;  %v1072_v62 = vpop.f32.mrf.mxu2 }
 0x198   : > { %v1241_v63 = vpop.f32.mrf.mxu3 }
 0x199   : > { %1605 = vst [vmem:[%s2416_s7 + $0xe8] sm:$0xff] %v1541_v61  ;;  %v1242_v0 = vadd.f32 %v1241_v63, %v1072_v62  ;;  %v995_v1 = vpop.f32.mrf.mxu0 }
 0x19a   : > { %v1164_v2 = vpop.f32.mrf.mxu1 }
 0x19b   : > { %v1509_v3 = vadd.f32 %v2408_v59, %v1242_v0  ;;  %v1165_v4 = vadd.f32 %v1164_v2, %v995_v1 }
 0x19d   : > { %v1573_v5 = vmax.f32 %v1509_v3, 0.0  ;;  %v1478_v6 = vadd.f32 %v2408_v59, %v1165_v4 }
 0x19f   : > { %1637 = vst [vmem:[%s2416_s7 + $0x1e8] sm:$0xff] %v1573_v5  ;;  %v1542_v7 = vmax.f32 %v1478_v6, 0.0  ;;  %v1075_v8 = vpop.f32.mrf.mxu2 }
 0x1a0   : > { %v1244_v9 = vpop.f32.mrf.mxu3 }
 0x1a1   : > { %1606 = vst [vmem:[%s2416_s7 + $0xf0] sm:$0xff] %v1542_v7  ;;  %v1245_v10 = vadd.f32 %v1244_v9, %v1075_v8  ;;  %v997_v11 = vpop.f32.mrf.mxu0 }
 0x1a2   : > { %v1166_v12 = vpop.f32.mrf.mxu1 }
 0x1a3   : > { %v1510_v13 = vadd.f32 %v2408_v59, %v1245_v10  ;;  %v1167_v14 = vadd.f32 %v1166_v12, %v997_v11 }
 0x1a5   : > { %v1574_v15 = vmax.f32 %v1510_v13, 0.0  ;;  %v1479_v16 = vadd.f32 %v2408_v59, %v1167_v14 }
 0x1a7   : > { %1638 = vst [vmem:[%s2416_s7 + $0x1f0] sm:$0xff] %v1574_v15  ;;  %v1543_v17 = vmax.f32 %v1479_v16, 0.0  ;;  %v1077_v18 = vpop.f32.mrf.mxu2 }
 0x1a8   : > { %v1246_v19 = vpop.f32.mrf.mxu3 }
 0x1a9   : > { %1607 = vst [vmem:[%s2416_s7 + $0xf8] sm:$0xff] %v1543_v17  ;;  %v1247_v20 = vadd.f32 %v1246_v19, %v1077_v18 }
 0x1ab   : > { %v1511_v21 = vadd.f32 %v2408_v59, %v1247_v20 }
 0x1ad   : > { %v1575_v22 = vmax.f32 %v1511_v21, 0.0 }
 0x1af   : > { %1639 = vst [vmem:[%s2416_s7 + $0x1f8] sm:$0xff] %v1575_v22 }
 0x1b0 PF: > { %s13_s14 = sadd.s32 1, %s2232_s14   ;;  %s2614_s12 = smov %s2228_s13 }
 0x1b1   : > { %p10_p5 = scmp.ge.s32.totalorder %s13_s14, 4   ;;  %s2615_s13 = smov %s2617_s15 }
 0x1b3   :  { %12 = sbr.rel (!%p10_p5) target bundleno = 2 (0x2), region = 76 }

// kernel: hourglass_fwd.39
= control target key start
LH: loop header
LB: loop body
LE: loop exit
PB: predicated region body
PF: predicated region fallthrough
CT: control target
= control target key end

     0   :  { %s889_s1 = inlined_call_operand.vmem [shape: bf16[256,128], index: 1, kind: input, shape index: {}]   ;;  %s890_s0 = inlined_call_operand.vmem [shape: bf16[128,256], index: 0, kind: input, shape index: {}]   ;;  %s891_s2 = inlined_call_operand.vmem [shape: f32[1,128], index: 2, kind: input, shape index: {}]   ;;  %s892_s3 = inlined_call_operand.vmem [shape: f32[128,128], index: 3, kind: output, shape index: {}]  }
   0x1   :  { %v630_v0 = vld [vmem:[%s889_s1 + $0x38] sm:$0xff]  ;;  %v629_v2 = vld [vmem:[%s889_s1 + $0x30] sm:$0xff]  ;;  %v628_v4 = vld [vmem:[%s889_s1 + $0x28] sm:$0xff] }
   0x2   :  { %v638_v1 = vld [vmem:[%s889_s1 + $0x78] sm:$0xff]  ;;  %274 = vmatpush.bf16.msra.mxu0 %v630_v0  ;;  %639 = vmatpush.bf16.msra.mxu2 %v630_v0  ;;  %v637_v3 = vld [vmem:[%s889_s1 + $0x70] sm:$0xff]  ;;  %v636_v5 = vld [vmem:[%s889_s1 + $0x68] sm:$0xff] }
   0x3   :  { %323 = vmatpush.bf16.msra.mxu1 %v638_v1  ;;  %647 = vmatpush.bf16.msra.mxu3 %v638_v1  ;;  %v627_v6 = vld [vmem:[%s889_s1 + $0x20] sm:$0xff]  ;;  %v626_v8 = vld [vmem:[%s889_s1 + $0x18] sm:$0xff]  ;;  %v625_v10 = vld [vmem:[%s889_s1 + $0x10] sm:$0xff] }
   0x4   :  { %v635_v7 = vld [vmem:[%s889_s1 + $0x60] sm:$0xff]  ;;  %v634_v9 = vld [vmem:[%s889_s1 + $0x58] sm:$0xff]  ;;  %v633_v11 = vld [vmem:[%s889_s1 + $0x50] sm:$0xff] }
   0x5   :  { %v624_v12 = vld [vmem:[%s889_s1 + $0x8] sm:$0xff]  ;;  %v623_v14 = vld [vmem:[%s889_s1] sm:$0xff]  ;;  %v489_v28 = vld [vmem:[%s890_s0 + $0x10] sm:$0xf] }
   0x6   :  { %275 = vmatpush.bf16.msra.mxu0 %v629_v2  ;;  %640 = vmatpush.bf16.msra.mxu2 %v629_v2  ;;  %v632_v13 = vld [vmem:[%s889_s1 + $0x48] sm:$0xff]  ;;  %v631_v15 = vld [vmem:[%s889_s1 + $0x40] sm:$0xff]  ;;  %v610_v29 = vld [vmem:[%s890_s0 + $0x14] sm:$0xf0] }
   0x7   :  { %324 = vmatpush.bf16.msra.mxu1 %v637_v3  ;;  %648 = vmatpush.bf16.msra.mxu3 %v637_v3  ;;  %v481_v16 = vld [vmem:[%s890_s0] sm:$0xf]  ;;  %v608_v17 = vld [vmem:[%s890_s0 + $0x4] sm:$0xf0]  ;;  %v607_v20 = vld [vmem:[%s890_s0 + $0x4] sm:$0xf]  ;;  %v490_v36 = vor.u32 %v610_v29, %v489_v28 }
   0x8   :  { %v513_v18 = vld [vmem:[%s890_s0 + $0x40] sm:$0xf]  ;;  %v616_v19 = vld [vmem:[%s890_s0 + $0x44] sm:$0xf0]  ;;  %v483_v21 = vld [vmem:[%s890_s0 + $0x8] sm:$0xf0]  ;;  %v482_v24 = vor.u32 %v608_v17, %v481_v16 }
   0x9   :  { %v615_v22 = vld [vmem:[%s890_s0 + $0x44] sm:$0xf]  ;;  %v515_v23 = vld [vmem:[%s890_s0 + $0x48] sm:$0xf0]  ;;  %v514_v25 = vor.u32 %v616_v19, %v513_v18  ;;  %v486_v26 = vor.u32 %v607_v20, %v483_v21  ;;  %v521_v30 = vld [vmem:[%s890_s0 + $0x50] sm:$0xf] }
   0xa   :  { %276 = vmatpush.bf16.msra.mxu0 %v628_v4  ;;  %641 = vmatpush.bf16.msra.mxu2 %v628_v4  ;;  %v518_v27 = vor.u32 %v615_v22, %v515_v23  ;;  %v618_v31 = vld [vmem:[%s890_s0 + $0x54] sm:$0xf0]  ;;  %v609_v32 = vld [vmem:[%s890_s0 + $0x14] sm:$0xf]  ;;  %v491_v33 = vld [vmem:[%s890_s0 + $0x18] sm:$0xf0] }
   0xb   :  { %325 = vmatpush.bf16.msra.mxu1 %v636_v5  ;;  %649 = vmatpush.bf16.msra.mxu3 %v636_v5  ;;  %v617_v34 = vld [vmem:[%s890_s0 + $0x54] sm:$0xf]  ;;  %v523_v35 = vld [vmem:[%s890_s0 + $0x58] sm:$0xf0]  ;;  %v522_v37 = vor.u32 %v618_v31, %v521_v30  ;;  %v494_v38 = vor.u32 %v609_v32, %v491_v33  ;;  %v497_v40 = vld [vmem:[%s890_s0 + $0x20] sm:$0xf] }
   0xc   :  { %v526_v39 = vor.u32 %v617_v34, %v523_v35  ;;  %v612_v41 = vld [vmem:[%s890_s0 + $0x24] sm:$0xf0]  ;;  %v529_v42 = vld [vmem:[%s890_s0 + $0x60] sm:$0xf]  ;;  %v611_v44 = vld [vmem:[%s890_s0 + $0x24] sm:$0xf] }
   0xd   :  { %v620_v43 = vld [vmem:[%s890_s0 + $0x64] sm:$0xf0]  ;;  %v499_v45 = vld [vmem:[%s890_s0 + $0x28] sm:$0xf0]  ;;  %v619_v46 = vld [vmem:[%s890_s0 + $0x64] sm:$0xf]  ;;  %v498_v48 = vor.u32 %v612_v41, %v497_v40 }
   0xe   :  { %277 = vmatpush.bf16.msra.mxu0 %v627_v6  ;;  %642 = vmatpush.bf16.msra.mxu2 %v627_v6  ;;  %v531_v47 = vld [vmem:[%s890_s0 + $0x68] sm:$0xf0]  ;;  %v530_v49 = vor.u32 %v620_v43, %v529_v42  ;;  %v502_v50 = vor.u32 %v611_v44, %v499_v45  ;;  %v505_v52 = vld [vmem:[%s890_s0 + $0x30] sm:$0xf]  ;;  %v614_v53 = vld [vmem:[%s890_s0 + $0x34] sm:$0xf0] }
   0xf   :  { %326 = vmatpush.bf16.msra.mxu1 %v635_v7  ;;  %650 = vmatpush.bf16.msra.mxu3 %v635_v7  ;;  %v534_v51 = vor.u32 %v619_v46, %v531_v47  ;;  %v537_v54 = vld [vmem:[%s890_s0 + $0x70] sm:$0xf]  ;;  %v622_v55 = vld [vmem:[%s890_s0 + $0x74] sm:$0xf0]  ;;  %v613_v56 = vld [vmem:[%s890_s0 + $0x34] sm:$0xf]  ;;  %v506_v60 = vor.u32 %v614_v53, %v505_v52 }
  0x10   :  { %v507_v57 = vld [vmem:[%s890_s0 + $0x38] sm:$0xf0]  ;;  %v621_v58 = vld [vmem:[%s890_s0 + $0x74] sm:$0xf]  ;;  %v538_v61 = vor.u32 %v622_v55, %v537_v54  ;;  %v823_v1 = vld [vmem:[%s891_s2] ss:$0 sm:$0xff] }
  0x11   :  { %v539_v59 = vld [vmem:[%s890_s0 + $0x78] sm:$0xf0]  ;;  %v510_v62 = vor.u32 %v613_v56, %v507_v57 }
  0x12   :  { %278 = vmatpush.bf16.msra.mxu0 %v626_v8  ;;  %643 = vmatpush.bf16.msra.mxu2 %v626_v8  ;;  %v542_v63 = vor.u32 %v621_v58, %v539_v59 }
  0x13   :  { %327 = vmatpush.bf16.msra.mxu1 %v634_v9  ;;  %651 = vmatpush.bf16.msra.mxu3 %v634_v9 }
  0x16   :  { %279 = vmatpush.bf16.msra.mxu0 %v625_v10  ;;  %644 = vmatpush.bf16.msra.mxu2 %v625_v10 }
  0x17   :  { %328 = vmatpush.bf16.msra.mxu1 %v633_v11  ;;  %652 = vmatpush.bf16.msra.mxu3 %v633_v11 }
  0x1a   :  { %280 = vmatpush.bf16.msra.mxu0 %v624_v12  ;;  %645 = vmatpush.bf16.msra.mxu2 %v624_v12 }
  0x1b   :  { %329 = vmatpush.bf16.msra.mxu1 %v632_v13  ;;  %653 = vmatpush.bf16.msra.mxu3 %v632_v13 }
  0x1e   :  { %281 = vmatpush.bf16.msra.mxu0 %v623_v14  ;;  %646 = vmatpush.bf16.msra.mxu2 %v623_v14 }
  0x1f   :  { %330 = vmatpush.bf16.msra.mxu1 %v631_v15  ;;  %654 = vmatpush.bf16.msra.mxu3 %v631_v15 }
  0x21   :  { %282 = vmatmul.bf16.vlgmr.msra.gmra.mxu0 %v482_v24  ;;  %302 = vmatmul.bf16.vlgmr.msra.gmra.mxu2 %v514_v25 }
  0x22   :  { %331 = vmatmul.bf16.vlgmr.msra.gmra.mxu1 %v486_v26  ;;  %351 = vmatmul.bf16.vlgmr.msra.gmra.mxu3 %v518_v27 }
  0x31   :  { %287 = vmatmul.bf16.gmra.mxu0 %v490_v36  ;;  %307 = vmatmul.bf16.gmra.mxu2 %v522_v37 }
  0x32   :  { %336 = vmatmul.bf16.gmra.mxu1 %v494_v38  ;;  %356 = vmatmul.bf16.gmra.mxu3 %v526_v39 }
  0x41   :  { %292 = vmatmul.bf16.gmra.mxu0 %v498_v48  ;;  %312 = vmatmul.bf16.gmra.mxu2 %v530_v49 }
  0x42   :  { %341 = vmatmul.bf16.gmra.mxu1 %v502_v50  ;;  %361 = vmatmul.bf16.gmra.mxu3 %v534_v51 }
  0x51   :  { %297 = vmatmul.bf16.gmra.mxu0 %v506_v60  ;;  %317 = vmatmul.bf16.gmra.mxu2 %v538_v61 }
  0x52   :  { %346 = vmatmul.bf16.gmra.mxu1 %v510_v62  ;;  %366 = vmatmul.bf16.gmra.mxu3 %v542_v63 }
  0x9e   :  { %v283_v0 = vpop.f32.mrf.mxu0 }
  0x9f   :  { %v332_v2 = vpop.f32.mrf.mxu1 }
  0xa0   :  { %v333_v3 = vadd.f32 %v332_v2, %v283_v0 }
  0xa2   :  { %v427_v4 = vadd.f32 %v823_v1, %v333_v3 }
  0xa4   :  { %v443_v5 = vmax.f32 %v427_v4, 0.0  ;;  %v303_v6 = vpop.f32.mrf.mxu2 }
  0xa5   :  { %v352_v7 = vpop.f32.mrf.mxu3 }
  0xa6   :  { %459 = vst [vmem:[%s892_s3] sm:$0xff] %v443_v5  ;;  %v353_v8 = vadd.f32 %v352_v7, %v303_v6  ;;  %v285_v9 = vpop.f32.mrf.mxu0 }
  0xa7   :  { %v334_v10 = vpop.f32.mrf.mxu1 }
  0xa8   :  { %v435_v11 = vadd.f32 %v823_v1, %v353_v8  ;;  %v335_v12 = vadd.f32 %v334_v10, %v285_v9 }
  0xaa   :  { %v451_v13 = vmax.f32 %v435_v11, 0.0  ;;  %v428_v14 = vadd.f32 %v823_v1, %v335_v12 }
  0xac   :  { %467 = vst [vmem:[%s892_s3 + $0x40] sm:$0xff] %v451_v13  ;;  %v444_v15 = vmax.f32 %v428_v14, 0.0  ;;  %v305_v16 = vpop.f32.mrf.mxu2 }
  0xad   :  { %v354_v17 = vpop.f32.mrf.mxu3 }
  0xae   :  { %460 = vst [vmem:[%s892_s3 + $0x8] sm:$0xff] %v444_v15  ;;  %v355_v18 = vadd.f32 %v354_v17, %v305_v16  ;;  %v288_v19 = vpop.f32.mrf.mxu0 }
  0xaf   :  { %v337_v20 = vpop.f32.mrf.mxu1 }
  0xb0   :  { %v436_v21 = vadd.f32 %v823_v1, %v355_v18  ;;  %v338_v22 = vadd.f32 %v337_v20, %v288_v19 }
  0xb2   :  { %v452_v23 = vmax.f32 %v436_v21, 0.0  ;;  %v429_v24 = vadd.f32 %v823_v1, %v338_v22 }
  0xb4   :  { %468 = vst [vmem:[%s892_s3 + $0x48] sm:$0xff] %v452_v23  ;;  %v445_v25 = vmax.f32 %v429_v24, 0.0  ;;  %v308_v26 = vpop.f32.mrf.mxu2 }
  0xb5   :  { %v357_v27 = vpop.f32.mrf.mxu3 }
  0xb6   :  { %461 = vst [vmem:[%s892_s3 + $0x10] sm:$0xff] %v445_v25  ;;  %v358_v28 = vadd.f32 %v357_v27, %v308_v26  ;;  %v290_v29 = vpop.f32.mrf.mxu0 }
  0xb7   :  { %v339_v30 = vpop.f32.mrf.mxu1 }
  0xb8   :  { %v437_v31 = vadd.f32 %v823_v1, %v358_v28  ;;  %v340_v32 = vadd.f32 %v339_v30, %v290_v29 }
  0xba   :  { %v453_v33 = vmax.f32 %v437_v31, 0.0  ;;  %v430_v34 = vadd.f32 %v823_v1, %v340_v32 }
  0xbc   :  { %469 = vst [vmem:[%s892_s3 + $0x50] sm:$0xff] %v453_v33  ;;  %v446_v35 = vmax.f32 %v430_v34, 0.0  ;;  %v310_v36 = vpop.f32.mrf.mxu2 }
  0xbd   :  { %v359_v37 = vpop.f32.mrf.mxu3 }
  0xbe   :  { %462 = vst [vmem:[%s892_s3 + $0x18] sm:$0xff] %v446_v35  ;;  %v360_v38 = vadd.f32 %v359_v37, %v310_v36  ;;  %v293_v39 = vpop.f32.mrf.mxu0 }
  0xbf   :  { %v342_v40 = vpop.f32.mrf.mxu1 }
  0xc0   :  { %v438_v41 = vadd.f32 %v823_v1, %v360_v38  ;;  %v343_v42 = vadd.f32 %v342_v40, %v293_v39 }
  0xc2   :  { %v454_v43 = vmax.f32 %v438_v41, 0.0  ;;  %v431_v44 = vadd.f32 %v823_v1, %v343_v42 }
  0xc4   :  { %470 = vst [vmem:[%s892_s3 + $0x58] sm:$0xff] %v454_v43  ;;  %v447_v45 = vmax.f32 %v431_v44, 0.0  ;;  %v313_v46 = vpop.f32.mrf.mxu2 }
  0xc5   :  { %v362_v47 = vpop.f32.mrf.mxu3 }
  0xc6   :  { %463 = vst [vmem:[%s892_s3 + $0x20] sm:$0xff] %v447_v45  ;;  %v363_v48 = vadd.f32 %v362_v47, %v313_v46  ;;  %v295_v49 = vpop.f32.mrf.mxu0 }
  0xc7   :  { %v344_v50 = vpop.f32.mrf.mxu1 }
  0xc8   :  { %v439_v51 = vadd.f32 %v823_v1, %v363_v48  ;;  %v345_v52 = vadd.f32 %v344_v50, %v295_v49 }
  0xca   :  { %v455_v53 = vmax.f32 %v439_v51, 0.0  ;;  %v432_v54 = vadd.f32 %v823_v1, %v345_v52 }
  0xcc   :  { %471 = vst [vmem:[%s892_s3 + $0x60] sm:$0xff] %v455_v53  ;;  %v448_v55 = vmax.f32 %v432_v54, 0.0  ;;  %v315_v56 = vpop.f32.mrf.mxu2 }
  0xcd   :  { %v364_v57 = vpop.f32.mrf.mxu3 }
  0xce   :  { %464 = vst [vmem:[%s892_s3 + $0x28] sm:$0xff] %v448_v55  ;;  %v365_v58 = vadd.f32 %v364_v57, %v315_v56  ;;  %v298_v59 = vpop.f32.mrf.mxu0 }
  0xcf   :  { %v347_v60 = vpop.f32.mrf.mxu1 }
  0xd0   :  { %v440_v61 = vadd.f32 %v823_v1, %v365_v58  ;;  %v348_v62 = vadd.f32 %v347_v60, %v298_v59 }
  0xd2   :  { %v456_v63 = vmax.f32 %v440_v61, 0.0  ;;  %v433_v0 = vadd.f32 %v823_v1, %v348_v62 }
  0xd4   :  { %472 = vst [vmem:[%s892_s3 + $0x68] sm:$0xff] %v456_v63  ;;  %v449_v2 = vmax.f32 %v433_v0, 0.0  ;;  %v318_v3 = vpop.f32.mrf.mxu2 }
  0xd5   :  { %v367_v4 = vpop.f32.mrf.mxu3 }
  0xd6   :  { %465 = vst [vmem:[%s892_s3 + $0x30] sm:$0xff] %v449_v2  ;;  %v368_v5 = vadd.f32 %v367_v4, %v318_v3  ;;  %v300_v6 = vpop.f32.mrf.mxu0 }
  0xd7   :  { %v349_v7 = vpop.f32.mrf.mxu1 }
  0xd8   :  { %v441_v8 = vadd.f32 %v823_v1, %v368_v5  ;;  %v350_v9 = vadd.f32 %v349_v7, %v300_v6 }
  0xda   :  { %v457_v10 = vmax.f32 %v441_v8, 0.0  ;;  %v434_v11 = vadd.f32 %v823_v1, %v350_v9 }
  0xdc   :  { %473 = vst [vmem:[%s892_s3 + $0x70] sm:$0xff] %v457_v10  ;;  %v450_v12 = vmax.f32 %v434_v11, 0.0  ;;  %v320_v13 = vpop.f32.mrf.mxu2 }
  0xdd   :  { %v369_v14 = vpop.f32.mrf.mxu3 }
  0xde   :  { %466 = vst [vmem:[%s892_s3 + $0x38] sm:$0xff] %v450_v12  ;;  %v370_v15 = vadd.f32 %v369_v14, %v320_v13 }
  0xe0   :  { %v442_v16 = vadd.f32 %v823_v1, %v370_v15 }
  0xe2   :  { %v458_v17 = vmax.f32 %v442_v16, 0.0 }
  0xe4   :  { %474 = vst [vmem:[%s892_s3 + $0x78] sm:$0xff] %v458_v17 }

// kernel: hourglass_fwd.40
= control target key start
LH: loop header
LB: loop body
LE: loop exit
PB: predicated region body
PF: predicated region fallthrough
CT: control target
= control target key end

     0   :  { %s1499_s1 = inlined_call_operand.vmem [shape: bf16[512,128], index: 1, kind: input, shape index: {}]   ;;  %s1500_s0 = inlined_call_operand.vmem [shape: bf16[128,512], index: 0, kind: input, shape index: {}]   ;;  %s1501_s2 = inlined_call_operand.vmem [shape: f32[1,128], index: 2, kind: input, shape index: {}]   ;;  %s1502_s3 = inlined_call_operand.vmem [shape: f32[128,128], index: 3, kind: output, shape index: {}]  }
   0x1   :  { %v1096_v0 = vld [vmem:[%s1499_s1 + $0x38] sm:$0xff]  ;;  %v1095_v4 = vld [vmem:[%s1499_s1 + $0x30] sm:$0xff]  ;;  %v1094_v8 = vld [vmem:[%s1499_s1 + $0x28] sm:$0xff] }
   0x2   :  { %v1104_v1 = vld [vmem:[%s1499_s1 + $0x78] sm:$0xff]  ;;  %498 = vmatpush.bf16.msra.mxu0 %v1096_v0  ;;  %v1103_v5 = vld [vmem:[%s1499_s1 + $0x70] sm:$0xff]  ;;  %v1102_v9 = vld [vmem:[%s1499_s1 + $0x68] sm:$0xff] }
   0x3   :  { %v1112_v2 = vld [vmem:[%s1499_s1 + $0xb8] sm:$0xff]  ;;  %547 = vmatpush.bf16.msra.mxu1 %v1104_v1  ;;  %v1111_v6 = vld [vmem:[%s1499_s1 + $0xb0] sm:$0xff]  ;;  %v1110_v10 = vld [vmem:[%s1499_s1 + $0xa8] sm:$0xff] }
   0x4   :  { %v1120_v3 = vld [vmem:[%s1499_s1 + $0xf8] sm:$0xff]  ;;  %596 = vmatpush.bf16.msra.mxu2 %v1112_v2  ;;  %v1119_v7 = vld [vmem:[%s1499_s1 + $0xf0] sm:$0xff]  ;;  %v1118_v11 = vld [vmem:[%s1499_s1 + $0xe8] sm:$0xff] }
   0x5   :  { %645 = vmatpush.bf16.msra.mxu3 %v1120_v3  ;;  %v1093_v12 = vld [vmem:[%s1499_s1 + $0x20] sm:$0xff]  ;;  %v1092_v16 = vld [vmem:[%s1499_s1 + $0x18] sm:$0xff]  ;;  %v1091_v20 = vld [vmem:[%s1499_s1 + $0x10] sm:$0xff] }
   0x6   :  { %499 = vmatpush.bf16.msra.mxu0 %v1095_v4  ;;  %v1101_v13 = vld [vmem:[%s1499_s1 + $0x60] sm:$0xff]  ;;  %v1100_v17 = vld [vmem:[%s1499_s1 + $0x58] sm:$0xff]  ;;  %v1099_v21 = vld [vmem:[%s1499_s1 + $0x50] sm:$0xff] }
   0x7   :  { %548 = vmatpush.bf16.msra.mxu1 %v1103_v5  ;;  %v1109_v14 = vld [vmem:[%s1499_s1 + $0xa0] sm:$0xff]  ;;  %v1108_v18 = vld [vmem:[%s1499_s1 + $0x98] sm:$0xff]  ;;  %v1107_v22 = vld [vmem:[%s1499_s1 + $0x90] sm:$0xff] }
   0x8   :  { %597 = vmatpush.bf16.msra.mxu2 %v1111_v6  ;;  %v1117_v15 = vld [vmem:[%s1499_s1 + $0xe0] sm:$0xff]  ;;  %v1116_v19 = vld [vmem:[%s1499_s1 + $0xd8] sm:$0xff]  ;;  %v1115_v23 = vld [vmem:[%s1499_s1 + $0xd0] sm:$0xff] }
   0x9   :  { %646 = vmatpush.bf16.msra.mxu3 %v1119_v7  ;;  %v1090_v24 = vld [vmem:[%s1499_s1 + $0x8] sm:$0xff]  ;;  %v1089_v28 = vld [vmem:[%s1499_s1] sm:$0xff]  ;;  %v1059_v33 = vld [vmem:[%s1500_s0 + $0xc] sm:$0xf0] }
   0xa   :  { %500 = vmatpush.bf16.msra.mxu0 %v1094_v8  ;;  %v1098_v25 = vld [vmem:[%s1499_s1 + $0x48] sm:$0xff]  ;;  %v1097_v29 = vld [vmem:[%s1499_s1 + $0x40] sm:$0xff]  ;;  %v805_v35 = vld [vmem:[%s1500_s0 + $0x10] sm:$0xf0] }
   0xb   :  { %549 = vmatpush.bf16.msra.mxu1 %v1102_v9  ;;  %v1106_v26 = vld [vmem:[%s1499_s1 + $0x88] sm:$0xff]  ;;  %v1105_v30 = vld [vmem:[%s1499_s1 + $0x80] sm:$0xff]  ;;  %v1060_v37 = vld [vmem:[%s1500_s0 + $0x14] sm:$0xf0] }
   0xc   :  { %598 = vmatpush.bf16.msra.mxu2 %v1110_v10  ;;  %v1114_v27 = vld [vmem:[%s1499_s1 + $0xc8] sm:$0xff]  ;;  %v1113_v31 = vld [vmem:[%s1499_s1 + $0xc0] sm:$0xff]  ;;  %v813_v39 = vld [vmem:[%s1500_s0 + $0x18] sm:$0xf0] }
   0xd   :  { %647 = vmatpush.bf16.msra.mxu3 %v1118_v11  ;;  %v803_v32 = vld [vmem:[%s1500_s0] sm:$0xf]  ;;  %v1057_v34 = vld [vmem:[%s1500_s0 + $0x4] sm:$0xf]  ;;  %v811_v36 = vld [vmem:[%s1500_s0 + $0x8] sm:$0xf] }
   0xe   :  { %501 = vmatpush.bf16.msra.mxu0 %v1093_v12  ;;  %v1058_v38 = vld [vmem:[%s1500_s0 + $0xc] sm:$0xf]  ;;  %v804_v40 = vor.u32 %v1059_v33, %v803_v32  ;;  %v808_v41 = vor.u32 %v1057_v34, %v805_v35  ;;  %v812_v42 = vor.u32 %v1060_v37, %v811_v36  ;;  %v819_v44 = vld [vmem:[%s1500_s0 + $0x20] sm:$0xf]  ;;  %v1063_v45 = vld [vmem:[%s1500_s0 + $0x2c] sm:$0xf0] }
   0xf   :  { %550 = vmatpush.bf16.msra.mxu1 %v1101_v13  ;;  %v816_v43 = vor.u32 %v1058_v38, %v813_v39  ;;  %v1061_v46 = vld [vmem:[%s1500_s0 + $0x24] sm:$0xf]  ;;  %v821_v47 = vld [vmem:[%s1500_s0 + $0x30] sm:$0xf0]  ;;  %v827_v48 = vld [vmem:[%s1500_s0 + $0x28] sm:$0xf]  ;;  %v820_v52 = vor.u32 %v1063_v45, %v819_v44 }
  0x10   :  { %599 = vmatpush.bf16.msra.mxu2 %v1109_v14  ;;  %v1064_v49 = vld [vmem:[%s1500_s0 + $0x34] sm:$0xf0]  ;;  %v1062_v50 = vld [vmem:[%s1500_s0 + $0x2c] sm:$0xf]  ;;  %v829_v51 = vld [vmem:[%s1500_s0 + $0x38] sm:$0xf0]  ;;  %v824_v53 = vor.u32 %v1061_v46, %v821_v47 }
  0x11   :  { %648 = vmatpush.bf16.msra.mxu3 %v1117_v15  ;;  %v828_v54 = vor.u32 %v1064_v49, %v827_v48  ;;  %v832_v55 = vor.u32 %v1062_v50, %v829_v51  ;;  %v835_v56 = vld [vmem:[%s1500_s0 + $0x40] sm:$0xf]  ;;  %v1067_v57 = vld [vmem:[%s1500_s0 + $0x4c] sm:$0xf0]  ;;  %v1065_v58 = vld [vmem:[%s1500_s0 + $0x44] sm:$0xf] }
  0x12   :  { %502 = vmatpush.bf16.msra.mxu0 %v1092_v16  ;;  %v837_v59 = vld [vmem:[%s1500_s0 + $0x50] sm:$0xf0]  ;;  %v843_v60 = vld [vmem:[%s1500_s0 + $0x48] sm:$0xf]  ;;  %v1068_v61 = vld [vmem:[%s1500_s0 + $0x54] sm:$0xf0]  ;;  %v836_v0 = vor.u32 %v1067_v57, %v835_v56 }
  0x13   :  { %551 = vmatpush.bf16.msra.mxu1 %v1100_v17  ;;  %v1066_v62 = vld [vmem:[%s1500_s0 + $0x4c] sm:$0xf]  ;;  %v845_v63 = vld [vmem:[%s1500_s0 + $0x58] sm:$0xf0]  ;;  %v840_v1 = vor.u32 %v1065_v58, %v837_v59  ;;  %v844_v2 = vor.u32 %v1068_v61, %v843_v60  ;;  %v851_v4 = vld [vmem:[%s1500_s0 + $0x60] sm:$0xf] }
  0x14   :  { %600 = vmatpush.bf16.msra.mxu2 %v1108_v18  ;;  %v848_v3 = vor.u32 %v1066_v62, %v845_v63  ;;  %v1071_v5 = vld [vmem:[%s1500_s0 + $0x6c] sm:$0xf0]  ;;  %v1069_v6 = vld [vmem:[%s1500_s0 + $0x64] sm:$0xf]  ;;  %v853_v7 = vld [vmem:[%s1500_s0 + $0x70] sm:$0xf0] }
  0x15   :  { %649 = vmatpush.bf16.msra.mxu3 %v1116_v19  ;;  %v859_v8 = vld [vmem:[%s1500_s0 + $0x68] sm:$0xf]  ;;  %v1072_v9 = vld [vmem:[%s1500_s0 + $0x74] sm:$0xf0]  ;;  %v1070_v10 = vld [vmem:[%s1500_s0 + $0x6c] sm:$0xf]  ;;  %v852_v12 = vor.u32 %v1071_v5, %v851_v4  ;;  %v856_v13 = vor.u32 %v1069_v6, %v853_v7 }
  0x16   :  { %503 = vmatpush.bf16.msra.mxu0 %v1091_v20  ;;  %v861_v11 = vld [vmem:[%s1500_s0 + $0x78] sm:$0xf0]  ;;  %v860_v14 = vor.u32 %v1072_v9, %v859_v8  ;;  %v867_v16 = vld [vmem:[%s1500_s0 + $0x80] sm:$0xf]  ;;  %v1075_v17 = vld [vmem:[%s1500_s0 + $0x8c] sm:$0xf0] }
  0x17   :  { %552 = vmatpush.bf16.msra.mxu1 %v1099_v21  ;;  %v864_v15 = vor.u32 %v1070_v10, %v861_v11  ;;  %v1073_v18 = vld [vmem:[%s1500_s0 + $0x84] sm:$0xf]  ;;  %v869_v19 = vld [vmem:[%s1500_s0 + $0x90] sm:$0xf0]  ;;  %v875_v20 = vld [vmem:[%s1500_s0 + $0x88] sm:$0xf] }
  0x18   :  { %601 = vmatpush.bf16.msra.mxu2 %v1107_v22  ;;  %v1076_v21 = vld [vmem:[%s1500_s0 + $0x94] sm:$0xf0]  ;;  %v1074_v22 = vld [vmem:[%s1500_s0 + $0x8c] sm:$0xf]  ;;  %v891_v32 = vld [vmem:[%s1500_s0 + $0xa8] sm:$0xf] }
  0x19   :  { %650 = vmatpush.bf16.msra.mxu3 %v1115_v23  ;;  %v877_v23 = vld [vmem:[%s1500_s0 + $0x98] sm:$0xf0]  ;;  %v1080_v33 = vld [vmem:[%s1500_s0 + $0xb4] sm:$0xf0]  ;;  %v1078_v34 = vld [vmem:[%s1500_s0 + $0xac] sm:$0xf] }
  0x1a   :  { %504 = vmatpush.bf16.msra.mxu0 %v1090_v24  ;;  %v868_v24 = vor.u32 %v1075_v17, %v867_v16  ;;  %v893_v35 = vld [vmem:[%s1500_s0 + $0xb8] sm:$0xf0]  ;;  %v892_v38 = vor.u32 %v1080_v33, %v891_v32  ;;  %v907_v44 = vld [vmem:[%s1500_s0 + $0xc8] sm:$0xf]  ;;  %v1084_v45 = vld [vmem:[%s1500_s0 + $0xd4] sm:$0xf0] }
  0x1b   :  { %553 = vmatpush.bf16.msra.mxu1 %v1098_v25  ;;  %v872_v25 = vor.u32 %v1073_v18, %v869_v19  ;;  %v896_v39 = vor.u32 %v1078_v34, %v893_v35  ;;  %v1082_v46 = vld [vmem:[%s1500_s0 + $0xcc] sm:$0xf]  ;;  %v909_v47 = vld [vmem:[%s1500_s0 + $0xd8] sm:$0xf0]  ;;  %v908_v50 = vor.u32 %v1084_v45, %v907_v44  ;;  %v923_v56 = vld [vmem:[%s1500_s0 + $0xe8] sm:$0xf] }
  0x1c   :  { %602 = vmatpush.bf16.msra.mxu2 %v1106_v26  ;;  %v876_v26 = vor.u32 %v1076_v21, %v875_v20  ;;  %v912_v51 = vor.u32 %v1082_v46, %v909_v47  ;;  %v1088_v57 = vld [vmem:[%s1500_s0 + $0xf4] sm:$0xf0]  ;;  %v1086_v58 = vld [vmem:[%s1500_s0 + $0xec] sm:$0xf]  ;;  %v925_v59 = vld [vmem:[%s1500_s0 + $0xf8] sm:$0xf0] }
  0x1d   :  { %651 = vmatpush.bf16.msra.mxu3 %v1114_v27  ;;  %v880_v27 = vor.u32 %v1074_v22, %v877_v23  ;;  %v924_v62 = vor.u32 %v1088_v57, %v923_v56  ;;  %v928_v63 = vor.u32 %v1086_v58, %v925_v59  ;;  %v1433_v6 = vld [vmem:[%s1501_s2] ss:$0 sm:$0xff] }
  0x1e   :  { %505 = vmatpush.bf16.msra.mxu0 %v1089_v28  ;;  %v883_v28 = vld [vmem:[%s1500_s0 + $0xa0] sm:$0xf] }
  0x1f   :  { %554 = vmatpush.bf16.msra.mxu1 %v1097_v29  ;;  %v1079_v29 = vld [vmem:[%s1500_s0 + $0xac] sm:$0xf0] }
  0x20   :  { %603 = vmatpush.bf16.msra.mxu2 %v1105_v30  ;;  %v1077_v30 = vld [vmem:[%s1500_s0 + $0xa4] sm:$0xf]  ;;  %v884_v36 = vor.u32 %v1079_v29, %v883_v28 }
  0x21   :  { %652 = vmatpush.bf16.msra.mxu3 %v1113_v31  ;;  %506 = vmatmul.bf16.vlgmr.msra.gmra.mxu0 %v804_v40  ;;  %v885_v31 = vld [vmem:[%s1500_s0 + $0xb0] sm:$0xf0]  ;;  %v899_v40 = vld [vmem:[%s1500_s0 + $0xc0] sm:$0xf] }
  0x22   :  { %555 = vmatmul.bf16.vlgmr.msra.gmra.mxu1 %v808_v41  ;;  %v888_v37 = vor.u32 %v1077_v30, %v885_v31  ;;  %v1083_v41 = vld [vmem:[%s1500_s0 + $0xcc] sm:$0xf0] }
  0x23   :  { %604 = vmatmul.bf16.vlgmr.msra.gmra.mxu2 %v812_v42  ;;  %v1081_v42 = vld [vmem:[%s1500_s0 + $0xc4] sm:$0xf]  ;;  %v900_v48 = vor.u32 %v1083_v41, %v899_v40 }
  0x24   :  { %653 = vmatmul.bf16.vlgmr.msra.gmra.mxu3 %v816_v43  ;;  %v901_v43 = vld [vmem:[%s1500_s0 + $0xd0] sm:$0xf0] }
  0x25   :  { %v904_v49 = vor.u32 %v1081_v42, %v901_v43 }
  0x31   :  { %511 = vmatmul.bf16.gmra.mxu0 %v820_v52  ;;  %v915_v52 = vld [vmem:[%s1500_s0 + $0xe0] sm:$0xf] }
  0x32   :  { %560 = vmatmul.bf16.gmra.mxu1 %v824_v53  ;;  %v1087_v53 = vld [vmem:[%s1500_s0 + $0xec] sm:$0xf0] }
  0x33   :  { %609 = vmatmul.bf16.gmra.mxu2 %v828_v54  ;;  %v1085_v54 = vld [vmem:[%s1500_s0 + $0xe4] sm:$0xf]  ;;  %v916_v60 = vor.u32 %v1087_v53, %v915_v52 }
  0x34   :  { %658 = vmatmul.bf16.gmra.mxu3 %v832_v55  ;;  %v917_v55 = vld [vmem:[%s1500_s0 + $0xf0] sm:$0xf0] }
  0x35   :  { %v920_v61 = vor.u32 %v1085_v54, %v917_v55 }
  0x41   :  { %516 = vmatmul.bf16.gmra.mxu0 %v836_v0 }
  0x42   :  { %565 = vmatmul.bf16.gmra.mxu1 %v840_v1 }
  0x43   :  { %614 = vmatmul.bf16.gmra.mxu2 %v844_v2 }
  0x44   :  { %663 = vmatmul.bf16.gmra.mxu3 %v848_v3 }
  0x51   :  { %521 = vmatmul.bf16.gmra.mxu0 %v852_v12 }
  0x52   :  { %570 = vmatmul.bf16.gmra.mxu1 %v856_v13 }
  0x53   :  { %619 = vmatmul.bf16.gmra.mxu2 %v860_v14 }
  0x54   :  { %668 = vmatmul.bf16.gmra.mxu3 %v864_v15 }
  0x61   :  { %526 = vmatmul.bf16.gmra.mxu0 %v868_v24 }
  0x62   :  { %575 = vmatmul.bf16.gmra.mxu1 %v872_v25 }
  0x63   :  { %624 = vmatmul.bf16.gmra.mxu2 %v876_v26 }
  0x64   :  { %673 = vmatmul.bf16.gmra.mxu3 %v880_v27 }
  0x71   :  { %531 = vmatmul.bf16.gmra.mxu0 %v884_v36 }
  0x72   :  { %580 = vmatmul.bf16.gmra.mxu1 %v888_v37 }
  0x73   :  { %629 = vmatmul.bf16.gmra.mxu2 %v892_v38 }
  0x74   :  { %678 = vmatmul.bf16.gmra.mxu3 %v896_v39 }
  0x81   :  { %536 = vmatmul.bf16.gmra.mxu0 %v900_v48 }
  0x82   :  { %585 = vmatmul.bf16.gmra.mxu1 %v904_v49 }
  0x83   :  { %634 = vmatmul.bf16.gmra.mxu2 %v908_v50 }
  0x84   :  { %683 = vmatmul.bf16.gmra.mxu3 %v912_v51 }
  0x91   :  { %541 = vmatmul.bf16.gmra.mxu0 %v916_v60 }
  0x92   :  { %590 = vmatmul.bf16.gmra.mxu1 %v920_v61 }
  0x93   :  { %639 = vmatmul.bf16.gmra.mxu2 %v924_v62 }
  0x94   :  { %688 = vmatmul.bf16.gmra.mxu3 %v928_v63 }
  0x9e   :  { %v507_v0 = vpop.f32.mrf.mxu0 }
  0x9f   :  { %v556_v1 = vpop.f32.mrf.mxu1 }
  0xa0   :  { %v557_v2 = vadd.f32 %v556_v1, %v507_v0 }
  0xa6   :  { %v605_v3 = vpop.f32.mrf.mxu2  ;;  %v509_v7 = vpop.f32.mrf.mxu0 }
  0xa7   :  { %v654_v4 = vpop.f32.mrf.mxu3  ;;  %v606_v5 = vadd.f32 %v605_v3, %v557_v2  ;;  %v558_v8 = vpop.f32.mrf.mxu1 }
  0xa8   :  { %v559_v12 = vadd.f32 %v558_v8, %v509_v7 }
  0xa9   :  { %v655_v9 = vadd.f32 %v654_v4, %v606_v5 }
  0xab   :  { %v749_v10 = vadd.f32 %v1433_v6, %v655_v9 }
  0xad   :  { %v765_v11 = vmax.f32 %v749_v10, 0.0 }
  0xae   :  { %v607_v13 = vpop.f32.mrf.mxu2  ;;  %v512_v16 = vpop.f32.mrf.mxu0 }
  0xaf   :  { %v656_v14 = vpop.f32.mrf.mxu3  ;;  %781 = vst [vmem:[%s1502_s3] sm:$0xff] %v765_v11  ;;  %v608_v15 = vadd.f32 %v607_v13, %v559_v12  ;;  %v561_v17 = vpop.f32.mrf.mxu1 }
  0xb0   :  { %v562_v20 = vadd.f32 %v561_v17, %v512_v16 }
  0xb1   :  { %v657_v18 = vadd.f32 %v656_v14, %v608_v15 }
  0xb3   :  { %v750_v19 = vadd.f32 %v1433_v6, %v657_v18 }
  0xb5   :  { %v766_v21 = vmax.f32 %v750_v19, 0.0 }
  0xb6   :  { %v610_v22 = vpop.f32.mrf.mxu2  ;;  %v514_v25 = vpop.f32.mrf.mxu0 }
  0xb7   :  { %v659_v23 = vpop.f32.mrf.mxu3  ;;  %782 = vst [vmem:[%s1502_s3 + $0x8] sm:$0xff] %v766_v21  ;;  %v611_v24 = vadd.f32 %v610_v22, %v562_v20  ;;  %v563_v26 = vpop.f32.mrf.mxu1 }
  0xb8   :  { %v564_v30 = vadd.f32 %v563_v26, %v514_v25 }
  0xb9   :  { %v660_v27 = vadd.f32 %v659_v23, %v611_v24 }
  0xbb   :  { %v751_v28 = vadd.f32 %v1433_v6, %v660_v27 }
  0xbd   :  { %v767_v29 = vmax.f32 %v751_v28, 0.0 }
  0xbe   :  { %v612_v31 = vpop.f32.mrf.mxu2  ;;  %v517_v34 = vpop.f32.mrf.mxu0 }
  0xbf   :  { %v661_v32 = vpop.f32.mrf.mxu3  ;;  %783 = vst [vmem:[%s1502_s3 + $0x10] sm:$0xff] %v767_v29  ;;  %v613_v33 = vadd.f32 %v612_v31, %v564_v30  ;;  %v566_v35 = vpop.f32.mrf.mxu1 }
  0xc0   :  { %v567_v38 = vadd.f32 %v566_v35, %v517_v34 }
  0xc1   :  { %v662_v36 = vadd.f32 %v661_v32, %v613_v33 }
  0xc3   :  { %v752_v37 = vadd.f32 %v1433_v6, %v662_v36 }
  0xc5   :  { %v768_v39 = vmax.f32 %v752_v37, 0.0 }
  0xc6   :  { %v615_v40 = vpop.f32.mrf.mxu2  ;;  %v519_v43 = vpop.f32.mrf.mxu0 }
  0xc7   :  { %v664_v41 = vpop.f32.mrf.mxu3  ;;  %784 = vst [vmem:[%s1502_s3 + $0x18] sm:$0xff] %v768_v39  ;;  %v616_v42 = vadd.f32 %v615_v40, %v567_v38  ;;  %v568_v44 = vpop.f32.mrf.mxu1 }
  0xc8   :  { %v569_v48 = vadd.f32 %v568_v44, %v519_v43 }
  0xc9   :  { %v665_v45 = vadd.f32 %v664_v41, %v616_v42 }
  0xcb   :  { %v753_v46 = vadd.f32 %v1433_v6, %v665_v45 }
  0xcd   :  { %v769_v47 = vmax.f32 %v753_v46, 0.0 }
  0xce   :  { %v617_v49 = vpop.f32.mrf.mxu2  ;;  %v522_v52 = vpop.f32.mrf.mxu0 }
  0xcf   :  { %v666_v50 = vpop.f32.mrf.mxu3  ;;  %785 = vst [vmem:[%s1502_s3 + $0x20] sm:$0xff] %v769_v47  ;;  %v618_v51 = vadd.f32 %v617_v49, %v569_v48  ;;  %v571_v53 = vpop.f32.mrf.mxu1 }
  0xd0   :  { %v572_v56 = vadd.f32 %v571_v53, %v522_v52 }
  0xd1   :  { %v667_v54 = vadd.f32 %v666_v50, %v618_v51 }
  0xd3   :  { %v754_v55 = vadd.f32 %v1433_v6, %v667_v54 }
  0xd5   :  { %v770_v57 = vmax.f32 %v754_v55, 0.0 }
  0xd6   :  { %v620_v58 = vpop.f32.mrf.mxu2  ;;  %v524_v61 = vpop.f32.mrf.mxu0 }
  0xd7   :  { %v669_v59 = vpop.f32.mrf.mxu3  ;;  %786 = vst [vmem:[%s1502_s3 + $0x28] sm:$0xff] %v770_v57  ;;  %v621_v60 = vadd.f32 %v620_v58, %v572_v56  ;;  %v573_v62 = vpop.f32.mrf.mxu1 }
  0xd8   :  { %v574_v2 = vadd.f32 %v573_v62, %v524_v61 }
  0xd9   :  { %v670_v63 = vadd.f32 %v669_v59, %v621_v60 }
  0xdb   :  { %v755_v0 = vadd.f32 %v1433_v6, %v670_v63 }
  0xdd   :  { %v771_v1 = vmax.f32 %v755_v0, 0.0 }
  0xde   :  { %v622_v3 = vpop.f32.mrf.mxu2  ;;  %v527_v7 = vpop.f32.mrf.mxu0 }
  0xdf   :  { %v671_v4 = vpop.f32.mrf.mxu3  ;;  %787 = vst [vmem:[%s1502_s3 + $0x30] sm:$0xff] %v771_v1  ;;  %v623_v5 = vadd.f32 %v622_v3, %v574_v2  ;;  %v576_v8 = vpop.f32.mrf.mxu1 }
  0xe0   :  { %v577_v11 = vadd.f32 %v576_v8, %v527_v7 }
  0xe1   :  { %v672_v9 = vadd.f32 %v671_v4, %v623_v5 }
  0xe3   :  { %v756_v10 = vadd.f32 %v1433_v6, %v672_v9 }
  0xe5   :  { %v772_v12 = vmax.f32 %v756_v10, 0.0 }
  0xe6   :  { %v625_v13 = vpop.f32.mrf.mxu2  ;;  %v529_v16 = vpop.f32.mrf.mxu0 }
  0xe7   :  { %v674_v14 = vpop.f32.mrf.mxu3  ;;  %788 = vst [vmem:[%s1502_s3 + $0x38] sm:$0xff] %v772_v12  ;;  %v626_v15 = vadd.f32 %v625_v13, %v577_v11  ;;  %v578_v17 = vpop.f32.mrf.mxu1 }
  0xe8   :  { %v579_v21 = vadd.f32 %v578_v17, %v529_v16 }
  0xe9   :  { %v675_v18 = vadd.f32 %v674_v14, %v626_v15 }
  0xeb   :  { %v757_v19 = vadd.f32 %v1433_v6, %v675_v18 }
  0xed   :  { %v773_v20 = vmax.f32 %v757_v19, 0.0 }
  0xee   :  { %v627_v22 = vpop.f32.mrf.mxu2  ;;  %v532_v25 = vpop.f32.mrf.mxu0 }
  0xef   :  { %v676_v23 = vpop.f32.mrf.mxu3  ;;  %789 = vst [vmem:[%s1502_s3 + $0x40] sm:$0xff] %v773_v20  ;;  %v628_v24 = vadd.f32 %v627_v22, %v579_v21  ;;  %v581_v26 = vpop.f32.mrf.mxu1 }
  0xf0   :  { %v582_v29 = vadd.f32 %v581_v26, %v532_v25 }
  0xf1   :  { %v677_v27 = vadd.f32 %v676_v23, %v628_v24 }
  0xf3   :  { %v758_v28 = vadd.f32 %v1433_v6, %v677_v27 }
  0xf5   :  { %v774_v30 = vmax.f32 %v758_v28, 0.0 }
  0xf6   :  { %v630_v31 = vpop.f32.mrf.mxu2  ;;  %v534_v34 = vpop.f32.mrf.mxu0 }
  0xf7   :  { %v679_v32 = vpop.f32.mrf.mxu3  ;;  %790 = vst [vmem:[%s1502_s3 + $0x48] sm:$0xff] %v774_v30  ;;  %v631_v33 = vadd.f32 %v630_v31, %v582_v29  ;;  %v583_v35 = vpop.f32.mrf.mxu1 }
  0xf8   :  { %v584_v39 = vadd.f32 %v583_v35, %v534_v34 }
  0xf9   :  { %v680_v36 = vadd.f32 %v679_v32, %v631_v33 }
  0xfb   :  { %v759_v37 = vadd.f32 %v1433_v6, %v680_v36 }
  0xfd   :  { %v775_v38 = vmax.f32 %v759_v37, 0.0 }
  0xfe   :  { %v632_v40 = vpop.f32.mrf.mxu2  ;;  %v537_v43 = vpop.f32.mrf.mxu0 }
  0xff   :  { %v681_v41 = vpop.f32.mrf.mxu3  ;;  %791 = vst [vmem:[%s1502_s3 + $0x50] sm:$0xff] %v775_v38  ;;  %v633_v42 = vadd.f32 %v632_v40, %v584_v39  ;;  %v586_v44 = vpop.f32.mrf.mxu1 }
 0x100   :  { %v587_v47 = vadd.f32 %v586_v44, %v537_v43 }
 0x101   :  { %v682_v45 = vadd.f32 %v681_v41, %v633_v42 }
 0x103   :  { %v760_v46 = vadd.f32 %v1433_v6, %v682_v45 }
 0x105   :  { %v776_v48 = vmax.f32 %v760_v46, 0.0 }
 0x106   :  { %v635_v49 = vpop.f32.mrf.mxu2  ;;  %v539_v52 = vpop.f32.mrf.mxu0 }
 0x107   :  { %v684_v50 = vpop.f32.mrf.mxu3  ;;  %792 = vst [vmem:[%s1502_s3 + $0x58] sm:$0xff] %v776_v48  ;;  %v636_v51 = vadd.f32 %v635_v49, %v587_v47  ;;  %v588_v53 = vpop.f32.mrf.mxu1 }
 0x108   :  { %v589_v57 = vadd.f32 %v588_v53, %v539_v52 }
 0x109   :  { %v685_v54 = vadd.f32 %v684_v50, %v636_v51 }
 0x10b   :  { %v761_v55 = vadd.f32 %v1433_v6, %v685_v54 }
 0x10d   :  { %v777_v56 = vmax.f32 %v761_v55, 0.0 }
 0x10e   :  { %v637_v58 = vpop.f32.mrf.mxu2  ;;  %v542_v61 = vpop.f32.mrf.mxu0 }
 0x10f   :  { %v686_v59 = vpop.f32.mrf.mxu3  ;;  %793 = vst [vmem:[%s1502_s3 + $0x60] sm:$0xff] %v777_v56  ;;  %v638_v60 = vadd.f32 %v637_v58, %v589_v57  ;;  %v591_v62 = vpop.f32.mrf.mxu1 }
 0x110   :  { %v592_v1 = vadd.f32 %v591_v62, %v542_v61 }
 0x111   :  { %v687_v63 = vadd.f32 %v686_v59, %v638_v60 }
 0x113   :  { %v762_v0 = vadd.f32 %v1433_v6, %v687_v63 }
 0x115   :  { %v778_v2 = vmax.f32 %v762_v0, 0.0 }
 0x116   :  { %v640_v3 = vpop.f32.mrf.mxu2  ;;  %v544_v8 = vpop.f32.mrf.mxu0 }
 0x117   :  { %v689_v4 = vpop.f32.mrf.mxu3  ;;  %794 = vst [vmem:[%s1502_s3 + $0x68] sm:$0xff] %v778_v2  ;;  %v641_v5 = vadd.f32 %v640_v3, %v592_v1  ;;  %v593_v9 = vpop.f32.mrf.mxu1 }
 0x118   :  { %v594_v12 = vadd.f32 %v593_v9, %v544_v8 }
 0x119   :  { %v690_v7 = vadd.f32 %v689_v4, %v641_v5 }
 0x11b   :  { %v763_v10 = vadd.f32 %v1433_v6, %v690_v7 }
 0x11d   :  { %v779_v11 = vmax.f32 %v763_v10, 0.0 }
 0x11e   :  { %v642_v13 = vpop.f32.mrf.mxu2 }
 0x11f   :  { %795 = vst [vmem:[%s1502_s3 + $0x70] sm:$0xff] %v779_v11  ;;  %v643_v14 = vadd.f32 %v642_v13, %v594_v12  ;;  %v691_v15 = vpop.f32.mrf.mxu3 }
 0x121   :  { %v692_v16 = vadd.f32 %v691_v15, %v643_v14 }
 0x123   :  { %v764_v17 = vadd.f32 %v1433_v6, %v692_v16 }
 0x125   :  { %v780_v18 = vmax.f32 %v764_v17, 0.0 }
 0x127   :  { %796 = vst [vmem:[%s1502_s3 + $0x78] sm:$0xff] %v780_v18 }

// kernel: hourglass_fwd.41
= control target key start
LH: loop header
LB: loop body
LE: loop exit
PB: predicated region body
PF: predicated region fallthrough
CT: control target
= control target key end

     0   :  { %s542_s1 = inlined_call_operand.vmem [shape: bf16[128,128], index: 1, kind: input, shape index: {}]   ;;  %s543_s2 = inlined_call_operand.vmem [shape: f32[1,128], index: 2, kind: input, shape index: {}]   ;;  %s544_s0 = inlined_call_operand.vmem [shape: bf16[128,128], index: 0, kind: input, shape index: {}]   ;;  %s545_s3 = inlined_call_operand.vmem [shape: f32[128,128], index: 3, kind: output, shape index: {}]  }
   0x1   :  { %v397_v0 = vld [vmem:[%s542_s1 + $0x38] sm:$0xff]  ;;  %v396_v1 = vld [vmem:[%s542_s1 + $0x30] sm:$0xff]  ;;  %v395_v2 = vld [vmem:[%s542_s1 + $0x28] sm:$0xff] }
   0x2   :  { %178 = vmatpush.bf16.msra.mxu0 %v397_v0  ;;  %398 = vmatpush.bf16.msra.mxu1 %v397_v0  ;;  %v394_v3 = vld [vmem:[%s542_s1 + $0x20] sm:$0xff]  ;;  %v393_v4 = vld [vmem:[%s542_s1 + $0x18] sm:$0xff]  ;;  %v392_v5 = vld [vmem:[%s542_s1 + $0x10] sm:$0xff] }
   0x3   :  { %399 = vmatpush.bf16.msra.mxu2 %v397_v0  ;;  %400 = vmatpush.bf16.msra.mxu3 %v397_v0  ;;  %v391_v6 = vld [vmem:[%s542_s1 + $0x8] sm:$0xff]  ;;  %v390_v7 = vld [vmem:[%s542_s1] sm:$0xff]  ;;  %v384_v9 = vld [vmem:[%s544_s0 + $0x10] sm:$0xff] }
   0x4   :  { %v382_v8 = vld [vmem:[%s544_s0] sm:$0xff]  ;;  %v388_v11 = vld [vmem:[%s544_s0 + $0x30] sm:$0xff]  ;;  %v383_v12 = vld [vmem:[%s544_s0 + $0x8] sm:$0xff] }
   0x5   :  { %v386_v10 = vld [vmem:[%s544_s0 + $0x20] sm:$0xff]  ;;  %v385_v13 = vld [vmem:[%s544_s0 + $0x18] sm:$0xff]  ;;  %v387_v14 = vld [vmem:[%s544_s0 + $0x28] sm:$0xff] }
   0x6   :  { %179 = vmatpush.bf16.msra.mxu0 %v396_v1  ;;  %401 = vmatpush.bf16.msra.mxu1 %v396_v1  ;;  %v389_v15 = vld [vmem:[%s544_s0 + $0x38] sm:$0xff]  ;;  %v422_v16 = vld [vmem:[%s543_s2] ss:$0 sm:$0xff] }
   0x7   :  { %402 = vmatpush.bf16.msra.mxu2 %v396_v1  ;;  %403 = vmatpush.bf16.msra.mxu3 %v396_v1 }
   0xa   :  { %180 = vmatpush.bf16.msra.mxu0 %v395_v2  ;;  %404 = vmatpush.bf16.msra.mxu1 %v395_v2 }
   0xb   :  { %405 = vmatpush.bf16.msra.mxu2 %v395_v2  ;;  %406 = vmatpush.bf16.msra.mxu3 %v395_v2 }
   0xe   :  { %181 = vmatpush.bf16.msra.mxu0 %v394_v3  ;;  %407 = vmatpush.bf16.msra.mxu1 %v394_v3 }
   0xf   :  { %408 = vmatpush.bf16.msra.mxu2 %v394_v3  ;;  %409 = vmatpush.bf16.msra.mxu3 %v394_v3 }
  0x12   :  { %182 = vmatpush.bf16.msra.mxu0 %v393_v4  ;;  %410 = vmatpush.bf16.msra.mxu1 %v393_v4 }
  0x13   :  { %411 = vmatpush.bf16.msra.mxu2 %v393_v4  ;;  %412 = vmatpush.bf16.msra.mxu3 %v393_v4 }
  0x16   :  { %183 = vmatpush.bf16.msra.mxu0 %v392_v5  ;;  %413 = vmatpush.bf16.msra.mxu1 %v392_v5 }
  0x17   :  { %414 = vmatpush.bf16.msra.mxu2 %v392_v5  ;;  %415 = vmatpush.bf16.msra.mxu3 %v392_v5 }
  0x1a   :  { %184 = vmatpush.bf16.msra.mxu0 %v391_v6  ;;  %416 = vmatpush.bf16.msra.mxu1 %v391_v6 }
  0x1b   :  { %417 = vmatpush.bf16.msra.mxu2 %v391_v6  ;;  %418 = vmatpush.bf16.msra.mxu3 %v391_v6 }
  0x1e   :  { %185 = vmatpush.bf16.msra.mxu0 %v390_v7  ;;  %419 = vmatpush.bf16.msra.mxu1 %v390_v7 }
  0x1f   :  { %420 = vmatpush.bf16.msra.mxu2 %v390_v7  ;;  %421 = vmatpush.bf16.msra.mxu3 %v390_v7 }
  0x21   :  { %186 = vmatmul.bf16.vlgmr.msra.gmra.mxu0 %v382_v8  ;;  %196 = vmatmul.bf16.vlgmr.msra.gmra.mxu1 %v384_v9 }
  0x22   :  { %206 = vmatmul.bf16.vlgmr.msra.gmra.mxu2 %v386_v10  ;;  %216 = vmatmul.bf16.vlgmr.msra.gmra.mxu3 %v388_v11 }
  0x31   :  { %191 = vmatmul.bf16.gmra.mxu0 %v383_v12  ;;  %201 = vmatmul.bf16.gmra.mxu1 %v385_v13 }
  0x32   :  { %211 = vmatmul.bf16.gmra.mxu2 %v387_v14  ;;  %221 = vmatmul.bf16.gmra.mxu3 %v389_v15 }
  0x9e   :  { %v187_v17 = vpop.f32.mrf.mxu0  ;;  %v197_v18 = vpop.f32.mrf.mxu1 }
  0x9f   :  { %v282_v19 = vadd.f32 %v422_v16, %v187_v17  ;;  %v286_v20 = vadd.f32 %v422_v16, %v197_v18 }
  0xa1   :  { %298 = vst [vmem:[%s545_s3] sm:$0xff] %v282_v19 }
  0xa2   :  { %302 = vst [vmem:[%s545_s3 + $0x20] sm:$0xff] %v286_v20 }
  0xa5   :  { %v207_v21 = vpop.f32.mrf.mxu2  ;;  %v217_v22 = vpop.f32.mrf.mxu3 }
  0xa6   :  { %v290_v23 = vadd.f32 %v422_v16, %v207_v21  ;;  %v294_v24 = vadd.f32 %v422_v16, %v217_v22  ;;  %v189_v25 = vpop.f32.mrf.mxu0  ;;  %v199_v26 = vpop.f32.mrf.mxu1 }
  0xa7   :  { %v283_v27 = vadd.f32 %v422_v16, %v189_v25  ;;  %v287_v28 = vadd.f32 %v422_v16, %v199_v26 }
  0xa8   :  { %306 = vst [vmem:[%s545_s3 + $0x40] sm:$0xff] %v290_v23 }
  0xa9   :  { %310 = vst [vmem:[%s545_s3 + $0x60] sm:$0xff] %v294_v24 }
  0xaa   :  { %299 = vst [vmem:[%s545_s3 + $0x8] sm:$0xff] %v283_v27 }
  0xab   :  { %303 = vst [vmem:[%s545_s3 + $0x28] sm:$0xff] %v287_v28 }
  0xad   :  { %v209_v29 = vpop.f32.mrf.mxu2  ;;  %v219_v30 = vpop.f32.mrf.mxu3 }
  0xae   :  { %v291_v31 = vadd.f32 %v422_v16, %v209_v29  ;;  %v295_v32 = vadd.f32 %v422_v16, %v219_v30  ;;  %v192_v33 = vpop.f32.mrf.mxu0  ;;  %v202_v34 = vpop.f32.mrf.mxu1 }
  0xaf   :  { %v284_v35 = vadd.f32 %v422_v16, %v192_v33  ;;  %v288_v36 = vadd.f32 %v422_v16, %v202_v34 }
  0xb0   :  { %307 = vst [vmem:[%s545_s3 + $0x48] sm:$0xff] %v291_v31 }
  0xb1   :  { %311 = vst [vmem:[%s545_s3 + $0x68] sm:$0xff] %v295_v32 }
  0xb2   :  { %300 = vst [vmem:[%s545_s3 + $0x10] sm:$0xff] %v284_v35 }
  0xb3   :  { %304 = vst [vmem:[%s545_s3 + $0x30] sm:$0xff] %v288_v36 }
  0xb5   :  { %v212_v37 = vpop.f32.mrf.mxu2  ;;  %v222_v38 = vpop.f32.mrf.mxu3 }
  0xb6   :  { %v292_v39 = vadd.f32 %v422_v16, %v212_v37  ;;  %v296_v40 = vadd.f32 %v422_v16, %v222_v38  ;;  %v194_v41 = vpop.f32.mrf.mxu0  ;;  %v204_v42 = vpop.f32.mrf.mxu1 }
  0xb7   :  { %v285_v43 = vadd.f32 %v422_v16, %v194_v41  ;;  %v289_v44 = vadd.f32 %v422_v16, %v204_v42 }
  0xb8   :  { %308 = vst [vmem:[%s545_s3 + $0x50] sm:$0xff] %v292_v39 }
  0xb9   :  { %312 = vst [vmem:[%s545_s3 + $0x70] sm:$0xff] %v296_v40 }
  0xba   :  { %301 = vst [vmem:[%s545_s3 + $0x18] sm:$0xff] %v285_v43 }
  0xbb   :  { %305 = vst [vmem:[%s545_s3 + $0x38] sm:$0xff] %v289_v44 }
  0xbd   :  { %v214_v45 = vpop.f32.mrf.mxu2  ;;  %v224_v46 = vpop.f32.mrf.mxu3 }
  0xbe   :  { %v293_v47 = vadd.f32 %v422_v16, %v214_v45  ;;  %v297_v48 = vadd.f32 %v422_v16, %v224_v46 }
  0xc0   :  { %309 = vst [vmem:[%s545_s3 + $0x58] sm:$0xff] %v293_v47 }
  0xc1   :  { %313 = vst [vmem:[%s545_s3 + $0x78] sm:$0xff] %v297_v48 }

// kernel: hourglass_fwd.45
= control target key start
LH: loop header
LB: loop body
LE: loop exit
PB: predicated region body
PF: predicated region fallthrough
CT: control target
= control target key end

     0   :  { %s106_s0 = inlined_call_operand.vmem [shape: f32[32,128], index: 0, kind: input, shape index: {}]   ;;  %s107_s1 = inlined_call_operand.vmem [shape: f32[32,128], index: 1, kind: output, shape index: {}]  }
   0x1   :  { %v10_v0 = vld [vmem:[%s106_s0 + $0x10] sm:$0xff]  ;;  %v8_v1 = vld [vmem:[%s106_s0] sm:$0xff]  ;;  %v11_v2 = vld [vmem:[%s106_s0 + $0x18] sm:$0xff] }
   0x2   :  { %16 = vmax.xlane.f32.xlu1 %v10_v0  ;;  %12 = vmax.xlane.f32.xlu0 %v8_v1  ;;  %v9_v3 = vld [vmem:[%s106_s0 + $0x8] sm:$0xff] }
   0xa   :  { %18 = vmax.xlane.f32.xlu1 %v11_v2  ;;  %14 = vmax.xlane.f32.xlu0 %v9_v3 }
  0x75   :  { %v17_v4 = vpop.xlane.xlu1 %16  ;;  %v13_v5 = vpop.xlane.xlu0 %12 }
  0x76   :  { %v22_v6 = vsub.f32 %v10_v0, %v17_v4  ;;  %v20_v7 = vsub.f32 %v8_v1, %v13_v5 }
  0x78   :  { %v28_v8 = vmul.f32 1.442695, %v22_v6  ;;  %v24_v9 = vmul.f32 1.442695, %v20_v7 }
  0x7a   :  { %56 = vpow2.f32 %v28_v8 }
  0x7b   :  { %58 = vpow2.f32 %v24_v9 }
  0x7d   :  { %v19_v10 = vpop.xlane.xlu1 %18  ;;  %v15_v11 = vpop.xlane.xlu0 %14 }
  0x7e   :  { %v23_v12 = vsub.f32 %v11_v2, %v19_v10  ;;  %v21_v13 = vsub.f32 %v9_v3, %v15_v11 }
  0x80   :  { %v57_v14 = vpop.eup %56  ;;  %v30_v15 = vmul.f32 1.442695, %v23_v12  ;;  %v26_v16 = vmul.f32 1.442695, %v21_v13 }
  0x81   :  { %v59_v17 = vpop.eup %58  ;;  %36 = vadd.xlane.f32.xlu0 %v57_v14 }
  0x82   :  { %60 = vpow2.f32 %v30_v15  ;;  %32 = vadd.xlane.f32.xlu2 %v59_v17 }
  0x83   :  { %62 = vpow2.f32 %v26_v16 }
  0x88   :  { %v61_v18 = vpop.eup %60 }
  0x89   :  { %v63_v19 = vpop.eup %62  ;;  %38 = vadd.xlane.f32.xlu1 %v61_v18 }
  0x8a   :  { %34 = vadd.xlane.f32.xlu2 %v63_v19 }
  0xf4   :  { %v37_v20 = vpop.xlane.xlu0 %36 }
  0xf5   :  { %v33_v21 = vpop.xlane.xlu2 %32  ;;  %64 = vrcp.f32 %v37_v20 }
  0xf6   :  { %66 = vrcp.f32 %v33_v21 }
  0xfb   :  { %v65_v22 = vpop.eup %64 }
  0xfc   :  { %v67_v23 = vpop.eup %66  ;;  %v46_v24 = vmul.f32 %v65_v22, %v57_v14  ;;  %v39_v25 = vpop.xlane.xlu1 %38 }
  0xfd   :  { %v44_v26 = vmul.f32 %v67_v23, %v59_v17  ;;  %68 = vrcp.f32 %v39_v25  ;;  %v35_v27 = vpop.xlane.xlu2 %34 }
  0xfe   :  { %50 = vst [vmem:[%s107_s1 + $0x10] sm:$0xff] %v46_v24  ;;  %70 = vrcp.f32 %v35_v27 }
  0xff   :  { %48 = vst [vmem:[%s107_s1] sm:$0xff] %v44_v26 }
 0x103   :  { %v69_v28 = vpop.eup %68 }
 0x104   :  { %v71_v29 = vpop.eup %70  ;;  %v47_v30 = vmul.f32 %v69_v28, %v61_v18 }
 0x105   :  { %v45_v31 = vmul.f32 %v71_v29, %v63_v19 }
 0x106   :  { %51 = vst [vmem:[%s107_s1 + $0x18] sm:$0xff] %v47_v30 }
 0x107   :  { %49 = vst [vmem:[%s107_s1 + $0x8] sm:$0xff] %v45_v31 }

// kernel: hourglass_fwd.44
= control target key start
LH: loop header
LB: loop body
LE: loop exit
PB: predicated region body
PF: predicated region fallthrough
CT: control target
= control target key end

     0   :  { %s1206_s9 = smov 0   ;;  %s1208_s10 = smov 0   ;;  %s1311_s0 = inlined_call_operand.vmem [shape: bf16[2,16,768], index: 0, kind: input, shape index: {}]   ;;  %s1312_s1 = inlined_call_operand.vmem [shape: bf16[2,768,128], index: 1, kind: input, shape index: {}]   ;;  %s1313_s2 = inlined_call_operand.vmem [shape: f32[2,16,128], index: 2, kind: output, shape index: {}]  }
   0x1   :  { %s1210_s11 = smov 0  }
   0x2 LB: > { %s31_s12 = sadd.s32 1, %s1185_s10  ;;  %p863_p0 = scmp.ge.s32.totalorder %s1189_s11, 1  ;;  %s1189_s11 = sphi %s1210_s11, %s12_s11   ;;  %s1185_s10 = sphi %s1208_s10, %s1315_s10   ;;  %s1181_s9 = sphi %s1206_s9, %s1314_s9  }
   0x3   : > { %p33_p1 = scmp.ge.s32.totalorder %s31_s12, 2  ;;  %p158_p2 = scmp.lt.s32.totalorder %s1189_s11, 3 }
   0x5   : > { %s1317_s12 = smov (%p33_p1, %s31_s12), 0  ;;  %p159_p3 = pnand %p863_p0, %p158_p2 }
   0x6   : > { %p201_p4 = scmp.lt.s32.totalorder (!%p159_p3), %s1181_s9, 1 }
   0x7   : > { %162 = sbr.rel (%p159_p3) target bundleno = 219 (0xdb), region = 28 }
   0xc   : > { %s1319_s9 = smov (!%p201_p4, %s1181_s9), 1 }
   0xd   : > { %s1142_s13 = smul.u32 384, %s1319_s9  ;;  %s1086_s21 = sshll.u32 %s1319_s9, 4 }
   0xe   : > { %s1141_s17 = smul.u32 48, %s1319_s9  ;;  %s230_s24 = scalar_lea.vmem %s1313_s2, %s1086_s21 }
   0xf   : > { %s1230_s16 = scalar_lea.vmem %s1312_s1, %s1142_s13 }
  0x10   : > { %v1100_v0 = vld [vmem:[%s1230_s16 + $0x38] sm:$0xff]  ;;  %v1099_v4 = vld [vmem:[%s1230_s16 + $0x30] sm:$0xff]  ;;  %v1098_v8 = vld [vmem:[%s1230_s16 + $0x28] sm:$0xff]  ;;  %s1266_s20 = scalar_lea.vmem %s1311_s0, %s1141_s17 }
  0x11   : > { %v1108_v1 = vld [vmem:[%s1230_s16 + $0x78] sm:$0xff]  ;;  %652 = vmatpush.bf16.msra.mxu0 %v1100_v0  ;;  %v1107_v5 = vld [vmem:[%s1230_s16 + $0x70] sm:$0xff]  ;;  %v1106_v9 = vld [vmem:[%s1230_s16 + $0x68] sm:$0xff] }
  0x12   : > { %v1116_v2 = vld [vmem:[%s1230_s16 + $0xb8] sm:$0xff]  ;;  %666 = vmatpush.bf16.msra.mxu1 %v1108_v1  ;;  %v1115_v6 = vld [vmem:[%s1230_s16 + $0xb0] sm:$0xff]  ;;  %v1114_v10 = vld [vmem:[%s1230_s16 + $0xa8] sm:$0xff] }
  0x13   : > { %v1124_v3 = vld [vmem:[%s1230_s16 + $0xf8] sm:$0xff]  ;;  %680 = vmatpush.bf16.msra.mxu2 %v1116_v2  ;;  %v1123_v7 = vld [vmem:[%s1230_s16 + $0xf0] sm:$0xff]  ;;  %v1122_v11 = vld [vmem:[%s1230_s16 + $0xe8] sm:$0xff] }
  0x14   : > { %694 = vmatpush.bf16.msra.mxu3 %v1124_v3  ;;  %v1097_v12 = vld [vmem:[%s1230_s16 + $0x20] sm:$0xff]  ;;  %v1096_v16 = vld [vmem:[%s1230_s16 + $0x18] sm:$0xff]  ;;  %v1095_v20 = vld [vmem:[%s1230_s16 + $0x10] sm:$0xff] }
  0x15   : > { %653 = vmatpush.bf16.msra.mxu0 %v1099_v4  ;;  %v1105_v13 = vld [vmem:[%s1230_s16 + $0x60] sm:$0xff]  ;;  %v1104_v17 = vld [vmem:[%s1230_s16 + $0x58] sm:$0xff]  ;;  %v1103_v21 = vld [vmem:[%s1230_s16 + $0x50] sm:$0xff] }
  0x16   : > { %667 = vmatpush.bf16.msra.mxu1 %v1107_v5  ;;  %v1113_v14 = vld [vmem:[%s1230_s16 + $0xa0] sm:$0xff]  ;;  %v1112_v18 = vld [vmem:[%s1230_s16 + $0x98] sm:$0xff]  ;;  %v1111_v22 = vld [vmem:[%s1230_s16 + $0x90] sm:$0xff] }
  0x17   : > { %681 = vmatpush.bf16.msra.mxu2 %v1115_v6  ;;  %v1121_v15 = vld [vmem:[%s1230_s16 + $0xe0] sm:$0xff]  ;;  %v1120_v19 = vld [vmem:[%s1230_s16 + $0xd8] sm:$0xff]  ;;  %v1119_v23 = vld [vmem:[%s1230_s16 + $0xd0] sm:$0xff] }
  0x18   : > { %695 = vmatpush.bf16.msra.mxu3 %v1123_v7  ;;  %v1094_v24 = vld [vmem:[%s1230_s16 + $0x8] sm:$0xff]  ;;  %v1093_v28 = vld [vmem:[%s1230_s16] sm:$0xff]  ;;  %v1132_v31 = vld [vmem:[%s1230_s16 + $0x138] sm:$0xff] }
  0x19   : > { %654 = vmatpush.bf16.msra.mxu0 %v1098_v8  ;;  %v1102_v25 = vld [vmem:[%s1230_s16 + $0x48] sm:$0xff]  ;;  %v1101_v29 = vld [vmem:[%s1230_s16 + $0x40] sm:$0xff]  ;;  %v1090_v33 = vld [vmem:[%s1266_s20 + $0x14] sm:$0xf0] }
  0x1a   : > { %668 = vmatpush.bf16.msra.mxu1 %v1106_v9  ;;  %v1110_v26 = vld [vmem:[%s1230_s16 + $0x88] sm:$0xff]  ;;  %v1109_v30 = vld [vmem:[%s1230_s16 + $0x80] sm:$0xff]  ;;  %v872_v35 = vld [vmem:[%s1266_s20 + $0x18] sm:$0xf0] }
  0x1b   : > { %682 = vmatpush.bf16.msra.mxu2 %v1114_v10  ;;  %v1118_v27 = vld [vmem:[%s1230_s16 + $0xc8] sm:$0xff]  ;;  %v870_v32 = vld [vmem:[%s1266_s20] sm:$0xf]  ;;  %v1087_v34 = vld [vmem:[%s1266_s20 + $0x4] sm:$0xf] }
  0x1c   : > { %696 = vmatpush.bf16.msra.mxu3 %v1122_v11  ;;  %v1140_v36 = vld [vmem:[%s1230_s16 + $0x178] sm:$0xff]  ;;  %v878_v37 = vld [vmem:[%s1266_s20 + $0x8] sm:$0xf]  ;;  %v1091_v38 = vld [vmem:[%s1266_s20 + $0x1c] sm:$0xf0]  ;;  %v871_v42 = vor.u32 %v1090_v33, %v870_v32  ;;  %v875_v43 = vor.u32 %v1087_v34, %v872_v35 }
  0x1d   : > { %655 = vmatpush.bf16.msra.mxu0 %v1097_v12  ;;  %v1117_v39 = vld [vmem:[%s1230_s16 + $0xc0] sm:$0xff]  ;;  %v1088_v40 = vld [vmem:[%s1266_s20 + $0xc] sm:$0xf]  ;;  %v879_v44 = vor.u32 %v1091_v38, %v878_v37  ;;  %v1131_v45 = vld [vmem:[%s1230_s16 + $0x130] sm:$0xff] }
  0x1e   : > { %669 = vmatpush.bf16.msra.mxu1 %v1105_v13  ;;  %v880_v41 = vld [vmem:[%s1266_s20 + $0x20] sm:$0xf0]  ;;  %v1139_v47 = vld [vmem:[%s1230_s16 + $0x170] sm:$0xff]  ;;  %v1130_v48 = vld [vmem:[%s1230_s16 + $0x128] sm:$0xff] }
  0x1f   : > { %683 = vmatpush.bf16.msra.mxu2 %v1113_v14  ;;  %v883_v46 = vor.u32 %v1088_v40, %v880_v41  ;;  %v1138_v49 = vld [vmem:[%s1230_s16 + $0x168] sm:$0xff]  ;;  %v1129_v50 = vld [vmem:[%s1230_s16 + $0x120] sm:$0xff]  ;;  %v1128_v52 = vld [vmem:[%s1230_s16 + $0x118] sm:$0xff] }
  0x20   : > { %697 = vmatpush.bf16.msra.mxu3 %v1121_v15  ;;  %v1137_v51 = vld [vmem:[%s1230_s16 + $0x160] sm:$0xff]  ;;  %v1136_v53 = vld [vmem:[%s1230_s16 + $0x158] sm:$0xff]  ;;  %v1127_v54 = vld [vmem:[%s1230_s16 + $0x110] sm:$0xff] }
  0x21   : > { %656 = vmatpush.bf16.msra.mxu0 %v1096_v16  ;;  %v1135_v55 = vld [vmem:[%s1230_s16 + $0x150] sm:$0xff]  ;;  %v1126_v56 = vld [vmem:[%s1230_s16 + $0x108] sm:$0xff]  ;;  %v1125_v58 = vld [vmem:[%s1230_s16 + $0x100] sm:$0xff] }
  0x22   : > { %670 = vmatpush.bf16.msra.mxu1 %v1104_v17  ;;  %v1134_v57 = vld [vmem:[%s1230_s16 + $0x148] sm:$0xff]  ;;  %v886_v59 = vld [vmem:[%s1266_s20 + $0x10] sm:$0xf]  ;;  %v1133_v61 = vld [vmem:[%s1230_s16 + $0x140] sm:$0xff] }
  0x23   : > { %684 = vmatpush.bf16.msra.mxu2 %v1112_v18  ;;  %v1092_v60 = vld [vmem:[%s1266_s20 + $0x24] sm:$0xf0]  ;;  %v1089_v62 = vld [vmem:[%s1266_s20 + $0x14] sm:$0xf]  ;;  %v888_v63 = vld [vmem:[%s1266_s20 + $0x28] sm:$0xf0] }
  0x24   : > { %698 = vmatpush.bf16.msra.mxu3 %v1120_v19  ;;  %v887_v0 = vor.u32 %v1092_v60, %v886_v59  ;;  %v891_v1 = vor.u32 %v1089_v62, %v888_v63 }
  0x25   : > { %657 = vmatpush.bf16.msra.mxu0 %v1095_v20 }
  0x26   : > { %671 = vmatpush.bf16.msra.mxu1 %v1103_v21 }
  0x27   : > { %685 = vmatpush.bf16.msra.mxu2 %v1111_v22 }
  0x28   : > { %699 = vmatpush.bf16.msra.mxu3 %v1119_v23 }
  0x29   : > { %658 = vmatpush.bf16.msra.mxu0 %v1094_v24 }
  0x2a   : > { %672 = vmatpush.bf16.msra.mxu1 %v1102_v25 }
  0x2b   : > { %686 = vmatpush.bf16.msra.mxu2 %v1110_v26 }
  0x2c   : > { %700 = vmatpush.bf16.msra.mxu3 %v1118_v27 }
  0x2d   : > { %659 = vmatpush.bf16.msra.mxu0 %v1093_v28 }
  0x2e   : > { %673 = vmatpush.bf16.msra.mxu1 %v1101_v29 }
  0x2f   : > { %687 = vmatpush.bf16.msra.mxu2 %v1109_v30 }
  0x30   : > { %701 = vmatpush.bf16.msra.mxu3 %v1117_v39  ;;  %660 = vmatmul.bf16.vlgmr.msra.gmra.mxu0 %v871_v42 }
  0x31   : > { %708 = vmatpush.bf16.msrb.mxu0 %v1132_v31  ;;  %674 = vmatmul.bf16.vlgmr.msra.gmra.mxu1 %v875_v43 }
  0x32   : > { %722 = vmatpush.bf16.msrb.mxu1 %v1140_v36  ;;  %688 = vmatmul.bf16.vlgmr.msra.gmra.mxu2 %v879_v44 }
  0x33   : > { %702 = vmatmul.bf16.vlgmr.msra.gmra.mxu3 %v883_v46 }
  0x35   : > { %709 = vmatpush.bf16.msrb.mxu0 %v1131_v45 }
  0x36   : > { %723 = vmatpush.bf16.msrb.mxu1 %v1139_v47 }
  0x39   : > { %710 = vmatpush.bf16.msrb.mxu0 %v1130_v48 }
  0x3a   : > { %724 = vmatpush.bf16.msrb.mxu1 %v1138_v49 }
  0x3d   : > { %711 = vmatpush.bf16.msrb.mxu0 %v1129_v50 }
  0x3e   : > { %725 = vmatpush.bf16.msrb.mxu1 %v1137_v51 }
  0x41   : > { %712 = vmatpush.bf16.msrb.mxu0 %v1128_v52 }
  0x42   : > { %726 = vmatpush.bf16.msrb.mxu1 %v1136_v53 }
  0x45   : > { %713 = vmatpush.bf16.msrb.mxu0 %v1127_v54 }
  0x46   : > { %727 = vmatpush.bf16.msrb.mxu1 %v1135_v55 }
  0x49   : > { %714 = vmatpush.bf16.msrb.mxu0 %v1126_v56 }
  0x4a   : > { %728 = vmatpush.bf16.msrb.mxu1 %v1134_v57 }
  0x4d   : > { %715 = vmatpush.bf16.msrb.mxu0 %v1125_v58 }
  0x4e   : > { %729 = vmatpush.bf16.msrb.mxu1 %v1133_v61 }
  0x50   : > { %716 = vmatmul.bf16.vlgmr.msrb.gmra.mxu0 %v887_v0 }
  0x51   : > { %730 = vmatmul.bf16.vlgmr.msrb.gmra.mxu1 %v891_v1 }
  0xad   : > { %v661_v2 = vpop.f32.mrf.mxu0 }
  0xae   : > { %v675_v3 = vpop.f32.mrf.mxu1 }
  0xaf   : > { %v676_v5 = vadd.f32 %v675_v3, %v661_v2 }
  0xb5   : > { %v689_v4 = vpop.f32.mrf.mxu2  ;;  %v663_v6 = vpop.f32.mrf.mxu0 }
  0xb6   : > { %v677_v7 = vpop.f32.mrf.mxu1  ;;  %v703_v8 = vpop.f32.mrf.mxu3  ;;  %v690_v9 = vadd.f32 %v689_v4, %v676_v5 }
  0xb7   : > { %v678_v11 = vadd.f32 %v677_v7, %v663_v6 }
  0xb8   : > { %v704_v10 = vadd.f32 %v703_v8, %v690_v9 }
  0xbd   : > { %v691_v12 = vpop.f32.mrf.mxu2 }
  0xbe   : > { %v692_v16 = vadd.f32 %v691_v12, %v678_v11  ;;  %v705_v18 = vpop.f32.mrf.mxu3 }
  0xc0   : > { %v706_v19 = vadd.f32 %v705_v18, %v692_v16 }
  0xcd   : > { %v717_v13 = vpop.f32.mrf.mxu0 }
  0xce   : > { %v718_v14 = vadd.f32 %v717_v13, %v704_v10  ;;  %v731_v15 = vpop.f32.mrf.mxu1 }
  0xd0   : > { %v732_v17 = vadd.f32 %v731_v15, %v718_v14 }
  0xd2   : > { %736 = vst [vmem:[%s230_s24] sm:$0xff] %v732_v17 }
  0xd5   : > { %v719_v20 = vpop.f32.mrf.mxu0 }
  0xd6   : > { %v720_v21 = vadd.f32 %v719_v20, %v706_v19  ;;  %v733_v22 = vpop.f32.mrf.mxu1 }
  0xd8   : > { %v734_v23 = vadd.f32 %v733_v22, %v720_v21 }
  0xda   : > { %737 = vst [vmem:[%s230_s24 + $0x8] sm:$0xff] %v734_v23 }
  0xdb PF: > { %s12_s11 = sadd.s32 1, %s1189_s11   ;;  %s1314_s9 = smov %s1185_s10 }
  0xdc   : > { %p9_p5 = scmp.ge.s32.totalorder %s12_s11, 4   ;;  %s1315_s10 = smov %s1317_s12 }
  0xde   :  { %11 = sbr.rel (!%p9_p5) target bundleno = 2 (0x2), region = 61 }

// kernel: hourglass_fwd.46
= control target key start
LH: loop header
LB: loop body
LE: loop exit
PB: predicated region body
PF: predicated region fallthrough
CT: control target
= control target key end

     0   :  { %s559_s9 = smov 0   ;;  %s561_s10 = smov 0   ;;  %s595_s0 = inlined_call_operand.vmem [shape: bf16[2,16,128], index: 0, kind: input, shape index: {}]   ;;  %s596_s1 = inlined_call_operand.vmem [shape: bf16[2,128,128], index: 1, kind: input, shape index: {}]   ;;  %s597_s2 = inlined_call_operand.vmem [shape: f32[2,16,128], index: 2, kind: output, shape index: {}]  }
   0x1   :  { %s563_s11 = smov 0  }
   0x2 LB: > { %s31_s12 = sadd.s32 1, %s538_s10  ;;  %p439_p0 = scmp.ge.s32.totalorder %s542_s11, 1  ;;  %s542_s11 = sphi %s563_s11, %s12_s11   ;;  %s538_s10 = sphi %s561_s10, %s599_s10   ;;  %s534_s9 = sphi %s559_s9, %s598_s9  }
   0x3   : > { %p33_p1 = scmp.ge.s32.totalorder %s31_s12, 2  ;;  %p157_p2 = scmp.lt.s32.totalorder %s542_s11, 3 }
   0x5   : > { %s601_s12 = smov (%p33_p1, %s31_s12), 0  ;;  %p158_p3 = pnand %p439_p0, %p157_p2 }
   0x6   : > { %p199_p4 = scmp.lt.s32.totalorder (!%p158_p3), %s534_s9, 1 }
   0x7   : > { %161 = sbr.rel (%p158_p3) target bundleno = 182 (0xb6), region = 28 }
   0xc   : > { %s603_s9 = smov (!%p199_p4, %s534_s9), 1 }
   0xd   : > { %s485_s13 = sshll.u32 %s603_s9, 6  ;;  %s484_s17 = sshll.u32 %s603_s9, 3 }
   0xe   : > { %s215_s16 = scalar_lea.vmem %s596_s1, %s485_s13  ;;  %s206_s20 = scalar_lea.vmem %s595_s0, %s484_s17 }
   0xf   : > { %v495_v0 = vld [vmem:[%s215_s16 + $0x38] sm:$0xff]  ;;  %v494_v1 = vld [vmem:[%s215_s16 + $0x30] sm:$0xff]  ;;  %v493_v2 = vld [vmem:[%s215_s16 + $0x28] sm:$0xff]  ;;  %s486_s21 = sshll.u32 %s603_s9, 4 }
  0x10   : > { %301 = vmatpush.bf16.msra.mxu0 %v495_v0  ;;  %v492_v3 = vld [vmem:[%s215_s16 + $0x20] sm:$0xff]  ;;  %v491_v4 = vld [vmem:[%s215_s16 + $0x18] sm:$0xff]  ;;  %v490_v5 = vld [vmem:[%s215_s16 + $0x10] sm:$0xff]  ;;  %s227_s24 = scalar_lea.vmem %s597_s2, %s486_s21 }
  0x11   : > { %v489_v6 = vld [vmem:[%s215_s16 + $0x8] sm:$0xff]  ;;  %v488_v7 = vld [vmem:[%s215_s16] sm:$0xff] }
  0x12   : > { %v487_v8 = vld [vmem:[%s206_s20] sm:$0xff] }
  0x14   : > { %302 = vmatpush.bf16.msra.mxu0 %v494_v1 }
  0x18   : > { %303 = vmatpush.bf16.msra.mxu0 %v493_v2 }
  0x1c   : > { %304 = vmatpush.bf16.msra.mxu0 %v492_v3 }
  0x20   : > { %305 = vmatpush.bf16.msra.mxu0 %v491_v4 }
  0x24   : > { %306 = vmatpush.bf16.msra.mxu0 %v490_v5 }
  0x28   : > { %307 = vmatpush.bf16.msra.mxu0 %v489_v6 }
  0x2c   : > { %308 = vmatpush.bf16.msra.mxu0 %v488_v7 }
  0x2f   : > { %309 = vmatmul.bf16.vlgmr.msra.gmra.mxu0 %v487_v8 }
  0xac   : > { %v310_v9 = vpop.f32.mrf.mxu0 }
  0xad   : > { %315 = vst [vmem:[%s227_s24] sm:$0xff] %v310_v9 }
  0xb4   : > { %v312_v10 = vpop.f32.mrf.mxu0 }
  0xb5   : > { %316 = vst [vmem:[%s227_s24 + $0x8] sm:$0xff] %v312_v10 }
  0xb6 PF: > { %s12_s11 = sadd.s32 1, %s542_s11   ;;  %s598_s9 = smov %s538_s10 }
  0xb7   : > { %p9_p5 = scmp.ge.s32.totalorder %s12_s11, 4   ;;  %s599_s10 = smov %s601_s12 }
  0xb9   :  { %11 = sbr.rel (!%p9_p5) target bundleno = 2 (0x2), region = 61 }

// kernel: hourglass_fwd.51
= control target key start
LH: loop header
LB: loop body
LE: loop exit
PB: predicated region body
PF: predicated region fallthrough
CT: control target
= control target key end

     0   :  { %s924_s9 = smov 0   ;;  %s926_s10 = smov 0   ;;  %s1115_s0 = inlined_call_operand.vmem [shape: bf16[2,64,128], index: 0, kind: input, shape index: {}]   ;;  %s1116_s1 = inlined_call_operand.vmem [shape: bf16[2,128,768], index: 1, kind: input, shape index: {}]   ;;  %s1117_s2 = inlined_call_operand.vmem [shape: f32[2,64,768], index: 2, kind: output, shape index: {}]  }
   0x1   :  { %s928_s11 = smov 0   ;;  %s930_s12 = smov 0  }
   0x2   :  { %s932_s13 = smov 0   ;;  %s934_s14 = smov 0  }
   0x3   :  { %s936_s15 = smov 0  }
   0x4 LB: > { %s24_s16 = sadd.s32 1, %s899_s13  ;;  %s31_s17 = sadd.s32 1, %s903_s14  ;;  %s907_s15 = sphi %s936_s15, %s12_s15   ;;  %s903_s14 = sphi %s934_s14, %s1124_s14   ;;  %s899_s13 = sphi %s932_s13, %s1123_s13   ;;  %s895_s12 = sphi %s930_s12, %s1122_s12   ;;  %s891_s11 = sphi %s928_s11, %s1121_s11   ;;  %s887_s10 = sphi %s926_s10, %s1120_s10   ;;  %s883_s9 = sphi %s924_s9, %s1119_s9  }
   0x5   : > { %p25_p0 = scmp.ge.s32.totalorder %s24_s16, 3  ;;  %s661_s18 = sadd.s32 4294967295, %s907_s15  }
   0x6   : > { %p75_p1 = scmp.ne.s32.totalorder %s887_s10, %s883_s9  ;;  %p76_p2 = scmp.eq.s32.totalorder %s907_s15, 0 }
   0x7   : > { %s1126_s16 = smov (%p25_p0, %s24_s16), 0  ;;  %s1128_s17 = smov (!%p25_p0, %s31_s17), %s903_s14 }
   0x8   : > { %p33_p3 = scmp.ge.s32.totalorder %s1128_s17, 2  ;;  %p109_p4 = scmp.eq.s32.totalorder %s661_s18, 5 }
   0x9   : > { %s64_s19 = ssub.s32 %s899_s13, %s1126_s16  ;;  %p77_p5 = por %p76_p2, %p75_p1 }
   0xa   : > { %s1130_s17 = smov (%p33_p3, %s1128_s17), 0  ;;  %p972_p6 = por %p109_p4, %p75_p1 }
   0xb   : > { %s63_s21 = ssub.s32 %s903_s14, %s1130_s17  ;;  %s68_s23 = sadd.s32 1, %s887_s10 }
   0xc   : > { %s65_s22 = sor.u32 %s64_s19, %s63_s21  ;;  %p664_p8 = scmp.ge.s32.totalorder %s907_s15, 6 }
   0xd   : > { %p66_p7 = scmp.eq.s32.totalorder %s65_s22, 0 }
   0xe   : > { %131 = sbr.rel (%p664_p8) target bundleno = 43 (0x2b), region = 16 }
   0xf   : > { %s980_s24 = scalar_select %p66_p7, %s887_s10, %s68_s23  }
  0x13   : > { %147 = sbr.rel (!%p77_p5) target bundleno = 43 (0x2b), region = 24  ;;  %s149_s25 = sand.u32 (%p77_p5), 1, %s887_s10  }
  0x14   : > { %s666_s26 = sshll.u32 (%p77_p5), %s899_s13, 1  ;;  %s665_s27 = sshll.u32 (%p77_p5), %s149_s25, 7 }
  0x15   : > { %s795_s28 = smul.u32 (%p77_p5), 96, %s903_s14  ;;  %s151_s6 = scalar_lea.vmem (%p77_p5), [#allocation2], %s665_s27 }
  0x17   : > { %s154_s29 = sadd.s32 (%p77_p5), %s795_s28, %s666_s26 }
  0x18   : > { %s667_s30 = sshll.u32 %s154_s29, 2 }
  0x19   : > { %s989_s5 = scalar_lea.vmem %s1116_s1, %s667_s30 }
  0x1a   : > { %v215_v0 = vld [vmem:[%s989_s5] sm:$0xff]  ;;  %v217_v1 = vld [vmem:[%s989_s5 + $0x18] sm:$0xff]  ;;  %v219_v2 = vld [vmem:[%s989_s5 + $0x30] sm:$0xff] }
  0x1b   : > { %216 = vst [vmem:[%s151_s6] sm:$0xff] %v215_v0  ;;  %v221_v3 = vld [vmem:[%s989_s5 + $0x48] sm:$0xff]  ;;  %v223_v4 = vld [vmem:[%s989_s5 + $0x60] sm:$0xff]  ;;  %v225_v5 = vld [vmem:[%s989_s5 + $0x78] sm:$0xff] }
  0x1c   : > { %218 = vst [vmem:[%s151_s6 + $0x8] sm:$0xff] %v217_v1  ;;  %v227_v6 = vld [vmem:[%s989_s5 + $0x90] sm:$0xff]  ;;  %v229_v7 = vld [vmem:[%s989_s5 + $0xa8] sm:$0xff]  ;;  %v231_v8 = vld [vmem:[%s989_s5 + $0xc0] sm:$0xff] }
  0x1d   : > { %220 = vst [vmem:[%s151_s6 + $0x10] sm:$0xff] %v219_v2  ;;  %v233_v9 = vld [vmem:[%s989_s5 + $0xd8] sm:$0xff]  ;;  %v235_v10 = vld [vmem:[%s989_s5 + $0xf0] sm:$0xff]  ;;  %v237_v11 = vld [vmem:[%s989_s5 + $0x108] sm:$0xff] }
  0x1e   : > { %222 = vst [vmem:[%s151_s6 + $0x18] sm:$0xff] %v221_v3  ;;  %v239_v12 = vld [vmem:[%s989_s5 + $0x120] sm:$0xff]  ;;  %v241_v13 = vld [vmem:[%s989_s5 + $0x138] sm:$0xff]  ;;  %v243_v14 = vld [vmem:[%s989_s5 + $0x150] sm:$0xff] }
  0x1f   : > { %224 = vst [vmem:[%s151_s6 + $0x20] sm:$0xff] %v223_v4  ;;  %v245_v15 = vld [vmem:[%s989_s5 + $0x168] sm:$0xff] }
  0x20   : > { %226 = vst [vmem:[%s151_s6 + $0x28] sm:$0xff] %v225_v5 }
  0x21   : > { %228 = vst [vmem:[%s151_s6 + $0x30] sm:$0xff] %v227_v6 }
  0x22   : > { %230 = vst [vmem:[%s151_s6 + $0x38] sm:$0xff] %v229_v7 }
  0x23   : > { %232 = vst [vmem:[%s151_s6 + $0x40] sm:$0xff] %v231_v8 }
  0x24   : > { %234 = vst [vmem:[%s151_s6 + $0x48] sm:$0xff] %v233_v9 }
  0x25   : > { %236 = vst [vmem:[%s151_s6 + $0x50] sm:$0xff] %v235_v10 }
  0x26   : > { %238 = vst [vmem:[%s151_s6 + $0x58] sm:$0xff] %v237_v11 }
  0x27   : > { %240 = vst [vmem:[%s151_s6 + $0x60] sm:$0xff] %v239_v12 }
  0x28   : > { %242 = vst [vmem:[%s151_s6 + $0x68] sm:$0xff] %v241_v13 }
  0x29   : > { %244 = vst [vmem:[%s151_s6 + $0x70] sm:$0xff] %v243_v14 }
  0x2a   : > { %246 = vst [vmem:[%s151_s6 + $0x78] sm:$0xff] %v245_v15 }
  0x2b PF: > { %p668_p9 = scmp.ge.s32.totalorder %s907_s15, 1  ;;  %p251_p10 = scmp.lt.s32.totalorder %s907_s15, 7 }
  0x2d   : > { %p252_p11 = pnand %p668_p9, %p251_p10 }
  0x2e   : > { %s258_s7 = sand.u32 (!%p252_p11), 1, %s883_s9   ;;  %p288_p12 = scmp.lt.s32.totalorder (!%p252_p11), %s895_s12, 1 }
  0x2f   : > { %255 = sbr.rel (%p252_p11) target bundleno = 252 (0xfc), region = 62  ;;  %s1010_s8 = sshll.u32 (!%p252_p11), %s258_s7, 7 }
  0x30   : > { %s1013_s18 = scalar_lea.vmem (!%p252_p11), [#allocation2], %s1010_s8  ;;  %s1053_s25 = scalar_lea.vmem (!%p252_p11), [#allocation3], %s1010_s8 }
  0x34   : > { %v747_v16 = vld [vmem:[%s1013_s18 + $0x70] sm:$0xf]  ;;  %v778_v17 = vld [vmem:[%s1013_s18 + $0x74] sm:$0xf0]  ;;  %v777_v18 = vld [vmem:[%s1013_s18 + $0x74] sm:$0xf] }
  0x35   : > { %v748_v19 = vor.u32 %v778_v17, %v747_v16  ;;  %v749_v20 = vld [vmem:[%s1013_s18 + $0x78] sm:$0xf0]  ;;  %v739_v21 = vld [vmem:[%s1013_s18 + $0x60] sm:$0xf]  ;;  %v776_v22 = vld [vmem:[%s1013_s18 + $0x64] sm:$0xf0] }
  0x36   : > { %v752_v23 = vor.u32 %v777_v18, %v749_v20  ;;  %v775_v24 = vld [vmem:[%s1013_s18 + $0x64] sm:$0xf]  ;;  %v741_v25 = vld [vmem:[%s1013_s18 + $0x68] sm:$0xf0]  ;;  %v740_v26 = vor.u32 %v776_v22, %v739_v21  ;;  %v731_v28 = vld [vmem:[%s1013_s18 + $0x50] sm:$0xf] }
  0x37   : > { %428 = vmatpush.bf16.msra.mxu0 %v748_v19  ;;  %779 = vmatpush.bf16.msra.mxu2 %v748_v19  ;;  %v744_v27 = vor.u32 %v775_v24, %v741_v25  ;;  %v774_v29 = vld [vmem:[%s1013_s18 + $0x54] sm:$0xf0]  ;;  %v773_v30 = vld [vmem:[%s1013_s18 + $0x54] sm:$0xf]  ;;  %v733_v31 = vld [vmem:[%s1013_s18 + $0x58] sm:$0xf0] }
  0x38   : > { %457 = vmatpush.bf16.msra.mxu1 %v752_v23  ;;  %787 = vmatpush.bf16.msra.mxu3 %v752_v23  ;;  %v732_v32 = vor.u32 %v774_v29, %v731_v28  ;;  %v736_v33 = vor.u32 %v773_v30, %v733_v31  ;;  %v723_v34 = vld [vmem:[%s1013_s18 + $0x40] sm:$0xf]  ;;  %v772_v35 = vld [vmem:[%s1013_s18 + $0x44] sm:$0xf0]  ;;  %v771_v36 = vld [vmem:[%s1013_s18 + $0x44] sm:$0xf] }
  0x39   : > { %v725_v37 = vld [vmem:[%s1013_s18 + $0x48] sm:$0xf0]  ;;  %v724_v38 = vor.u32 %v772_v35, %v723_v34  ;;  %v715_v40 = vld [vmem:[%s1013_s18 + $0x30] sm:$0xf]  ;;  %v770_v41 = vld [vmem:[%s1013_s18 + $0x34] sm:$0xf0] }
  0x3a   : > { %v728_v39 = vor.u32 %v771_v36, %v725_v37  ;;  %v769_v42 = vld [vmem:[%s1013_s18 + $0x34] sm:$0xf]  ;;  %v717_v43 = vld [vmem:[%s1013_s18 + $0x38] sm:$0xf0]  ;;  %v716_v44 = vor.u32 %v770_v41, %v715_v40  ;;  %v707_v46 = vld [vmem:[%s1013_s18 + $0x20] sm:$0xf] }
  0x3b   : > { %429 = vmatpush.bf16.msra.mxu0 %v740_v26  ;;  %780 = vmatpush.bf16.msra.mxu2 %v740_v26  ;;  %v720_v45 = vor.u32 %v769_v42, %v717_v43  ;;  %v768_v47 = vld [vmem:[%s1013_s18 + $0x24] sm:$0xf0]  ;;  %v767_v48 = vld [vmem:[%s1013_s18 + $0x24] sm:$0xf]  ;;  %v709_v49 = vld [vmem:[%s1013_s18 + $0x28] sm:$0xf0] }
  0x3c   : > { %458 = vmatpush.bf16.msra.mxu1 %v744_v27  ;;  %788 = vmatpush.bf16.msra.mxu3 %v744_v27  ;;  %v708_v50 = vor.u32 %v768_v47, %v707_v46  ;;  %v712_v51 = vor.u32 %v767_v48, %v709_v49  ;;  %v699_v52 = vld [vmem:[%s1013_s18 + $0x10] sm:$0xf]  ;;  %v766_v53 = vld [vmem:[%s1013_s18 + $0x14] sm:$0xf0]  ;;  %s289_s9 = scalar_select %p288_p12, %s895_s12, 1 }
  0x3d   : > { %v765_v54 = vld [vmem:[%s1013_s18 + $0x14] sm:$0xf]  ;;  %v701_v55 = vld [vmem:[%s1013_s18 + $0x18] sm:$0xf0]  ;;  %v700_v56 = vor.u32 %v766_v53, %v699_v52  ;;  %v691_v58 = vld [vmem:[%s1013_s18] sm:$0xf] }
  0x3e   : > { %v704_v57 = vor.u32 %v765_v54, %v701_v55  ;;  %v764_v59 = vld [vmem:[%s1013_s18 + $0x4] sm:$0xf0]  ;;  %s758_s19 = sshll.u32 %s289_s9, 5  ;;  %v763_v60 = vld [vmem:[%s1013_s18 + $0x4] sm:$0xf]  ;;  %s754_s26 = sshll.u32 (%p972_p6), %s891_s11, 1 }
  0x3f   : > { %430 = vmatpush.bf16.msra.mxu0 %v732_v32  ;;  %781 = vmatpush.bf16.msra.mxu2 %v732_v32  ;;  %v693_v61 = vld [vmem:[%s1013_s18 + $0x8] sm:$0xf0]  ;;  %v692_v62 = vor.u32 %v764_v59, %v691_v58  ;;  %s295_s23 = scalar_lea.vmem %s1115_s0, %s758_s19  ;;  %s796_s27 = smul.u32 (%p972_p6), 48, %s895_s12 }
  0x40   : > { %459 = vmatpush.bf16.msra.mxu1 %v736_v33  ;;  %789 = vmatpush.bf16.msra.mxu3 %v736_v33  ;;  %v696_v63 = vor.u32 %v763_v60, %v693_v61  ;;  %v759_v0 = vld [vmem:[%s295_s23] sm:$0xff]  ;;  %v761_v1 = vld [vmem:[%s295_s23 + $0x10] sm:$0xff]  ;;  %v760_v2 = vld [vmem:[%s295_s23 + $0x8] sm:$0xff] }
  0x41   : > { %v762_v3 = vld [vmem:[%s295_s23 + $0x18] sm:$0xff]  ;;  %s514_s28 = sadd.s32 (%p972_p6), %s796_s27, %s754_s26 }
  0x42   : > { %s755_s29 = sshll.u32 (%p972_p6), %s514_s28, 3 }
  0x43   : > { %431 = vmatpush.bf16.msra.mxu0 %v724_v38  ;;  %782 = vmatpush.bf16.msra.mxu2 %v724_v38  ;;  %s516_s3 = scalar_lea.vmem (%p972_p6), %s1117_s2, %s755_s29 }
  0x44   : > { %460 = vmatpush.bf16.msra.mxu1 %v728_v39  ;;  %790 = vmatpush.bf16.msra.mxu3 %v728_v39 }
  0x47   : > { %432 = vmatpush.bf16.msra.mxu0 %v716_v44  ;;  %783 = vmatpush.bf16.msra.mxu2 %v716_v44 }
  0x48   : > { %461 = vmatpush.bf16.msra.mxu1 %v720_v45  ;;  %791 = vmatpush.bf16.msra.mxu3 %v720_v45 }
  0x4b   : > { %433 = vmatpush.bf16.msra.mxu0 %v708_v50  ;;  %784 = vmatpush.bf16.msra.mxu2 %v708_v50 }
  0x4c   : > { %462 = vmatpush.bf16.msra.mxu1 %v712_v51  ;;  %792 = vmatpush.bf16.msra.mxu3 %v712_v51 }
  0x4f   : > { %434 = vmatpush.bf16.msra.mxu0 %v700_v56  ;;  %785 = vmatpush.bf16.msra.mxu2 %v700_v56 }
  0x50   : > { %463 = vmatpush.bf16.msra.mxu1 %v704_v57  ;;  %793 = vmatpush.bf16.msra.mxu3 %v704_v57 }
  0x53   : > { %435 = vmatpush.bf16.msra.mxu0 %v692_v62  ;;  %786 = vmatpush.bf16.msra.mxu2 %v692_v62 }
  0x54   : > { %464 = vmatpush.bf16.msra.mxu1 %v696_v63  ;;  %794 = vmatpush.bf16.msra.mxu3 %v696_v63 }
  0x56   : > { %436 = vmatmul.bf16.vlgmr.msra.gmra.mxu0 %v759_v0  ;;  %446 = vmatmul.bf16.vlgmr.msra.gmra.mxu2 %v761_v1 }
  0x57   : > { %465 = vmatmul.bf16.vlgmr.msra.gmra.mxu1 %v759_v0  ;;  %475 = vmatmul.bf16.vlgmr.msra.gmra.mxu3 %v761_v1 }
  0x66   : > { %441 = vmatmul.bf16.gmra.mxu0 %v760_v2  ;;  %451 = vmatmul.bf16.gmra.mxu2 %v762_v3 }
  0x67   : > { %470 = vmatmul.bf16.gmra.mxu1 %v760_v2  ;;  %480 = vmatmul.bf16.gmra.mxu3 %v762_v3 }
  0xd3   : > { %v437_v4 = vpop.f32.mrf.mxu0 }
  0xd4   : > { %486 = vst [vmem:[%s1053_s25] sm:$0xff] %v437_v4  ;;  %v466_v5 = vpop.f32.mrf.mxu1 }
  0xd5   : > { %487 = vst [vmem:[%s1053_s25 + $0x8] sm:$0xff] %v466_v5 }
  0xd9   : > { %v447_v6 = vpop.f32.mrf.mxu2 }
  0xda   : > { %494 = vst [vmem:[%s1053_s25 + $0x40] sm:$0xff] %v447_v6  ;;  %v476_v7 = vpop.f32.mrf.mxu3 }
  0xdb   : > { %495 = vst [vmem:[%s1053_s25 + $0x48] sm:$0xff] %v476_v7  ;;  %v439_v8 = vpop.f32.mrf.mxu0  ;;  %v529_v20 = vld [vmem:[%s1053_s25] sm:$0xff] (%p972_p6) }
  0xdc   : > { %488 = vst [vmem:[%s1053_s25 + $0x10] sm:$0xff] %v439_v8  ;;  %v468_v9 = vpop.f32.mrf.mxu1  ;;  %v531_v21 = vld [vmem:[%s1053_s25 + $0x8] sm:$0xff] (%p972_p6) }
  0xdd   : > { %489 = vst [vmem:[%s1053_s25 + $0x18] sm:$0xff] %v468_v9 }
  0xde   : > { %530 = vst [vmem:[%s516_s3] sm:$0xff] (%p972_p6), %v529_v20 }
  0xdf   : > { %532 = vst [vmem:[%s516_s3 + $0x8] sm:$0xff] (%p972_p6), %v531_v21 }
  0xe1   : > { %v449_v10 = vpop.f32.mrf.mxu2  ;;  %v545_v28 = vld [vmem:[%s1053_s25 + $0x40] sm:$0xff] (%p972_p6) }
  0xe2   : > { %496 = vst [vmem:[%s1053_s25 + $0x50] sm:$0xff] %v449_v10  ;;  %v478_v11 = vpop.f32.mrf.mxu3  ;;  %v547_v29 = vld [vmem:[%s1053_s25 + $0x48] sm:$0xff] (%p972_p6) }
  0xe3   : > { %497 = vst [vmem:[%s1053_s25 + $0x58] sm:$0xff] %v478_v11  ;;  %v442_v12 = vpop.f32.mrf.mxu0  ;;  %v533_v22 = vld [vmem:[%s1053_s25 + $0x10] sm:$0xff] (%p972_p6) }
  0xe4   : > { %490 = vst [vmem:[%s1053_s25 + $0x20] sm:$0xff] %v442_v12  ;;  %v471_v13 = vpop.f32.mrf.mxu1  ;;  %v535_v23 = vld [vmem:[%s1053_s25 + $0x18] sm:$0xff] (%p972_p6) }
  0xe5   : > { %491 = vst [vmem:[%s1053_s25 + $0x28] sm:$0xff] %v471_v13 }
  0xe6   : > { %534 = vst [vmem:[%s516_s3 + $0x30] sm:$0xff] (%p972_p6), %v533_v22 }
  0xe7   : > { %536 = vst [vmem:[%s516_s3 + $0x38] sm:$0xff] (%p972_p6), %v535_v23 }
  0xe8   : > { %546 = vst [vmem:[%s516_s3 + $0xc0] sm:$0xff] (%p972_p6), %v545_v28 }
  0xe9   : > { %v452_v14 = vpop.f32.mrf.mxu2  ;;  %v549_v30 = vld [vmem:[%s1053_s25 + $0x50] sm:$0xff] (%p972_p6)  ;;  %548 = vst [vmem:[%s516_s3 + $0xc8] sm:$0xff] (%p972_p6), %v547_v29 }
  0xea   : > { %498 = vst [vmem:[%s1053_s25 + $0x60] sm:$0xff] %v452_v14  ;;  %v481_v15 = vpop.f32.mrf.mxu3  ;;  %v551_v31 = vld [vmem:[%s1053_s25 + $0x58] sm:$0xff] (%p972_p6) }
  0xeb   : > { %499 = vst [vmem:[%s1053_s25 + $0x68] sm:$0xff] %v481_v15  ;;  %v444_v16 = vpop.f32.mrf.mxu0  ;;  %v537_v24 = vld [vmem:[%s1053_s25 + $0x20] sm:$0xff] (%p972_p6) }
  0xec   : > { %492 = vst [vmem:[%s1053_s25 + $0x30] sm:$0xff] %v444_v16  ;;  %v473_v17 = vpop.f32.mrf.mxu1  ;;  %v539_v25 = vld [vmem:[%s1053_s25 + $0x28] sm:$0xff] (%p972_p6) }
  0xed   : > { %493 = vst [vmem:[%s1053_s25 + $0x38] sm:$0xff] %v473_v17 }
  0xee   : > { %538 = vst [vmem:[%s516_s3 + $0x60] sm:$0xff] (%p972_p6), %v537_v24 }
  0xef   : > { %508 = sbr.rel (!%p972_p6) target bundleno = 252 (0xfc), region = 70  ;;  %540 = vst [vmem:[%s516_s3 + $0x68] sm:$0xff] (%p972_p6), %v539_v25 }
  0xf0   : > { %550 = vst [vmem:[%s516_s3 + $0xf0] sm:$0xff] (%p972_p6), %v549_v30 }
  0xf1   : > { %v454_v18 = vpop.f32.mrf.mxu2  ;;  %v553_v32 = vld [vmem:[%s1053_s25 + $0x60] sm:$0xff] (%p972_p6)  ;;  %552 = vst [vmem:[%s516_s3 + $0xf8] sm:$0xff] (%p972_p6), %v551_v31 }
  0xf2   : > { %500 = vst [vmem:[%s1053_s25 + $0x70] sm:$0xff] %v454_v18  ;;  %v483_v19 = vpop.f32.mrf.mxu3  ;;  %v555_v33 = vld [vmem:[%s1053_s25 + $0x68] sm:$0xff] (%p972_p6) }
  0xf3   : > { %501 = vst [vmem:[%s1053_s25 + $0x78] sm:$0xff] %v483_v19  ;;  %v541_v26 = vld [vmem:[%s1053_s25 + $0x30] sm:$0xff] (%p972_p6) }
  0xf4   : > { %v543_v27 = vld [vmem:[%s1053_s25 + $0x38] sm:$0xff]  ;;  %542 = vst [vmem:[%s516_s3 + $0x90] sm:$0xff] %v541_v26 }
  0xf5   : > { %544 = vst [vmem:[%s516_s3 + $0x98] sm:$0xff] %v543_v27 }
  0xf6   : > { %554 = vst [vmem:[%s516_s3 + $0x120] sm:$0xff] %v553_v32 }
  0xf7   : > { %556 = vst [vmem:[%s516_s3 + $0x128] sm:$0xff] %v555_v33 }
  0xf9   : > { %v557_v34 = vld [vmem:[%s1053_s25 + $0x70] sm:$0xff] }
  0xfa   : > { %v559_v35 = vld [vmem:[%s1053_s25 + $0x78] sm:$0xff]  ;;  %558 = vst [vmem:[%s516_s3 + $0x150] sm:$0xff] %v557_v34 }
  0xfb   : > { %560 = vst [vmem:[%s516_s3 + $0x158] sm:$0xff] %v559_v35 }
  0xfc PF: > { %s12_s15 = sadd.s32 1, %s907_s15   ;;  %s1119_s9 = smov %s887_s10 }
  0xfd   : > { %p9_p13 = scmp.ge.s32.totalorder %s12_s15, 8   ;;  %s1120_s10 = smov %s980_s24 }
  0xfe   : > { %s1121_s11 = smov %s899_s13  ;;  %s1122_s12 = smov %s903_s14 }
  0xff   : > { %s1123_s13 = smov %s1126_s16  ;;  %s1124_s14 = smov %s1130_s17 }
 0x100   :  { %11 = sbr.rel (!%p9_p13) target bundleno = 4 (0x4), region = 127 }

// kernel: hourglass_fwd.52
= control target key start
LH: loop header
LB: loop body
LE: loop exit
PB: predicated region body
PF: predicated region fallthrough
CT: control target
= control target key end

     0   :  { %s2549_s0 = inlined_call_operand.vmem [shape: f32[128,768], index: 0, kind: input, shape index: {}]   ;;  %s2550_s1 = inlined_call_operand.vmem [shape: f32[128,768], index: 1, kind: output, shape index: {}]  }
   0x1   :  { %v1065_v0 = vld [vmem:[%s2549_s0 + $0xc0] sm:$0xff]  ;;  %v1070_v1 = vld [vmem:[%s2549_s0 + $0xc8] sm:$0xff]  ;;  %v1075_v2 = vld [vmem:[%s2549_s0 + $0xd0] sm:$0xff] }
   0x2   :  { %v1080_v3 = vld [vmem:[%s2549_s0 + $0xd8] sm:$0xff]  ;;  %v132_v4 = vmax.f32 %v1065_v0, %v1070_v1  ;;  %v1087_v5 = vld [vmem:[%s2549_s0 + $0x60] sm:$0xff]  ;;  %v1092_v6 = vld [vmem:[%s2549_s0 + $0x68] sm:$0xff] }
   0x3   :  { %2646 = vst [vmem:[#allocation2_spill] sm:$0xff] %v1080_v3  ;;  %v1097_v7 = vld [vmem:[%s2549_s0 + $0x70] sm:$0xff]  ;;  %v1102_v8 = vld [vmem:[%s2549_s0 + $0xe0] sm:$0xff]  ;;  %v1108_v10 = vld [vmem:[%s2549_s0 + $0x78] sm:$0xff]  ;;  %v118_v11 = vmax.f32 %v1087_v5, %v1092_v6 }
   0x4   :  { %2647 = vst [vmem:[#allocation3_spill] sm:$0xff] %v1102_v8  ;;  %v133_v9 = vmax.f32 %v132_v4, %v1075_v2  ;;  %v1115_v12 = vld [vmem:[%s2549_s0] sm:$0xff]  ;;  %v1120_v13 = vld [vmem:[%s2549_s0 + $0x8] sm:$0xff]  ;;  %v1125_v14 = vld [vmem:[%s2549_s0 + $0x10] sm:$0xff] }
   0x5   :  { %v1130_v15 = vld [vmem:[%s2549_s0 + $0xe8] sm:$0xff]  ;;  %v1136_v17 = vld [vmem:[%s2549_s0 + $0x80] sm:$0xff]  ;;  %v119_v18 = vmax.f32 %v118_v11, %v1097_v7  ;;  %v1142_v19 = vld [vmem:[%s2549_s0 + $0x18] sm:$0xff]  ;;  %v104_v20 = vmax.f32 %v1115_v12, %v1120_v13 }
   0x6   :  { %2648 = vst [vmem:[#allocation4_spill] sm:$0xff] %v1130_v15  ;;  %v134_v16 = vmax.f32 %v133_v9, %v1080_v3  ;;  %v1149_v21 = vld [vmem:[%s2549_s0 + $0xf0] sm:$0xff]  ;;  %v1154_v22 = vld [vmem:[%s2549_s0 + $0xf8] sm:$0xff]  ;;  %v1159_v23 = vld [vmem:[%s2549_s0 + $0x100] sm:$0xff] }
   0x7   :  { %v1165_v25 = vld [vmem:[%s2549_s0 + $0x88] sm:$0xff]  ;;  %v120_v26 = vmax.f32 %v119_v18, %v1108_v10  ;;  %v1171_v27 = vld [vmem:[%s2549_s0 + $0x20] sm:$0xff]  ;;  %v105_v28 = vmax.f32 %v104_v20, %v1125_v14  ;;  %v139_v29 = vmax.f32 %v1149_v21, %v1154_v22  ;;  %v1184_v31 = vld [vmem:[%s2549_s0 + $0x90] sm:$0xff] }
   0x8   :  { %v135_v24 = vmax.f32 %v134_v16, %v1102_v8  ;;  %v1179_v30 = vld [vmem:[%s2549_s0 + $0x108] sm:$0xff]  ;;  %v1189_v32 = vld [vmem:[%s2549_s0 + $0x98] sm:$0xff]  ;;  %v1202_v37 = vld [vmem:[%s2549_s0 + $0x110] sm:$0xff] }
   0x9   :  { %v121_v34 = vmax.f32 %v120_v26, %v1136_v17  ;;  %v1196_v35 = vld [vmem:[%s2549_s0 + $0x28] sm:$0xff]  ;;  %v106_v36 = vmax.f32 %v105_v28, %v1142_v19  ;;  %2649 = vst [vmem:[#allocation5_spill] sm:$0xff] %v1202_v37  ;;  %v140_v38 = vmax.f32 %v139_v29, %v1159_v23  ;;  %v1208_v39 = vld [vmem:[%s2549_s0 + $0xa0] sm:$0xff]  ;;  %v1213_v40 = vld [vmem:[%s2549_s0 + $0x118] sm:$0xff]  ;;  %v125_v41 = vmax.f32 %v1184_v31, %v1189_v32 }
   0xa   :  { %v136_v33 = vmax.f32 %v135_v24, %v1130_v15  ;;  %2650 = vst [vmem:[#allocation6_spill] sm:$0xff] %v1213_v40  ;;  %v1220_v42 = vld [vmem:[%s2549_s0 + $0x30] sm:$0xff]  ;;  %v1225_v43 = vld [vmem:[%s2549_s0 + $0x38] sm:$0xff]  ;;  %v1230_v44 = vld [vmem:[%s2549_s0 + $0x40] sm:$0xff] }
   0xb   :  { %v122_v45 = vmax.f32 %v121_v34, %v1165_v25  ;;  %v107_v46 = vmax.f32 %v106_v36, %v1171_v27  ;;  %v141_v47 = vmax.f32 %v140_v38, %v1179_v30  ;;  %v1238_v48 = vld [vmem:[%s2549_s0 + $0xa8] sm:$0xff]  ;;  %v1243_v49 = vld [vmem:[%s2549_s0 + $0xb0] sm:$0xff]  ;;  %v111_v51 = vmax.f32 %v1220_v42, %v1225_v43  ;;  %v1256_v53 = vld [vmem:[%s2549_s0 + $0x180] sm:$0xff] }
   0xc   :  { %137 = vmax.xlane.f32.xlu2 %v136_v33  ;;  %2651 = vst [vmem:[#allocation7_spill] sm:$0xff] %v1238_v48  ;;  %v1248_v50 = vld [vmem:[%s2549_s0 + $0x48] sm:$0xff]  ;;  %v126_v52 = vmax.f32 %v125_v41, %v1208_v39  ;;  %v1266_v55 = vld [vmem:[%s2549_s0 + $0x190] sm:$0xff]  ;;  %v1273_v58 = vld [vmem:[%s2549_s0 + $0xb8] sm:$0xff] }
   0xd   :  { %2652 = vst [vmem:[#allocation8_spill] sm:$0xff] %v1243_v49  ;;  %v1261_v54 = vld [vmem:[%s2549_s0 + $0x188] sm:$0xff]  ;;  %123 = vmax.xlane.f32.xlu1 %v122_v45  ;;  %v108_v56 = vmax.f32 %v107_v46, %v1196_v35  ;;  %v142_v57 = vmax.f32 %v141_v47, %v1202_v37  ;;  %v1278_v59 = vld [vmem:[%s2549_s0 + $0x50] sm:$0xff]  ;;  %v112_v60 = vmax.f32 %v111_v51, %v1230_v44  ;;  %v1284_v61 = vld [vmem:[%s2549_s0 + $0x198] sm:$0xff] }
   0xe   :  { %2653 = vst [vmem:[#allocation9_spill] sm:$0xff] %v1248_v50  ;;  %v160_v62 = vmax.f32 %v1256_v53, %v1261_v54  ;;  %v127_v63 = vmax.f32 %v126_v52, %v1238_v48  ;;  %v1292_v4 = vld [vmem:[%s2549_s0 + $0x150] sm:$0xff]  ;;  %v1297_v9 = vld [vmem:[%s2549_s0 + $0x158] sm:$0xff]  ;;  %v1302_v11 = vld [vmem:[%s2549_s0 + $0x160] sm:$0xff] }
   0xf   :  { %2654 = vst [vmem:[#allocation10_spill] sm:$0xff] %v1273_v58  ;;  %109 = vmax.xlane.f32.xlu0 %v108_v56  ;;  %v143_v16 = vmax.f32 %v142_v57, %v1213_v40  ;;  %v1308_v18 = vld [vmem:[%s2549_s0 + $0x58] sm:$0xff]  ;;  %v113_v20 = vmax.f32 %v112_v60, %v1248_v50  ;;  %v1314_v24 = vld [vmem:[%s2549_s0 + $0x1a0] sm:$0xff]  ;;  %v1320_v28 = vld [vmem:[%s2549_s0 + $0x168] sm:$0xff]  ;;  %v153_v29 = vmax.f32 %v1292_v4, %v1297_v9 }
  0x10   :  { %2655 = vst [vmem:[#allocation11_spill] sm:$0xff] %v1278_v59  ;;  %v161_v26 = vmax.f32 %v160_v62, %v1266_v55  ;;  %v128_v33 = vmax.f32 %v127_v63, %v1243_v49  ;;  %v1328_v34 = vld [vmem:[%s2549_s0 + $0x120] sm:$0xff]  ;;  %v1333_v36 = vld [vmem:[%s2549_s0 + $0x128] sm:$0xff]  ;;  %v1338_v38 = vld [vmem:[%s2549_s0 + $0x130] sm:$0xff] }
  0x11   :  { %2656 = vst [vmem:[#allocation12_spill] sm:$0xff] %v1284_v61  ;;  %v114_v41 = vmax.f32 %v113_v20, %v1278_v59  ;;  %v1345_v46 = vld [vmem:[%s2549_s0 + $0x170] sm:$0xff]  ;;  %v154_v47 = vmax.f32 %v153_v29, %v1302_v11  ;;  %v146_v51 = vmax.f32 %v1328_v34, %v1333_v36  ;;  %v1354_v56 = vld [vmem:[%s2549_s0 + $0x138] sm:$0xff]  ;;  %v1370_v63 = vld [vmem:[%s2549_s0 + $0x1a8] sm:$0xff] }
  0x12   :  { %2657 = vst [vmem:[#allocation13_spill] sm:$0xff] %v1308_v18  ;;  %v162_v45 = vmax.f32 %v161_v26, %v1284_v61  ;;  %v129_v52 = vmax.f32 %v128_v33, %v1273_v58  ;;  %v1359_v57 = vld [vmem:[%s2549_s0 + $0x210] sm:$0xff]  ;;  %v1364_v60 = vld [vmem:[%s2549_s0 + $0x218] sm:$0xff]  ;;  %v1377_v29 = vld [vmem:[%s2549_s0 + $0x140] sm:$0xff] }
  0x13   :  { %2658 = vst [vmem:[#allocation14_spill] sm:$0xff] %v1314_v24  ;;  %v115_v62 = vmax.f32 %v114_v41, %v1308_v18  ;;  %v155_v26 = vmax.f32 %v154_v47, %v1320_v28  ;;  %v147_v33 = vmax.f32 %v146_v51, %v1338_v38  ;;  %v181_v41 = vmax.f32 %v1359_v57, %v1364_v60  ;;  %v1395_v47 = vld [vmem:[%s2549_s0 + $0x1e8] sm:$0xff]  ;;  %v1400_v51 = vld [vmem:[%s2549_s0 + $0x1f0] sm:$0xff]  ;;  %v1405_v15 = vld [vmem:[%s2549_s0 + $0x178] sm:$0xff] }
  0x14   :  { %2659 = vst [vmem:[#allocation15_spill] sm:$0xff] %v1320_v28  ;;  %144 = vmax.xlane.f32.xlu2 %v143_v16  ;;  %v163_v20 = vmax.f32 %v162_v45, %v1314_v24  ;;  %v1383_v16 = vld [vmem:[%s2549_s0 + $0x220] sm:$0xff]  ;;  %v1412_v28 = vld [vmem:[%s2549_s0 + $0x228] sm:$0xff]  ;;  %v1417_v61 = vld [vmem:[%s2549_s0 + $0x1f8] sm:$0xff] }
  0x15   :  { %2660 = vst [vmem:[#allocation16_spill] sm:$0xff] %v1345_v46  ;;  %v1390_v45 = vld [vmem:[%s2549_s0 + $0x1e0] sm:$0xff]  ;;  %130 = vmax.xlane.f32.xlu1 %v129_v52  ;;  %v156_v8 = vmax.f32 %v155_v26, %v1345_v46  ;;  %v148_v24 = vmax.f32 %v147_v33, %v1354_v56  ;;  %v182_v18 = vmax.f32 %v181_v41, %v1383_v16  ;;  %v1425_v26 = vld [vmem:[%s2549_s0 + $0x1b0] sm:$0xff]  ;;  %v1430_v33 = vld [vmem:[%s2549_s0 + $0x1b8] sm:$0xff] }
  0x16   :  { %2661 = vst [vmem:[#allocation17_spill] sm:$0xff] %v1354_v56  ;;  %v174_v52 = vmax.f32 %v1390_v45, %v1395_v47  ;;  %v1435_v46 = vld [vmem:[%s2549_s0 + $0x1c0] sm:$0xff]  ;;  %v164_v56 = vmax.f32 %v163_v20, %v1370_v63  ;;  %v1441_v41 = vld [vmem:[%s2549_s0 + $0x148] sm:$0xff]  ;;  %v1447_v58 = vld [vmem:[%s2549_s0 + $0x230] sm:$0xff]  ;;  %v167_v20 = vmax.f32 %v1425_v26, %v1430_v33 }
  0x17   :  { %2662 = vst [vmem:[#allocation18_spill] sm:$0xff] %v1370_v63  ;;  %116 = vmax.xlane.f32.xlu0 %v115_v62  ;;  %v149_v59 = vmax.f32 %v148_v24, %v1377_v29  ;;  %v1453_v62 = vld [vmem:[%s2549_s0 + $0x1c8] sm:$0xff]  ;;  %v183_v63 = vmax.f32 %v182_v18, %v1412_v28  ;;  %v1461_v24 = vld [vmem:[%s2549_s0 + $0x2a0] sm:$0xff]  ;;  %v157_v50 = vmax.f32 %v156_v8, %v1405_v15  ;;  %v1487_v3 = vld [vmem:[%s2549_s0 + $0x270] sm:$0xff] }
  0x18   :  { %2663 = vst [vmem:[#allocation19_spill] sm:$0xff] %v1377_v29  ;;  %v175_v49 = vmax.f32 %v174_v52, %v1400_v51  ;;  %v1466_v29 = vld [vmem:[%s2549_s0 + $0x2a8] sm:$0xff]  ;;  %v1471_v52 = vld [vmem:[%s2549_s0 + $0x2b0] sm:$0xff]  ;;  %v1477_v18 = vld [vmem:[%s2549_s0 + $0x200] sm:$0xff]  ;;  %v168_v40 = vmax.f32 %v167_v20, %v1435_v46 }
  0x19   :  { %2664 = vst [vmem:[#allocation20_spill] sm:$0xff] %v1405_v15  ;;  %v202_v37 = vmax.f32 %v1461_v24, %v1466_v29  ;;  %v150_v48 = vmax.f32 %v149_v59, %v1441_v41  ;;  %v1492_v8 = vld [vmem:[%s2549_s0 + $0x278] sm:$0xff]  ;;  %v184_v20 = vmax.f32 %v183_v63, %v1447_v58  ;;  %v1508_v15 = vld [vmem:[%s2549_s0 + $0x1d0] sm:$0xff]  ;;  %v1522_v63 = vld [vmem:[%s2549_s0 + $0x240] sm:$0xff] }
  0x1a   :  { %2665 = vst [vmem:[#allocation21_spill] sm:$0xff] %v1412_v28  ;;  %v176_v28 = vmax.f32 %v175_v49, %v1417_v61  ;;  %v1497_v49 = vld [vmem:[%s2549_s0 + $0x280] sm:$0xff]  ;;  %v1502_v59 = vld [vmem:[%s2549_s0 + $0x238] sm:$0xff] }
  0x1b   :  { %2666 = vst [vmem:[#allocation22_spill] sm:$0xff] %v1417_v61  ;;  %v169_v61 = vmax.f32 %v168_v40, %v1453_v62 }
  0x1c   :  { %2667 = vst [vmem:[#allocation23_spill] sm:$0xff] %v1441_v41  ;;  %165 = vmax.xlane.f32.xlu2 %v164_v56  ;;  %v203_v41 = vmax.f32 %v202_v37, %v1471_v52  ;;  %v1517_v56 = vld [vmem:[%s2549_s0 + $0x2b8] sm:$0xff]  ;;  %v177_v37 = vmax.f32 %v176_v28, %v1477_v18  ;;  %v185_v28 = vmax.f32 %v184_v20, %v1502_v59 }
  0x1d   :  { %2668 = vst [vmem:[#allocation24_spill] sm:$0xff] %v1447_v58  ;;  %v1527_v58 = vld [vmem:[%s2549_s0 + $0x248] sm:$0xff]  ;;  %158 = vmax.xlane.f32.xlu1 %v157_v50 }
  0x1e   :  { %2669 = vst [vmem:[#allocation25_spill] sm:$0xff] %v1453_v62  ;;  %v1534_v62 = vld [vmem:[%s2549_s0 + $0x250] sm:$0xff]  ;;  %v188_v50 = vmax.f32 %v1522_v63, %v1527_v58 }
  0x1f   :  { %2670 = vst [vmem:[#allocation26_spill] sm:$0xff] %v1466_v29  ;;  %v195_v29 = vmax.f32 %v1487_v3, %v1492_v8  ;;  %151 = vmax.xlane.f32.xlu0 %v150_v48  ;;  %v1564_v48 = vld [vmem:[%s2549_s0 + $0x258] sm:$0xff] }
  0x20   :  { %2671 = vst [vmem:[#allocation27_spill] sm:$0xff] %v1471_v52  ;;  %v204_v52 = vmax.f32 %v203_v41, %v1517_v56  ;;  %v189_v20 = vmax.f32 %v188_v50, %v1534_v62 }
  0x21   :  { %2672 = vst [vmem:[#allocation28_spill] sm:$0xff] %v1477_v18  ;;  %v196_v40 = vmax.f32 %v195_v29, %v1497_v49  ;;  %v1552_v29 = vld [vmem:[%s2549_s0 + $0x1d8] sm:$0xff]  ;;  %v170_v18 = vmax.f32 %v169_v61, %v1508_v15 }
  0x22   :  { %2673 = vst [vmem:[#allocation29_spill] sm:$0xff] %v1487_v3  ;;  %v1544_v3 = vld [vmem:[%s2549_s0 + $0x288] sm:$0xff]  ;;  %v1575_v61 = vld [vmem:[%s2549_s0 + $0x2d8] sm:$0xff] }
  0x23   :  { %2674 = vst [vmem:[#allocation30_spill] sm:$0xff] %v1492_v8  ;;  %v1539_v8 = vld [vmem:[%s2549_s0 + $0x208] sm:$0xff]  ;;  %v197_v41 = vmax.f32 %v196_v40, %v1544_v3  ;;  %v171_v50 = vmax.f32 %v170_v18, %v1552_v29  ;;  %v1597_v40 = vld [vmem:[%s2549_s0 + $0x260] sm:$0xff] }
  0x24   :  { %2675 = vst [vmem:[#allocation31_spill] sm:$0xff] %v1497_v49  ;;  %v1558_v49 = vld [vmem:[%s2549_s0 + $0x2c0] sm:$0xff]  ;;  %186 = vmax.xlane.f32.xlu2 %v185_v28  ;;  %v1608_v28 = vld [vmem:[%s2549_s0 + $0x298] sm:$0xff] }
  0x25   :  { %2676 = vst [vmem:[#allocation32_spill] sm:$0xff] %v1502_v59  ;;  %v1570_v59 = vld [vmem:[%s2549_s0 + $0x2d0] sm:$0xff]  ;;  %v1602_v18 = vld [vmem:[%s2549_s0 + $0x2e0] sm:$0xff] }
  0x26   :  { %2677 = vst [vmem:[#allocation33_spill] sm:$0xff] %v1508_v15  ;;  %v178_v15 = vmax.f32 %v177_v37, %v1539_v8  ;;  %v1592_v37 = vld [vmem:[%s2549_s0 + $0x2c8] sm:$0xff] }
  0x27   :  { %2678 = vst [vmem:[#allocation34_spill] sm:$0xff] %v1517_v56  ;;  %v1582_v56 = vld [vmem:[%s2549_s0 + $0x290] sm:$0xff]  ;;  %172 = vmax.xlane.f32.xlu0 %v171_v50 }
  0x28   :  { %2679 = vst [vmem:[#allocation35_spill] sm:$0xff] %v1522_v63  ;;  %v209_v63 = vmax.f32 %v1570_v59, %v1575_v61  ;;  %179 = vmax.xlane.f32.xlu1 %v178_v15  ;;  %v1621_v15 = vld [vmem:[%s2549_s0 + $0x2e8] sm:$0xff] }
  0x29   :  { %2680 = vst [vmem:[#allocation36_spill] sm:$0xff] %v1527_v58  ;;  %v190_v58 = vmax.f32 %v189_v20, %v1564_v48 }
  0x2a   :  { %2681 = vst [vmem:[#allocation37_spill] sm:$0xff] %v1534_v62  ;;  %v205_v62 = vmax.f32 %v204_v52, %v1558_v49  ;;  %v198_v52 = vmax.f32 %v197_v41, %v1582_v56 }
  0x2b   :  { %2682 = vst [vmem:[#allocation38_spill] sm:$0xff] %v1539_v8  ;;  %v191_v8 = vmax.f32 %v190_v58, %v1597_v40  ;;  %v1629_v58 = vld [vmem:[%s2549_s0 + $0x2f0] sm:$0xff] }
  0x2c   :  { %2683 = vst [vmem:[#allocation39_spill] sm:$0xff] %v1558_v49  ;;  %v206_v20 = vmax.f32 %v205_v62, %v1592_v37  ;;  %v1616_v49 = vld [vmem:[%s2549_s0 + $0x268] sm:$0xff]  ;;  %v199_v41 = vmax.f32 %v198_v52, %v1608_v28 }
  0x2d   :  { %2684 = vst [vmem:[#allocation40_spill] sm:$0xff] %v1564_v48  ;;  %v210_v48 = vmax.f32 %v209_v63, %v1602_v18  ;;  %v192_v50 = vmax.f32 %v191_v8, %v1616_v49 }
  0x2e   :  { %2685 = vst [vmem:[#allocation41_spill] sm:$0xff] %v1582_v56  ;;  %207 = vmax.xlane.f32.xlu2 %v206_v20  ;;  %v1635_v56 = vld [vmem:[%s2549_s0 + $0x2f8] sm:$0xff] }
  0x2f   :  { %2686 = vst [vmem:[#allocation42_spill] sm:$0xff] %v1597_v40  ;;  %v211_v62 = vmax.f32 %v210_v48, %v1621_v15  ;;  %193 = vmax.xlane.f32.xlu0 %v192_v50 }
  0x30   :  { %2687 = vst [vmem:[#allocation43_spill] sm:$0xff] %v1608_v28  ;;  %200 = vmax.xlane.f32.xlu1 %v199_v41 }
  0x31   :  { %2688 = vst [vmem:[#allocation44_spill] sm:$0xff] %v1616_v49  ;;  %v212_v63 = vmax.f32 %v211_v62, %v1629_v58 }
  0x32   :  { %2689 = vst [vmem:[#allocation45_spill] sm:$0xff] %v1621_v15 }
  0x33   :  { %2690 = vst [vmem:[#allocation46_spill] sm:$0xff] %v1629_v58  ;;  %v213_v52 = vmax.f32 %v212_v63, %v1635_v56 }
  0x34   :  { %2691 = vst [vmem:[#allocation47_spill] sm:$0xff] %v1635_v56 }
  0x37   :  { %214 = vmax.xlane.f32.xlu0 %v213_v52 }
  0x7f   :  { %v1638_v8 = vpop.xlane.xlu2 %137 }
  0x80   :  { %v240_v48 = vsub.f32 %v1065_v0, %v1638_v8  ;;  %v241_v20 = vsub.f32 %v1070_v1, %v1638_v8  ;;  %v242_v41 = vsub.f32 %v1075_v2, %v1638_v8  ;;  %v1646_v50 = vpop.xlane.xlu1 %123 }
  0x81   :  { %v228_v63 = vsub.f32 %v1087_v5, %v1646_v50  ;;  %v229_v52 = vsub.f32 %v1092_v6, %v1646_v50  ;;  %v230_v0 = vsub.f32 %v1097_v7, %v1646_v50 }
  0x82   :  { %v360_v62 = vmul.f32 1.442695, %v240_v48  ;;  %v362_v58 = vmul.f32 1.442695, %v241_v20  ;;  %v364_v28 = vmul.f32 1.442695, %v242_v41  ;;  %v1654_v56 = vpop.xlane.xlu0 %109 }
  0x83   :  { %v336_v1 = vmul.f32 1.442695, %v228_v63  ;;  %v216_v2 = vsub.f32 %v1115_v12, %v1654_v56  ;;  %v217_v48 = vsub.f32 %v1120_v13, %v1654_v56  ;;  %v338_v20 = vmul.f32 1.442695, %v229_v52 }
  0x84   :  { %828 = vpow2.f32 %v360_v62  ;;  %v340_v41 = vmul.f32 1.442695, %v230_v0  ;;  %v218_v5 = vsub.f32 %v1125_v14, %v1654_v56 }
  0x85   :  { %830 = vpow2.f32 %v362_v58  ;;  %v312_v6 = vmul.f32 1.442695, %v216_v2  ;;  %v314_v7 = vmul.f32 1.442695, %v217_v48 }
  0x86   :  { %832 = vpow2.f32 %v364_v28  ;;  %v316_v62 = vmul.f32 1.442695, %v218_v5 }
  0x87   :  { %834 = vpow2.f32 %v336_v1  ;;  %v1662_v15 = vpop.xlane.xlu2 %144 }
  0x88   :  { %836 = vpow2.f32 %v338_v20  ;;  %v246_v12 = vsub.f32 %v1149_v21, %v1662_v15  ;;  %v247_v13 = vsub.f32 %v1154_v22, %v1662_v15  ;;  %v248_v28 = vsub.f32 %v1159_v23, %v1662_v15  ;;  %v1670_v58 = vpop.xlane.xlu1 %130 }
  0x89   :  { %838 = vpow2.f32 %v340_v41  ;;  %v234_v52 = vsub.f32 %v1184_v31, %v1670_v58  ;;  %v235_v0 = vsub.f32 %v1189_v32, %v1670_v58  ;;  %v236_v48 = vsub.f32 %v1208_v39, %v1670_v58 }
  0x8a   :  { %v1672_v14 = vpop.eup %828  ;;  %840 = vpow2.f32 %v312_v6  ;;  %v372_v63 = vmul.f32 1.442695, %v246_v12  ;;  %v374_v1 = vmul.f32 1.442695, %v247_v13  ;;  %v376_v22 = vmul.f32 1.442695, %v248_v28  ;;  %v1680_v2 = vpop.xlane.xlu0 %116 }
  0x8b   :  { %2692 = vst [vmem:[#allocation48_spill] sm:$0xff] %v1672_v14  ;;  %v1678_v21 = vpop.eup %830  ;;  %842 = vpow2.f32 %v314_v7  ;;  %v348_v20 = vmul.f32 1.442695, %v234_v52  ;;  %v350_v31 = vmul.f32 1.442695, %v235_v0  ;;  %v222_v32 = vsub.f32 %v1220_v42, %v1680_v2 }
  0x8c   :  { %2693 = vst [vmem:[#allocation49_spill] sm:$0xff] %v1678_v21  ;;  %v1682_v23 = vpop.eup %832  ;;  %844 = vpow2.f32 %v316_v62  ;;  %v223_v5 = vsub.f32 %v1225_v43, %v1680_v2  ;;  %v352_v7 = vmul.f32 1.442695, %v236_v48  ;;  %v224_v62 = vsub.f32 %v1230_v44, %v1680_v2 }
  0x8d   :  { %v1686_v41 = vpop.eup %834  ;;  %846 = vpow2.f32 %v372_v63  ;;  %v324_v39 = vmul.f32 1.442695, %v222_v32 }
  0x8e   :  { %2694 = vst [vmem:[#allocation50_spill] sm:$0xff] %v1686_v41  ;;  %v1692_v6 = vpop.eup %836  ;;  %848 = vpow2.f32 %v374_v1  ;;  %v326_v42 = vmul.f32 1.442695, %v223_v5  ;;  %v328_v44 = vmul.f32 1.442695, %v224_v62 }
  0x8f   :  { %2695 = vst [vmem:[#allocation51_spill] sm:$0xff] %v1692_v6  ;;  %v1696_v12 = vpop.eup %838  ;;  %850 = vpow2.f32 %v376_v22  ;;  %v1698_v13 = vpop.xlane.xlu2 %165 }
  0x90   :  { %2696 = vst [vmem:[#allocation52_spill] sm:$0xff] %v1696_v12  ;;  %v1700_v28 = vpop.eup %840  ;;  %852 = vpow2.f32 %v348_v20  ;;  %v264_v43 = vsub.f32 %v1256_v53, %v1698_v13  ;;  %v265_v63 = vsub.f32 %v1261_v54, %v1698_v13  ;;  %v266_v0 = vsub.f32 %v1266_v55, %v1698_v13  ;;  %v1710_v1 = vpop.xlane.xlu1 %158 }
  0x91   :  { %2697 = vst [vmem:[#allocation53_spill] sm:$0xff] %v1700_v28  ;;  %v1706_v52 = vpop.eup %842  ;;  %854 = vpow2.f32 %v350_v31  ;;  %v258_v20 = vsub.f32 %v1292_v4, %v1710_v1  ;;  %v259_v31 = vsub.f32 %v1297_v9, %v1710_v1 }
  0x92   :  { %2698 = vst [vmem:[#allocation54_spill] sm:$0xff] %v1706_v52  ;;  %v1712_v22 = vpop.eup %844  ;;  %856 = vpow2.f32 %v352_v7  ;;  %v408_v48 = vmul.f32 1.442695, %v264_v43  ;;  %v410_v54 = vmul.f32 1.442695, %v265_v63  ;;  %v1720_v32 = vpop.xlane.xlu0 %151  ;;  %v260_v7 = vsub.f32 %v1302_v11, %v1710_v1 }
  0x93   :  { %2699 = vst [vmem:[#allocation55_spill] sm:$0xff] %v1712_v22  ;;  %v1716_v53 = vpop.eup %846  ;;  %858 = vpow2.f32 %v324_v39  ;;  %v412_v55 = vmul.f32 1.442695, %v266_v0  ;;  %v396_v4 = vmul.f32 1.442695, %v258_v20  ;;  %v252_v39 = vsub.f32 %v1328_v34, %v1720_v32 }
  0x94   :  { %2700 = vst [vmem:[#allocation56_spill] sm:$0xff] %v1716_v53  ;;  %v1722_v5 = vpop.eup %848  ;;  %860 = vpow2.f32 %v326_v42  ;;  %v253_v43 = vsub.f32 %v1333_v36, %v1720_v32  ;;  %v398_v63 = vmul.f32 1.442695, %v259_v31  ;;  %v254_v42 = vsub.f32 %v1338_v38, %v1720_v32 }
  0x95   :  { %2701 = vst [vmem:[#allocation57_spill] sm:$0xff] %v1722_v5  ;;  %v1726_v62 = vpop.eup %850  ;;  %862 = vpow2.f32 %v328_v44  ;;  %v231_v11 = vsub.f32 %v1108_v10, %v1646_v50  ;;  %v400_v44 = vmul.f32 1.442695, %v260_v7  ;;  %v384_v34 = vmul.f32 1.442695, %v252_v39 }
  0x96   :  { %2702 = vst [vmem:[#allocation58_spill] sm:$0xff] %v1726_v62  ;;  %v1732_v9 = vpop.eup %852  ;;  %864 = vpow2.f32 %v408_v48  ;;  %v232_v36 = vsub.f32 %v1136_v17, %v1646_v50  ;;  %v386_v48 = vmul.f32 1.442695, %v253_v43  ;;  %v233_v38 = vsub.f32 %v1165_v25, %v1646_v50 }
  0x97   :  { %2703 = vst [vmem:[#allocation59_spill] sm:$0xff] %v1732_v9  ;;  %v1736_v0 = vpop.eup %854  ;;  %866 = vpow2.f32 %v410_v54  ;;  %v219_v10 = vsub.f32 %v1142_v19, %v1654_v56  ;;  %v388_v54 = vmul.f32 1.442695, %v254_v42  ;;  %v1752_v7 = vpop.xlane.xlu2 %186  ;;  %v342_v39 = vmul.f32 1.442695, %v231_v11 }
  0x98   :  { %2704 = vst [vmem:[#allocation60_spill] sm:$0xff] %v1736_v0  ;;  %v1740_v20 = vpop.eup %856  ;;  %868 = vpow2.f32 %v412_v55  ;;  %v220_v17 = vsub.f32 %v1171_v27, %v1654_v56  ;;  %v344_v25 = vmul.f32 1.442695, %v232_v36  ;;  %v221_v50 = vsub.f32 %v1196_v35, %v1654_v56 }
  0x99   :  { %2705 = vst [vmem:[#allocation61_spill] sm:$0xff] %v1740_v20  ;;  %v1744_v49 = vpop.eup %858  ;;  %870 = vpow2.f32 %v396_v4  ;;  %v346_v19 = vmul.f32 1.442695, %v233_v38  ;;  %v518_v27 = vadd.f32 %v1692_v6, %v1686_v41  ;;  %v284_v36 = vsub.f32 %v1383_v16, %v1752_v7 }
  0x9a   :  { %2706 = vst [vmem:[#allocation62_spill] sm:$0xff] %v1744_v49  ;;  %v1748_v31 = vpop.eup %860  ;;  %872 = vpow2.f32 %v398_v63  ;;  %v282_v63 = vsub.f32 %v1359_v57, %v1752_v7  ;;  %v320_v56 = vmul.f32 1.442695, %v220_v17 }
  0x9b   :  { %2707 = vst [vmem:[#allocation63_spill] sm:$0xff] %v1748_v31  ;;  %v1754_v55 = vpop.eup %862  ;;  %874 = vpow2.f32 %v400_v44  ;;  %v1766_v42 = vpop.xlane.xlu1 %179  ;;  %v318_v44 = vmul.f32 1.442695, %v219_v10 }
  0x9c   :  { %2708 = vst [vmem:[#allocation64_spill] sm:$0xff] %v1754_v55  ;;  %v1758_v4 = vpop.eup %864  ;;  %876 = vpow2.f32 %v384_v34  ;;  %v283_v34 = vsub.f32 %v1364_v60, %v1752_v7  ;;  %v276_v38 = vsub.f32 %v1390_v45, %v1766_v42  ;;  %v1782_v10 = vpop.xlane.xlu0 %172  ;;  %v504_v60 = vadd.f32 %v1706_v52, %v1700_v28 }
  0x9d   :  { %2709 = vst [vmem:[#allocation65_spill] sm:$0xff] %v1758_v4  ;;  %v1762_v43 = vpop.eup %866  ;;  %878 = vpow2.f32 %v386_v48  ;;  %v322_v48 = vmul.f32 1.442695, %v221_v50  ;;  %v277_v17 = vsub.f32 %v1395_v47, %v1766_v42  ;;  %v278_v45 = vsub.f32 %v1400_v51, %v1766_v42 }
  0x9e   :  { %2710 = vst [vmem:[#allocation66_spill] sm:$0xff] %v1762_v43  ;;  %v1768_v11 = vpop.eup %868  ;;  %880 = vpow2.f32 %v388_v54  ;;  %v446_v50 = vmul.f32 1.442695, %v283_v34  ;;  %v270_v52 = vsub.f32 %v1425_v26, %v1782_v10  ;;  %v249_v47 = vsub.f32 %v1179_v30, %v1662_v15 }
  0x9f   :  { %2711 = vst [vmem:[#allocation67_spill] sm:$0xff] %v1768_v11  ;;  %v1774_v35 = vpop.eup %870  ;;  %882 = vpow2.f32 %v342_v39  ;;  %v444_v39 = vmul.f32 1.442695, %v282_v63  ;;  %v432_v28 = vmul.f32 1.442695, %v276_v38  ;;  %v505_v51 = vadd.f32 %v1712_v22, %v504_v60 }
  0xa0   :  { %v1778_v57 = vpop.eup %872  ;;  %884 = vpow2.f32 %v344_v25  ;;  %v519_v25 = vadd.f32 %v1696_v12, %v518_v27  ;;  %v434_v34 = vmul.f32 1.442695, %v277_v17  ;;  %v420_v60 = vmul.f32 1.442695, %v270_v52 }
  0xa1   :  { %v1784_v54 = vpop.eup %874  ;;  %886 = vpow2.f32 %v346_v19  ;;  %v448_v19 = vmul.f32 1.442695, %v284_v36  ;;  %v2717_v36 = vld [vmem:[#allocation2_spill] sm:$0xff] }
  0xa2   :  { %2712 = vst [vmem:[#allocation68_spill] sm:$0xff] %v1784_v54  ;;  %v1790_v16 = vpop.eup %876  ;;  %888 = vpow2.f32 %v318_v44  ;;  %v271_v44 = vsub.f32 %v1430_v33, %v1782_v10  ;;  %v243_v12 = vsub.f32 %v2717_v36, %v1638_v8  ;;  %v2719_v33 = vld [vmem:[#allocation7_spill] sm:$0xff] }
  0xa3   :  { %2713 = vst [vmem:[#allocation69_spill] sm:$0xff] %v1790_v16  ;;  %v1795_v6 = vpop.eup %878  ;;  %890 = vpow2.f32 %v320_v56  ;;  %v272_v56 = vsub.f32 %v1435_v46, %v1782_v10  ;;  %v237_v41 = vsub.f32 %v2719_v33, %v1670_v58  ;;  %v2725_v33 = vld [vmem:[#allocation9_spill] sm:$0xff] }
  0xa4   :  { %2714 = vst [vmem:[#allocation70_spill] sm:$0xff] %v1795_v6  ;;  %v1799_v63 = vpop.eup %880  ;;  %892 = vpow2.f32 %v322_v48  ;;  %v436_v48 = vmul.f32 1.442695, %v278_v45  ;;  %v422_v36 = vmul.f32 1.442695, %v271_v44 }
  0xa5   :  { %v1805_v27 = vpop.eup %882  ;;  %894 = vpow2.f32 %v444_v39  ;;  %v2720_v39 = vld [vmem:[#allocation5_spill] sm:$0xff] }
  0xa6   :  { %2715 = vst [vmem:[#allocation71_spill] sm:$0xff] %v1805_v27  ;;  %v1810_v26 = vpop.eup %884  ;;  %v520_v30 = vadd.f32 %v1805_v27, %v519_v25  ;;  %896 = vpow2.f32 %v446_v50  ;;  %v250_v17 = vsub.f32 %v2720_v39, %v1662_v15  ;;  %v2722_v25 = vld [vmem:[#allocation6_spill] sm:$0xff]  ;;  %v378_v27 = vmul.f32 1.442695, %v249_v47 }
  0xa7   :  { %2716 = vst [vmem:[#allocation72_spill] sm:$0xff] %v1810_v26  ;;  %v1815_v38 = vpop.eup %886  ;;  %898 = vpow2.f32 %v448_v19  ;;  %v251_v50 = vsub.f32 %v2722_v25, %v1662_v15  ;;  %v424_v19 = vmul.f32 1.442695, %v272_v56  ;;  %v225_v39 = vsub.f32 %v2725_v33, %v1680_v2 }
  0xa8   :  { %2718 = vst [vmem:[#allocation2_spill] sm:$0xff] %v1815_v38  ;;  %v1821_v46 = vpop.eup %888  ;;  %v521_v22 = vadd.f32 %v1810_v26, %v520_v30  ;;  %900 = vpow2.f32 %v432_v28  ;;  %v2726_v28 = vld [vmem:[#allocation8_spill] sm:$0xff]  ;;  %v380_v47 = vmul.f32 1.442695, %v250_v17  ;;  %v354_v25 = vmul.f32 1.442695, %v237_v41 }
  0xa9   :  { %2721 = vst [vmem:[#allocation7_spill] sm:$0xff] %v1821_v46  ;;  %v1826_v45 = vpop.eup %890  ;;  %v506_v40 = vadd.f32 %v1821_v46, %v505_v51  ;;  %902 = vpow2.f32 %v434_v34  ;;  %v238_v44 = vsub.f32 %v2726_v28, %v1670_v58  ;;  %v2728_v51 = vld [vmem:[#allocation10_spill] sm:$0xff]  ;;  %v382_v33 = vmul.f32 1.442695, %v251_v50 }
  0xaa   :  { %2723 = vst [vmem:[#allocation5_spill] sm:$0xff] %v1826_v45  ;;  %v1829_v52 = vpop.eup %892  ;;  %v522_v54 = vadd.f32 %v1815_v38, %v521_v22  ;;  %904 = vpow2.f32 %v436_v48  ;;  %v239_v34 = vsub.f32 %v2728_v51, %v1670_v58  ;;  %v1843_v22 = vpop.xlane.xlu2 %207  ;;  %v1854_v51 = vmul.f32 1.442695, %v243_v12  ;;  %v2736_v12 = vld [vmem:[#allocation12_spill] sm:$0xff] }
  0xab   :  { %2724 = vst [vmem:[#allocation6_spill] sm:$0xff] %v1829_v52  ;;  %v1836_v30 = vpop.eup %894  ;;  %v507_v15 = vadd.f32 %v1826_v45, %v506_v40  ;;  %906 = vpow2.f32 %v420_v60  ;;  %v539_v40 = vadd.f32 %v1722_v5, %v1716_v53  ;;  %v2731_v60 = vld [vmem:[#allocation11_spill] sm:$0xff]  ;;  %v356_v41 = vmul.f32 1.442695, %v238_v44  ;;  %v1862_v5 = vpop.xlane.xlu1 %200  ;;  %v2737_v44 = vld [vmem:[#allocation26_spill] sm:$0xff] }
  0xac   :  { %2727 = vst [vmem:[#allocation9_spill] sm:$0xff] %v1836_v30  ;;  %v1841_v56 = vpop.eup %896  ;;  %523 = vadd.xlane.f32.xlu0 %v522_v54  ;;  %908 = vpow2.f32 %v422_v36  ;;  %v226_v17 = vsub.f32 %v2731_v60, %v1680_v2  ;;  %v2733_v54 = vld [vmem:[#allocation13_spill] sm:$0xff]  ;;  %v330_v38 = vmul.f32 1.442695, %v225_v39  ;;  %v301_v39 = vsub.f32 %v2737_v44, %v1843_v22  ;;  %v1883_v44 = vpop.xlane.xlu0 %193 }
  0xad   :  { %2729 = vst [vmem:[#allocation8_spill] sm:$0xff] %v1841_v56  ;;  %v1845_v48 = vpop.eup %898  ;;  %v508_v28 = vadd.f32 %v1829_v52, %v507_v15  ;;  %910 = vpow2.f32 %v424_v19  ;;  %v227_v36 = vsub.f32 %v2733_v54, %v1680_v2  ;;  %v358_v19 = vmul.f32 1.442695, %v239_v34  ;;  %v2738_v34 = vld [vmem:[#allocation27_spill] sm:$0xff] }
  0xae   :  { %2730 = vst [vmem:[#allocation10_spill] sm:$0xff] %v1845_v48  ;;  %v1852_v58 = vpop.eup %900  ;;  %912 = vpow2.f32 %v378_v27  ;;  %v300_v15 = vsub.f32 %v1461_v24, %v1843_v22  ;;  %v267_v27 = vsub.f32 %v2736_v12, %v1698_v13  ;;  %v525_v2 = vadd.f32 %v1736_v0, %v1732_v9  ;;  %v2740_v0 = vld [vmem:[#allocation29_spill] sm:$0xff] }
  0xaf   :  { %2732 = vst [vmem:[#allocation11_spill] sm:$0xff] %v1852_v58  ;;  %v1858_v50 = vpop.eup %902  ;;  %509 = vadd.xlane.f32.xlu1 %v508_v28  ;;  %914 = vpow2.f32 %v380_v47  ;;  %v540_v47 = vadd.f32 %v1726_v62, %v539_v40  ;;  %v332_v24 = vmul.f32 1.442695, %v226_v17  ;;  %v302_v54 = vsub.f32 %v2738_v34, %v1843_v22  ;;  %v2742_v34 = vld [vmem:[#allocation30_spill] sm:$0xff] }
  0xb0   :  { %2734 = vst [vmem:[#allocation13_spill] sm:$0xff] %v1858_v50  ;;  %v1864_v60 = vpop.eup %904  ;;  %916 = vpow2.f32 %v382_v33  ;;  %v334_v12 = vmul.f32 1.442695, %v227_v36  ;;  %v511_v33 = vadd.f32 %v1748_v31, %v1744_v49  ;;  %v294_v9 = vsub.f32 %v2740_v0, %v1862_v5  ;;  %v2744_v0 = vld [vmem:[#allocation31_spill] sm:$0xff] }
  0xb1   :  { %2735 = vst [vmem:[#allocation73_spill] sm:$0xff] %v1864_v60  ;;  %v1872_v28 = vpop.eup %906  ;;  %918 = vpow2.f32 %v354_v25  ;;  %v2741_v25 = vld [vmem:[#allocation15_spill] sm:$0xff]  ;;  %v480_v17 = vmul.f32 1.442695, %v300_v15  ;;  %v295_v62 = vsub.f32 %v2742_v34, %v1862_v5  ;;  %v526_v36 = vadd.f32 %v1740_v20, %v525_v2 }
  0xb2   :  { %v1877_v53 = vpop.eup %908  ;;  %920 = vpow2.f32 %v356_v41  ;;  %v261_v40 = vsub.f32 %v2741_v25, %v1710_v1  ;;  %v482_v31 = vmul.f32 1.442695, %v301_v39  ;;  %v296_v49 = vsub.f32 %v2744_v0, %v1862_v5 }
  0xb3   :  { %2739 = vst [vmem:[#allocation12_spill] sm:$0xff] %v1877_v53  ;;  %v1885_v26 = vpop.eup %910  ;;  %922 = vpow2.f32 %v358_v19  ;;  %v484_v25 = vmul.f32 1.442695, %v302_v54  ;;  %v2746_v19 = vld [vmem:[#allocation35_spill] sm:$0xff]  ;;  %v512_v34 = vadd.f32 %v1754_v55, %v511_v33  ;;  %v468_v2 = vmul.f32 1.442695, %v294_v9 }
  0xb4   :  { %v1891_v41 = vpop.eup %912  ;;  %924 = vpow2.f32 %v330_v38  ;;  %v288_v15 = vsub.f32 %v2746_v19, %v1883_v44  ;;  %v2748_v38 = vld [vmem:[#allocation36_spill] sm:$0xff]  ;;  %v2750_v19 = vld [vmem:[#allocation17_spill] sm:$0xff]  ;;  %v472_v9 = vmul.f32 1.442695, %v296_v49  ;;  %v414_v49 = vmul.f32 1.442695, %v267_v27 }
  0xb5   :  { %2743 = vst [vmem:[#allocation26_spill] sm:$0xff] %v1891_v41  ;;  %v1896_v52 = vpop.eup %914  ;;  %v541_v45 = vadd.f32 %v1891_v41, %v540_v47  ;;  %926 = vpow2.f32 %v332_v24  ;;  %v289_v39 = vsub.f32 %v2748_v38, %v1883_v44  ;;  %v470_v47 = vmul.f32 1.442695, %v295_v62  ;;  %v2749_v24 = vld [vmem:[#allocation37_spill] sm:$0xff]  ;;  %v2751_v62 = vld [vmem:[#allocation14_spill] sm:$0xff] }
  0xb6   :  { %2745 = vst [vmem:[#allocation27_spill] sm:$0xff] %v1896_v52  ;;  %v1901_v46 = vpop.eup %916  ;;  %928 = vpow2.f32 %v334_v12  ;;  %v290_v54 = vsub.f32 %v2749_v24, %v1883_v44  ;;  %v255_v12 = vsub.f32 %v2750_v19, %v1720_v32  ;;  %v2753_v19 = vld [vmem:[#allocation18_spill] sm:$0xff] }
  0xb7   :  { %2747 = vst [vmem:[#allocation29_spill] sm:$0xff] %v1901_v46  ;;  %v1906_v20 = vpop.eup %918  ;;  %v542_v0 = vadd.f32 %v1896_v52, %v541_v45  ;;  %930 = vpow2.f32 %v480_v17  ;;  %v456_v45 = vmul.f32 1.442695, %v288_v15  ;;  %v268_v17 = vsub.f32 %v2751_v62, %v1698_v13  ;;  %v2754_v62 = vld [vmem:[#allocation21_spill] sm:$0xff] }
  0xb8   :  { %v1911_v41 = vpop.eup %920  ;;  %v527_v33 = vadd.f32 %v1906_v20, %v526_v36  ;;  %932 = vpow2.f32 %v482_v31  ;;  %v458_v60 = vmul.f32 1.442695, %v289_v39  ;;  %v269_v36 = vsub.f32 %v2753_v19, %v1698_v13 }
  0xb9   :  { %v1916_v55 = vpop.eup %922  ;;  %v543_v38 = vadd.f32 %v1901_v46, %v542_v0  ;;  %934 = vpow2.f32 %v484_v25  ;;  %v460_v25 = vmul.f32 1.442695, %v290_v54  ;;  %v285_v46 = vsub.f32 %v2754_v62, %v1752_v7 }
  0xba   :  { %v1921_v52 = vpop.eup %924  ;;  %v528_v24 = vadd.f32 %v1911_v41, %v527_v33  ;;  %936 = vpow2.f32 %v468_v2  ;;  %v2755_v2 = vld [vmem:[#allocation3_spill] sm:$0xff]  ;;  %v1943_v19 = vmul.f32 1.442695, %v261_v40  ;;  %v390_v62 = vmul.f32 1.442695, %v255_v12 }
  0xbb   :  { %2752 = vst [vmem:[#allocation15_spill] sm:$0xff] %v1921_v52  ;;  %v1926_v31 = vpop.eup %926  ;;  %544 = vadd.xlane.f32.xlu0 %v543_v38  ;;  %v513_v0 = vadd.f32 %v1921_v52, %v512_v34  ;;  %938 = vpow2.f32 %v470_v47  ;;  %v244_v39 = vsub.f32 %v2755_v2, %v1638_v8  ;;  %v416_v38 = vmul.f32 1.442695, %v268_v17  ;;  %v2757_v34 = vld [vmem:[#allocation4_spill] sm:$0xff] }
  0xbc   :  { %v1929_v15 = vpop.eup %928  ;;  %v529_v33 = vadd.f32 %v1916_v55, %v528_v24  ;;  %940 = vpow2.f32 %v472_v9  ;;  %v245_v47 = vsub.f32 %v2757_v34, %v1638_v8  ;;  %v418_v9 = vmul.f32 1.442695, %v269_v36  ;;  %v1945_v24 = vpop.xlane.xlu0 %214  ;;  %v2760_v8 = vld [vmem:[#allocation19_spill] sm:$0xff]  ;;  %v2762_v34 = vld [vmem:[#allocation22_spill] sm:$0xff] }
  0xbd   :  { %v1936_v13 = vpop.eup %930  ;;  %v514_v27 = vadd.f32 %v1926_v31, %v513_v0  ;;  %942 = vpow2.f32 %v456_v45  ;;  %v560_v45 = vadd.f32 %v1762_v43, %v1758_v4  ;;  %v256_v17 = vsub.f32 %v2760_v8, %v1720_v32 }
  0xbe   :  { %2756 = vst [vmem:[#allocation30_spill] sm:$0xff] %v1936_v13  ;;  %v1941_v54 = vpop.eup %932  ;;  %530 = vadd.xlane.f32.xlu1 %v529_v33  ;;  %944 = vpow2.f32 %v458_v60  ;;  %v450_v40 = vmul.f32 1.442695, %v285_v46  ;;  %v368_v12 = vmul.f32 1.442695, %v244_v39  ;;  %v2761_v60 = vld [vmem:[#allocation23_spill] sm:$0xff]  ;;  %v306_v43 = vsub.f32 %v1570_v59, %v1945_v24 }
  0xbf   :  { %2758 = vst [vmem:[#allocation31_spill] sm:$0xff] %v1941_v54  ;;  %v1947_v2 = vpop.eup %934  ;;  %v515_v52 = vadd.f32 %v1929_v15, %v514_v27  ;;  %946 = vpow2.f32 %v460_v25  ;;  %v257_v36 = vsub.f32 %v2761_v60, %v1720_v32  ;;  %v279_v27 = vsub.f32 %v2762_v34, %v1766_v42  ;;  %v2763_v46 = vld [vmem:[#allocation25_spill] sm:$0xff] }
  0xc0   :  { %2759 = vst [vmem:[#allocation35_spill] sm:$0xff] %v1947_v2  ;;  %v1954_v0 = vpop.eup %936  ;;  %948 = vpow2.f32 %v414_v49  ;;  %v370_v25 = vmul.f32 1.442695, %v245_v47  ;;  %v273_v49 = vsub.f32 %v2763_v46, %v1782_v10  ;;  %v532_v32 = vadd.f32 %v1678_v21, %v1672_v14 }
  0xc1   :  { %v1958_v33 = vpop.eup %938  ;;  %516 = vadd.xlane.f32.xlu2 %v515_v52  ;;  %950 = vpow2.f32 %v416_v38  ;;  %v307_v39 = vsub.f32 %v1575_v61, %v1945_v24  ;;  %v561_v52 = vadd.f32 %v1768_v11, %v560_v45  ;;  %v392_v38 = vmul.f32 1.442695, %v256_v17  ;;  %v2765_v45 = vld [vmem:[#allocation24_spill] sm:$0xff] }
  0xc2   :  { %v1964_v8 = vpop.eup %940  ;;  %952 = vpow2.f32 %v418_v9  ;;  %v308_v59 = vsub.f32 %v1602_v18, %v1945_v24  ;;  %v2764_v9 = vld [vmem:[#allocation34_spill] sm:$0xff]  ;;  %v394_v46 = vmul.f32 1.442695, %v257_v36  ;;  %v546_v61 = vadd.f32 %v1795_v6, %v1790_v16 }
  0xc3   :  { %v1972_v60 = vpop.eup %942  ;;  %954 = vpow2.f32 %v1854_v51  ;;  %v303_v34 = vsub.f32 %v2764_v9, %v1843_v22  ;;  %v1986_v14 = vmul.f32 1.442695, %v279_v27  ;;  %v492_v51 = vmul.f32 1.442695, %v306_v43 }
  0xc4   :  { %v1978_v47 = vpop.eup %944  ;;  %956 = vpow2.f32 %v368_v12  ;;  %v286_v17 = vsub.f32 %v2765_v45, %v1752_v7  ;;  %v533_v11 = vadd.f32 %v1682_v23, %v532_v32  ;;  %v494_v9 = vmul.f32 1.442695, %v307_v39  ;;  %v2766_v12 = vld [vmem:[#allocation32_spill] sm:$0xff] }
  0xc5   :  { %v1984_v21 = vpop.eup %946  ;;  %958 = vpow2.f32 %v370_v25  ;;  %v287_v36 = vsub.f32 %v2766_v12, %v1752_v7  ;;  %v426_v6 = vmul.f32 1.442695, %v273_v49  ;;  %v496_v25 = vmul.f32 1.442695, %v308_v59 }
  0xc6   :  { %v1990_v18 = vpop.eup %948  ;;  %960 = vpow2.f32 %v390_v62  ;;  %v2000_v16 = vmul.f32 1.442695, %v303_v34  ;;  %v547_v45 = vadd.f32 %v1799_v63, %v546_v61  ;;  %v2767_v62 = vld [vmem:[#allocation16_spill] sm:$0xff]  ;;  %v452_v49 = vmul.f32 1.442695, %v286_v17  ;;  %v2769_v17 = vld [vmem:[#allocation33_spill] sm:$0xff] }
  0xc7   :  { %v1995_v4 = vpop.eup %950  ;;  %v562_v27 = vadd.f32 %v1990_v18, %v561_v52  ;;  %962 = vpow2.f32 %v392_v38  ;;  %v262_v32 = vsub.f32 %v2767_v62, %v1710_v1  ;;  %v2768_v52 = vld [vmem:[#allocation20_spill] sm:$0xff]  ;;  %v581_v61 = vadd.f32 %v1841_v56, %v1836_v30 }
  0xc8   :  { %v1998_v43 = vpop.eup %952  ;;  %964 = vpow2.f32 %v394_v46  ;;  %v263_v38 = vsub.f32 %v2768_v52, %v1710_v1  ;;  %v454_v46 = vmul.f32 1.442695, %v287_v36  ;;  %v297_v62 = vsub.f32 %v1544_v3, %v1862_v5 }
  0xc9   :  { %v2005_v39 = vpop.eup %954  ;;  %v563_v7 = vadd.f32 %v1995_v4, %v562_v27  ;;  %966 = vpow2.f32 %v492_v51  ;;  %v274_v1 = vsub.f32 %v2769_v17, %v1782_v10  ;;  %v275_v36 = vsub.f32 %v1552_v29, %v1782_v10 }
  0xca   :  { %v2010_v59 = vpop.eup %956  ;;  %v534_v34 = vadd.f32 %v2005_v39, %v533_v11  ;;  %968 = vpow2.f32 %v494_v9  ;;  %v404_v9 = vmul.f32 1.442695, %v262_v32  ;;  %v2770_v32 = vld [vmem:[#allocation39_spill] sm:$0xff] }
  0xcb   :  { %v2015_v12 = vpop.eup %958  ;;  %v564_v51 = vadd.f32 %v1998_v43, %v563_v7  ;;  %970 = vpow2.f32 %v496_v25  ;;  %v406_v7 = vmul.f32 1.442695, %v263_v38  ;;  %v553_v25 = vadd.f32 %v1778_v57, %v1774_v35 }
  0xcc   :  { %v2022_v27 = vpop.eup %960  ;;  %v535_v11 = vadd.f32 %v2010_v59, %v534_v34  ;;  %972 = vpow2.f32 %v450_v40  ;;  %v582_v40 = vadd.f32 %v1845_v48, %v581_v61  ;;  %v304_v29 = vsub.f32 %v2770_v32, %v1843_v22  ;;  %v2777_v48 = vld [vmem:[#allocation38_spill] sm:$0xff] }
  0xcd   :  { %v2027_v52 = vpop.eup %962  ;;  %565 = vadd.xlane.f32.xlu0 %v564_v51  ;;  %v548_v3 = vadd.f32 %v2022_v27, %v547_v45  ;;  %974 = vpow2.f32 %v452_v49  ;;  %v428_v45 = vmul.f32 1.442695, %v274_v1  ;;  %v305_v49 = vsub.f32 %v1592_v37, %v1843_v22  ;;  %v2773_v51 = vld [vmem:[#allocation28_spill] sm:$0xff] }
  0xce   :  { %v2032_v17 = vpop.eup %964  ;;  %v536_v56 = vadd.f32 %v2015_v12, %v535_v11  ;;  %976 = vpow2.f32 %v454_v46  ;;  %v430_v46 = vmul.f32 1.442695, %v275_v36  ;;  %v567_v61 = vadd.f32 %v1877_v53, %v1872_v28 }
  0xcf   :  { %v2038_v10 = vpop.eup %966  ;;  %v549_v34 = vadd.f32 %v2027_v52, %v548_v3  ;;  %978 = vpow2.f32 %v1943_v19  ;;  %v280_v11 = vsub.f32 %v2773_v51, %v1766_v42  ;;  %v2052_v3 = vmul.f32 1.442695, %v297_v62  ;;  %v2775_v19 = vld [vmem:[#allocation40_spill] sm:$0xff] }
  0xd0   :  { %2771 = vst [vmem:[#allocation36_spill] sm:$0xff] %v2038_v10  ;;  %v2044_v38 = vpop.eup %968  ;;  %537 = vadd.xlane.f32.xlu2 %v536_v56  ;;  %980 = vpow2.f32 %v404_v9  ;;  %v291_v1 = vsub.f32 %v2775_v19, %v1883_v44  ;;  %v2776_v56 = vld [vmem:[#allocation68_spill] sm:$0xff]  ;;  %v488_v36 = vmul.f32 1.442695, %v304_v29  ;;  %v281_v30 = vsub.f32 %v2777_v48, %v1766_v42  ;;  %v2778_v29 = vld [vmem:[#allocation42_spill] sm:$0xff] }
  0xd1   :  { %2772 = vst [vmem:[#allocation37_spill] sm:$0xff] %v2044_v38  ;;  %v2050_v32 = vpop.eup %970  ;;  %v550_v37 = vadd.f32 %v2032_v17, %v549_v34  ;;  %982 = vpow2.f32 %v406_v7  ;;  %v554_v9 = vadd.f32 %v2776_v56, %v553_v25  ;;  %v490_v53 = vmul.f32 1.442695, %v305_v49 }
  0xd2   :  { %2774 = vst [vmem:[#allocation17_spill] sm:$0xff] %v2050_v32  ;;  %v2057_v22 = vpop.eup %972  ;;  %984 = vpow2.f32 %v426_v6  ;;  %v602_v34 = vadd.f32 %v1941_v54, %v1936_v13  ;;  %v568_v25 = vadd.f32 %v1885_v26, %v567_v61  ;;  %v440_v6 = vmul.f32 1.442695, %v280_v11  ;;  %v2780_v54 = vld [vmem:[#allocation45_spill] sm:$0xff] }
  0xd3   :  { %v2062_v51 = vpop.eup %974  ;;  %551 = vadd.xlane.f32.xlu1 %v550_v37  ;;  %v583_v62 = vadd.f32 %v2057_v22, %v582_v40  ;;  %986 = vpow2.f32 %v428_v45  ;;  %v292_v19 = vsub.f32 %v2778_v29, %v1883_v44  ;;  %v574_v40 = vadd.f32 %v1858_v50, %v1852_v58  ;;  %v2779_v45 = vld [vmem:[#allocation44_spill] sm:$0xff]  ;;  %v2781_v13 = vld [vmem:[#allocation41_spill] sm:$0xff] }
  0xd4   :  { %v2067_v7 = vpop.eup %976  ;;  %988 = vpow2.f32 %v430_v46  ;;  %v293_v49 = vsub.f32 %v2779_v45, %v1883_v44  ;;  %v462_v46 = vmul.f32 1.442695, %v291_v1  ;;  %v442_v11 = vmul.f32 1.442695, %v281_v30 }
  0xd5   :  { %v2072_v42 = vpop.eup %978  ;;  %v584_v48 = vadd.f32 %v2062_v51, %v583_v62  ;;  %990 = vpow2.f32 %v2000_v16  ;;  %v309_v62 = vsub.f32 %v2780_v54, %v1945_v24  ;;  %v298_v50 = vsub.f32 %v2781_v13, %v1862_v5 }
  0xd6   :  { %v2080_v37 = vpop.eup %980  ;;  %v555_v61 = vadd.f32 %v2072_v42, %v554_v9  ;;  %992 = vpow2.f32 %v488_v36  ;;  %v603_v1 = vadd.f32 %v1947_v2, %v602_v34  ;;  %v464_v30 = vmul.f32 1.442695, %v292_v19  ;;  %v2782_v36 = vld [vmem:[#allocation73_spill] sm:$0xff] }
  0xd7   :  { %v2083_v29 = vpop.eup %982  ;;  %v585_v16 = vadd.f32 %v2067_v7, %v584_v48  ;;  %994 = vpow2.f32 %v490_v53  ;;  %v575_v53 = vadd.f32 %v2782_v36, %v574_v40  ;;  %v466_v48 = vmul.f32 1.442695, %v293_v49 }
  0xd8   :  { %v2090_v58 = vpop.eup %984  ;;  %v556_v44 = vadd.f32 %v2080_v37, %v555_v61  ;;  %996 = vpow2.f32 %v1986_v14  ;;  %v588_v34 = vadd.f32 %v1978_v47, %v1972_v60  ;;  %v2783_v14 = vld [vmem:[#allocation43_spill] sm:$0xff]  ;;  %v498_v2 = vmul.f32 1.442695, %v309_v62 }
  0xd9   :  { %v2095_v9 = vpop.eup %986  ;;  %586 = vadd.xlane.f32.xlu0 %v585_v16  ;;  %v569_v54 = vadd.f32 %v2090_v58, %v568_v25  ;;  %998 = vpow2.f32 %v440_v6  ;;  %v299_v19 = vsub.f32 %v2783_v14, %v1862_v5  ;;  %v476_v25 = vmul.f32 1.442695, %v298_v50  ;;  %v2784_v6 = vld [vmem:[#allocation46_spill] sm:$0xff]  ;;  %v2785_v50 = vld [vmem:[#allocation47_spill] sm:$0xff] }
  0xda   :  { %v2099_v45 = vpop.eup %988  ;;  %v557_v13 = vadd.f32 %v2083_v29, %v556_v44  ;;  %1000 = vpow2.f32 %v442_v11  ;;  %v310_v40 = vsub.f32 %v2784_v6, %v1945_v24  ;;  %v589_v62 = vadd.f32 %v1984_v21, %v588_v34 }
  0xdb   :  { %v2106_v61 = vpop.eup %990  ;;  %v570_v16 = vadd.f32 %v2095_v9, %v569_v54  ;;  %1002 = vpow2.f32 %v462_v46  ;;  %v595_v54 = vadd.f32 %v1958_v33, %v1954_v0  ;;  %v311_v46 = vsub.f32 %v2785_v50, %v1945_v24 }
  0xdc   :  { %v2111_v49 = vpop.eup %992  ;;  %558 = vadd.xlane.f32.xlu2 %v557_v13  ;;  %v604_v11 = vadd.f32 %v2106_v61, %v603_v1  ;;  %1004 = vpow2.f32 %v464_v30  ;;  %v478_v1 = vmul.f32 1.442695, %v299_v19  ;;  %v500_v13 = vmul.f32 1.442695, %v310_v40 }
  0xdd   :  { %v2114_v44 = vpop.eup %994  ;;  %v571_v5 = vadd.f32 %v2099_v45, %v570_v16  ;;  %1006 = vpow2.f32 %v466_v48  ;;  %v609_v50 = vadd.f32 %v2044_v38, %v2038_v10  ;;  %v502_v19 = vmul.f32 1.442695, %v311_v46  ;;  %v2791_v10 = vld [vmem:[#allocation52_spill] sm:$0xff] }
  0xde   :  { %v2121_v14 = vpop.eup %996  ;;  %v605_v6 = vadd.f32 %v2111_v49, %v604_v11  ;;  %1008 = vpow2.f32 %v2052_v3  ;;  %v596_v3 = vadd.f32 %v1964_v8, %v595_v54 }
  0xdf   :  { %v2126_v30 = vpop.eup %998  ;;  %572 = vadd.xlane.f32.xlu1 %v571_v5  ;;  %v576_v48 = vadd.f32 %v2121_v14, %v575_v53  ;;  %1010 = vpow2.f32 %v476_v25 }
  0xe0   :  { %v2129_v16 = vpop.eup %1000  ;;  %v606_v24 = vadd.f32 %v2114_v44, %v605_v6  ;;  %1012 = vpow2.f32 %v498_v2 }
  0xe1   :  { %v2134_v11 = vpop.eup %1002  ;;  %v577_v34 = vadd.f32 %v2126_v30, %v576_v48  ;;  %1014 = vpow2.f32 %v478_v1  ;;  %v610_v48 = vadd.f32 %v2050_v32, %v609_v50 }
  0xe2   :  { %v2138_v5 = vpop.eup %1004  ;;  %607 = vadd.xlane.f32.xlu0 %v606_v24  ;;  %v590_v53 = vadd.f32 %v2134_v11, %v589_v62  ;;  %1016 = vpow2.f32 %v500_v13 }
  0xe3   :  { %v2141_v25 = vpop.eup %1006  ;;  %v578_v40 = vadd.f32 %v2129_v16, %v577_v34  ;;  %1018 = vpow2.f32 %v502_v19 }
  0xe4   :  { %v2144_v6 = vpop.eup %1008  ;;  %v591_v38 = vadd.f32 %v2138_v5, %v590_v53 }
  0xe5   :  { %v2148_v54 = vpop.eup %1010  ;;  %579 = vadd.xlane.f32.xlu2 %v578_v40  ;;  %v597_v2 = vadd.f32 %v2144_v6, %v596_v3 }
  0xe6   :  { %2786 = vst [vmem:[#allocation14_spill] sm:$0xff] %v2148_v54  ;;  %v592_v46 = vadd.f32 %v2141_v25, %v591_v38  ;;  %v2152_v62 = vpop.eup %1012 }
  0xe7   :  { %2787 = vst [vmem:[#allocation18_spill] sm:$0xff] %v2152_v62  ;;  %v598_v1 = vadd.f32 %v2148_v54, %v597_v2  ;;  %v2155_v24 = vpop.eup %1014  ;;  %v611_v13 = vadd.f32 %v2152_v62, %v610_v48  ;;  %v2790_v48 = vld [vmem:[#allocation51_spill] sm:$0xff] }
  0xe8   :  { %593 = vadd.xlane.f32.xlu1 %v592_v46  ;;  %v2158_v34 = vpop.eup %1016  ;;  %v2789_v46 = vld [vmem:[#allocation50_spill] sm:$0xff] }
  0xe9   :  { %v612_v50 = vadd.f32 %v2158_v34, %v611_v13  ;;  %v2161_v53 = vpop.eup %1018  ;;  %v599_v3 = vadd.f32 %v2155_v24, %v598_v1  ;;  %v2792_v1 = vld [vmem:[#allocation53_spill] sm:$0xff] }
  0xea   :  { %2788 = vst [vmem:[#allocation21_spill] sm:$0xff] %v2161_v53 }
  0xeb   :  { %v613_v19 = vadd.f32 %v2161_v53, %v612_v50  ;;  %v2794_v53 = vld [vmem:[#allocation55_spill] sm:$0xff] }
  0xed   :  { %600 = vadd.xlane.f32.xlu2 %v599_v3  ;;  %v2793_v3 = vld [vmem:[#allocation54_spill] sm:$0xff] }
  0xf0   :  { %614 = vadd.xlane.f32.xlu1 %v613_v19 }
 0x11f   :  { %v524_v38 = vpop.xlane.xlu0 %523 }
 0x120   :  { %1020 = vrcp.f32 %v524_v38 }
 0x122   :  { %v510_v40 = vpop.xlane.xlu1 %509 }
 0x123   :  { %1022 = vrcp.f32 %v510_v40  ;;  %v2795_v40 = vld [vmem:[#allocation7_spill] sm:$0xff] }
 0x126   :  { %v1021_v2 = vpop.eup %1020 }
 0x127   :  { %v644_v32 = vmul.f32 %v1021_v2, %v2789_v46  ;;  %v645_v62 = vmul.f32 %v1021_v2, %v2790_v48  ;;  %v646_v54 = vmul.f32 %v1021_v2, %v2791_v10  ;;  %v2796_v10 = vld [vmem:[#allocation5_spill] sm:$0xff] }
 0x129   :  { %v1023_v13 = vpop.eup %1022  ;;  %740 = vst [vmem:[%s2550_s1 + $0x60] sm:$0xff] %v644_v32  ;;  %v2797_v32 = vld [vmem:[#allocation6_spill] sm:$0xff] }
 0x12a   :  { %v632_v50 = vmul.f32 %v1023_v13, %v2792_v1  ;;  %v633_v19 = vmul.f32 %v1023_v13, %v2793_v3  ;;  %v634_v38 = vmul.f32 %v1023_v13, %v2794_v53  ;;  %741 = vst [vmem:[%s2550_s1 + $0x68] sm:$0xff] %v645_v62  ;;  %v635_v46 = vmul.f32 %v1023_v13, %v2795_v40  ;;  %v2798_v62 = vld [vmem:[#allocation71_spill] sm:$0xff] }
 0x12b   :  { %742 = vst [vmem:[%s2550_s1 + $0x70] sm:$0xff] %v646_v54  ;;  %v636_v48 = vmul.f32 %v1023_v13, %v2796_v10  ;;  %v637_v1 = vmul.f32 %v1023_v13, %v2797_v32  ;;  %v647_v53 = vmul.f32 %v1021_v2, %v2798_v62  ;;  %v2799_v54 = vld [vmem:[#allocation72_spill] sm:$0xff]  ;;  %v2800_v13 = vld [vmem:[#allocation2_spill] sm:$0xff] }
 0x12c   :  { %728 = vst [vmem:[%s2550_s1] sm:$0xff] %v632_v50  ;;  %v648_v40 = vmul.f32 %v1021_v2, %v2799_v54  ;;  %v649_v50 = vmul.f32 %v1021_v2, %v2800_v13 }
 0x12d   :  { %729 = vst [vmem:[%s2550_s1 + $0x8] sm:$0xff] %v633_v19 }
 0x12e   :  { %730 = vst [vmem:[%s2550_s1 + $0x10] sm:$0xff] %v634_v38  ;;  %v545_v3 = vpop.xlane.xlu0 %544 }
 0x12f   :  { %731 = vst [vmem:[%s2550_s1 + $0x18] sm:$0xff] %v635_v46  ;;  %1024 = vrcp.f32 %v545_v3  ;;  %v2801_v46 = vld [vmem:[#allocation56_spill] sm:$0xff] }
 0x130   :  { %732 = vst [vmem:[%s2550_s1 + $0x20] sm:$0xff] %v636_v48  ;;  %v2802_v48 = vld [vmem:[#allocation57_spill] sm:$0xff] }
 0x131   :  { %733 = vst [vmem:[%s2550_s1 + $0x28] sm:$0xff] %v637_v1  ;;  %v531_v19 = vpop.xlane.xlu1 %530  ;;  %v2803_v1 = vld [vmem:[#allocation58_spill] sm:$0xff] }
 0x132   :  { %743 = vst [vmem:[%s2550_s1 + $0x78] sm:$0xff] %v647_v53  ;;  %1026 = vrcp.f32 %v531_v19  ;;  %v2804_v53 = vld [vmem:[#allocation59_spill] sm:$0xff]  ;;  %v2806_v19 = vld [vmem:[#allocation61_spill] sm:$0xff] }
 0x133   :  { %744 = vst [vmem:[%s2550_s1 + $0x80] sm:$0xff] %v648_v40  ;;  %v2805_v40 = vld [vmem:[#allocation60_spill] sm:$0xff] }
 0x134   :  { %745 = vst [vmem:[%s2550_s1 + $0x88] sm:$0xff] %v649_v50  ;;  %v517_v38 = vpop.xlane.xlu2 %516 }
 0x135   :  { %v1025_v2 = vpop.eup %1024  ;;  %1028 = vrcp.f32 %v517_v38 }
 0x136   :  { %v662_v10 = vmul.f32 %v1025_v2, %v2801_v46  ;;  %v663_v32 = vmul.f32 %v1025_v2, %v2802_v48  ;;  %v664_v62 = vmul.f32 %v1025_v2, %v2803_v1 }
 0x138   :  { %v1027_v3 = vpop.eup %1026  ;;  %758 = vst [vmem:[%s2550_s1 + $0xf0] sm:$0xff] %v662_v10 }
 0x139   :  { %v650_v54 = vmul.f32 %v1027_v3, %v2804_v53  ;;  %v651_v13 = vmul.f32 %v1027_v3, %v2805_v40  ;;  %v652_v50 = vmul.f32 %v1027_v3, %v2806_v19  ;;  %759 = vst [vmem:[%s2550_s1 + $0xf8] sm:$0xff] %v663_v32  ;;  %v653_v38 = vmul.f32 %v1027_v3, %v1906_v20  ;;  %v2807_v20 = vld [vmem:[#allocation62_spill] sm:$0xff] }
 0x13a   :  { %760 = vst [vmem:[%s2550_s1 + $0x100] sm:$0xff] %v664_v62  ;;  %v654_v48 = vmul.f32 %v1027_v3, %v1911_v41  ;;  %v655_v10 = vmul.f32 %v1027_v3, %v1916_v55  ;;  %v2808_v41 = vld [vmem:[#allocation63_spill] sm:$0xff]  ;;  %v2809_v55 = vld [vmem:[#allocation64_spill] sm:$0xff]  ;;  %v2811_v19 = vld [vmem:[#allocation26_spill] sm:$0xff] }
 0x13b   :  { %v1029_v46 = vpop.eup %1028  ;;  %746 = vst [vmem:[%s2550_s1 + $0x90] sm:$0xff] %v650_v54  ;;  %v2810_v3 = vld [vmem:[#allocation15_spill] sm:$0xff] }
 0x13c   :  { %747 = vst [vmem:[%s2550_s1 + $0x98] sm:$0xff] %v651_v13  ;;  %v638_v32 = vmul.f32 %v1029_v46, %v2807_v20  ;;  %v639_v1 = vmul.f32 %v1029_v46, %v2808_v41  ;;  %v640_v62 = vmul.f32 %v1029_v46, %v2809_v55  ;;  %v641_v53 = vmul.f32 %v1029_v46, %v2810_v3 }
 0x13d   :  { %748 = vst [vmem:[%s2550_s1 + $0xa0] sm:$0xff] %v652_v50  ;;  %v642_v40 = vmul.f32 %v1029_v46, %v1926_v31  ;;  %v643_v13 = vmul.f32 %v1029_v46, %v1929_v15  ;;  %v665_v50 = vmul.f32 %v1025_v2, %v2811_v19  ;;  %v2812_v31 = vld [vmem:[#allocation27_spill] sm:$0xff]  ;;  %v2813_v15 = vld [vmem:[#allocation29_spill] sm:$0xff] }
 0x13e   :  { %749 = vst [vmem:[%s2550_s1 + $0xa8] sm:$0xff] %v653_v38  ;;  %v667_v46 = vmul.f32 %v1025_v2, %v2813_v15 }
 0x13f   :  { %750 = vst [vmem:[%s2550_s1 + $0xb0] sm:$0xff] %v654_v48  ;;  %v666_v48 = vmul.f32 %v1025_v2, %v2812_v31  ;;  %v2816_v2 = vld [vmem:[#allocation67_spill] sm:$0xff] }
 0x140   :  { %751 = vst [vmem:[%s2550_s1 + $0xb8] sm:$0xff] %v655_v10  ;;  %v566_v54 = vpop.xlane.xlu0 %565 }
 0x141   :  { %734 = vst [vmem:[%s2550_s1 + $0x30] sm:$0xff] %v638_v32  ;;  %1030 = vrcp.f32 %v566_v54  ;;  %v2814_v32 = vld [vmem:[#allocation65_spill] sm:$0xff] }
 0x142   :  { %735 = vst [vmem:[%s2550_s1 + $0x38] sm:$0xff] %v639_v1  ;;  %v2815_v1 = vld [vmem:[#allocation66_spill] sm:$0xff] }
 0x143   :  { %736 = vst [vmem:[%s2550_s1 + $0x40] sm:$0xff] %v640_v62  ;;  %v538_v38 = vpop.xlane.xlu2 %537 }
 0x144   :  { %737 = vst [vmem:[%s2550_s1 + $0x48] sm:$0xff] %v641_v53  ;;  %1032 = vrcp.f32 %v538_v38  ;;  %v2817_v53 = vld [vmem:[#allocation48_spill] sm:$0xff] }
 0x145   :  { %738 = vst [vmem:[%s2550_s1 + $0x50] sm:$0xff] %v642_v40  ;;  %v2818_v40 = vld [vmem:[#allocation49_spill] sm:$0xff] }
 0x146   :  { %739 = vst [vmem:[%s2550_s1 + $0x58] sm:$0xff] %v643_v13  ;;  %v552_v10 = vpop.xlane.xlu1 %551 }
 0x147   :  { %v1031_v20 = vpop.eup %1030  ;;  %761 = vst [vmem:[%s2550_s1 + $0x108] sm:$0xff] %v665_v50  ;;  %1034 = vrcp.f32 %v552_v10 }
 0x148   :  { %762 = vst [vmem:[%s2550_s1 + $0x110] sm:$0xff] %v666_v48  ;;  %v680_v41 = vmul.f32 %v1031_v20, %v2814_v32  ;;  %v681_v55 = vmul.f32 %v1031_v20, %v2815_v1  ;;  %v682_v62 = vmul.f32 %v1031_v20, %v2816_v2 }
 0x149   :  { %763 = vst [vmem:[%s2550_s1 + $0x118] sm:$0xff] %v667_v46 }
 0x14a   :  { %v1033_v3 = vpop.eup %1032  ;;  %776 = vst [vmem:[%s2550_s1 + $0x180] sm:$0xff] %v680_v41 }
 0x14b   :  { %v656_v54 = vmul.f32 %v1033_v3, %v2817_v53  ;;  %v657_v13 = vmul.f32 %v1033_v3, %v2818_v40  ;;  %v658_v19 = vmul.f32 %v1033_v3, %v1682_v23  ;;  %777 = vst [vmem:[%s2550_s1 + $0x188] sm:$0xff] %v681_v55  ;;  %v659_v50 = vmul.f32 %v1033_v3, %v2005_v39  ;;  %v2819_v23 = vld [vmem:[#allocation69_spill] sm:$0xff] }
 0x14c   :  { %778 = vst [vmem:[%s2550_s1 + $0x190] sm:$0xff] %v682_v62  ;;  %v660_v31 = vmul.f32 %v1033_v3, %v2010_v59  ;;  %v661_v48 = vmul.f32 %v1033_v3, %v2015_v12  ;;  %v2820_v59 = vld [vmem:[#allocation70_spill] sm:$0xff]  ;;  %v587_v55 = vpop.xlane.xlu0 %586 }
 0x14d   :  { %v1035_v38 = vpop.eup %1034  ;;  %752 = vst [vmem:[%s2550_s1 + $0xc0] sm:$0xff] %v656_v54 }
 0x14e   :  { %753 = vst [vmem:[%s2550_s1 + $0xc8] sm:$0xff] %v657_v13  ;;  %v668_v39 = vmul.f32 %v1035_v38, %v2819_v23  ;;  %v669_v46 = vmul.f32 %v1035_v38, %v2820_v59  ;;  %v670_v12 = vmul.f32 %v1035_v38, %v1799_v63  ;;  %v671_v10 = vmul.f32 %v1035_v38, %v2022_v27  ;;  %v2825_v23 = vld [vmem:[#allocation11_spill] sm:$0xff] }
 0x14f   :  { %754 = vst [vmem:[%s2550_s1 + $0xd0] sm:$0xff] %v658_v19  ;;  %v559_v15 = vpop.xlane.xlu2 %558  ;;  %v672_v41 = vmul.f32 %v1035_v38, %v2027_v52  ;;  %v673_v1 = vmul.f32 %v1035_v38, %v2032_v17  ;;  %v683_v63 = vmul.f32 %v1031_v20, %v1990_v18  ;;  %v684_v52 = vmul.f32 %v1031_v20, %v1995_v4 }
 0x150   :  { %755 = vst [vmem:[%s2550_s1 + $0xd8] sm:$0xff] %v659_v50  ;;  %1036 = vrcp.f32 %v559_v15  ;;  %v685_v17 = vmul.f32 %v1031_v20, %v1998_v43 }
 0x151   :  { %756 = vst [vmem:[%s2550_s1 + $0xe0] sm:$0xff] %v660_v31 }
 0x152   :  { %757 = vst [vmem:[%s2550_s1 + $0xe8] sm:$0xff] %v661_v48  ;;  %v573_v32 = vpop.xlane.xlu1 %572 }
 0x153   :  { %764 = vst [vmem:[%s2550_s1 + $0x120] sm:$0xff] %v668_v39  ;;  %1038 = vrcp.f32 %v573_v32 }
 0x154   :  { %765 = vst [vmem:[%s2550_s1 + $0x128] sm:$0xff] %v669_v46  ;;  %1040 = vrcp.f32 %v587_v55 }
 0x155   :  { %766 = vst [vmem:[%s2550_s1 + $0x130] sm:$0xff] %v670_v12 }
 0x156   :  { %v1037_v27 = vpop.eup %1036  ;;  %767 = vst [vmem:[%s2550_s1 + $0x138] sm:$0xff] %v671_v10 }
 0x157   :  { %768 = vst [vmem:[%s2550_s1 + $0x140] sm:$0xff] %v672_v41  ;;  %v674_v18 = vmul.f32 %v1037_v27, %v1774_v35  ;;  %v675_v2 = vmul.f32 %v1037_v27, %v1778_v57  ;;  %v676_v4 = vmul.f32 %v1037_v27, %v2776_v56  ;;  %v677_v35 = vmul.f32 %v1037_v27, %v2072_v42 }
 0x158   :  { %769 = vst [vmem:[%s2550_s1 + $0x148] sm:$0xff] %v673_v1  ;;  %v678_v20 = vmul.f32 %v1037_v27, %v2080_v37  ;;  %v679_v57 = vmul.f32 %v1037_v27, %v2083_v29  ;;  %v580_v42 = vpop.xlane.xlu2 %579  ;;  %v2821_v37 = vld [vmem:[#allocation12_spill] sm:$0xff] }
 0x159   :  { %779 = vst [vmem:[%s2550_s1 + $0x198] sm:$0xff] %v683_v63  ;;  %v1039_v43 = vpop.eup %1038  ;;  %1042 = vrcp.f32 %v580_v42 }
 0x15a   :  { %780 = vst [vmem:[%s2550_s1 + $0x1a0] sm:$0xff] %v684_v52  ;;  %v686_v56 = vmul.f32 %v1039_v43, %v1872_v28  ;;  %v687_v62 = vmul.f32 %v1039_v43, %v2821_v37  ;;  %v688_v29 = vmul.f32 %v1039_v43, %v1885_v26  ;;  %v1041_v3 = vpop.eup %1040  ;;  %v689_v28 = vmul.f32 %v1039_v43, %v2090_v58  ;;  %v2822_v26 = vld [vmem:[#allocation9_spill] sm:$0xff] }
 0x15b   :  { %781 = vst [vmem:[%s2550_s1 + $0x1a8] sm:$0xff] %v685_v17  ;;  %v690_v53 = vmul.f32 %v1039_v43, %v2095_v9  ;;  %v691_v54 = vmul.f32 %v1039_v43, %v2099_v45  ;;  %v698_v40 = vmul.f32 %v1041_v3, %v2822_v26  ;;  %v594_v58 = vpop.xlane.xlu1 %593  ;;  %v2823_v9 = vld [vmem:[#allocation8_spill] sm:$0xff]  ;;  %v2824_v45 = vld [vmem:[#allocation10_spill] sm:$0xff]  ;;  %v701_v38 = vmul.f32 %v1041_v3, %v2057_v22  ;;  %v608_v22 = vpop.xlane.xlu0 %607 }
 0x15c   :  { %770 = vst [vmem:[%s2550_s1 + $0x150] sm:$0xff] %v674_v18  ;;  %v699_v13 = vmul.f32 %v1041_v3, %v2823_v9  ;;  %v700_v19 = vmul.f32 %v1041_v3, %v2824_v45  ;;  %1044 = vrcp.f32 %v594_v58  ;;  %v702_v31 = vmul.f32 %v1041_v3, %v2062_v51  ;;  %v2826_v51 = vld [vmem:[#allocation13_spill] sm:$0xff] }
 0x15d   :  { %771 = vst [vmem:[%s2550_s1 + $0x158] sm:$0xff] %v675_v2  ;;  %v703_v48 = vmul.f32 %v1041_v3, %v2067_v7  ;;  %1046 = vrcp.f32 %v608_v22 }
 0x15e   :  { %772 = vst [vmem:[%s2550_s1 + $0x160] sm:$0xff] %v676_v4 }
 0x15f   :  { %773 = vst [vmem:[%s2550_s1 + $0x168] sm:$0xff] %v677_v35  ;;  %v1043_v50 = vpop.eup %1042 }
 0x160   :  { %774 = vst [vmem:[%s2550_s1 + $0x170] sm:$0xff] %v678_v20  ;;  %v692_v39 = vmul.f32 %v1043_v50, %v2825_v23  ;;  %v693_v15 = vmul.f32 %v1043_v50, %v2826_v51  ;;  %v694_v7 = vmul.f32 %v1043_v50, %v2782_v36  ;;  %v695_v46 = vmul.f32 %v1043_v50, %v2121_v14  ;;  %v601_v14 = vpop.xlane.xlu2 %600 }
 0x161   :  { %775 = vst [vmem:[%s2550_s1 + $0x178] sm:$0xff] %v679_v57  ;;  %v696_v12 = vmul.f32 %v1043_v50, %v2126_v30  ;;  %v697_v10 = vmul.f32 %v1043_v50, %v2129_v16  ;;  %1048 = vrcp.f32 %v601_v14 }
 0x162   :  { %782 = vst [vmem:[%s2550_s1 + $0x1b0] sm:$0xff] %v686_v56  ;;  %v1045_v59 = vpop.eup %1044  ;;  %v2834_v56 = vld [vmem:[#allocation18_spill] sm:$0xff] }
 0x163   :  { %783 = vst [vmem:[%s2550_s1 + $0x1b8] sm:$0xff] %v687_v62  ;;  %v704_v36 = vmul.f32 %v1045_v59, %v1972_v60  ;;  %v705_v30 = vmul.f32 %v1045_v59, %v1978_v47  ;;  %v706_v16 = vmul.f32 %v1045_v59, %v1984_v21  ;;  %v1047_v32 = vpop.eup %1046  ;;  %v707_v60 = vmul.f32 %v1045_v59, %v2134_v11  ;;  %v2827_v21 = vld [vmem:[#allocation30_spill] sm:$0xff]  ;;  %v615_v11 = vpop.xlane.xlu1 %614  ;;  %v2835_v62 = vld [vmem:[#allocation21_spill] sm:$0xff] }
 0x164   :  { %784 = vst [vmem:[%s2550_s1 + $0x1c0] sm:$0xff] %v688_v29  ;;  %v708_v41 = vmul.f32 %v1045_v59, %v2138_v5  ;;  %v709_v47 = vmul.f32 %v1045_v59, %v2141_v25  ;;  %v716_v1 = vmul.f32 %v1047_v32, %v2827_v21  ;;  %v2828_v5 = vld [vmem:[#allocation31_spill] sm:$0xff]  ;;  %v719_v17 = vmul.f32 %v1047_v32, %v2106_v61 }
 0x165   :  { %785 = vst [vmem:[%s2550_s1 + $0x1c8] sm:$0xff] %v689_v28  ;;  %v717_v63 = vmul.f32 %v1047_v32, %v2828_v5  ;;  %v2829_v25 = vld [vmem:[#allocation35_spill] sm:$0xff]  ;;  %1050 = vrcp.f32 %v615_v11  ;;  %v720_v18 = vmul.f32 %v1047_v32, %v2111_v49  ;;  %v721_v55 = vmul.f32 %v1047_v32, %v2114_v44 }
 0x166   :  { %786 = vst [vmem:[%s2550_s1 + $0x1d0] sm:$0xff] %v690_v53  ;;  %v718_v27 = vmul.f32 %v1047_v32, %v2829_v25 }
 0x167   :  { %787 = vst [vmem:[%s2550_s1 + $0x1d8] sm:$0xff] %v691_v54  ;;  %v1049_v52 = vpop.eup %1048 }
 0x168   :  { %794 = vst [vmem:[%s2550_s1 + $0x210] sm:$0xff] %v698_v40  ;;  %v710_v2 = vmul.f32 %v1049_v52, %v1954_v0  ;;  %v711_v61 = vmul.f32 %v1049_v52, %v1958_v33  ;;  %v712_v49 = vmul.f32 %v1049_v52, %v1964_v8  ;;  %v713_v4 = vmul.f32 %v1049_v52, %v2144_v6  ;;  %v2830_v0 = vld [vmem:[#allocation14_spill] sm:$0xff]  ;;  %v2831_v8 = vld [vmem:[#allocation36_spill] sm:$0xff]  ;;  %v2832_v6 = vld [vmem:[#allocation37_spill] sm:$0xff] }
 0x169   :  { %795 = vst [vmem:[%s2550_s1 + $0x218] sm:$0xff] %v699_v13  ;;  %v714_v43 = vmul.f32 %v1049_v52, %v2830_v0  ;;  %v715_v33 = vmul.f32 %v1049_v52, %v2155_v24  ;;  %v2833_v24 = vld [vmem:[#allocation17_spill] sm:$0xff] }
 0x16a   :  { %796 = vst [vmem:[%s2550_s1 + $0x220] sm:$0xff] %v700_v19 }
 0x16b   :  { %797 = vst [vmem:[%s2550_s1 + $0x228] sm:$0xff] %v701_v38  ;;  %v1051_v44 = vpop.eup %1050 }
 0x16c   :  { %798 = vst [vmem:[%s2550_s1 + $0x230] sm:$0xff] %v702_v31  ;;  %v722_v35 = vmul.f32 %v1051_v44, %v2831_v8  ;;  %v723_v20 = vmul.f32 %v1051_v44, %v2832_v6  ;;  %v724_v57 = vmul.f32 %v1051_v44, %v2833_v24  ;;  %v725_v42 = vmul.f32 %v1051_v44, %v2834_v56 }
 0x16d   :  { %799 = vst [vmem:[%s2550_s1 + $0x238] sm:$0xff] %v703_v48  ;;  %v726_v37 = vmul.f32 %v1051_v44, %v2158_v34  ;;  %v727_v29 = vmul.f32 %v1051_v44, %v2835_v62 }
 0x16e   :  { %788 = vst [vmem:[%s2550_s1 + $0x1e0] sm:$0xff] %v692_v39 }
 0x16f   :  { %789 = vst [vmem:[%s2550_s1 + $0x1e8] sm:$0xff] %v693_v15 }
 0x170   :  { %790 = vst [vmem:[%s2550_s1 + $0x1f0] sm:$0xff] %v694_v7 }
 0x171   :  { %791 = vst [vmem:[%s2550_s1 + $0x1f8] sm:$0xff] %v695_v46 }
 0x172   :  { %792 = vst [vmem:[%s2550_s1 + $0x200] sm:$0xff] %v696_v12 }
 0x173   :  { %793 = vst [vmem:[%s2550_s1 + $0x208] sm:$0xff] %v697_v10 }
 0x174   :  { %800 = vst [vmem:[%s2550_s1 + $0x240] sm:$0xff] %v704_v36 }
 0x175   :  { %801 = vst [vmem:[%s2550_s1 + $0x248] sm:$0xff] %v705_v30 }
 0x176   :  { %802 = vst [vmem:[%s2550_s1 + $0x250] sm:$0xff] %v706_v16 }
 0x177   :  { %803 = vst [vmem:[%s2550_s1 + $0x258] sm:$0xff] %v707_v60 }
 0x178   :  { %804 = vst [vmem:[%s2550_s1 + $0x260] sm:$0xff] %v708_v41 }
 0x179   :  { %805 = vst [vmem:[%s2550_s1 + $0x268] sm:$0xff] %v709_v47 }
 0x17a   :  { %812 = vst [vmem:[%s2550_s1 + $0x2a0] sm:$0xff] %v716_v1 }
 0x17b   :  { %813 = vst [vmem:[%s2550_s1 + $0x2a8] sm:$0xff] %v717_v63 }
 0x17c   :  { %814 = vst [vmem:[%s2550_s1 + $0x2b0] sm:$0xff] %v718_v27 }
 0x17d   :  { %815 = vst [vmem:[%s2550_s1 + $0x2b8] sm:$0xff] %v719_v17 }
 0x17e   :  { %816 = vst [vmem:[%s2550_s1 + $0x2c0] sm:$0xff] %v720_v18 }
 0x17f   :  { %817 = vst [vmem:[%s2550_s1 + $0x2c8] sm:$0xff] %v721_v55 }
 0x180   :  { %806 = vst [vmem:[%s2550_s1 + $0x270] sm:$0xff] %v710_v2 }
 0x181   :  { %807 = vst [vmem:[%s2550_s1 + $0x278] sm:$0xff] %v711_v61 }
 0x182   :  { %808 = vst [vmem:[%s2550_s1 + $0x280] sm:$0xff] %v712_v49 }
 0x183   :  { %809 = vst [vmem:[%s2550_s1 + $0x288] sm:$0xff] %v713_v4 }
 0x184   :  { %810 = vst [vmem:[%s2550_s1 + $0x290] sm:$0xff] %v714_v43 }
 0x185   :  { %811 = vst [vmem:[%s2550_s1 + $0x298] sm:$0xff] %v715_v33 }
 0x186   :  { %818 = vst [vmem:[%s2550_s1 + $0x2d0] sm:$0xff] %v722_v35 }
 0x187   :  { %819 = vst [vmem:[%s2550_s1 + $0x2d8] sm:$0xff] %v723_v20 }
 0x188   :  { %820 = vst [vmem:[%s2550_s1 + $0x2e0] sm:$0xff] %v724_v57 }
 0x189   :  { %821 = vst [vmem:[%s2550_s1 + $0x2e8] sm:$0xff] %v725_v42 }
 0x18a   :  { %822 = vst [vmem:[%s2550_s1 + $0x2f0] sm:$0xff] %v726_v37 }
 0x18b   :  { %823 = vst [vmem:[%s2550_s1 + $0x2f8] sm:$0xff] %v727_v29 }

// kernel: hourglass_fwd.53
= control target key start
LH: loop header
LB: loop body
LE: loop exit
PB: predicated region body
PF: predicated region fallthrough
CT: control target
= control target key end

     0   :  { %s1516_s9 = smov 0   ;;  %s1518_s10 = smov 0   ;;  %s1679_s0 = inlined_call_operand.vmem [shape: bf16[2,64,768], index: 0, kind: input, shape index: {}]   ;;  %s1680_s1 = inlined_call_operand.vmem [shape: bf16[2,768,128], index: 1, kind: input, shape index: {}]   ;;  %s1681_s2 = inlined_call_operand.vmem [shape: f32[2,64,128], index: 2, kind: output, shape index: {}]  }
   0x1   :  { %s1520_s11 = smov 0  }
   0x2 LB: > { %s31_s12 = sadd.s32 1, %s1495_s10  ;;  %p1067_p0 = scmp.ge.s32.totalorder %s1499_s11, 1  ;;  %s1499_s11 = sphi %s1520_s11, %s12_s11   ;;  %s1495_s10 = sphi %s1518_s10, %s1683_s10   ;;  %s1491_s9 = sphi %s1516_s9, %s1682_s9  }
   0x3   : > { %p33_p1 = scmp.ge.s32.totalorder %s31_s12, 2  ;;  %p158_p2 = scmp.lt.s32.totalorder %s1499_s11, 3 }
   0x5   : > { %s1685_s12 = smov (%p33_p1, %s31_s12), 0  ;;  %p159_p3 = pnand %p1067_p0, %p158_p2 }
   0x6   : > { %p201_p4 = scmp.lt.s32.totalorder (!%p159_p3), %s1491_s9, 1 }
   0x7   : > { %162 = sbr.rel (%p159_p3) target bundleno = 277 (0x115), region = 28 }
   0xc   : > { %s1687_s9 = smov (!%p201_p4, %s1491_s9), 1 }
   0xd   : > { %s1452_s13 = smul.u32 384, %s1687_s9  ;;  %s1362_s21 = sshll.u32 %s1687_s9, 6 }
   0xe   : > { %s1451_s17 = smul.u32 192, %s1687_s9  ;;  %s1656_s24 = scalar_lea.vmem %s1681_s2, %s1362_s21 }
   0xf   : > { %s1540_s16 = scalar_lea.vmem %s1680_s1, %s1452_s13 }
  0x10   : > { %v1394_v0 = vld [vmem:[%s1540_s16 + $0x38] sm:$0xff]  ;;  %v1393_v2 = vld [vmem:[%s1540_s16 + $0x30] sm:$0xff]  ;;  %v1392_v4 = vld [vmem:[%s1540_s16 + $0x28] sm:$0xff]  ;;  %s1560_s20 = scalar_lea.vmem %s1679_s0, %s1451_s17 }
  0x11   : > { %v1402_v1 = vld [vmem:[%s1540_s16 + $0x78] sm:$0xff]  ;;  %1435 = vmatpush.bf16.msra.mxu2 %v1394_v0  ;;  %v1401_v3 = vld [vmem:[%s1540_s16 + $0x70] sm:$0xff]  ;;  %760 = vmatpush.bf16.msra.mxu0 %v1394_v0  ;;  %v1400_v5 = vld [vmem:[%s1540_s16 + $0x68] sm:$0xff] }
  0x12   : > { %1443 = vmatpush.bf16.msra.mxu3 %v1402_v1  ;;  %789 = vmatpush.bf16.msra.mxu1 %v1402_v1  ;;  %v1391_v6 = vld [vmem:[%s1540_s16 + $0x20] sm:$0xff]  ;;  %v1390_v8 = vld [vmem:[%s1540_s16 + $0x18] sm:$0xff]  ;;  %v1389_v10 = vld [vmem:[%s1540_s16 + $0x10] sm:$0xff] }
  0x13   : > { %v1399_v7 = vld [vmem:[%s1540_s16 + $0x60] sm:$0xff]  ;;  %v1398_v9 = vld [vmem:[%s1540_s16 + $0x58] sm:$0xff]  ;;  %v1397_v11 = vld [vmem:[%s1540_s16 + $0x50] sm:$0xff] }
  0x14   : > { %v1388_v12 = vld [vmem:[%s1540_s16 + $0x8] sm:$0xff]  ;;  %v1387_v14 = vld [vmem:[%s1540_s16] sm:$0xff]  ;;  %v1378_v17 = vld [vmem:[%s1560_s20 + $0x74] sm:$0xf0] }
  0x15   : > { %1436 = vmatpush.bf16.msra.mxu2 %v1393_v2  ;;  %761 = vmatpush.bf16.msra.mxu0 %v1393_v2  ;;  %v1396_v13 = vld [vmem:[%s1540_s16 + $0x48] sm:$0xff]  ;;  %v1395_v15 = vld [vmem:[%s1540_s16 + $0x40] sm:$0xff]  ;;  %v1124_v19 = vld [vmem:[%s1560_s20 + $0x78] sm:$0xf0] }
  0x16   : > { %1444 = vmatpush.bf16.msra.mxu3 %v1401_v3  ;;  %790 = vmatpush.bf16.msra.mxu1 %v1401_v3  ;;  %v1122_v16 = vld [vmem:[%s1560_s20 + $0x60] sm:$0xf]  ;;  %v1375_v18 = vld [vmem:[%s1560_s20 + $0x64] sm:$0xf]  ;;  %v1366_v21 = vld [vmem:[%s1560_s20 + $0x14] sm:$0xf0] }
  0x17   : > { %v1074_v20 = vld [vmem:[%s1560_s20] sm:$0xf]  ;;  %v1363_v22 = vld [vmem:[%s1560_s20 + $0x4] sm:$0xf]  ;;  %v1076_v23 = vld [vmem:[%s1560_s20 + $0x18] sm:$0xf0]  ;;  %v1123_v26 = vor.u32 %v1378_v17, %v1122_v16  ;;  %v1127_v27 = vor.u32 %v1375_v18, %v1124_v19 }
  0x18   : > { %v1410_v24 = vld [vmem:[%s1540_s16 + $0xb8] sm:$0xff]  ;;  %v1075_v28 = vor.u32 %v1366_v21, %v1074_v20  ;;  %v1079_v29 = vor.u32 %v1363_v22, %v1076_v23  ;;  %v1409_v32 = vld [vmem:[%s1540_s16 + $0xb0] sm:$0xff]  ;;  %v1408_v36 = vld [vmem:[%s1540_s16 + $0xa8] sm:$0xff] }
  0x19   : > { %1437 = vmatpush.bf16.msra.mxu2 %v1392_v4  ;;  %762 = vmatpush.bf16.msra.mxu0 %v1392_v4  ;;  %v1418_v25 = vld [vmem:[%s1540_s16 + $0xf8] sm:$0xff]  ;;  %v1417_v33 = vld [vmem:[%s1540_s16 + $0xf0] sm:$0xff]  ;;  %v1416_v37 = vld [vmem:[%s1540_s16 + $0xe8] sm:$0xff] }
  0x1a   : > { %1445 = vmatpush.bf16.msra.mxu3 %v1400_v5  ;;  %791 = vmatpush.bf16.msra.mxu1 %v1400_v5  ;;  %v1426_v30 = vld [vmem:[%s1540_s16 + $0x138] sm:$0xff]  ;;  %v1425_v34 = vld [vmem:[%s1540_s16 + $0x130] sm:$0xff]  ;;  %v1424_v38 = vld [vmem:[%s1540_s16 + $0x128] sm:$0xff] }
  0x1b   : > { %v1434_v31 = vld [vmem:[%s1540_s16 + $0x178] sm:$0xff]  ;;  %v1433_v35 = vld [vmem:[%s1540_s16 + $0x170] sm:$0xff]  ;;  %v1432_v39 = vld [vmem:[%s1540_s16 + $0x168] sm:$0xff] }
  0x1c   : > { %v1407_v40 = vld [vmem:[%s1540_s16 + $0xa0] sm:$0xff]  ;;  %v1146_v43 = vld [vmem:[%s1560_s20 + $0x90] sm:$0xf]  ;;  %v1384_v44 = vld [vmem:[%s1560_s20 + $0xa4] sm:$0xf0] }
  0x1d   : > { %1438 = vmatpush.bf16.msra.mxu2 %v1391_v6  ;;  %763 = vmatpush.bf16.msra.mxu0 %v1391_v6  ;;  %v1415_v41 = vld [vmem:[%s1540_s16 + $0xe0] sm:$0xff]  ;;  %v1381_v45 = vld [vmem:[%s1560_s20 + $0x94] sm:$0xf]  ;;  %v1148_v46 = vld [vmem:[%s1560_s20 + $0xa8] sm:$0xf0]  ;;  %v1147_v54 = vor.u32 %v1384_v44, %v1146_v43 }
  0x1e   : > { %1446 = vmatpush.bf16.msra.mxu3 %v1399_v7  ;;  %792 = vmatpush.bf16.msra.mxu1 %v1399_v7  ;;  %v1423_v42 = vld [vmem:[%s1540_s16 + $0x120] sm:$0xff]  ;;  %v1098_v48 = vld [vmem:[%s1560_s20 + $0x30] sm:$0xf]  ;;  %v1372_v49 = vld [vmem:[%s1560_s20 + $0x44] sm:$0xf0]  ;;  %v1151_v55 = vor.u32 %v1381_v45, %v1148_v46 }
  0x1f   : > { %v1431_v47 = vld [vmem:[%s1540_s16 + $0x160] sm:$0xff]  ;;  %v1369_v50 = vld [vmem:[%s1560_s20 + $0x34] sm:$0xf]  ;;  %v1100_v51 = vld [vmem:[%s1560_s20 + $0x48] sm:$0xf0]  ;;  %v1099_v56 = vor.u32 %v1372_v49, %v1098_v48 }
  0x20   : > { %v1406_v52 = vld [vmem:[%s1540_s16 + $0x98] sm:$0xff]  ;;  %v1103_v57 = vor.u32 %v1369_v50, %v1100_v51  ;;  %v1405_v60 = vld [vmem:[%s1540_s16 + $0x90] sm:$0xff]  ;;  %v1404_v0 = vld [vmem:[%s1540_s16 + $0x88] sm:$0xff] }
  0x21   : > { %1439 = vmatpush.bf16.msra.mxu2 %v1390_v8  ;;  %764 = vmatpush.bf16.msra.mxu0 %v1390_v8  ;;  %v1414_v53 = vld [vmem:[%s1540_s16 + $0xd8] sm:$0xff]  ;;  %v1413_v61 = vld [vmem:[%s1540_s16 + $0xd0] sm:$0xff]  ;;  %v1412_v1 = vld [vmem:[%s1540_s16 + $0xc8] sm:$0xff] }
  0x22   : > { %1447 = vmatpush.bf16.msra.mxu3 %v1398_v9  ;;  %793 = vmatpush.bf16.msra.mxu1 %v1398_v9  ;;  %v1422_v58 = vld [vmem:[%s1540_s16 + $0x118] sm:$0xff]  ;;  %v1421_v62 = vld [vmem:[%s1540_s16 + $0x110] sm:$0xff]  ;;  %v1420_v2 = vld [vmem:[%s1540_s16 + $0x108] sm:$0xff] }
  0x23   : > { %v1430_v59 = vld [vmem:[%s1540_s16 + $0x158] sm:$0xff]  ;;  %v1429_v63 = vld [vmem:[%s1540_s16 + $0x150] sm:$0xff]  ;;  %v1428_v3 = vld [vmem:[%s1540_s16 + $0x148] sm:$0xff] }
  0x24   : > { %v1403_v4 = vld [vmem:[%s1540_s16 + $0x80] sm:$0xff]  ;;  %v1082_v7 = vld [vmem:[%s1560_s20 + $0x8] sm:$0xf]  ;;  %v1364_v9 = vld [vmem:[%s1560_s20 + $0xc] sm:$0xf] }
  0x25   : > { %1440 = vmatpush.bf16.msra.mxu2 %v1389_v10  ;;  %765 = vmatpush.bf16.msra.mxu0 %v1389_v10  ;;  %v1411_v5 = vld [vmem:[%s1540_s16 + $0xc0] sm:$0xff]  ;;  %v1106_v20 = vld [vmem:[%s1560_s20 + $0x38] sm:$0xf]  ;;  %v1373_v21 = vld [vmem:[%s1560_s20 + $0x4c] sm:$0xf0] }
  0x26   : > { %1448 = vmatpush.bf16.msra.mxu3 %v1397_v11  ;;  %794 = vmatpush.bf16.msra.mxu1 %v1397_v11  ;;  %v1419_v6 = vld [vmem:[%s1540_s16 + $0x100] sm:$0xff]  ;;  %v1370_v22 = vld [vmem:[%s1560_s20 + $0x3c] sm:$0xf]  ;;  %v1108_v23 = vld [vmem:[%s1560_s20 + $0x50] sm:$0xf0] }
  0x27   : > { %v1367_v8 = vld [vmem:[%s1560_s20 + $0x1c] sm:$0xf0]  ;;  %v1084_v10 = vld [vmem:[%s1560_s20 + $0x20] sm:$0xf0]  ;;  %v1154_v44 = vld [vmem:[%s1560_s20 + $0x98] sm:$0xf] }
  0x28   : > { %v1427_v11 = vld [vmem:[%s1540_s16 + $0x140] sm:$0xff]  ;;  %v1083_v16 = vor.u32 %v1367_v8, %v1082_v7  ;;  %v1087_v17 = vor.u32 %v1364_v9, %v1084_v10  ;;  %v1385_v45 = vld [vmem:[%s1560_s20 + $0xac] sm:$0xf0]  ;;  %v1382_v46 = vld [vmem:[%s1560_s20 + $0x9c] sm:$0xf] }
  0x29   : > { %1441 = vmatpush.bf16.msra.mxu2 %v1388_v12  ;;  %766 = vmatpush.bf16.msra.mxu0 %v1388_v12  ;;  %v1090_v12 = vld [vmem:[%s1560_s20 + $0x10] sm:$0xf]  ;;  %v1162_v48 = vld [vmem:[%s1560_s20 + $0xa0] sm:$0xf]  ;;  %v1386_v49 = vld [vmem:[%s1560_s20 + $0xb4] sm:$0xf0] }
  0x2a   : > { %1449 = vmatpush.bf16.msra.mxu3 %v1396_v13  ;;  %795 = vmatpush.bf16.msra.mxu1 %v1396_v13  ;;  %v1368_v13 = vld [vmem:[%s1560_s20 + $0x24] sm:$0xf0]  ;;  %v1383_v50 = vld [vmem:[%s1560_s20 + $0xa4] sm:$0xf]  ;;  %v1164_v51 = vld [vmem:[%s1560_s20 + $0xb8] sm:$0xf0] }
  0x2b   : > { %v1091_v18 = vor.u32 %v1368_v13, %v1090_v12 }
  0x2d   : > { %1442 = vmatpush.bf16.msra.mxu2 %v1387_v14  ;;  %767 = vmatpush.bf16.msra.mxu0 %v1387_v14  ;;  %v1365_v14 = vld [vmem:[%s1560_s20 + $0x14] sm:$0xf] }
  0x2e   : > { %1450 = vmatpush.bf16.msra.mxu3 %v1395_v15  ;;  %796 = vmatpush.bf16.msra.mxu1 %v1395_v15  ;;  %v1092_v15 = vld [vmem:[%s1560_s20 + $0x28] sm:$0xf0] }
  0x2f   : > { %v1095_v19 = vor.u32 %v1365_v14, %v1092_v15 }
  0x30   : > { %778 = vmatmul.bf16.vlgmr.msra.gmra.mxu2 %v1123_v26  ;;  %768 = vmatmul.bf16.vlgmr.msra.gmra.mxu0 %v1075_v28  ;;  %v1371_v26 = vld [vmem:[%s1560_s20 + $0x44] sm:$0xf]  ;;  %v1107_v28 = vor.u32 %v1373_v21, %v1106_v20 }
  0x31   : > { %818 = vmatpush.bf16.msrb.mxu2 %v1410_v24  ;;  %807 = vmatmul.bf16.vlgmr.msra.gmra.mxu3 %v1127_v27  ;;  %v1114_v24 = vld [vmem:[%s1560_s20 + $0x40] sm:$0xf]  ;;  %v1116_v27 = vld [vmem:[%s1560_s20 + $0x58] sm:$0xf0] }
  0x32   : > { %847 = vmatpush.bf16.msrb.mxu3 %v1418_v25  ;;  %797 = vmatmul.bf16.vlgmr.msra.gmra.mxu1 %v1079_v29  ;;  %v1374_v25 = vld [vmem:[%s1560_s20 + $0x54] sm:$0xf0]  ;;  %v1111_v29 = vor.u32 %v1370_v22, %v1108_v23 }
  0x33   : > { %876 = vmatpush.bf16.msrb.mxu0 %v1426_v30  ;;  %905 = vmatpush.bf16.msrb.mxu1 %v1434_v31  ;;  %v1115_v30 = vor.u32 %v1374_v25, %v1114_v24  ;;  %v1119_v31 = vor.u32 %v1371_v26, %v1116_v27 }
  0x35   : > { %819 = vmatpush.bf16.msrb.mxu2 %v1409_v32  ;;  %v1130_v32 = vld [vmem:[%s1560_s20 + $0x68] sm:$0xf] }
  0x36   : > { %848 = vmatpush.bf16.msrb.mxu3 %v1417_v33  ;;  %v1379_v33 = vld [vmem:[%s1560_s20 + $0x7c] sm:$0xf0] }
  0x37   : > { %877 = vmatpush.bf16.msrb.mxu0 %v1425_v34  ;;  %906 = vmatpush.bf16.msrb.mxu1 %v1433_v35  ;;  %v1376_v34 = vld [vmem:[%s1560_s20 + $0x6c] sm:$0xf]  ;;  %v1132_v35 = vld [vmem:[%s1560_s20 + $0x80] sm:$0xf0] }
  0x39   : > { %820 = vmatpush.bf16.msrb.mxu2 %v1408_v36  ;;  %v1138_v36 = vld [vmem:[%s1560_s20 + $0x70] sm:$0xf] }
  0x3a   : > { %849 = vmatpush.bf16.msrb.mxu3 %v1416_v37  ;;  %v1380_v37 = vld [vmem:[%s1560_s20 + $0x84] sm:$0xf0] }
  0x3b   : > { %878 = vmatpush.bf16.msrb.mxu0 %v1424_v38  ;;  %907 = vmatpush.bf16.msrb.mxu1 %v1432_v39  ;;  %v1377_v38 = vld [vmem:[%s1560_s20 + $0x74] sm:$0xf]  ;;  %v1140_v39 = vld [vmem:[%s1560_s20 + $0x88] sm:$0xf0] }
  0x3c   : > { %v1143_v43 = vor.u32 %v1377_v38, %v1140_v39 }
  0x3d   : > { %821 = vmatpush.bf16.msrb.mxu2 %v1407_v40  ;;  %v1131_v40 = vor.u32 %v1379_v33, %v1130_v32 }
  0x3e   : > { %850 = vmatpush.bf16.msrb.mxu3 %v1415_v41  ;;  %v1135_v41 = vor.u32 %v1376_v34, %v1132_v35 }
  0x3f   : > { %879 = vmatpush.bf16.msrb.mxu0 %v1423_v42  ;;  %908 = vmatpush.bf16.msrb.mxu1 %v1431_v47  ;;  %v1139_v42 = vor.u32 %v1380_v37, %v1138_v36  ;;  %v1156_v47 = vld [vmem:[%s1560_s20 + $0xb0] sm:$0xf0] }
  0x40   : > { %783 = vmatmul.bf16.gmra.mxu2 %v1147_v54  ;;  %773 = vmatmul.bf16.gmra.mxu0 %v1099_v56  ;;  %v1163_v54 = vor.u32 %v1386_v49, %v1162_v48 }
  0x41   : > { %822 = vmatpush.bf16.msrb.mxu2 %v1406_v52  ;;  %812 = vmatmul.bf16.gmra.mxu3 %v1151_v55  ;;  %v1155_v52 = vor.u32 %v1385_v45, %v1154_v44  ;;  %v1167_v55 = vor.u32 %v1383_v50, %v1164_v51 }
  0x42   : > { %851 = vmatpush.bf16.msrb.mxu3 %v1414_v53  ;;  %802 = vmatmul.bf16.gmra.mxu1 %v1103_v57  ;;  %v1159_v53 = vor.u32 %v1382_v46, %v1156_v47 }
  0x43   : > { %880 = vmatpush.bf16.msrb.mxu0 %v1422_v58  ;;  %909 = vmatpush.bf16.msrb.mxu1 %v1430_v59 }
  0x45   : > { %823 = vmatpush.bf16.msrb.mxu2 %v1405_v60 }
  0x46   : > { %852 = vmatpush.bf16.msrb.mxu3 %v1413_v61 }
  0x47   : > { %881 = vmatpush.bf16.msrb.mxu0 %v1421_v62  ;;  %910 = vmatpush.bf16.msrb.mxu1 %v1429_v63 }
  0x49   : > { %824 = vmatpush.bf16.msrb.mxu2 %v1404_v0 }
  0x4a   : > { %853 = vmatpush.bf16.msrb.mxu3 %v1412_v1 }
  0x4b   : > { %882 = vmatpush.bf16.msrb.mxu0 %v1420_v2  ;;  %911 = vmatpush.bf16.msrb.mxu1 %v1428_v3 }
  0x4d   : > { %825 = vmatpush.bf16.msrb.mxu2 %v1403_v4 }
  0x4e   : > { %854 = vmatpush.bf16.msrb.mxu3 %v1411_v5 }
  0x4f   : > { %883 = vmatpush.bf16.msrb.mxu0 %v1419_v6  ;;  %912 = vmatpush.bf16.msrb.mxu1 %v1427_v11 }
  0x50   : > { %826 = vmatmul.bf16.vlgmr.msrb.gmra.mxu2 %v1083_v16 }
  0x51   : > { %855 = vmatmul.bf16.vlgmr.msrb.gmra.mxu3 %v1087_v17 }
  0x52   : > { %884 = vmatmul.bf16.vlgmr.msrb.gmra.mxu0 %v1091_v18  ;;  %913 = vmatmul.bf16.vlgmr.msrb.gmra.mxu1 %v1095_v19 }
  0x60   : > { %831 = vmatmul.bf16.gmra.mxu2 %v1107_v28 }
  0x61   : > { %860 = vmatmul.bf16.gmra.mxu3 %v1111_v29 }
  0x62   : > { %889 = vmatmul.bf16.gmra.mxu0 %v1115_v30  ;;  %918 = vmatmul.bf16.gmra.mxu1 %v1119_v31 }
  0x70   : > { %836 = vmatmul.bf16.gmra.mxu2 %v1131_v40 }
  0x71   : > { %865 = vmatmul.bf16.gmra.mxu3 %v1135_v41 }
  0x72   : > { %894 = vmatmul.bf16.gmra.mxu0 %v1139_v42  ;;  %923 = vmatmul.bf16.gmra.mxu1 %v1143_v43 }
  0x80   : > { %841 = vmatmul.bf16.gmra.mxu2 %v1155_v52 }
  0x81   : > { %870 = vmatmul.bf16.gmra.mxu3 %v1159_v53 }
  0x82   : > { %899 = vmatmul.bf16.gmra.mxu0 %v1163_v54  ;;  %928 = vmatmul.bf16.gmra.mxu1 %v1167_v55 }
  0xad   : > { %v769_v56 = vpop.f32.mrf.mxu0 }
  0xaf   : > { %v798_v57 = vpop.f32.mrf.mxu1 }
  0xb0   : > { %v799_v10 = vadd.f32 %v798_v57, %v769_v56 }
  0xb3   : > { %v779_v58 = vpop.f32.mrf.mxu2 }
  0xb4   : > { %v808_v59 = vpop.f32.mrf.mxu3 }
  0xb5   : > { %v771_v60 = vpop.f32.mrf.mxu0  ;;  %v809_v44 = vadd.f32 %v808_v59, %v779_v58 }
  0xb7   : > { %v800_v61 = vpop.f32.mrf.mxu1 }
  0xb8   : > { %v801_v18 = vadd.f32 %v800_v61, %v771_v60 }
  0xbb   : > { %v781_v62 = vpop.f32.mrf.mxu2 }
  0xbc   : > { %v810_v63 = vpop.f32.mrf.mxu3 }
  0xbd   : > { %v774_v0 = vpop.f32.mrf.mxu0  ;;  %v811_v52 = vadd.f32 %v810_v63, %v781_v62 }
  0xbf   : > { %v803_v1 = vpop.f32.mrf.mxu1 }
  0xc0   : > { %v804_v27 = vadd.f32 %v803_v1, %v774_v0 }
  0xc3   : > { %v1644_v2 = vpop.f32.mrf.mxu2 }
  0xc4   : > { %v1646_v3 = vpop.f32.mrf.mxu3 }
  0xc5   : > { %v776_v4 = vpop.f32.mrf.mxu0  ;;  %v814_v59 = vadd.f32 %v1646_v3, %v1644_v2 }
  0xc7   : > { %v805_v5 = vpop.f32.mrf.mxu1 }
  0xc8   : > { %v806_v36 = vadd.f32 %v805_v5, %v776_v4 }
  0xcb   : > { %v1648_v6 = vpop.f32.mrf.mxu2 }
  0xcc   : > { %v1650_v7 = vpop.f32.mrf.mxu3 }
  0xcf   : > { %v885_v8 = vpop.f32.mrf.mxu0  ;;  %v914_v9 = vpop.f32.mrf.mxu1 }
  0xd3   : > { %v827_v11 = vpop.f32.mrf.mxu2 }
  0xd4   : > { %v856_v12 = vpop.f32.mrf.mxu3  ;;  %v828_v13 = vadd.f32 %v827_v11, %v799_v10  ;;  %v816_v10 = vadd.f32 %v1650_v7, %v1648_v6 }
  0xd6   : > { %v857_v14 = vadd.f32 %v856_v12, %v828_v13 }
  0xd7   : > { %v887_v15 = vpop.f32.mrf.mxu0  ;;  %v916_v16 = vpop.f32.mrf.mxu1 }
  0xd8   : > { %v886_v17 = vadd.f32 %v885_v8, %v857_v14 }
  0xda   : > { %v915_v19 = vadd.f32 %v914_v9, %v886_v17 }
  0xdb   : > { %v829_v20 = vpop.f32.mrf.mxu2 }
  0xdc   : > { %v858_v21 = vpop.f32.mrf.mxu3  ;;  %934 = vst [vmem:[%s1656_s24] sm:$0xff] %v915_v19  ;;  %v830_v22 = vadd.f32 %v829_v20, %v801_v18 }
  0xde   : > { %v859_v23 = vadd.f32 %v858_v21, %v830_v22 }
  0xdf   : > { %v890_v24 = vpop.f32.mrf.mxu0  ;;  %v919_v25 = vpop.f32.mrf.mxu1 }
  0xe0   : > { %v888_v26 = vadd.f32 %v887_v15, %v859_v23 }
  0xe2   : > { %v917_v28 = vadd.f32 %v916_v16, %v888_v26 }
  0xe3   : > { %v832_v29 = vpop.f32.mrf.mxu2 }
  0xe4   : > { %v861_v30 = vpop.f32.mrf.mxu3  ;;  %935 = vst [vmem:[%s1656_s24 + $0x8] sm:$0xff] %v917_v28  ;;  %v833_v31 = vadd.f32 %v832_v29, %v804_v27 }
  0xe6   : > { %v862_v32 = vadd.f32 %v861_v30, %v833_v31 }
  0xe7   : > { %v892_v33 = vpop.f32.mrf.mxu0  ;;  %v921_v35 = vpop.f32.mrf.mxu1 }
  0xe8   : > { %v891_v34 = vadd.f32 %v890_v24, %v862_v32 }
  0xea   : > { %v920_v37 = vadd.f32 %v919_v25, %v891_v34 }
  0xeb   : > { %v834_v38 = vpop.f32.mrf.mxu2 }
  0xec   : > { %v863_v39 = vpop.f32.mrf.mxu3  ;;  %936 = vst [vmem:[%s1656_s24 + $0x10] sm:$0xff] %v920_v37  ;;  %v835_v40 = vadd.f32 %v834_v38, %v806_v36 }
  0xee   : > { %v864_v41 = vadd.f32 %v863_v39, %v835_v40 }
  0xef   : > { %v895_v43 = vpop.f32.mrf.mxu0  ;;  %v924_v46 = vpop.f32.mrf.mxu1 }
  0xf0   : > { %v893_v42 = vadd.f32 %v892_v33, %v864_v41 }
  0xf2   : > { %v922_v45 = vadd.f32 %v921_v35, %v893_v42 }
  0xf3   : > { %v837_v47 = vpop.f32.mrf.mxu2 }
  0xf4   : > { %v866_v48 = vpop.f32.mrf.mxu3  ;;  %937 = vst [vmem:[%s1656_s24 + $0x18] sm:$0xff] %v922_v45  ;;  %v838_v49 = vadd.f32 %v837_v47, %v809_v44 }
  0xf6   : > { %v867_v50 = vadd.f32 %v866_v48, %v838_v49 }
  0xf7   : > { %v897_v54 = vpop.f32.mrf.mxu0  ;;  %v926_v60 = vpop.f32.mrf.mxu1 }
  0xf8   : > { %v896_v51 = vadd.f32 %v895_v43, %v867_v50 }
  0xfa   : > { %v925_v53 = vadd.f32 %v924_v46, %v896_v51 }
  0xfb   : > { %v839_v55 = vpop.f32.mrf.mxu2 }
  0xfc   : > { %v868_v56 = vpop.f32.mrf.mxu3  ;;  %938 = vst [vmem:[%s1656_s24 + $0x20] sm:$0xff] %v925_v53  ;;  %v840_v57 = vadd.f32 %v839_v55, %v811_v52 }
  0xfe   : > { %v869_v61 = vadd.f32 %v868_v56, %v840_v57 }
  0xff   : > { %v900_v62 = vpop.f32.mrf.mxu0  ;;  %v929_v8 = vpop.f32.mrf.mxu1 }
 0x100   : > { %v898_v58 = vadd.f32 %v897_v54, %v869_v61 }
 0x102   : > { %v927_v0 = vadd.f32 %v926_v60, %v898_v58 }
 0x103   : > { %v842_v1 = vpop.f32.mrf.mxu2 }
 0x104   : > { %v871_v4 = vpop.f32.mrf.mxu3  ;;  %939 = vst [vmem:[%s1656_s24 + $0x28] sm:$0xff] %v927_v0  ;;  %v843_v5 = vadd.f32 %v842_v1, %v814_v59 }
 0x106   : > { %v872_v63 = vadd.f32 %v871_v4, %v843_v5 }
 0x107   : > { %v902_v2 = vpop.f32.mrf.mxu0  ;;  %v931_v16 = vpop.f32.mrf.mxu1 }
 0x108   : > { %v901_v9 = vadd.f32 %v900_v62, %v872_v63 }
 0x10a   : > { %v930_v11 = vadd.f32 %v929_v8, %v901_v9 }
 0x10b   : > { %v844_v12 = vpop.f32.mrf.mxu2 }
 0x10c   : > { %940 = vst [vmem:[%s1656_s24 + $0x30] sm:$0xff] %v930_v11  ;;  %v845_v13 = vadd.f32 %v844_v12, %v816_v10  ;;  %v873_v14 = vpop.f32.mrf.mxu3 }
 0x10e   : > { %v874_v15 = vadd.f32 %v873_v14, %v845_v13 }
 0x110   : > { %v903_v3 = vadd.f32 %v902_v2, %v874_v15 }
 0x112   : > { %v932_v17 = vadd.f32 %v931_v16, %v903_v3 }
 0x114   : > { %941 = vst [vmem:[%s1656_s24 + $0x38] sm:$0xff] %v932_v17 }
 0x115 PF: > { %s12_s11 = sadd.s32 1, %s1499_s11   ;;  %s1682_s9 = smov %s1495_s10 }
 0x116   : > { %p9_p5 = scmp.ge.s32.totalorder %s12_s11, 4   ;;  %s1683_s10 = smov %s1685_s12 }
 0x118   :  { %11 = sbr.rel (!%p9_p5) target bundleno = 2 (0x2), region = 61 }

// kernel: hourglass_fwd.55
= control target key start
LH: loop header
LB: loop body
LE: loop exit
PB: predicated region body
PF: predicated region fallthrough
CT: control target
= control target key end

     0   :  { %s558_s1 = inlined_call_operand.vmem [shape: bf16[128,128], index: 1, kind: input, shape index: {}]   ;;  %s559_s2 = inlined_call_operand.vmem [shape: f32[1,128], index: 2, kind: input, shape index: {}]   ;;  %s560_s0 = inlined_call_operand.vmem [shape: bf16[128,128], index: 0, kind: input, shape index: {}]   ;;  %s561_s3 = inlined_call_operand.vmem [shape: f32[128,128], index: 3, kind: output, shape index: {}]  }
   0x1   :  { %v413_v0 = vld [vmem:[%s558_s1 + $0x38] sm:$0xff]  ;;  %v412_v1 = vld [vmem:[%s558_s1 + $0x30] sm:$0xff]  ;;  %v411_v2 = vld [vmem:[%s558_s1 + $0x28] sm:$0xff] }
   0x2   :  { %178 = vmatpush.bf16.msra.mxu0 %v413_v0  ;;  %414 = vmatpush.bf16.msra.mxu1 %v413_v0  ;;  %v410_v3 = vld [vmem:[%s558_s1 + $0x20] sm:$0xff]  ;;  %v409_v4 = vld [vmem:[%s558_s1 + $0x18] sm:$0xff]  ;;  %v408_v5 = vld [vmem:[%s558_s1 + $0x10] sm:$0xff] }
   0x3   :  { %415 = vmatpush.bf16.msra.mxu2 %v413_v0  ;;  %416 = vmatpush.bf16.msra.mxu3 %v413_v0  ;;  %v407_v6 = vld [vmem:[%s558_s1 + $0x8] sm:$0xff]  ;;  %v406_v7 = vld [vmem:[%s558_s1] sm:$0xff]  ;;  %v400_v9 = vld [vmem:[%s560_s0 + $0x10] sm:$0xff] }
   0x4   :  { %v398_v8 = vld [vmem:[%s560_s0] sm:$0xff]  ;;  %v404_v11 = vld [vmem:[%s560_s0 + $0x30] sm:$0xff]  ;;  %v399_v12 = vld [vmem:[%s560_s0 + $0x8] sm:$0xff] }
   0x5   :  { %v402_v10 = vld [vmem:[%s560_s0 + $0x20] sm:$0xff]  ;;  %v401_v13 = vld [vmem:[%s560_s0 + $0x18] sm:$0xff]  ;;  %v403_v14 = vld [vmem:[%s560_s0 + $0x28] sm:$0xff] }
   0x6   :  { %179 = vmatpush.bf16.msra.mxu0 %v412_v1  ;;  %417 = vmatpush.bf16.msra.mxu1 %v412_v1  ;;  %v405_v15 = vld [vmem:[%s560_s0 + $0x38] sm:$0xff]  ;;  %v438_v16 = vld [vmem:[%s559_s2] ss:$0 sm:$0xff] }
   0x7   :  { %418 = vmatpush.bf16.msra.mxu2 %v412_v1  ;;  %419 = vmatpush.bf16.msra.mxu3 %v412_v1 }
   0xa   :  { %180 = vmatpush.bf16.msra.mxu0 %v411_v2  ;;  %420 = vmatpush.bf16.msra.mxu1 %v411_v2 }
   0xb   :  { %421 = vmatpush.bf16.msra.mxu2 %v411_v2  ;;  %422 = vmatpush.bf16.msra.mxu3 %v411_v2 }
   0xe   :  { %181 = vmatpush.bf16.msra.mxu0 %v410_v3  ;;  %423 = vmatpush.bf16.msra.mxu1 %v410_v3 }
   0xf   :  { %424 = vmatpush.bf16.msra.mxu2 %v410_v3  ;;  %425 = vmatpush.bf16.msra.mxu3 %v410_v3 }
  0x12   :  { %182 = vmatpush.bf16.msra.mxu0 %v409_v4  ;;  %426 = vmatpush.bf16.msra.mxu1 %v409_v4 }
  0x13   :  { %427 = vmatpush.bf16.msra.mxu2 %v409_v4  ;;  %428 = vmatpush.bf16.msra.mxu3 %v409_v4 }
  0x16   :  { %183 = vmatpush.bf16.msra.mxu0 %v408_v5  ;;  %429 = vmatpush.bf16.msra.mxu1 %v408_v5 }
  0x17   :  { %430 = vmatpush.bf16.msra.mxu2 %v408_v5  ;;  %431 = vmatpush.bf16.msra.mxu3 %v408_v5 }
  0x1a   :  { %184 = vmatpush.bf16.msra.mxu0 %v407_v6  ;;  %432 = vmatpush.bf16.msra.mxu1 %v407_v6 }
  0x1b   :  { %433 = vmatpush.bf16.msra.mxu2 %v407_v6  ;;  %434 = vmatpush.bf16.msra.mxu3 %v407_v6 }
  0x1e   :  { %185 = vmatpush.bf16.msra.mxu0 %v406_v7  ;;  %435 = vmatpush.bf16.msra.mxu1 %v406_v7 }
  0x1f   :  { %436 = vmatpush.bf16.msra.mxu2 %v406_v7  ;;  %437 = vmatpush.bf16.msra.mxu3 %v406_v7 }
  0x21   :  { %186 = vmatmul.bf16.vlgmr.msra.gmra.mxu0 %v398_v8  ;;  %196 = vmatmul.bf16.vlgmr.msra.gmra.mxu1 %v400_v9 }
  0x22   :  { %206 = vmatmul.bf16.vlgmr.msra.gmra.mxu2 %v402_v10  ;;  %216 = vmatmul.bf16.vlgmr.msra.gmra.mxu3 %v404_v11 }
  0x31   :  { %191 = vmatmul.bf16.gmra.mxu0 %v399_v12  ;;  %201 = vmatmul.bf16.gmra.mxu1 %v401_v13 }
  0x32   :  { %211 = vmatmul.bf16.gmra.mxu2 %v403_v14  ;;  %221 = vmatmul.bf16.gmra.mxu3 %v405_v15 }
  0x9e   :  { %v187_v17 = vpop.f32.mrf.mxu0  ;;  %v197_v18 = vpop.f32.mrf.mxu1 }
  0x9f   :  { %v282_v19 = vadd.f32 %v438_v16, %v187_v17  ;;  %v286_v20 = vadd.f32 %v438_v16, %v197_v18 }
  0xa1   :  { %v298_v21 = vmax.f32 %v282_v19, 0.0  ;;  %v302_v22 = vmax.f32 %v286_v20, 0.0 }
  0xa3   :  { %314 = vst [vmem:[%s561_s3] sm:$0xff] %v298_v21 }
  0xa4   :  { %318 = vst [vmem:[%s561_s3 + $0x20] sm:$0xff] %v302_v22 }
  0xa5   :  { %v207_v23 = vpop.f32.mrf.mxu2  ;;  %v217_v24 = vpop.f32.mrf.mxu3 }
  0xa6   :  { %v290_v25 = vadd.f32 %v438_v16, %v207_v23  ;;  %v294_v26 = vadd.f32 %v438_v16, %v217_v24  ;;  %v189_v27 = vpop.f32.mrf.mxu0  ;;  %v199_v28 = vpop.f32.mrf.mxu1 }
  0xa7   :  { %v283_v29 = vadd.f32 %v438_v16, %v189_v27  ;;  %v287_v30 = vadd.f32 %v438_v16, %v199_v28 }
  0xa8   :  { %v306_v31 = vmax.f32 %v290_v25, 0.0  ;;  %v310_v32 = vmax.f32 %v294_v26, 0.0 }
  0xa9   :  { %v299_v33 = vmax.f32 %v283_v29, 0.0  ;;  %v303_v34 = vmax.f32 %v287_v30, 0.0 }
  0xaa   :  { %322 = vst [vmem:[%s561_s3 + $0x40] sm:$0xff] %v306_v31 }
  0xab   :  { %326 = vst [vmem:[%s561_s3 + $0x60] sm:$0xff] %v310_v32 }
  0xac   :  { %315 = vst [vmem:[%s561_s3 + $0x8] sm:$0xff] %v299_v33 }
  0xad   :  { %319 = vst [vmem:[%s561_s3 + $0x28] sm:$0xff] %v303_v34  ;;  %v209_v35 = vpop.f32.mrf.mxu2  ;;  %v219_v36 = vpop.f32.mrf.mxu3 }
  0xae   :  { %v291_v37 = vadd.f32 %v438_v16, %v209_v35  ;;  %v295_v38 = vadd.f32 %v438_v16, %v219_v36  ;;  %v192_v39 = vpop.f32.mrf.mxu0  ;;  %v202_v40 = vpop.f32.mrf.mxu1 }
  0xaf   :  { %v284_v41 = vadd.f32 %v438_v16, %v192_v39  ;;  %v288_v42 = vadd.f32 %v438_v16, %v202_v40 }
  0xb0   :  { %v307_v43 = vmax.f32 %v291_v37, 0.0  ;;  %v311_v44 = vmax.f32 %v295_v38, 0.0 }
  0xb1   :  { %v300_v45 = vmax.f32 %v284_v41, 0.0  ;;  %v304_v46 = vmax.f32 %v288_v42, 0.0 }
  0xb2   :  { %323 = vst [vmem:[%s561_s3 + $0x48] sm:$0xff] %v307_v43 }
  0xb3   :  { %327 = vst [vmem:[%s561_s3 + $0x68] sm:$0xff] %v311_v44 }
  0xb4   :  { %316 = vst [vmem:[%s561_s3 + $0x10] sm:$0xff] %v300_v45 }
  0xb5   :  { %320 = vst [vmem:[%s561_s3 + $0x30] sm:$0xff] %v304_v46  ;;  %v212_v47 = vpop.f32.mrf.mxu2  ;;  %v222_v48 = vpop.f32.mrf.mxu3 }
  0xb6   :  { %v292_v49 = vadd.f32 %v438_v16, %v212_v47  ;;  %v296_v50 = vadd.f32 %v438_v16, %v222_v48  ;;  %v194_v51 = vpop.f32.mrf.mxu0  ;;  %v204_v52 = vpop.f32.mrf.mxu1 }
  0xb7   :  { %v285_v53 = vadd.f32 %v438_v16, %v194_v51  ;;  %v289_v54 = vadd.f32 %v438_v16, %v204_v52 }
  0xb8   :  { %v308_v55 = vmax.f32 %v292_v49, 0.0  ;;  %v312_v56 = vmax.f32 %v296_v50, 0.0 }
  0xb9   :  { %v301_v57 = vmax.f32 %v285_v53, 0.0  ;;  %v305_v58 = vmax.f32 %v289_v54, 0.0 }
  0xba   :  { %324 = vst [vmem:[%s561_s3 + $0x50] sm:$0xff] %v308_v55 }
  0xbb   :  { %328 = vst [vmem:[%s561_s3 + $0x70] sm:$0xff] %v312_v56 }
  0xbc   :  { %317 = vst [vmem:[%s561_s3 + $0x18] sm:$0xff] %v301_v57 }
  0xbd   :  { %321 = vst [vmem:[%s561_s3 + $0x38] sm:$0xff] %v305_v58  ;;  %v214_v59 = vpop.f32.mrf.mxu2  ;;  %v224_v60 = vpop.f32.mrf.mxu3 }
  0xbe   :  { %v293_v61 = vadd.f32 %v438_v16, %v214_v59  ;;  %v297_v62 = vadd.f32 %v438_v16, %v224_v60 }
  0xc0   :  { %v309_v63 = vmax.f32 %v293_v61, 0.0  ;;  %v313_v0 = vmax.f32 %v297_v62, 0.0 }
  0xc2   :  { %325 = vst [vmem:[%s561_s3 + $0x58] sm:$0xff] %v309_v63 }
  0xc3   :  { %329 = vst [vmem:[%s561_s3 + $0x78] sm:$0xff] %v313_v0 }

// kernel: hourglass_fwd.64
= control target key start
LH: loop header
LB: loop body
LE: loop exit
PB: predicated region body
PF: predicated region fallthrough
CT: control target
= control target key end

     0   :  { %s664_s1 = inlined_call_operand.vmem [shape: bf16[128,128], index: 1, kind: input, shape index: {}]   ;;  %s665_s2 = inlined_call_operand.vmem [shape: f32[1,128], index: 2, kind: input, shape index: {}]   ;;  %s666_s0 = inlined_call_operand.vmem [shape: bf16[128,128], index: 0, kind: input, shape index: {}]   ;;  %s667_s3 = inlined_call_operand.vmem [shape: f32[128,128], index: 3, kind: input, shape index: {}]   ;;  %s668_s4 = inlined_call_operand.vmem [shape: f32[128,128], index: 4, kind: output, shape index: {}]  }
   0x1   :  { %v448_v0 = vld [vmem:[%s664_s1 + $0x38] sm:$0xff]  ;;  %v447_v1 = vld [vmem:[%s664_s1 + $0x30] sm:$0xff]  ;;  %v446_v2 = vld [vmem:[%s664_s1 + $0x28] sm:$0xff] }
   0x2   :  { %181 = vmatpush.bf16.msra.mxu0 %v448_v0  ;;  %449 = vmatpush.bf16.msra.mxu1 %v448_v0  ;;  %v445_v3 = vld [vmem:[%s664_s1 + $0x20] sm:$0xff]  ;;  %v444_v4 = vld [vmem:[%s664_s1 + $0x18] sm:$0xff]  ;;  %v443_v5 = vld [vmem:[%s664_s1 + $0x10] sm:$0xff] }
   0x3   :  { %450 = vmatpush.bf16.msra.mxu2 %v448_v0  ;;  %451 = vmatpush.bf16.msra.mxu3 %v448_v0  ;;  %v442_v6 = vld [vmem:[%s664_s1 + $0x8] sm:$0xff]  ;;  %v441_v7 = vld [vmem:[%s664_s1] sm:$0xff]  ;;  %v435_v9 = vld [vmem:[%s666_s0 + $0x10] sm:$0xff] }
   0x4   :  { %v433_v8 = vld [vmem:[%s666_s0] sm:$0xff]  ;;  %v439_v11 = vld [vmem:[%s666_s0 + $0x30] sm:$0xff]  ;;  %v434_v12 = vld [vmem:[%s666_s0 + $0x8] sm:$0xff] }
   0x5   :  { %v437_v10 = vld [vmem:[%s666_s0 + $0x20] sm:$0xff]  ;;  %v436_v13 = vld [vmem:[%s666_s0 + $0x18] sm:$0xff]  ;;  %v438_v14 = vld [vmem:[%s666_s0 + $0x28] sm:$0xff] }
   0x6   :  { %182 = vmatpush.bf16.msra.mxu0 %v447_v1  ;;  %452 = vmatpush.bf16.msra.mxu1 %v447_v1  ;;  %v440_v15 = vld [vmem:[%s666_s0 + $0x38] sm:$0xff]  ;;  %v550_v16 = vld [vmem:[%s665_s2] ss:$0 sm:$0xff]  ;;  %v302_v34 = vld [vmem:[%s667_s3 + $0x8] sm:$0xff] }
   0x7   :  { %453 = vmatpush.bf16.msra.mxu2 %v447_v1  ;;  %454 = vmatpush.bf16.msra.mxu3 %v447_v1  ;;  %v301_v18 = vld [vmem:[%s667_s3] sm:$0xff]  ;;  %v306_v36 = vld [vmem:[%s667_s3 + $0x28] sm:$0xff]  ;;  %v303_v54 = vld [vmem:[%s667_s3 + $0x10] sm:$0xff] }
   0x8   :  { %v305_v20 = vld [vmem:[%s667_s3 + $0x20] sm:$0xff]  ;;  %v310_v48 = vld [vmem:[%s667_s3 + $0x48] sm:$0xff]  ;;  %v307_v56 = vld [vmem:[%s667_s3 + $0x30] sm:$0xff] }
   0x9   :  { %v309_v28 = vld [vmem:[%s667_s3 + $0x40] sm:$0xff]  ;;  %v314_v50 = vld [vmem:[%s667_s3 + $0x68] sm:$0xff] }
   0xa   :  { %183 = vmatpush.bf16.msra.mxu0 %v446_v2  ;;  %455 = vmatpush.bf16.msra.mxu1 %v446_v2  ;;  %v313_v30 = vld [vmem:[%s667_s3 + $0x60] sm:$0xff] }
   0xb   :  { %456 = vmatpush.bf16.msra.mxu2 %v446_v2  ;;  %457 = vmatpush.bf16.msra.mxu3 %v446_v2 }
   0xe   :  { %184 = vmatpush.bf16.msra.mxu0 %v445_v3  ;;  %458 = vmatpush.bf16.msra.mxu1 %v445_v3 }
   0xf   :  { %459 = vmatpush.bf16.msra.mxu2 %v445_v3  ;;  %460 = vmatpush.bf16.msra.mxu3 %v445_v3 }
  0x12   :  { %185 = vmatpush.bf16.msra.mxu0 %v444_v4  ;;  %461 = vmatpush.bf16.msra.mxu1 %v444_v4 }
  0x13   :  { %462 = vmatpush.bf16.msra.mxu2 %v444_v4  ;;  %463 = vmatpush.bf16.msra.mxu3 %v444_v4  ;;  %v311_v4 = vld [vmem:[%s667_s3 + $0x50] sm:$0xff] }
  0x16   :  { %186 = vmatpush.bf16.msra.mxu0 %v443_v5  ;;  %464 = vmatpush.bf16.msra.mxu1 %v443_v5 }
  0x17   :  { %465 = vmatpush.bf16.msra.mxu2 %v443_v5  ;;  %466 = vmatpush.bf16.msra.mxu3 %v443_v5 }
  0x1a   :  { %187 = vmatpush.bf16.msra.mxu0 %v442_v6  ;;  %467 = vmatpush.bf16.msra.mxu1 %v442_v6 }
  0x1b   :  { %468 = vmatpush.bf16.msra.mxu2 %v442_v6  ;;  %469 = vmatpush.bf16.msra.mxu3 %v442_v6  ;;  %v315_v6 = vld [vmem:[%s667_s3 + $0x70] sm:$0xff] }
  0x1e   :  { %188 = vmatpush.bf16.msra.mxu0 %v441_v7  ;;  %470 = vmatpush.bf16.msra.mxu1 %v441_v7 }
  0x1f   :  { %471 = vmatpush.bf16.msra.mxu2 %v441_v7  ;;  %472 = vmatpush.bf16.msra.mxu3 %v441_v7 }
  0x21   :  { %189 = vmatmul.bf16.vlgmr.msra.gmra.mxu0 %v433_v8  ;;  %199 = vmatmul.bf16.vlgmr.msra.gmra.mxu1 %v435_v9 }
  0x22   :  { %209 = vmatmul.bf16.vlgmr.msra.gmra.mxu2 %v437_v10  ;;  %219 = vmatmul.bf16.vlgmr.msra.gmra.mxu3 %v439_v11  ;;  %v304_v10 = vld [vmem:[%s667_s3 + $0x18] sm:$0xff] }
  0x31   :  { %194 = vmatmul.bf16.gmra.mxu0 %v434_v12  ;;  %204 = vmatmul.bf16.gmra.mxu1 %v436_v13  ;;  %v308_v12 = vld [vmem:[%s667_s3 + $0x38] sm:$0xff] }
  0x32   :  { %214 = vmatmul.bf16.gmra.mxu2 %v438_v14  ;;  %224 = vmatmul.bf16.gmra.mxu3 %v440_v15 }
  0x9e   :  { %v190_v17 = vpop.f32.mrf.mxu0  ;;  %v200_v19 = vpop.f32.mrf.mxu1 }
  0x9f   :  { %v285_v21 = vadd.f32 %v550_v16, %v190_v17  ;;  %v289_v22 = vadd.f32 %v550_v16, %v200_v19 }
  0xa1   :  { %v317_v23 = vadd.f32 %v301_v18, %v285_v21  ;;  %v321_v24 = vadd.f32 %v305_v20, %v289_v22 }
  0xa3   :  { %v333_v25 = vmax.f32 %v317_v23, 0.0  ;;  %v337_v26 = vmax.f32 %v321_v24, 0.0 }
  0xa5   :  { %349 = vst [vmem:[%s668_s4] sm:$0xff] %v333_v25  ;;  %v210_v27 = vpop.f32.mrf.mxu2  ;;  %v220_v29 = vpop.f32.mrf.mxu3  ;;  %v312_v25 = vld [vmem:[%s667_s3 + $0x58] sm:$0xff] }
  0xa6   :  { %353 = vst [vmem:[%s668_s4 + $0x20] sm:$0xff] %v337_v26  ;;  %v293_v31 = vadd.f32 %v550_v16, %v210_v27  ;;  %v297_v32 = vadd.f32 %v550_v16, %v220_v29  ;;  %v192_v33 = vpop.f32.mrf.mxu0  ;;  %v202_v35 = vpop.f32.mrf.mxu1  ;;  %v316_v27 = vld [vmem:[%s667_s3 + $0x78] sm:$0xff] }
  0xa7   :  { %v286_v37 = vadd.f32 %v550_v16, %v192_v33  ;;  %v290_v38 = vadd.f32 %v550_v16, %v202_v35 }
  0xa8   :  { %v325_v39 = vadd.f32 %v309_v28, %v293_v31  ;;  %v329_v40 = vadd.f32 %v313_v30, %v297_v32 }
  0xa9   :  { %v318_v41 = vadd.f32 %v302_v34, %v286_v37  ;;  %v322_v42 = vadd.f32 %v306_v36, %v290_v38 }
  0xaa   :  { %v341_v43 = vmax.f32 %v325_v39, 0.0  ;;  %v345_v44 = vmax.f32 %v329_v40, 0.0 }
  0xab   :  { %v334_v45 = vmax.f32 %v318_v41, 0.0  ;;  %v338_v46 = vmax.f32 %v322_v42, 0.0 }
  0xac   :  { %357 = vst [vmem:[%s668_s4 + $0x40] sm:$0xff] %v341_v43 }
  0xad   :  { %361 = vst [vmem:[%s668_s4 + $0x60] sm:$0xff] %v345_v44  ;;  %v212_v47 = vpop.f32.mrf.mxu2  ;;  %v222_v49 = vpop.f32.mrf.mxu3 }
  0xae   :  { %350 = vst [vmem:[%s668_s4 + $0x8] sm:$0xff] %v334_v45  ;;  %v294_v51 = vadd.f32 %v550_v16, %v212_v47  ;;  %v298_v52 = vadd.f32 %v550_v16, %v222_v49  ;;  %v195_v53 = vpop.f32.mrf.mxu0  ;;  %v205_v55 = vpop.f32.mrf.mxu1 }
  0xaf   :  { %354 = vst [vmem:[%s668_s4 + $0x28] sm:$0xff] %v338_v46  ;;  %v287_v57 = vadd.f32 %v550_v16, %v195_v53  ;;  %v291_v58 = vadd.f32 %v550_v16, %v205_v55 }
  0xb0   :  { %v326_v59 = vadd.f32 %v310_v48, %v294_v51  ;;  %v330_v60 = vadd.f32 %v314_v50, %v298_v52 }
  0xb1   :  { %v319_v61 = vadd.f32 %v303_v54, %v287_v57  ;;  %v323_v62 = vadd.f32 %v307_v56, %v291_v58 }
  0xb2   :  { %v342_v63 = vmax.f32 %v326_v59, 0.0  ;;  %v346_v0 = vmax.f32 %v330_v60, 0.0 }
  0xb3   :  { %v335_v1 = vmax.f32 %v319_v61, 0.0  ;;  %v339_v2 = vmax.f32 %v323_v62, 0.0 }
  0xb4   :  { %358 = vst [vmem:[%s668_s4 + $0x48] sm:$0xff] %v342_v63 }
  0xb5   :  { %362 = vst [vmem:[%s668_s4 + $0x68] sm:$0xff] %v346_v0  ;;  %v215_v3 = vpop.f32.mrf.mxu2  ;;  %v225_v5 = vpop.f32.mrf.mxu3 }
  0xb6   :  { %351 = vst [vmem:[%s668_s4 + $0x10] sm:$0xff] %v335_v1  ;;  %v295_v7 = vadd.f32 %v550_v16, %v215_v3  ;;  %v299_v8 = vadd.f32 %v550_v16, %v225_v5  ;;  %v197_v9 = vpop.f32.mrf.mxu0  ;;  %v207_v11 = vpop.f32.mrf.mxu1 }
  0xb7   :  { %355 = vst [vmem:[%s668_s4 + $0x30] sm:$0xff] %v339_v2  ;;  %v288_v13 = vadd.f32 %v550_v16, %v197_v9  ;;  %v292_v14 = vadd.f32 %v550_v16, %v207_v11 }
  0xb8   :  { %v327_v15 = vadd.f32 %v311_v4, %v295_v7  ;;  %v331_v17 = vadd.f32 %v315_v6, %v299_v8 }
  0xb9   :  { %v320_v18 = vadd.f32 %v304_v10, %v288_v13  ;;  %v324_v19 = vadd.f32 %v308_v12, %v292_v14 }
  0xba   :  { %v343_v20 = vmax.f32 %v327_v15, 0.0  ;;  %v347_v21 = vmax.f32 %v331_v17, 0.0 }
  0xbb   :  { %v336_v22 = vmax.f32 %v320_v18, 0.0  ;;  %v340_v23 = vmax.f32 %v324_v19, 0.0 }
  0xbc   :  { %359 = vst [vmem:[%s668_s4 + $0x50] sm:$0xff] %v343_v20 }
  0xbd   :  { %363 = vst [vmem:[%s668_s4 + $0x70] sm:$0xff] %v347_v21  ;;  %v217_v24 = vpop.f32.mrf.mxu2  ;;  %v227_v26 = vpop.f32.mrf.mxu3 }
  0xbe   :  { %352 = vst [vmem:[%s668_s4 + $0x18] sm:$0xff] %v336_v22  ;;  %v296_v28 = vadd.f32 %v550_v16, %v217_v24  ;;  %v300_v29 = vadd.f32 %v550_v16, %v227_v26 }
  0xbf   :  { %356 = vst [vmem:[%s668_s4 + $0x38] sm:$0xff] %v340_v23 }
  0xc0   :  { %v328_v30 = vadd.f32 %v312_v25, %v296_v28  ;;  %v332_v31 = vadd.f32 %v316_v27, %v300_v29 }
  0xc2   :  { %v344_v32 = vmax.f32 %v328_v30, 0.0  ;;  %v348_v33 = vmax.f32 %v332_v31, 0.0 }
  0xc4   :  { %360 = vst [vmem:[%s668_s4 + $0x58] sm:$0xff] %v344_v32 }
  0xc5   :  { %364 = vst [vmem:[%s668_s4 + $0x78] sm:$0xff] %v348_v33 }

// kernel: hourglass_fwd.56
= control target key start
LH: loop header
LB: loop body
LE: loop exit
PB: predicated region body
PF: predicated region fallthrough
CT: control target
= control target key end

     0   :  { %s1624_s12 = smov 0   ;;  %s1626_s13 = smov 0   ;;  %s1857_s0 = inlined_call_operand.vmem [shape: bf16[1024,128], index: 0, kind: input, shape index: {}]   ;;  %s1858_s1 = inlined_call_operand.vmem [shape: bf16[128,128], index: 1, kind: input, shape index: {}]   ;;  %s1859_s2 = inlined_call_operand.vmem [shape: f32[1,128], index: 2, kind: input, shape index: {}]   ;;  %s1860_s3 = inlined_call_operand.vmem [shape: f32[1024,128], index: 3, kind: output, shape index: {}]  }
   0x1   :  { %s1628_s14 = smov 0  }
   0x2 LB: > { %s32_s15 = sadd.s32 1, %s1598_s13  ;;  %p1324_p0 = scmp.ge.s32.totalorder %s1602_s14, 1  ;;  %s1602_s14 = sphi %s1628_s14, %s13_s14   ;;  %s1598_s13 = sphi %s1626_s13, %s1862_s13   ;;  %s1594_s12 = sphi %s1624_s12, %s1861_s12  }
   0x3   : > { %p34_p1 = scmp.ge.s32.totalorder %s32_s15, 2  ;;  %p188_p2 = scmp.lt.s32.totalorder %s1602_s14, 3 }
   0x5   : > { %s1864_s15 = smov (%p34_p1, %s32_s15), 0  ;;  %p189_p3 = pnand %p1324_p0, %p188_p2 }
   0x6   : > { %s1325_s24 = sshll.u32 (!%p189_p3), %s1594_s12, 6 }
   0x7   : > { %192 = sbr.rel (%p189_p3) target bundleno = 301 (0x12d), region = 32  ;;  %p230_p4 = scmp.lt.s32.totalorder (!%p189_p3), %s1325_s24, 127 }
   0xc   : > { %v1530_v0 = vld [vmem:[%s1858_s1 + $0x38] sm:$0xff]  ;;  %v1529_v1 = vld [vmem:[%s1858_s1 + $0x30] sm:$0xff]  ;;  %v1528_v2 = vld [vmem:[%s1858_s1 + $0x28] sm:$0xff]  ;;  %s1866_s24 = smov (!%p230_p4, %s1325_s24), 127 }
   0xd   : > { %711 = vmatpush.bf16.msra.mxu0 %v1530_v0  ;;  %1531 = vmatpush.bf16.msra.mxu1 %v1530_v0  ;;  %v1527_v3 = vld [vmem:[%s1858_s1 + $0x20] sm:$0xff]  ;;  %v1526_v4 = vld [vmem:[%s1858_s1 + $0x18] sm:$0xff]  ;;  %v1525_v5 = vld [vmem:[%s1858_s1 + $0x10] sm:$0xff]  ;;  %s1326_s4 = sshll.u32 %s1866_s24, 2  ;;  %s1328_s10 = sshll.u32 %s1866_s24, 3 }
   0xe   : > { %1532 = vmatpush.bf16.msra.mxu2 %v1530_v0  ;;  %1533 = vmatpush.bf16.msra.mxu3 %v1530_v0  ;;  %v1524_v6 = vld [vmem:[%s1858_s1 + $0x8] sm:$0xff]  ;;  %v1523_v7 = vld [vmem:[%s1858_s1] sm:$0xff]  ;;  %s1675_s9 = scalar_lea.vmem %s1857_s0, %s1326_s4  ;;  %s1718_s18 = scalar_lea.vmem %s1860_s3, %s1328_s10 }
   0xf   : > { %v1491_v8 = vld [vmem:[%s1675_s9] sm:$0xff]  ;;  %v1492_v12 = vld [vmem:[%s1675_s9 + $0x8] sm:$0xff]  ;;  %v1493_v16 = vld [vmem:[%s1675_s9 + $0x10] sm:$0xff] }
  0x10   : > { %v1499_v9 = vld [vmem:[%s1675_s9 + $0x40] sm:$0xff]  ;;  %v1500_v13 = vld [vmem:[%s1675_s9 + $0x48] sm:$0xff]  ;;  %v1501_v17 = vld [vmem:[%s1675_s9 + $0x50] sm:$0xff] }
  0x11   : > { %712 = vmatpush.bf16.msra.mxu0 %v1529_v1  ;;  %1534 = vmatpush.bf16.msra.mxu1 %v1529_v1  ;;  %v1507_v10 = vld [vmem:[%s1675_s9 + $0x80] sm:$0xff]  ;;  %v1508_v14 = vld [vmem:[%s1675_s9 + $0x88] sm:$0xff]  ;;  %v1509_v18 = vld [vmem:[%s1675_s9 + $0x90] sm:$0xff] }
  0x12   : > { %1535 = vmatpush.bf16.msra.mxu2 %v1529_v1  ;;  %1536 = vmatpush.bf16.msra.mxu3 %v1529_v1  ;;  %v1515_v11 = vld [vmem:[%s1675_s9 + $0xc0] sm:$0xff]  ;;  %v1516_v15 = vld [vmem:[%s1675_s9 + $0xc8] sm:$0xff]  ;;  %v1517_v19 = vld [vmem:[%s1675_s9 + $0xd0] sm:$0xff] }
  0x13   : > { %v1494_v20 = vld [vmem:[%s1675_s9 + $0x18] sm:$0xff]  ;;  %v1495_v24 = vld [vmem:[%s1675_s9 + $0x20] sm:$0xff]  ;;  %v1496_v28 = vld [vmem:[%s1675_s9 + $0x28] sm:$0xff] }
  0x14   : > { %v1502_v21 = vld [vmem:[%s1675_s9 + $0x58] sm:$0xff]  ;;  %v1503_v25 = vld [vmem:[%s1675_s9 + $0x60] sm:$0xff]  ;;  %v1504_v29 = vld [vmem:[%s1675_s9 + $0x68] sm:$0xff] }
  0x15   : > { %713 = vmatpush.bf16.msra.mxu0 %v1528_v2  ;;  %1537 = vmatpush.bf16.msra.mxu1 %v1528_v2  ;;  %v1510_v22 = vld [vmem:[%s1675_s9 + $0x98] sm:$0xff]  ;;  %v1511_v26 = vld [vmem:[%s1675_s9 + $0xa0] sm:$0xff]  ;;  %v1512_v30 = vld [vmem:[%s1675_s9 + $0xa8] sm:$0xff] }
  0x16   : > { %1538 = vmatpush.bf16.msra.mxu2 %v1528_v2  ;;  %1539 = vmatpush.bf16.msra.mxu3 %v1528_v2  ;;  %v1518_v23 = vld [vmem:[%s1675_s9 + $0xd8] sm:$0xff]  ;;  %v1519_v27 = vld [vmem:[%s1675_s9 + $0xe0] sm:$0xff]  ;;  %v1520_v31 = vld [vmem:[%s1675_s9 + $0xe8] sm:$0xff] }
  0x17   : > { %v1497_v32 = vld [vmem:[%s1675_s9 + $0x30] sm:$0xff]  ;;  %v1498_v36 = vld [vmem:[%s1675_s9 + $0x38] sm:$0xff]  ;;  %v1713_v40 = vld [vmem:[%s1859_s2] ss:$0 sm:$0xff] }
  0x18   : > { %v1505_v33 = vld [vmem:[%s1675_s9 + $0x70] sm:$0xff]  ;;  %v1506_v37 = vld [vmem:[%s1675_s9 + $0x78] sm:$0xff] }
  0x19   : > { %714 = vmatpush.bf16.msra.mxu0 %v1527_v3  ;;  %1540 = vmatpush.bf16.msra.mxu1 %v1527_v3  ;;  %v1513_v34 = vld [vmem:[%s1675_s9 + $0xb0] sm:$0xff]  ;;  %v1514_v38 = vld [vmem:[%s1675_s9 + $0xb8] sm:$0xff] }
  0x1a   : > { %1541 = vmatpush.bf16.msra.mxu2 %v1527_v3  ;;  %1542 = vmatpush.bf16.msra.mxu3 %v1527_v3  ;;  %v1521_v35 = vld [vmem:[%s1675_s9 + $0xf0] sm:$0xff]  ;;  %v1522_v39 = vld [vmem:[%s1675_s9 + $0xf8] sm:$0xff] }
  0x1d   : > { %715 = vmatpush.bf16.msra.mxu0 %v1526_v4  ;;  %1543 = vmatpush.bf16.msra.mxu1 %v1526_v4 }
  0x1e   : > { %1544 = vmatpush.bf16.msra.mxu2 %v1526_v4  ;;  %1545 = vmatpush.bf16.msra.mxu3 %v1526_v4 }
  0x21   : > { %716 = vmatpush.bf16.msra.mxu0 %v1525_v5  ;;  %1546 = vmatpush.bf16.msra.mxu1 %v1525_v5 }
  0x22   : > { %1547 = vmatpush.bf16.msra.mxu2 %v1525_v5  ;;  %1548 = vmatpush.bf16.msra.mxu3 %v1525_v5 }
  0x25   : > { %717 = vmatpush.bf16.msra.mxu0 %v1524_v6  ;;  %1549 = vmatpush.bf16.msra.mxu1 %v1524_v6 }
  0x26   : > { %1550 = vmatpush.bf16.msra.mxu2 %v1524_v6  ;;  %1551 = vmatpush.bf16.msra.mxu3 %v1524_v6 }
  0x29   : > { %718 = vmatpush.bf16.msra.mxu0 %v1523_v7  ;;  %1552 = vmatpush.bf16.msra.mxu1 %v1523_v7 }
  0x2a   : > { %1553 = vmatpush.bf16.msra.mxu2 %v1523_v7  ;;  %1554 = vmatpush.bf16.msra.mxu3 %v1523_v7 }
  0x2c   : > { %719 = vmatmul.bf16.vlgmr.msra.gmra.mxu0 %v1491_v8  ;;  %759 = vmatmul.bf16.vlgmr.msra.gmra.mxu1 %v1499_v9 }
  0x2d   : > { %799 = vmatmul.bf16.vlgmr.msra.gmra.mxu2 %v1507_v10  ;;  %839 = vmatmul.bf16.vlgmr.msra.gmra.mxu3 %v1515_v11 }
  0x3c   : > { %724 = vmatmul.bf16.gmra.mxu0 %v1492_v12  ;;  %764 = vmatmul.bf16.gmra.mxu1 %v1500_v13 }
  0x3d   : > { %804 = vmatmul.bf16.gmra.mxu2 %v1508_v14  ;;  %844 = vmatmul.bf16.gmra.mxu3 %v1516_v15 }
  0x4c   : > { %729 = vmatmul.bf16.gmra.mxu0 %v1493_v16  ;;  %769 = vmatmul.bf16.gmra.mxu1 %v1501_v17 }
  0x4d   : > { %809 = vmatmul.bf16.gmra.mxu2 %v1509_v18  ;;  %849 = vmatmul.bf16.gmra.mxu3 %v1517_v19 }
  0x5c   : > { %734 = vmatmul.bf16.gmra.mxu0 %v1494_v20  ;;  %774 = vmatmul.bf16.gmra.mxu1 %v1502_v21 }
  0x5d   : > { %814 = vmatmul.bf16.gmra.mxu2 %v1510_v22  ;;  %854 = vmatmul.bf16.gmra.mxu3 %v1518_v23 }
  0x6c   : > { %739 = vmatmul.bf16.gmra.mxu0 %v1495_v24  ;;  %779 = vmatmul.bf16.gmra.mxu1 %v1503_v25 }
  0x6d   : > { %819 = vmatmul.bf16.gmra.mxu2 %v1511_v26  ;;  %859 = vmatmul.bf16.gmra.mxu3 %v1519_v27 }
  0x7c   : > { %744 = vmatmul.bf16.gmra.mxu0 %v1496_v28  ;;  %784 = vmatmul.bf16.gmra.mxu1 %v1504_v29 }
  0x7d   : > { %824 = vmatmul.bf16.gmra.mxu2 %v1512_v30  ;;  %864 = vmatmul.bf16.gmra.mxu3 %v1520_v31 }
  0x8c   : > { %749 = vmatmul.bf16.gmra.mxu0 %v1497_v32  ;;  %789 = vmatmul.bf16.gmra.mxu1 %v1505_v33 }
  0x8d   : > { %829 = vmatmul.bf16.gmra.mxu2 %v1513_v34  ;;  %869 = vmatmul.bf16.gmra.mxu3 %v1521_v35 }
  0x9c   : > { %754 = vmatmul.bf16.gmra.mxu0 %v1498_v36  ;;  %794 = vmatmul.bf16.gmra.mxu1 %v1506_v37 }
  0x9d   : > { %834 = vmatmul.bf16.gmra.mxu2 %v1514_v38  ;;  %874 = vmatmul.bf16.gmra.mxu3 %v1522_v39 }
  0xa9   : > { %v720_v41 = vpop.f32.mrf.mxu0  ;;  %v760_v42 = vpop.f32.mrf.mxu1 }
  0xaa   : > { %v1079_v43 = vadd.f32 %v1713_v40, %v720_v41  ;;  %v1095_v44 = vadd.f32 %v1713_v40, %v760_v42 }
  0xac   : > { %1143 = vst [vmem:[%s1718_s18] sm:$0xff] %v1079_v43 }
  0xad   : > { %1159 = vst [vmem:[%s1718_s18 + $0x80] sm:$0xff] %v1095_v44 }
  0xb0   : > { %v800_v45 = vpop.f32.mrf.mxu2  ;;  %v840_v46 = vpop.f32.mrf.mxu3 }
  0xb1   : > { %v1111_v47 = vadd.f32 %v1713_v40, %v800_v45  ;;  %v1127_v48 = vadd.f32 %v1713_v40, %v840_v46  ;;  %v722_v49 = vpop.f32.mrf.mxu0  ;;  %v762_v50 = vpop.f32.mrf.mxu1 }
  0xb2   : > { %v1080_v51 = vadd.f32 %v1713_v40, %v722_v49  ;;  %v1096_v52 = vadd.f32 %v1713_v40, %v762_v50 }
  0xb3   : > { %1175 = vst [vmem:[%s1718_s18 + $0x100] sm:$0xff] %v1111_v47 }
  0xb4   : > { %1191 = vst [vmem:[%s1718_s18 + $0x180] sm:$0xff] %v1127_v48 }
  0xb5   : > { %1144 = vst [vmem:[%s1718_s18 + $0x8] sm:$0xff] %v1080_v51 }
  0xb6   : > { %1160 = vst [vmem:[%s1718_s18 + $0x88] sm:$0xff] %v1096_v52 }
  0xb8   : > { %v802_v53 = vpop.f32.mrf.mxu2  ;;  %v842_v54 = vpop.f32.mrf.mxu3 }
  0xb9   : > { %v1112_v55 = vadd.f32 %v1713_v40, %v802_v53  ;;  %v1128_v56 = vadd.f32 %v1713_v40, %v842_v54  ;;  %v725_v57 = vpop.f32.mrf.mxu0  ;;  %v765_v58 = vpop.f32.mrf.mxu1 }
  0xba   : > { %v1081_v59 = vadd.f32 %v1713_v40, %v725_v57  ;;  %v1097_v60 = vadd.f32 %v1713_v40, %v765_v58 }
  0xbb   : > { %1176 = vst [vmem:[%s1718_s18 + $0x108] sm:$0xff] %v1112_v55 }
  0xbc   : > { %1192 = vst [vmem:[%s1718_s18 + $0x188] sm:$0xff] %v1128_v56 }
  0xbd   : > { %1145 = vst [vmem:[%s1718_s18 + $0x10] sm:$0xff] %v1081_v59 }
  0xbe   : > { %1161 = vst [vmem:[%s1718_s18 + $0x90] sm:$0xff] %v1097_v60 }
  0xc0   : > { %v805_v61 = vpop.f32.mrf.mxu2  ;;  %v845_v62 = vpop.f32.mrf.mxu3 }
  0xc1   : > { %v1113_v63 = vadd.f32 %v1713_v40, %v805_v61  ;;  %v1129_v0 = vadd.f32 %v1713_v40, %v845_v62  ;;  %v727_v1 = vpop.f32.mrf.mxu0  ;;  %v767_v2 = vpop.f32.mrf.mxu1 }
  0xc2   : > { %v1082_v3 = vadd.f32 %v1713_v40, %v727_v1  ;;  %v1098_v4 = vadd.f32 %v1713_v40, %v767_v2 }
  0xc3   : > { %1177 = vst [vmem:[%s1718_s18 + $0x110] sm:$0xff] %v1113_v63 }
  0xc4   : > { %1193 = vst [vmem:[%s1718_s18 + $0x190] sm:$0xff] %v1129_v0 }
  0xc5   : > { %1146 = vst [vmem:[%s1718_s18 + $0x18] sm:$0xff] %v1082_v3 }
  0xc6   : > { %1162 = vst [vmem:[%s1718_s18 + $0x98] sm:$0xff] %v1098_v4 }
  0xc8   : > { %v807_v5 = vpop.f32.mrf.mxu2  ;;  %v847_v6 = vpop.f32.mrf.mxu3 }
  0xc9   : > { %v1114_v7 = vadd.f32 %v1713_v40, %v807_v5  ;;  %v1130_v8 = vadd.f32 %v1713_v40, %v847_v6  ;;  %v730_v9 = vpop.f32.mrf.mxu0  ;;  %v770_v10 = vpop.f32.mrf.mxu1 }
  0xca   : > { %v1083_v11 = vadd.f32 %v1713_v40, %v730_v9  ;;  %v1099_v12 = vadd.f32 %v1713_v40, %v770_v10 }
  0xcb   : > { %1178 = vst [vmem:[%s1718_s18 + $0x118] sm:$0xff] %v1114_v7 }
  0xcc   : > { %1194 = vst [vmem:[%s1718_s18 + $0x198] sm:$0xff] %v1130_v8 }
  0xcd   : > { %1147 = vst [vmem:[%s1718_s18 + $0x20] sm:$0xff] %v1083_v11 }
  0xce   : > { %1163 = vst [vmem:[%s1718_s18 + $0xa0] sm:$0xff] %v1099_v12 }
  0xd0   : > { %v810_v13 = vpop.f32.mrf.mxu2  ;;  %v850_v14 = vpop.f32.mrf.mxu3 }
  0xd1   : > { %v1115_v15 = vadd.f32 %v1713_v40, %v810_v13  ;;  %v1131_v16 = vadd.f32 %v1713_v40, %v850_v14  ;;  %v732_v17 = vpop.f32.mrf.mxu0  ;;  %v772_v18 = vpop.f32.mrf.mxu1 }
  0xd2   : > { %v1084_v19 = vadd.f32 %v1713_v40, %v732_v17  ;;  %v1100_v20 = vadd.f32 %v1713_v40, %v772_v18 }
  0xd3   : > { %1179 = vst [vmem:[%s1718_s18 + $0x120] sm:$0xff] %v1115_v15 }
  0xd4   : > { %1195 = vst [vmem:[%s1718_s18 + $0x1a0] sm:$0xff] %v1131_v16 }
  0xd5   : > { %1148 = vst [vmem:[%s1718_s18 + $0x28] sm:$0xff] %v1084_v19 }
  0xd6   : > { %1164 = vst [vmem:[%s1718_s18 + $0xa8] sm:$0xff] %v1100_v20 }
  0xd8   : > { %v812_v21 = vpop.f32.mrf.mxu2  ;;  %v852_v22 = vpop.f32.mrf.mxu3 }
  0xd9   : > { %v1116_v23 = vadd.f32 %v1713_v40, %v812_v21  ;;  %v1132_v24 = vadd.f32 %v1713_v40, %v852_v22  ;;  %v735_v25 = vpop.f32.mrf.mxu0  ;;  %v775_v26 = vpop.f32.mrf.mxu1 }
  0xda   : > { %v1085_v27 = vadd.f32 %v1713_v40, %v735_v25  ;;  %v1101_v28 = vadd.f32 %v1713_v40, %v775_v26 }
  0xdb   : > { %1180 = vst [vmem:[%s1718_s18 + $0x128] sm:$0xff] %v1116_v23 }
  0xdc   : > { %1196 = vst [vmem:[%s1718_s18 + $0x1a8] sm:$0xff] %v1132_v24 }
  0xdd   : > { %1149 = vst [vmem:[%s1718_s18 + $0x30] sm:$0xff] %v1085_v27 }
  0xde   : > { %1165 = vst [vmem:[%s1718_s18 + $0xb0] sm:$0xff] %v1101_v28 }
  0xe0   : > { %v815_v29 = vpop.f32.mrf.mxu2  ;;  %v855_v30 = vpop.f32.mrf.mxu3 }
  0xe1   : > { %v1117_v31 = vadd.f32 %v1713_v40, %v815_v29  ;;  %v1133_v32 = vadd.f32 %v1713_v40, %v855_v30  ;;  %v737_v33 = vpop.f32.mrf.mxu0  ;;  %v777_v34 = vpop.f32.mrf.mxu1 }
  0xe2   : > { %v1086_v35 = vadd.f32 %v1713_v40, %v737_v33  ;;  %v1102_v36 = vadd.f32 %v1713_v40, %v777_v34 }
  0xe3   : > { %1181 = vst [vmem:[%s1718_s18 + $0x130] sm:$0xff] %v1117_v31 }
  0xe4   : > { %1197 = vst [vmem:[%s1718_s18 + $0x1b0] sm:$0xff] %v1133_v32 }
  0xe5   : > { %1150 = vst [vmem:[%s1718_s18 + $0x38] sm:$0xff] %v1086_v35 }
  0xe6   : > { %1166 = vst [vmem:[%s1718_s18 + $0xb8] sm:$0xff] %v1102_v36 }
  0xe8   : > { %v817_v37 = vpop.f32.mrf.mxu2  ;;  %v857_v38 = vpop.f32.mrf.mxu3 }
  0xe9   : > { %v1118_v39 = vadd.f32 %v1713_v40, %v817_v37  ;;  %v1134_v41 = vadd.f32 %v1713_v40, %v857_v38  ;;  %v740_v42 = vpop.f32.mrf.mxu0  ;;  %v780_v43 = vpop.f32.mrf.mxu1 }
  0xea   : > { %v1087_v44 = vadd.f32 %v1713_v40, %v740_v42  ;;  %v1103_v45 = vadd.f32 %v1713_v40, %v780_v43 }
  0xeb   : > { %1182 = vst [vmem:[%s1718_s18 + $0x138] sm:$0xff] %v1118_v39 }
  0xec   : > { %1198 = vst [vmem:[%s1718_s18 + $0x1b8] sm:$0xff] %v1134_v41 }
  0xed   : > { %1151 = vst [vmem:[%s1718_s18 + $0x40] sm:$0xff] %v1087_v44 }
  0xee   : > { %1167 = vst [vmem:[%s1718_s18 + $0xc0] sm:$0xff] %v1103_v45 }
  0xf0   : > { %v820_v46 = vpop.f32.mrf.mxu2  ;;  %v860_v47 = vpop.f32.mrf.mxu3 }
  0xf1   : > { %v1119_v48 = vadd.f32 %v1713_v40, %v820_v46  ;;  %v1135_v49 = vadd.f32 %v1713_v40, %v860_v47  ;;  %v742_v50 = vpop.f32.mrf.mxu0  ;;  %v782_v51 = vpop.f32.mrf.mxu1 }
  0xf2   : > { %v1088_v52 = vadd.f32 %v1713_v40, %v742_v50  ;;  %v1104_v53 = vadd.f32 %v1713_v40, %v782_v51 }
  0xf3   : > { %1183 = vst [vmem:[%s1718_s18 + $0x140] sm:$0xff] %v1119_v48 }
  0xf4   : > { %1199 = vst [vmem:[%s1718_s18 + $0x1c0] sm:$0xff] %v1135_v49 }
  0xf5   : > { %1152 = vst [vmem:[%s1718_s18 + $0x48] sm:$0xff] %v1088_v52 }
  0xf6   : > { %1168 = vst [vmem:[%s1718_s18 + $0xc8] sm:$0xff] %v1104_v53 }
  0xf8   : > { %v822_v54 = vpop.f32.mrf.mxu2  ;;  %v862_v55 = vpop.f32.mrf.mxu3 }
  0xf9   : > { %v1120_v56 = vadd.f32 %v1713_v40, %v822_v54  ;;  %v1136_v57 = vadd.f32 %v1713_v40, %v862_v55  ;;  %v745_v58 = vpop.f32.mrf.mxu0  ;;  %v785_v59 = vpop.f32.mrf.mxu1 }
  0xfa   : > { %v1089_v60 = vadd.f32 %v1713_v40, %v745_v58  ;;  %v1105_v61 = vadd.f32 %v1713_v40, %v785_v59 }
  0xfb   : > { %1184 = vst [vmem:[%s1718_s18 + $0x148] sm:$0xff] %v1120_v56 }
  0xfc   : > { %1200 = vst [vmem:[%s1718_s18 + $0x1c8] sm:$0xff] %v1136_v57 }
  0xfd   : > { %1153 = vst [vmem:[%s1718_s18 + $0x50] sm:$0xff] %v1089_v60 }
  0xfe   : > { %1169 = vst [vmem:[%s1718_s18 + $0xd0] sm:$0xff] %v1105_v61 }
 0x100   : > { %v825_v62 = vpop.f32.mrf.mxu2  ;;  %v865_v63 = vpop.f32.mrf.mxu3 }
 0x101   : > { %v1121_v0 = vadd.f32 %v1713_v40, %v825_v62  ;;  %v1137_v1 = vadd.f32 %v1713_v40, %v865_v63  ;;  %v747_v2 = vpop.f32.mrf.mxu0  ;;  %v787_v3 = vpop.f32.mrf.mxu1 }
 0x102   : > { %v1090_v4 = vadd.f32 %v1713_v40, %v747_v2  ;;  %v1106_v5 = vadd.f32 %v1713_v40, %v787_v3 }
 0x103   : > { %1185 = vst [vmem:[%s1718_s18 + $0x150] sm:$0xff] %v1121_v0 }
 0x104   : > { %1201 = vst [vmem:[%s1718_s18 + $0x1d0] sm:$0xff] %v1137_v1 }
 0x105   : > { %1154 = vst [vmem:[%s1718_s18 + $0x58] sm:$0xff] %v1090_v4 }
 0x106   : > { %1170 = vst [vmem:[%s1718_s18 + $0xd8] sm:$0xff] %v1106_v5 }
 0x108   : > { %v827_v6 = vpop.f32.mrf.mxu2  ;;  %v867_v7 = vpop.f32.mrf.mxu3 }
 0x109   : > { %v1122_v8 = vadd.f32 %v1713_v40, %v827_v6  ;;  %v1138_v9 = vadd.f32 %v1713_v40, %v867_v7  ;;  %v750_v10 = vpop.f32.mrf.mxu0  ;;  %v790_v11 = vpop.f32.mrf.mxu1 }
 0x10a   : > { %v1091_v12 = vadd.f32 %v1713_v40, %v750_v10  ;;  %v1107_v13 = vadd.f32 %v1713_v40, %v790_v11 }
 0x10b   : > { %1186 = vst [vmem:[%s1718_s18 + $0x158] sm:$0xff] %v1122_v8 }
 0x10c   : > { %1202 = vst [vmem:[%s1718_s18 + $0x1d8] sm:$0xff] %v1138_v9 }
 0x10d   : > { %1155 = vst [vmem:[%s1718_s18 + $0x60] sm:$0xff] %v1091_v12 }
 0x10e   : > { %1171 = vst [vmem:[%s1718_s18 + $0xe0] sm:$0xff] %v1107_v13 }
 0x110   : > { %v830_v14 = vpop.f32.mrf.mxu2  ;;  %v870_v15 = vpop.f32.mrf.mxu3 }
 0x111   : > { %v1123_v16 = vadd.f32 %v1713_v40, %v830_v14  ;;  %v1139_v17 = vadd.f32 %v1713_v40, %v870_v15  ;;  %v752_v18 = vpop.f32.mrf.mxu0  ;;  %v792_v19 = vpop.f32.mrf.mxu1 }
 0x112   : > { %v1092_v20 = vadd.f32 %v1713_v40, %v752_v18  ;;  %v1108_v21 = vadd.f32 %v1713_v40, %v792_v19 }
 0x113   : > { %1187 = vst [vmem:[%s1718_s18 + $0x160] sm:$0xff] %v1123_v16 }
 0x114   : > { %1203 = vst [vmem:[%s1718_s18 + $0x1e0] sm:$0xff] %v1139_v17 }
 0x115   : > { %1156 = vst [vmem:[%s1718_s18 + $0x68] sm:$0xff] %v1092_v20 }
 0x116   : > { %1172 = vst [vmem:[%s1718_s18 + $0xe8] sm:$0xff] %v1108_v21 }
 0x118   : > { %v832_v22 = vpop.f32.mrf.mxu2  ;;  %v872_v23 = vpop.f32.mrf.mxu3 }
 0x119   : > { %v1124_v24 = vadd.f32 %v1713_v40, %v832_v22  ;;  %v1140_v25 = vadd.f32 %v1713_v40, %v872_v23  ;;  %v755_v26 = vpop.f32.mrf.mxu0  ;;  %v795_v27 = vpop.f32.mrf.mxu1 }
 0x11a   : > { %v1093_v28 = vadd.f32 %v1713_v40, %v755_v26  ;;  %v1109_v29 = vadd.f32 %v1713_v40, %v795_v27 }
 0x11b   : > { %1188 = vst [vmem:[%s1718_s18 + $0x168] sm:$0xff] %v1124_v24 }
 0x11c   : > { %1204 = vst [vmem:[%s1718_s18 + $0x1e8] sm:$0xff] %v1140_v25 }
 0x11d   : > { %1157 = vst [vmem:[%s1718_s18 + $0x70] sm:$0xff] %v1093_v28 }
 0x11e   : > { %1173 = vst [vmem:[%s1718_s18 + $0xf0] sm:$0xff] %v1109_v29 }
 0x120   : > { %v835_v30 = vpop.f32.mrf.mxu2  ;;  %v875_v31 = vpop.f32.mrf.mxu3 }
 0x121   : > { %v1125_v32 = vadd.f32 %v1713_v40, %v835_v30  ;;  %v1141_v33 = vadd.f32 %v1713_v40, %v875_v31  ;;  %v757_v34 = vpop.f32.mrf.mxu0  ;;  %v797_v35 = vpop.f32.mrf.mxu1 }
 0x122   : > { %v1094_v36 = vadd.f32 %v1713_v40, %v757_v34  ;;  %v1110_v37 = vadd.f32 %v1713_v40, %v797_v35 }
 0x123   : > { %1189 = vst [vmem:[%s1718_s18 + $0x170] sm:$0xff] %v1125_v32 }
 0x124   : > { %1205 = vst [vmem:[%s1718_s18 + $0x1f0] sm:$0xff] %v1141_v33 }
 0x125   : > { %1158 = vst [vmem:[%s1718_s18 + $0x78] sm:$0xff] %v1094_v36 }
 0x126   : > { %1174 = vst [vmem:[%s1718_s18 + $0xf8] sm:$0xff] %v1110_v37 }
 0x128   : > { %v837_v38 = vpop.f32.mrf.mxu2  ;;  %v877_v39 = vpop.f32.mrf.mxu3 }
 0x129   : > { %v1126_v41 = vadd.f32 %v1713_v40, %v837_v38  ;;  %v1142_v42 = vadd.f32 %v1713_v40, %v877_v39 }
 0x12b   : > { %1190 = vst [vmem:[%s1718_s18 + $0x178] sm:$0xff] %v1126_v41 }
 0x12c   : > { %1206 = vst [vmem:[%s1718_s18 + $0x1f8] sm:$0xff] %v1142_v42 }
 0x12d PF: > { %s13_s14 = sadd.s32 1, %s1602_s14   ;;  %s1861_s12 = smov %s1598_s13 }
 0x12e   : > { %p10_p5 = scmp.ge.s32.totalorder %s13_s14, 4   ;;  %s1862_s13 = smov %s1864_s15 }
 0x130   :  { %12 = sbr.rel (!%p10_p5) target bundleno = 2 (0x2), region = 76 }

// kernel: hourglass_fwd.65
= control target key start
LH: loop header
LB: loop body
LE: loop exit
PB: predicated region body
PF: predicated region fallthrough
CT: control target
= control target key end

     0   :  { %s1624_s12 = smov 0   ;;  %s1626_s13 = smov 0   ;;  %s1857_s0 = inlined_call_operand.vmem [shape: bf16[8192,128], index: 0, kind: input, shape index: {}]   ;;  %s1858_s1 = inlined_call_operand.vmem [shape: bf16[128,128], index: 1, kind: input, shape index: {}]   ;;  %s1859_s2 = inlined_call_operand.vmem [shape: f32[1,128], index: 2, kind: input, shape index: {}]   ;;  %s1860_s3 = inlined_call_operand.vmem [shape: f32[8192,128], index: 3, kind: output, shape index: {}]  }
   0x1   :  { %s1628_s14 = smov 0  }
   0x2 LB: > { %s32_s15 = sadd.s32 1, %s1598_s13  ;;  %p1324_p0 = scmp.ge.s32.totalorder %s1602_s14, 1  ;;  %s1602_s14 = sphi %s1628_s14, %s13_s14   ;;  %s1598_s13 = sphi %s1626_s13, %s1862_s13   ;;  %s1594_s12 = sphi %s1624_s12, %s1861_s12  }
   0x3   : > { %p34_p1 = scmp.ge.s32.totalorder %s32_s15, 16  ;;  %p188_p2 = scmp.lt.s32.totalorder %s1602_s14, 17 }
   0x5   : > { %s1864_s15 = smov (%p34_p1, %s32_s15), 0  ;;  %p189_p3 = pnand %p1324_p0, %p188_p2 }
   0x6   : > { %s1325_s24 = sshll.u32 (!%p189_p3), %s1594_s12, 6 }
   0x7   : > { %192 = sbr.rel (%p189_p3) target bundleno = 301 (0x12d), region = 32  ;;  %p230_p4 = scmp.lt.s32.totalorder (!%p189_p3), %s1325_s24, 1023 }
   0xc   : > { %v1530_v0 = vld [vmem:[%s1858_s1 + $0x38] sm:$0xff]  ;;  %v1529_v1 = vld [vmem:[%s1858_s1 + $0x30] sm:$0xff]  ;;  %v1528_v2 = vld [vmem:[%s1858_s1 + $0x28] sm:$0xff]  ;;  %s1866_s24 = smov (!%p230_p4, %s1325_s24), 1023 }
   0xd   : > { %711 = vmatpush.bf16.msra.mxu0 %v1530_v0  ;;  %1531 = vmatpush.bf16.msra.mxu1 %v1530_v0  ;;  %v1527_v3 = vld [vmem:[%s1858_s1 + $0x20] sm:$0xff]  ;;  %v1526_v4 = vld [vmem:[%s1858_s1 + $0x18] sm:$0xff]  ;;  %v1525_v5 = vld [vmem:[%s1858_s1 + $0x10] sm:$0xff]  ;;  %s1326_s4 = sshll.u32 %s1866_s24, 2  ;;  %s1328_s10 = sshll.u32 %s1866_s24, 3 }
   0xe   : > { %1532 = vmatpush.bf16.msra.mxu2 %v1530_v0  ;;  %1533 = vmatpush.bf16.msra.mxu3 %v1530_v0  ;;  %v1524_v6 = vld [vmem:[%s1858_s1 + $0x8] sm:$0xff]  ;;  %v1523_v7 = vld [vmem:[%s1858_s1] sm:$0xff]  ;;  %s1675_s9 = scalar_lea.vmem %s1857_s0, %s1326_s4  ;;  %s1718_s18 = scalar_lea.vmem %s1860_s3, %s1328_s10 }
   0xf   : > { %v1491_v8 = vld [vmem:[%s1675_s9] sm:$0xff]  ;;  %v1492_v12 = vld [vmem:[%s1675_s9 + $0x8] sm:$0xff]  ;;  %v1493_v16 = vld [vmem:[%s1675_s9 + $0x10] sm:$0xff] }
  0x10   : > { %v1499_v9 = vld [vmem:[%s1675_s9 + $0x40] sm:$0xff]  ;;  %v1500_v13 = vld [vmem:[%s1675_s9 + $0x48] sm:$0xff]  ;;  %v1501_v17 = vld [vmem:[%s1675_s9 + $0x50] sm:$0xff] }
  0x11   : > { %712 = vmatpush.bf16.msra.mxu0 %v1529_v1  ;;  %1534 = vmatpush.bf16.msra.mxu1 %v1529_v1  ;;  %v1507_v10 = vld [vmem:[%s1675_s9 + $0x80] sm:$0xff]  ;;  %v1508_v14 = vld [vmem:[%s1675_s9 + $0x88] sm:$0xff]  ;;  %v1509_v18 = vld [vmem:[%s1675_s9 + $0x90] sm:$0xff] }
  0x12   : > { %1535 = vmatpush.bf16.msra.mxu2 %v1529_v1  ;;  %1536 = vmatpush.bf16.msra.mxu3 %v1529_v1  ;;  %v1515_v11 = vld [vmem:[%s1675_s9 + $0xc0] sm:$0xff]  ;;  %v1516_v15 = vld [vmem:[%s1675_s9 + $0xc8] sm:$0xff]  ;;  %v1517_v19 = vld [vmem:[%s1675_s9 + $0xd0] sm:$0xff] }
  0x13   : > { %v1494_v20 = vld [vmem:[%s1675_s9 + $0x18] sm:$0xff]  ;;  %v1495_v24 = vld [vmem:[%s1675_s9 + $0x20] sm:$0xff]  ;;  %v1496_v28 = vld [vmem:[%s1675_s9 + $0x28] sm:$0xff] }
  0x14   : > { %v1502_v21 = vld [vmem:[%s1675_s9 + $0x58] sm:$0xff]  ;;  %v1503_v25 = vld [vmem:[%s1675_s9 + $0x60] sm:$0xff]  ;;  %v1504_v29 = vld [vmem:[%s1675_s9 + $0x68] sm:$0xff] }
  0x15   : > { %713 = vmatpush.bf16.msra.mxu0 %v1528_v2  ;;  %1537 = vmatpush.bf16.msra.mxu1 %v1528_v2  ;;  %v1510_v22 = vld [vmem:[%s1675_s9 + $0x98] sm:$0xff]  ;;  %v1511_v26 = vld [vmem:[%s1675_s9 + $0xa0] sm:$0xff]  ;;  %v1512_v30 = vld [vmem:[%s1675_s9 + $0xa8] sm:$0xff] }
  0x16   : > { %1538 = vmatpush.bf16.msra.mxu2 %v1528_v2  ;;  %1539 = vmatpush.bf16.msra.mxu3 %v1528_v2  ;;  %v1518_v23 = vld [vmem:[%s1675_s9 + $0xd8] sm:$0xff]  ;;  %v1519_v27 = vld [vmem:[%s1675_s9 + $0xe0] sm:$0xff]  ;;  %v1520_v31 = vld [vmem:[%s1675_s9 + $0xe8] sm:$0xff] }
  0x17   : > { %v1497_v32 = vld [vmem:[%s1675_s9 + $0x30] sm:$0xff]  ;;  %v1498_v36 = vld [vmem:[%s1675_s9 + $0x38] sm:$0xff]  ;;  %v1713_v40 = vld [vmem:[%s1859_s2] ss:$0 sm:$0xff] }
  0x18   : > { %v1505_v33 = vld [vmem:[%s1675_s9 + $0x70] sm:$0xff]  ;;  %v1506_v37 = vld [vmem:[%s1675_s9 + $0x78] sm:$0xff] }
  0x19   : > { %714 = vmatpush.bf16.msra.mxu0 %v1527_v3  ;;  %1540 = vmatpush.bf16.msra.mxu1 %v1527_v3  ;;  %v1513_v34 = vld [vmem:[%s1675_s9 + $0xb0] sm:$0xff]  ;;  %v1514_v38 = vld [vmem:[%s1675_s9 + $0xb8] sm:$0xff] }
  0x1a   : > { %1541 = vmatpush.bf16.msra.mxu2 %v1527_v3  ;;  %1542 = vmatpush.bf16.msra.mxu3 %v1527_v3  ;;  %v1521_v35 = vld [vmem:[%s1675_s9 + $0xf0] sm:$0xff]  ;;  %v1522_v39 = vld [vmem:[%s1675_s9 + $0xf8] sm:$0xff] }
  0x1d   : > { %715 = vmatpush.bf16.msra.mxu0 %v1526_v4  ;;  %1543 = vmatpush.bf16.msra.mxu1 %v1526_v4 }
  0x1e   : > { %1544 = vmatpush.bf16.msra.mxu2 %v1526_v4  ;;  %1545 = vmatpush.bf16.msra.mxu3 %v1526_v4 }
  0x21   : > { %716 = vmatpush.bf16.msra.mxu0 %v1525_v5  ;;  %1546 = vmatpush.bf16.msra.mxu1 %v1525_v5 }
  0x22   : > { %1547 = vmatpush.bf16.msra.mxu2 %v1525_v5  ;;  %1548 = vmatpush.bf16.msra.mxu3 %v1525_v5 }
  0x25   : > { %717 = vmatpush.bf16.msra.mxu0 %v1524_v6  ;;  %1549 = vmatpush.bf16.msra.mxu1 %v1524_v6 }
  0x26   : > { %1550 = vmatpush.bf16.msra.mxu2 %v1524_v6  ;;  %1551 = vmatpush.bf16.msra.mxu3 %v1524_v6 }
  0x29   : > { %718 = vmatpush.bf16.msra.mxu0 %v1523_v7  ;;  %1552 = vmatpush.bf16.msra.mxu1 %v1523_v7 }
  0x2a   : > { %1553 = vmatpush.bf16.msra.mxu2 %v1523_v7  ;;  %1554 = vmatpush.bf16.msra.mxu3 %v1523_v7 }
  0x2c   : > { %719 = vmatmul.bf16.vlgmr.msra.gmra.mxu0 %v1491_v8  ;;  %759 = vmatmul.bf16.vlgmr.msra.gmra.mxu1 %v1499_v9 }
  0x2d   : > { %799 = vmatmul.bf16.vlgmr.msra.gmra.mxu2 %v1507_v10  ;;  %839 = vmatmul.bf16.vlgmr.msra.gmra.mxu3 %v1515_v11 }
  0x3c   : > { %724 = vmatmul.bf16.gmra.mxu0 %v1492_v12  ;;  %764 = vmatmul.bf16.gmra.mxu1 %v1500_v13 }
  0x3d   : > { %804 = vmatmul.bf16.gmra.mxu2 %v1508_v14  ;;  %844 = vmatmul.bf16.gmra.mxu3 %v1516_v15 }
  0x4c   : > { %729 = vmatmul.bf16.gmra.mxu0 %v1493_v16  ;;  %769 = vmatmul.bf16.gmra.mxu1 %v1501_v17 }
  0x4d   : > { %809 = vmatmul.bf16.gmra.mxu2 %v1509_v18  ;;  %849 = vmatmul.bf16.gmra.mxu3 %v1517_v19 }
  0x5c   : > { %734 = vmatmul.bf16.gmra.mxu0 %v1494_v20  ;;  %774 = vmatmul.bf16.gmra.mxu1 %v1502_v21 }
  0x5d   : > { %814 = vmatmul.bf16.gmra.mxu2 %v1510_v22  ;;  %854 = vmatmul.bf16.gmra.mxu3 %v1518_v23 }
  0x6c   : > { %739 = vmatmul.bf16.gmra.mxu0 %v1495_v24  ;;  %779 = vmatmul.bf16.gmra.mxu1 %v1503_v25 }
  0x6d   : > { %819 = vmatmul.bf16.gmra.mxu2 %v1511_v26  ;;  %859 = vmatmul.bf16.gmra.mxu3 %v1519_v27 }
  0x7c   : > { %744 = vmatmul.bf16.gmra.mxu0 %v1496_v28  ;;  %784 = vmatmul.bf16.gmra.mxu1 %v1504_v29 }
  0x7d   : > { %824 = vmatmul.bf16.gmra.mxu2 %v1512_v30  ;;  %864 = vmatmul.bf16.gmra.mxu3 %v1520_v31 }
  0x8c   : > { %749 = vmatmul.bf16.gmra.mxu0 %v1497_v32  ;;  %789 = vmatmul.bf16.gmra.mxu1 %v1505_v33 }
  0x8d   : > { %829 = vmatmul.bf16.gmra.mxu2 %v1513_v34  ;;  %869 = vmatmul.bf16.gmra.mxu3 %v1521_v35 }
  0x9c   : > { %754 = vmatmul.bf16.gmra.mxu0 %v1498_v36  ;;  %794 = vmatmul.bf16.gmra.mxu1 %v1506_v37 }
  0x9d   : > { %834 = vmatmul.bf16.gmra.mxu2 %v1514_v38  ;;  %874 = vmatmul.bf16.gmra.mxu3 %v1522_v39 }
  0xa9   : > { %v720_v41 = vpop.f32.mrf.mxu0  ;;  %v760_v42 = vpop.f32.mrf.mxu1 }
  0xaa   : > { %v1079_v43 = vadd.f32 %v1713_v40, %v720_v41  ;;  %v1095_v44 = vadd.f32 %v1713_v40, %v760_v42 }
  0xac   : > { %1143 = vst [vmem:[%s1718_s18] sm:$0xff] %v1079_v43 }
  0xad   : > { %1159 = vst [vmem:[%s1718_s18 + $0x80] sm:$0xff] %v1095_v44 }
  0xb0   : > { %v800_v45 = vpop.f32.mrf.mxu2  ;;  %v840_v46 = vpop.f32.mrf.mxu3 }
  0xb1   : > { %v1111_v47 = vadd.f32 %v1713_v40, %v800_v45  ;;  %v1127_v48 = vadd.f32 %v1713_v40, %v840_v46  ;;  %v722_v49 = vpop.f32.mrf.mxu0  ;;  %v762_v50 = vpop.f32.mrf.mxu1 }
  0xb2   : > { %v1080_v51 = vadd.f32 %v1713_v40, %v722_v49  ;;  %v1096_v52 = vadd.f32 %v1713_v40, %v762_v50 }
  0xb3   : > { %1175 = vst [vmem:[%s1718_s18 + $0x100] sm:$0xff] %v1111_v47 }
  0xb4   : > { %1191 = vst [vmem:[%s1718_s18 + $0x180] sm:$0xff] %v1127_v48 }
  0xb5   : > { %1144 = vst [vmem:[%s1718_s18 + $0x8] sm:$0xff] %v1080_v51 }
  0xb6   : > { %1160 = vst [vmem:[%s1718_s18 + $0x88] sm:$0xff] %v1096_v52 }
  0xb8   : > { %v802_v53 = vpop.f32.mrf.mxu2  ;;  %v842_v54 = vpop.f32.mrf.mxu3 }
  0xb9   : > { %v1112_v55 = vadd.f32 %v1713_v40, %v802_v53  ;;  %v1128_v56 = vadd.f32 %v1713_v40, %v842_v54  ;;  %v725_v57 = vpop.f32.mrf.mxu0  ;;  %v765_v58 = vpop.f32.mrf.mxu1 }
  0xba   : > { %v1081_v59 = vadd.f32 %v1713_v40, %v725_v57  ;;  %v1097_v60 = vadd.f32 %v1713_v40, %v765_v58 }
  0xbb   : > { %1176 = vst [vmem:[%s1718_s18 + $0x108] sm:$0xff] %v1112_v55 }
  0xbc   : > { %1192 = vst [vmem:[%s1718_s18 + $0x188] sm:$0xff] %v1128_v56 }
  0xbd   : > { %1145 = vst [vmem:[%s1718_s18 + $0x10] sm:$0xff] %v1081_v59 }
  0xbe   : > { %1161 = vst [vmem:[%s1718_s18 + $0x90] sm:$0xff] %v1097_v60 }
  0xc0   : > { %v805_v61 = vpop.f32.mrf.mxu2  ;;  %v845_v62 = vpop.f32.mrf.mxu3 }
  0xc1   : > { %v1113_v63 = vadd.f32 %v1713_v40, %v805_v61  ;;  %v1129_v0 = vadd.f32 %v1713_v40, %v845_v62  ;;  %v727_v1 = vpop.f32.mrf.mxu0  ;;  %v767_v2 = vpop.f32.mrf.mxu1 }
  0xc2   : > { %v1082_v3 = vadd.f32 %v1713_v40, %v727_v1  ;;  %v1098_v4 = vadd.f32 %v1713_v40, %v767_v2 }
  0xc3   : > { %1177 = vst [vmem:[%s1718_s18 + $0x110] sm:$0xff] %v1113_v63 }
  0xc4   : > { %1193 = vst [vmem:[%s1718_s18 + $0x190] sm:$0xff] %v1129_v0 }
  0xc5   : > { %1146 = vst [vmem:[%s1718_s18 + $0x18] sm:$0xff] %v1082_v3 }
  0xc6   : > { %1162 = vst [vmem:[%s1718_s18 + $0x98] sm:$0xff] %v1098_v4 }
  0xc8   : > { %v807_v5 = vpop.f32.mrf.mxu2  ;;  %v847_v6 = vpop.f32.mrf.mxu3 }
  0xc9   : > { %v1114_v7 = vadd.f32 %v1713_v40, %v807_v5  ;;  %v1130_v8 = vadd.f32 %v1713_v40, %v847_v6  ;;  %v730_v9 = vpop.f32.mrf.mxu0  ;;  %v770_v10 = vpop.f32.mrf.mxu1 }
  0xca   : > { %v1083_v11 = vadd.f32 %v1713_v40, %v730_v9  ;;  %v1099_v12 = vadd.f32 %v1713_v40, %v770_v10 }
  0xcb   : > { %1178 = vst [vmem:[%s1718_s18 + $0x118] sm:$0xff] %v1114_v7 }
  0xcc   : > { %1194 = vst [vmem:[%s1718_s18 + $0x198] sm:$0xff] %v1130_v8 }
  0xcd   : > { %1147 = vst [vmem:[%s1718_s18 + $0x20] sm:$0xff] %v1083_v11 }
  0xce   : > { %1163 = vst [vmem:[%s1718_s18 + $0xa0] sm:$0xff] %v1099_v12 }
  0xd0   : > { %v810_v13 = vpop.f32.mrf.mxu2  ;;  %v850_v14 = vpop.f32.mrf.mxu3 }
  0xd1   : > { %v1115_v15 = vadd.f32 %v1713_v40, %v810_v13  ;;  %v1131_v16 = vadd.f32 %v1713_v40, %v850_v14  ;;  %v732_v17 = vpop.f32.mrf.mxu0  ;;  %v772_v18 = vpop.f32.mrf.mxu1 }
  0xd2   : > { %v1084_v19 = vadd.f32 %v1713_v40, %v732_v17  ;;  %v1100_v20 = vadd.f32 %v1713_v40, %v772_v18 }
  0xd3   : > { %1179 = vst [vmem:[%s1718_s18 + $0x120] sm:$0xff] %v1115_v15 }
  0xd4   : > { %1195 = vst [vmem:[%s1718_s18 + $0x1a0] sm:$0xff] %v1131_v16 }
  0xd5   : > { %1148 = vst [vmem:[%s1718_s18 + $0x28] sm:$0xff] %v1084_v19 }
  0xd6   : > { %1164 = vst [vmem:[%s1718_s18 + $0xa8] sm:$0xff] %v1100_v20 }
  0xd8   : > { %v812_v21 = vpop.f32.mrf.mxu2  ;;  %v852_v22 = vpop.f32.mrf.mxu3 }
  0xd9   : > { %v1116_v23 = vadd.f32 %v1713_v40, %v812_v21  ;;  %v1132_v24 = vadd.f32 %v1713_v40, %v852_v22  ;;  %v735_v25 = vpop.f32.mrf.mxu0  ;;  %v775_v26 = vpop.f32.mrf.mxu1 }
  0xda   : > { %v1085_v27 = vadd.f32 %v1713_v40, %v735_v25  ;;  %v1101_v28 = vadd.f32 %v1713_v40, %v775_v26 }
  0xdb   : > { %1180 = vst [vmem:[%s1718_s18 + $0x128] sm:$0xff] %v1116_v23 }
  0xdc   : > { %1196 = vst [vmem:[%s1718_s18 + $0x1a8] sm:$0xff] %v1132_v24 }
  0xdd   : > { %1149 = vst [vmem:[%s1718_s18 + $0x30] sm:$0xff] %v1085_v27 }
  0xde   : > { %1165 = vst [vmem:[%s1718_s18 + $0xb0] sm:$0xff] %v1101_v28 }
  0xe0   : > { %v815_v29 = vpop.f32.mrf.mxu2  ;;  %v855_v30 = vpop.f32.mrf.mxu3 }
  0xe1   : > { %v1117_v31 = vadd.f32 %v1713_v40, %v815_v29  ;;  %v1133_v32 = vadd.f32 %v1713_v40, %v855_v30  ;;  %v737_v33 = vpop.f32.mrf.mxu0  ;;  %v777_v34 = vpop.f32.mrf.mxu1 }
  0xe2   : > { %v1086_v35 = vadd.f32 %v1713_v40, %v737_v33  ;;  %v1102_v36 = vadd.f32 %v1713_v40, %v777_v34 }
  0xe3   : > { %1181 = vst [vmem:[%s1718_s18 + $0x130] sm:$0xff] %v1117_v31 }
  0xe4   : > { %1197 = vst [vmem:[%s1718_s18 + $0x1b0] sm:$0xff] %v1133_v32 }
  0xe5   : > { %1150 = vst [vmem:[%s1718_s18 + $0x38] sm:$0xff] %v1086_v35 }
  0xe6   : > { %1166 = vst [vmem:[%s1718_s18 + $0xb8] sm:$0xff] %v1102_v36 }
  0xe8   : > { %v817_v37 = vpop.f32.mrf.mxu2  ;;  %v857_v38 = vpop.f32.mrf.mxu3 }
  0xe9   : > { %v1118_v39 = vadd.f32 %v1713_v40, %v817_v37  ;;  %v1134_v41 = vadd.f32 %v1713_v40, %v857_v38  ;;  %v740_v42 = vpop.f32.mrf.mxu0  ;;  %v780_v43 = vpop.f32.mrf.mxu1 }
  0xea   : > { %v1087_v44 = vadd.f32 %v1713_v40, %v740_v42  ;;  %v1103_v45 = vadd.f32 %v1713_v40, %v780_v43 }
  0xeb   : > { %1182 = vst [vmem:[%s1718_s18 + $0x138] sm:$0xff] %v1118_v39 }
  0xec   : > { %1198 = vst [vmem:[%s1718_s18 + $0x1b8] sm:$0xff] %v1134_v41 }
  0xed   : > { %1151 = vst [vmem:[%s1718_s18 + $0x40] sm:$0xff] %v1087_v44 }
  0xee   : > { %1167 = vst [vmem:[%s1718_s18 + $0xc0] sm:$0xff] %v1103_v45 }
  0xf0   : > { %v820_v46 = vpop.f32.mrf.mxu2  ;;  %v860_v47 = vpop.f32.mrf.mxu3 }
  0xf1   : > { %v1119_v48 = vadd.f32 %v1713_v40, %v820_v46  ;;  %v1135_v49 = vadd.f32 %v1713_v40, %v860_v47  ;;  %v742_v50 = vpop.f32.mrf.mxu0  ;;  %v782_v51 = vpop.f32.mrf.mxu1 }
  0xf2   : > { %v1088_v52 = vadd.f32 %v1713_v40, %v742_v50  ;;  %v1104_v53 = vadd.f32 %v1713_v40, %v782_v51 }
  0xf3   : > { %1183 = vst [vmem:[%s1718_s18 + $0x140] sm:$0xff] %v1119_v48 }
  0xf4   : > { %1199 = vst [vmem:[%s1718_s18 + $0x1c0] sm:$0xff] %v1135_v49 }
  0xf5   : > { %1152 = vst [vmem:[%s1718_s18 + $0x48] sm:$0xff] %v1088_v52 }
  0xf6   : > { %1168 = vst [vmem:[%s1718_s18 + $0xc8] sm:$0xff] %v1104_v53 }
  0xf8   : > { %v822_v54 = vpop.f32.mrf.mxu2  ;;  %v862_v55 = vpop.f32.mrf.mxu3 }
  0xf9   : > { %v1120_v56 = vadd.f32 %v1713_v40, %v822_v54  ;;  %v1136_v57 = vadd.f32 %v1713_v40, %v862_v55  ;;  %v745_v58 = vpop.f32.mrf.mxu0  ;;  %v785_v59 = vpop.f32.mrf.mxu1 }
  0xfa   : > { %v1089_v60 = vadd.f32 %v1713_v40, %v745_v58  ;;  %v1105_v61 = vadd.f32 %v1713_v40, %v785_v59 }
  0xfb   : > { %1184 = vst [vmem:[%s1718_s18 + $0x148] sm:$0xff] %v1120_v56 }
  0xfc   : > { %1200 = vst [vmem:[%s1718_s18 + $0x1c8] sm:$0xff] %v1136_v57 }
  0xfd   : > { %1153 = vst [vmem:[%s1718_s18 + $0x50] sm:$0xff] %v1089_v60 }
  0xfe   : > { %1169 = vst [vmem:[%s1718_s18 + $0xd0] sm:$0xff] %v1105_v61 }
 0x100   : > { %v825_v62 = vpop.f32.mrf.mxu2  ;;  %v865_v63 = vpop.f32.mrf.mxu3 }
 0x101   : > { %v1121_v0 = vadd.f32 %v1713_v40, %v825_v62  ;;  %v1137_v1 = vadd.f32 %v1713_v40, %v865_v63  ;;  %v747_v2 = vpop.f32.mrf.mxu0  ;;  %v787_v3 = vpop.f32.mrf.mxu1 }
 0x102   : > { %v1090_v4 = vadd.f32 %v1713_v40, %v747_v2  ;;  %v1106_v5 = vadd.f32 %v1713_v40, %v787_v3 }
 0x103   : > { %1185 = vst [vmem:[%s1718_s18 + $0x150] sm:$0xff] %v1121_v0 }
 0x104   : > { %1201 = vst [vmem:[%s1718_s18 + $0x1d0] sm:$0xff] %v1137_v1 }
 0x105   : > { %1154 = vst [vmem:[%s1718_s18 + $0x58] sm:$0xff] %v1090_v4 }
 0x106   : > { %1170 = vst [vmem:[%s1718_s18 + $0xd8] sm:$0xff] %v1106_v5 }
 0x108   : > { %v827_v6 = vpop.f32.mrf.mxu2  ;;  %v867_v7 = vpop.f32.mrf.mxu3 }
 0x109   : > { %v1122_v8 = vadd.f32 %v1713_v40, %v827_v6  ;;  %v1138_v9 = vadd.f32 %v1713_v40, %v867_v7  ;;  %v750_v10 = vpop.f32.mrf.mxu0  ;;  %v790_v11 = vpop.f32.mrf.mxu1 }
 0x10a   : > { %v1091_v12 = vadd.f32 %v1713_v40, %v750_v10  ;;  %v1107_v13 = vadd.f32 %v1713_v40, %v790_v11 }
 0x10b   : > { %1186 = vst [vmem:[%s1718_s18 + $0x158] sm:$0xff] %v1122_v8 }
 0x10c   : > { %1202 = vst [vmem:[%s1718_s18 + $0x1d8] sm:$0xff] %v1138_v9 }
 0x10d   : > { %1155 = vst [vmem:[%s1718_s18 + $0x60] sm:$0xff] %v1091_v12 }
 0x10e   : > { %1171 = vst [vmem:[%s1718_s18 + $0xe0] sm:$0xff] %v1107_v13 }
 0x110   : > { %v830_v14 = vpop.f32.mrf.mxu2  ;;  %v870_v15 = vpop.f32.mrf.mxu3 }
 0x111   : > { %v1123_v16 = vadd.f32 %v1713_v40, %v830_v14  ;;  %v1139_v17 = vadd.f32 %v1713_v40, %v870_v15  ;;  %v752_v18 = vpop.f32.mrf.mxu0  ;;  %v792_v19 = vpop.f32.mrf.mxu1 }
 0x112   : > { %v1092_v20 = vadd.f32 %v1713_v40, %v752_v18  ;;  %v1108_v21 = vadd.f32 %v1713_v40, %v792_v19 }
 0x113   : > { %1187 = vst [vmem:[%s1718_s18 + $0x160] sm:$0xff] %v1123_v16 }
 0x114   : > { %1203 = vst [vmem:[%s1718_s18 + $0x1e0] sm:$0xff] %v1139_v17 }
 0x115   : > { %1156 = vst [vmem:[%s1718_s18 + $0x68] sm:$0xff] %v1092_v20 }
 0x116   : > { %1172 = vst [vmem:[%s1718_s18 + $0xe8] sm:$0xff] %v1108_v21 }
 0x118   : > { %v832_v22 = vpop.f32.mrf.mxu2  ;;  %v872_v23 = vpop.f32.mrf.mxu3 }
 0x119   : > { %v1124_v24 = vadd.f32 %v1713_v40, %v832_v22  ;;  %v1140_v25 = vadd.f32 %v1713_v40, %v872_v23  ;;  %v755_v26 = vpop.f32.mrf.mxu0  ;;  %v795_v27 = vpop.f32.mrf.mxu1 }
 0x11a   : > { %v1093_v28 = vadd.f32 %v1713_v40, %v755_v26  ;;  %v1109_v29 = vadd.f32 %v1713_v40, %v795_v27 }
 0x11b   : > { %1188 = vst [vmem:[%s1718_s18 + $0x168] sm:$0xff] %v1124_v24 }
 0x11c   : > { %1204 = vst [vmem:[%s1718_s18 + $0x1e8] sm:$0xff] %v1140_v25 }
 0x11d   : > { %1157 = vst [vmem:[%s1718_s18 + $0x70] sm:$0xff] %v1093_v28 }
 0x11e   : > { %1173 = vst [vmem:[%s1718_s18 + $0xf0] sm:$0xff] %v1109_v29 }
 0x120   : > { %v835_v30 = vpop.f32.mrf.mxu2  ;;  %v875_v31 = vpop.f32.mrf.mxu3 }
 0x121   : > { %v1125_v32 = vadd.f32 %v1713_v40, %v835_v30  ;;  %v1141_v33 = vadd.f32 %v1713_v40, %v875_v31  ;;  %v757_v34 = vpop.f32.mrf.mxu0  ;;  %v797_v35 = vpop.f32.mrf.mxu1 }
 0x122   : > { %v1094_v36 = vadd.f32 %v1713_v40, %v757_v34  ;;  %v1110_v37 = vadd.f32 %v1713_v40, %v797_v35 }
 0x123   : > { %1189 = vst [vmem:[%s1718_s18 + $0x170] sm:$0xff] %v1125_v32 }
 0x124   : > { %1205 = vst [vmem:[%s1718_s18 + $0x1f0] sm:$0xff] %v1141_v33 }
 0x125   : > { %1158 = vst [vmem:[%s1718_s18 + $0x78] sm:$0xff] %v1094_v36 }
 0x126   : > { %1174 = vst [vmem:[%s1718_s18 + $0xf8] sm:$0xff] %v1110_v37 }
 0x128   : > { %v837_v38 = vpop.f32.mrf.mxu2  ;;  %v877_v39 = vpop.f32.mrf.mxu3 }
 0x129   : > { %v1126_v41 = vadd.f32 %v1713_v40, %v837_v38  ;;  %v1142_v42 = vadd.f32 %v1713_v40, %v877_v39 }
 0x12b   : > { %1190 = vst [vmem:[%s1718_s18 + $0x178] sm:$0xff] %v1126_v41 }
 0x12c   : > { %1206 = vst [vmem:[%s1718_s18 + $0x1f8] sm:$0xff] %v1142_v42 }
 0x12d PF: > { %s13_s14 = sadd.s32 1, %s1602_s14   ;;  %s1861_s12 = smov %s1598_s13 }
 0x12e   : > { %p10_p5 = scmp.ge.s32.totalorder %s13_s14, 18   ;;  %s1862_s13 = smov %s1864_s15 }
 0x130   :  { %12 = sbr.rel (!%p10_p5) target bundleno = 2 (0x2), region = 76 }

// kernel: hourglass_fwd.73
= control target key start
LH: loop header
LB: loop body
LE: loop exit
PB: predicated region body
PF: predicated region fallthrough
CT: control target
= control target key end

     0   :  { %s1898_s15 = smov 0   ;;  %s1900_s16 = smov 0   ;;  %s2200_s0 = inlined_call_operand.vmem [shape: bf16[1024,128], index: 0, kind: input, shape index: {}]   ;;  %s2201_s1 = inlined_call_operand.vmem [shape: bf16[128,128], index: 1, kind: input, shape index: {}]   ;;  %s2202_s2 = inlined_call_operand.vmem [shape: f32[1,128], index: 2, kind: input, shape index: {}]   ;;  %s2203_s3 = inlined_call_operand.vmem [shape: f32[1024,128], index: 3, kind: input, shape index: {}]   ;;  %s2204_s4 = inlined_call_operand.vmem [shape: f32[1024,128], index: 4, kind: output, shape index: {}]  }
   0x1   :  { %s1902_s17 = smov 0  }
   0x2 LB: > { %s33_s18 = sadd.s32 1, %s1867_s16  ;;  %p1591_p0 = scmp.ge.s32.totalorder %s1871_s17, 1  ;;  %s1871_s17 = sphi %s1902_s17, %s14_s17   ;;  %s1867_s16 = sphi %s1900_s16, %s2206_s16   ;;  %s1863_s15 = sphi %s1898_s15, %s2205_s15  }
   0x3   : > { %p35_p1 = scmp.ge.s32.totalorder %s33_s18, 2  ;;  %p229_p2 = scmp.lt.s32.totalorder %s1871_s17, 3 }
   0x5   : > { %s2208_s18 = smov (%p35_p1, %s33_s18), 0  ;;  %p230_p3 = pnand %p1591_p0, %p229_p2 }
   0x6   : > { %s1592_s27 = sshll.u32 (!%p230_p3), %s1863_s15, 6 }
   0x7   : > { %233 = sbr.rel (%p230_p3) target bundleno = 305 (0x131), region = 36  ;;  %p281_p4 = scmp.lt.s32.totalorder (!%p230_p3), %s1592_s27, 127 }
   0xc   : > { %v1799_v0 = vld [vmem:[%s2201_s1 + $0x38] sm:$0xff]  ;;  %v1798_v1 = vld [vmem:[%s2201_s1 + $0x30] sm:$0xff]  ;;  %v1797_v2 = vld [vmem:[%s2201_s1 + $0x28] sm:$0xff]  ;;  %s2210_s27 = smov (!%p281_p4, %s1592_s27), 127 }
   0xd   : > { %771 = vmatpush.bf16.msra.mxu0 %v1799_v0  ;;  %1800 = vmatpush.bf16.msra.mxu1 %v1799_v0  ;;  %v1796_v3 = vld [vmem:[%s2201_s1 + $0x20] sm:$0xff]  ;;  %v1795_v4 = vld [vmem:[%s2201_s1 + $0x18] sm:$0xff]  ;;  %v1794_v5 = vld [vmem:[%s2201_s1 + $0x10] sm:$0xff]  ;;  %s1593_s8 = sshll.u32 %s2210_s27, 2  ;;  %s1595_s14 = sshll.u32 %s2210_s27, 3 }
   0xe   : > { %1801 = vmatpush.bf16.msra.mxu2 %v1799_v0  ;;  %1802 = vmatpush.bf16.msra.mxu3 %v1799_v0  ;;  %v1793_v6 = vld [vmem:[%s2201_s1 + $0x8] sm:$0xff]  ;;  %v1792_v7 = vld [vmem:[%s2201_s1] sm:$0xff]  ;;  %s1949_s13 = scalar_lea.vmem %s2200_s0, %s1593_s8  ;;  %s1987_s20 = scalar_lea.vmem %s2203_s3, %s1595_s14 }
   0xf   : > { %v1760_v8 = vld [vmem:[%s1949_s13] sm:$0xff]  ;;  %v1761_v12 = vld [vmem:[%s1949_s13 + $0x8] sm:$0xff]  ;;  %v1762_v16 = vld [vmem:[%s1949_s13 + $0x10] sm:$0xff]  ;;  %s2001_s25 = scalar_lea.vmem %s2204_s4, %s1595_s14 }
  0x10   : > { %v1768_v9 = vld [vmem:[%s1949_s13 + $0x40] sm:$0xff]  ;;  %v1769_v13 = vld [vmem:[%s1949_s13 + $0x48] sm:$0xff]  ;;  %v1770_v17 = vld [vmem:[%s1949_s13 + $0x50] sm:$0xff] }
  0x11   : > { %772 = vmatpush.bf16.msra.mxu0 %v1798_v1  ;;  %1803 = vmatpush.bf16.msra.mxu1 %v1798_v1  ;;  %v1776_v10 = vld [vmem:[%s1949_s13 + $0x80] sm:$0xff]  ;;  %v1777_v14 = vld [vmem:[%s1949_s13 + $0x88] sm:$0xff]  ;;  %v1778_v18 = vld [vmem:[%s1949_s13 + $0x90] sm:$0xff] }
  0x12   : > { %1804 = vmatpush.bf16.msra.mxu2 %v1798_v1  ;;  %1805 = vmatpush.bf16.msra.mxu3 %v1798_v1  ;;  %v1784_v11 = vld [vmem:[%s1949_s13 + $0xc0] sm:$0xff]  ;;  %v1785_v15 = vld [vmem:[%s1949_s13 + $0xc8] sm:$0xff]  ;;  %v1786_v19 = vld [vmem:[%s1949_s13 + $0xd0] sm:$0xff] }
  0x13   : > { %v1763_v20 = vld [vmem:[%s1949_s13 + $0x18] sm:$0xff]  ;;  %v1764_v24 = vld [vmem:[%s1949_s13 + $0x20] sm:$0xff]  ;;  %v1765_v28 = vld [vmem:[%s1949_s13 + $0x28] sm:$0xff] }
  0x14   : > { %v1771_v21 = vld [vmem:[%s1949_s13 + $0x58] sm:$0xff]  ;;  %v1772_v25 = vld [vmem:[%s1949_s13 + $0x60] sm:$0xff]  ;;  %v1773_v29 = vld [vmem:[%s1949_s13 + $0x68] sm:$0xff] }
  0x15   : > { %773 = vmatpush.bf16.msra.mxu0 %v1797_v2  ;;  %1806 = vmatpush.bf16.msra.mxu1 %v1797_v2  ;;  %v1779_v22 = vld [vmem:[%s1949_s13 + $0x98] sm:$0xff]  ;;  %v1780_v26 = vld [vmem:[%s1949_s13 + $0xa0] sm:$0xff]  ;;  %v1781_v30 = vld [vmem:[%s1949_s13 + $0xa8] sm:$0xff] }
  0x16   : > { %1807 = vmatpush.bf16.msra.mxu2 %v1797_v2  ;;  %1808 = vmatpush.bf16.msra.mxu3 %v1797_v2  ;;  %v1787_v23 = vld [vmem:[%s1949_s13 + $0xd8] sm:$0xff]  ;;  %v1788_v27 = vld [vmem:[%s1949_s13 + $0xe0] sm:$0xff]  ;;  %v1789_v31 = vld [vmem:[%s1949_s13 + $0xe8] sm:$0xff] }
  0x17   : > { %v1766_v32 = vld [vmem:[%s1949_s13 + $0x30] sm:$0xff]  ;;  %v1767_v36 = vld [vmem:[%s1949_s13 + $0x38] sm:$0xff]  ;;  %v1992_v40 = vld [vmem:[%s2202_s2] ss:$0 sm:$0xff] }
  0x18   : > { %v1774_v33 = vld [vmem:[%s1949_s13 + $0x70] sm:$0xff]  ;;  %v1775_v37 = vld [vmem:[%s1949_s13 + $0x78] sm:$0xff]  ;;  %v1203_v42 = vld [vmem:[%s1987_s20] sm:$0xff] }
  0x19   : > { %774 = vmatpush.bf16.msra.mxu0 %v1796_v3  ;;  %1809 = vmatpush.bf16.msra.mxu1 %v1796_v3  ;;  %v1782_v34 = vld [vmem:[%s1949_s13 + $0xb0] sm:$0xff]  ;;  %v1783_v38 = vld [vmem:[%s1949_s13 + $0xb8] sm:$0xff]  ;;  %v1219_v44 = vld [vmem:[%s1987_s20 + $0x80] sm:$0xff] }
  0x1a   : > { %1810 = vmatpush.bf16.msra.mxu2 %v1796_v3  ;;  %1811 = vmatpush.bf16.msra.mxu3 %v1796_v3  ;;  %v1790_v35 = vld [vmem:[%s1949_s13 + $0xf0] sm:$0xff]  ;;  %v1791_v39 = vld [vmem:[%s1949_s13 + $0xf8] sm:$0xff]  ;;  %v1235_v52 = vld [vmem:[%s1987_s20 + $0x100] sm:$0xff] }
  0x1b   : > { %v1251_v54 = vld [vmem:[%s1987_s20 + $0x180] sm:$0xff]  ;;  %v1204_v58 = vld [vmem:[%s1987_s20 + $0x8] sm:$0xff] }
  0x1c   : > { %v1220_v60 = vld [vmem:[%s1987_s20 + $0x88] sm:$0xff] }
  0x1d   : > { %775 = vmatpush.bf16.msra.mxu0 %v1795_v4  ;;  %1812 = vmatpush.bf16.msra.mxu1 %v1795_v4 }
  0x1e   : > { %1813 = vmatpush.bf16.msra.mxu2 %v1795_v4  ;;  %1814 = vmatpush.bf16.msra.mxu3 %v1795_v4 }
  0x21   : > { %776 = vmatpush.bf16.msra.mxu0 %v1794_v5  ;;  %1815 = vmatpush.bf16.msra.mxu1 %v1794_v5 }
  0x22   : > { %1816 = vmatpush.bf16.msra.mxu2 %v1794_v5  ;;  %1817 = vmatpush.bf16.msra.mxu3 %v1794_v5 }
  0x25   : > { %777 = vmatpush.bf16.msra.mxu0 %v1793_v6  ;;  %1818 = vmatpush.bf16.msra.mxu1 %v1793_v6 }
  0x26   : > { %1819 = vmatpush.bf16.msra.mxu2 %v1793_v6  ;;  %1820 = vmatpush.bf16.msra.mxu3 %v1793_v6 }
  0x29   : > { %778 = vmatpush.bf16.msra.mxu0 %v1792_v7  ;;  %1821 = vmatpush.bf16.msra.mxu1 %v1792_v7 }
  0x2a   : > { %1822 = vmatpush.bf16.msra.mxu2 %v1792_v7  ;;  %1823 = vmatpush.bf16.msra.mxu3 %v1792_v7 }
  0x2c   : > { %779 = vmatmul.bf16.vlgmr.msra.gmra.mxu0 %v1760_v8  ;;  %819 = vmatmul.bf16.vlgmr.msra.gmra.mxu1 %v1768_v9  ;;  %v1236_v8 = vld [vmem:[%s1987_s20 + $0x108] sm:$0xff] }
  0x2d   : > { %859 = vmatmul.bf16.vlgmr.msra.gmra.mxu2 %v1776_v10  ;;  %899 = vmatmul.bf16.vlgmr.msra.gmra.mxu3 %v1784_v11  ;;  %v1252_v10 = vld [vmem:[%s1987_s20 + $0x188] sm:$0xff] }
  0x3c   : > { %784 = vmatmul.bf16.gmra.mxu0 %v1761_v12  ;;  %824 = vmatmul.bf16.gmra.mxu1 %v1769_v13 }
  0x3d   : > { %864 = vmatmul.bf16.gmra.mxu2 %v1777_v14  ;;  %904 = vmatmul.bf16.gmra.mxu3 %v1785_v15  ;;  %v1205_v14 = vld [vmem:[%s1987_s20 + $0x10] sm:$0xff] }
  0x4c   : > { %789 = vmatmul.bf16.gmra.mxu0 %v1762_v16  ;;  %829 = vmatmul.bf16.gmra.mxu1 %v1770_v17  ;;  %v1221_v16 = vld [vmem:[%s1987_s20 + $0x90] sm:$0xff] }
  0x4d   : > { %869 = vmatmul.bf16.gmra.mxu2 %v1778_v18  ;;  %909 = vmatmul.bf16.gmra.mxu3 %v1786_v19 }
  0x5c   : > { %794 = vmatmul.bf16.gmra.mxu0 %v1763_v20  ;;  %834 = vmatmul.bf16.gmra.mxu1 %v1771_v21 }
  0x5d   : > { %874 = vmatmul.bf16.gmra.mxu2 %v1779_v22  ;;  %914 = vmatmul.bf16.gmra.mxu3 %v1787_v23 }
  0x6c   : > { %799 = vmatmul.bf16.gmra.mxu0 %v1764_v24  ;;  %839 = vmatmul.bf16.gmra.mxu1 %v1772_v25 }
  0x6d   : > { %879 = vmatmul.bf16.gmra.mxu2 %v1780_v26  ;;  %919 = vmatmul.bf16.gmra.mxu3 %v1788_v27 }
  0x7c   : > { %804 = vmatmul.bf16.gmra.mxu0 %v1765_v28  ;;  %844 = vmatmul.bf16.gmra.mxu1 %v1773_v29  ;;  %v1237_v28 = vld [vmem:[%s1987_s20 + $0x110] sm:$0xff] }
  0x7d   : > { %884 = vmatmul.bf16.gmra.mxu2 %v1781_v30  ;;  %924 = vmatmul.bf16.gmra.mxu3 %v1789_v31  ;;  %v1253_v30 = vld [vmem:[%s1987_s20 + $0x190] sm:$0xff] }
  0x8c   : > { %809 = vmatmul.bf16.gmra.mxu0 %v1766_v32  ;;  %849 = vmatmul.bf16.gmra.mxu1 %v1774_v33 }
  0x8d   : > { %889 = vmatmul.bf16.gmra.mxu2 %v1782_v34  ;;  %929 = vmatmul.bf16.gmra.mxu3 %v1790_v35  ;;  %v1206_v34 = vld [vmem:[%s1987_s20 + $0x18] sm:$0xff] }
  0x9c   : > { %814 = vmatmul.bf16.gmra.mxu0 %v1767_v36  ;;  %854 = vmatmul.bf16.gmra.mxu1 %v1775_v37  ;;  %v1222_v36 = vld [vmem:[%s1987_s20 + $0x98] sm:$0xff] }
  0x9d   : > { %894 = vmatmul.bf16.gmra.mxu2 %v1783_v38  ;;  %934 = vmatmul.bf16.gmra.mxu3 %v1791_v39 }
  0xa9   : > { %v780_v41 = vpop.f32.mrf.mxu0  ;;  %v820_v43 = vpop.f32.mrf.mxu1 }
  0xaa   : > { %v1139_v45 = vadd.f32 %v1992_v40, %v780_v41  ;;  %v1155_v46 = vadd.f32 %v1992_v40, %v820_v43 }
  0xac   : > { %v1267_v47 = vadd.f32 %v1203_v42, %v1139_v45  ;;  %v1283_v48 = vadd.f32 %v1219_v44, %v1155_v46 }
  0xae   : > { %v1331_v49 = vmax.f32 %v1267_v47, 0.0  ;;  %v1347_v50 = vmax.f32 %v1283_v48, 0.0 }
  0xb0   : > { %1395 = vst [vmem:[%s2001_s25] sm:$0xff] %v1331_v49  ;;  %v860_v51 = vpop.f32.mrf.mxu2  ;;  %v900_v53 = vpop.f32.mrf.mxu3  ;;  %v1238_v49 = vld [vmem:[%s1987_s20 + $0x118] sm:$0xff] }
  0xb1   : > { %1411 = vst [vmem:[%s2001_s25 + $0x80] sm:$0xff] %v1347_v50  ;;  %v1171_v55 = vadd.f32 %v1992_v40, %v860_v51  ;;  %v1187_v56 = vadd.f32 %v1992_v40, %v900_v53  ;;  %v782_v57 = vpop.f32.mrf.mxu0  ;;  %v822_v59 = vpop.f32.mrf.mxu1  ;;  %v1254_v51 = vld [vmem:[%s1987_s20 + $0x198] sm:$0xff] }
  0xb2   : > { %v1140_v61 = vadd.f32 %v1992_v40, %v782_v57  ;;  %v1156_v62 = vadd.f32 %v1992_v40, %v822_v59  ;;  %v1223_v57 = vld [vmem:[%s1987_s20 + $0xa0] sm:$0xff] }
  0xb3   : > { %v1299_v63 = vadd.f32 %v1235_v52, %v1171_v55  ;;  %v1315_v0 = vadd.f32 %v1251_v54, %v1187_v56  ;;  %v1207_v55 = vld [vmem:[%s1987_s20 + $0x20] sm:$0xff] }
  0xb4   : > { %v1268_v1 = vadd.f32 %v1204_v58, %v1140_v61  ;;  %v1284_v2 = vadd.f32 %v1220_v60, %v1156_v62 }
  0xb5   : > { %v1363_v3 = vmax.f32 %v1299_v63, 0.0  ;;  %v1379_v4 = vmax.f32 %v1315_v0, 0.0 }
  0xb6   : > { %v1332_v5 = vmax.f32 %v1268_v1, 0.0  ;;  %v1348_v6 = vmax.f32 %v1284_v2, 0.0 }
  0xb7   : > { %1427 = vst [vmem:[%s2001_s25 + $0x100] sm:$0xff] %v1363_v3 }
  0xb8   : > { %1443 = vst [vmem:[%s2001_s25 + $0x180] sm:$0xff] %v1379_v4  ;;  %v862_v7 = vpop.f32.mrf.mxu2  ;;  %v902_v9 = vpop.f32.mrf.mxu3 }
  0xb9   : > { %1396 = vst [vmem:[%s2001_s25 + $0x8] sm:$0xff] %v1332_v5  ;;  %v1172_v11 = vadd.f32 %v1992_v40, %v862_v7  ;;  %v1188_v12 = vadd.f32 %v1992_v40, %v902_v9  ;;  %v785_v13 = vpop.f32.mrf.mxu0  ;;  %v825_v15 = vpop.f32.mrf.mxu1  ;;  %v1239_v5 = vld [vmem:[%s1987_s20 + $0x120] sm:$0xff] }
  0xba   : > { %1412 = vst [vmem:[%s2001_s25 + $0x88] sm:$0xff] %v1348_v6  ;;  %v1141_v17 = vadd.f32 %v1992_v40, %v785_v13  ;;  %v1157_v18 = vadd.f32 %v1992_v40, %v825_v15  ;;  %v1255_v7 = vld [vmem:[%s1987_s20 + $0x1a0] sm:$0xff]  ;;  %v1224_v13 = vld [vmem:[%s1987_s20 + $0xa8] sm:$0xff] }
  0xbb   : > { %v1300_v19 = vadd.f32 %v1236_v8, %v1172_v11  ;;  %v1316_v20 = vadd.f32 %v1252_v10, %v1188_v12  ;;  %v1208_v11 = vld [vmem:[%s1987_s20 + $0x28] sm:$0xff] }
  0xbc   : > { %v1269_v21 = vadd.f32 %v1205_v14, %v1141_v17  ;;  %v1285_v22 = vadd.f32 %v1221_v16, %v1157_v18 }
  0xbd   : > { %v1364_v23 = vmax.f32 %v1300_v19, 0.0  ;;  %v1380_v24 = vmax.f32 %v1316_v20, 0.0 }
  0xbe   : > { %v1333_v25 = vmax.f32 %v1269_v21, 0.0  ;;  %v1349_v26 = vmax.f32 %v1285_v22, 0.0 }
  0xbf   : > { %1428 = vst [vmem:[%s2001_s25 + $0x108] sm:$0xff] %v1364_v23 }
  0xc0   : > { %1444 = vst [vmem:[%s2001_s25 + $0x188] sm:$0xff] %v1380_v24  ;;  %v865_v27 = vpop.f32.mrf.mxu2  ;;  %v905_v29 = vpop.f32.mrf.mxu3 }
  0xc1   : > { %1397 = vst [vmem:[%s2001_s25 + $0x10] sm:$0xff] %v1333_v25  ;;  %v1173_v31 = vadd.f32 %v1992_v40, %v865_v27  ;;  %v1189_v32 = vadd.f32 %v1992_v40, %v905_v29  ;;  %v787_v33 = vpop.f32.mrf.mxu0  ;;  %v827_v35 = vpop.f32.mrf.mxu1  ;;  %v1240_v25 = vld [vmem:[%s1987_s20 + $0x128] sm:$0xff] }
  0xc2   : > { %1413 = vst [vmem:[%s2001_s25 + $0x90] sm:$0xff] %v1349_v26  ;;  %v1142_v37 = vadd.f32 %v1992_v40, %v787_v33  ;;  %v1158_v38 = vadd.f32 %v1992_v40, %v827_v35  ;;  %v1256_v27 = vld [vmem:[%s1987_s20 + $0x1a8] sm:$0xff]  ;;  %v1225_v33 = vld [vmem:[%s1987_s20 + $0xb0] sm:$0xff] }
  0xc3   : > { %v1301_v39 = vadd.f32 %v1237_v28, %v1173_v31  ;;  %v1317_v41 = vadd.f32 %v1253_v30, %v1189_v32  ;;  %v1209_v31 = vld [vmem:[%s1987_s20 + $0x30] sm:$0xff] }
  0xc4   : > { %v1270_v42 = vadd.f32 %v1206_v34, %v1142_v37  ;;  %v1286_v43 = vadd.f32 %v1222_v36, %v1158_v38 }
  0xc5   : > { %v1365_v44 = vmax.f32 %v1301_v39, 0.0  ;;  %v1381_v45 = vmax.f32 %v1317_v41, 0.0 }
  0xc6   : > { %v1334_v46 = vmax.f32 %v1270_v42, 0.0  ;;  %v1350_v47 = vmax.f32 %v1286_v43, 0.0 }
  0xc7   : > { %1429 = vst [vmem:[%s2001_s25 + $0x110] sm:$0xff] %v1365_v44 }
  0xc8   : > { %1445 = vst [vmem:[%s2001_s25 + $0x190] sm:$0xff] %v1381_v45  ;;  %v867_v48 = vpop.f32.mrf.mxu2  ;;  %v907_v50 = vpop.f32.mrf.mxu3 }
  0xc9   : > { %1398 = vst [vmem:[%s2001_s25 + $0x18] sm:$0xff] %v1334_v46  ;;  %v1174_v52 = vadd.f32 %v1992_v40, %v867_v48  ;;  %v1190_v53 = vadd.f32 %v1992_v40, %v907_v50  ;;  %v790_v54 = vpop.f32.mrf.mxu0  ;;  %v830_v56 = vpop.f32.mrf.mxu1  ;;  %v1241_v46 = vld [vmem:[%s1987_s20 + $0x130] sm:$0xff] }
  0xca   : > { %1414 = vst [vmem:[%s2001_s25 + $0x98] sm:$0xff] %v1350_v47  ;;  %v1143_v58 = vadd.f32 %v1992_v40, %v790_v54  ;;  %v1159_v59 = vadd.f32 %v1992_v40, %v830_v56  ;;  %v1257_v48 = vld [vmem:[%s1987_s20 + $0x1b0] sm:$0xff]  ;;  %v1226_v54 = vld [vmem:[%s1987_s20 + $0xb8] sm:$0xff] }
  0xcb   : > { %v1302_v60 = vadd.f32 %v1238_v49, %v1174_v52  ;;  %v1318_v61 = vadd.f32 %v1254_v51, %v1190_v53  ;;  %v1210_v52 = vld [vmem:[%s1987_s20 + $0x38] sm:$0xff] }
  0xcc   : > { %v1271_v62 = vadd.f32 %v1207_v55, %v1143_v58  ;;  %v1287_v63 = vadd.f32 %v1223_v57, %v1159_v59 }
  0xcd   : > { %v1366_v0 = vmax.f32 %v1302_v60, 0.0  ;;  %v1382_v1 = vmax.f32 %v1318_v61, 0.0 }
  0xce   : > { %v1335_v2 = vmax.f32 %v1271_v62, 0.0  ;;  %v1351_v3 = vmax.f32 %v1287_v63, 0.0 }
  0xcf   : > { %1430 = vst [vmem:[%s2001_s25 + $0x118] sm:$0xff] %v1366_v0 }
  0xd0   : > { %1446 = vst [vmem:[%s2001_s25 + $0x198] sm:$0xff] %v1382_v1  ;;  %v870_v4 = vpop.f32.mrf.mxu2  ;;  %v910_v6 = vpop.f32.mrf.mxu3 }
  0xd1   : > { %1399 = vst [vmem:[%s2001_s25 + $0x20] sm:$0xff] %v1335_v2  ;;  %v1175_v8 = vadd.f32 %v1992_v40, %v870_v4  ;;  %v1191_v9 = vadd.f32 %v1992_v40, %v910_v6  ;;  %v792_v10 = vpop.f32.mrf.mxu0  ;;  %v832_v12 = vpop.f32.mrf.mxu1  ;;  %v1242_v2 = vld [vmem:[%s1987_s20 + $0x138] sm:$0xff] }
  0xd2   : > { %1415 = vst [vmem:[%s2001_s25 + $0xa0] sm:$0xff] %v1351_v3  ;;  %v1144_v14 = vadd.f32 %v1992_v40, %v792_v10  ;;  %v1160_v15 = vadd.f32 %v1992_v40, %v832_v12  ;;  %v1258_v4 = vld [vmem:[%s1987_s20 + $0x1b8] sm:$0xff]  ;;  %v1227_v10 = vld [vmem:[%s1987_s20 + $0xc0] sm:$0xff] }
  0xd3   : > { %v1303_v16 = vadd.f32 %v1239_v5, %v1175_v8  ;;  %v1319_v17 = vadd.f32 %v1255_v7, %v1191_v9  ;;  %v1211_v8 = vld [vmem:[%s1987_s20 + $0x40] sm:$0xff] }
  0xd4   : > { %v1272_v18 = vadd.f32 %v1208_v11, %v1144_v14  ;;  %v1288_v19 = vadd.f32 %v1224_v13, %v1160_v15 }
  0xd5   : > { %v1367_v20 = vmax.f32 %v1303_v16, 0.0  ;;  %v1383_v21 = vmax.f32 %v1319_v17, 0.0 }
  0xd6   : > { %v1336_v22 = vmax.f32 %v1272_v18, 0.0  ;;  %v1352_v23 = vmax.f32 %v1288_v19, 0.0 }
  0xd7   : > { %1431 = vst [vmem:[%s2001_s25 + $0x120] sm:$0xff] %v1367_v20 }
  0xd8   : > { %1447 = vst [vmem:[%s2001_s25 + $0x1a0] sm:$0xff] %v1383_v21  ;;  %v872_v24 = vpop.f32.mrf.mxu2  ;;  %v912_v26 = vpop.f32.mrf.mxu3 }
  0xd9   : > { %1400 = vst [vmem:[%s2001_s25 + $0x28] sm:$0xff] %v1336_v22  ;;  %v1176_v28 = vadd.f32 %v1992_v40, %v872_v24  ;;  %v1192_v29 = vadd.f32 %v1992_v40, %v912_v26  ;;  %v795_v30 = vpop.f32.mrf.mxu0  ;;  %v835_v32 = vpop.f32.mrf.mxu1  ;;  %v1243_v22 = vld [vmem:[%s1987_s20 + $0x140] sm:$0xff] }
  0xda   : > { %1416 = vst [vmem:[%s2001_s25 + $0xa8] sm:$0xff] %v1352_v23  ;;  %v1145_v34 = vadd.f32 %v1992_v40, %v795_v30  ;;  %v1161_v35 = vadd.f32 %v1992_v40, %v835_v32  ;;  %v1259_v24 = vld [vmem:[%s1987_s20 + $0x1c0] sm:$0xff]  ;;  %v1228_v30 = vld [vmem:[%s1987_s20 + $0xc8] sm:$0xff] }
  0xdb   : > { %v1304_v36 = vadd.f32 %v1240_v25, %v1176_v28  ;;  %v1320_v37 = vadd.f32 %v1256_v27, %v1192_v29  ;;  %v1212_v28 = vld [vmem:[%s1987_s20 + $0x48] sm:$0xff] }
  0xdc   : > { %v1273_v38 = vadd.f32 %v1209_v31, %v1145_v34  ;;  %v1289_v39 = vadd.f32 %v1225_v33, %v1161_v35 }
  0xdd   : > { %v1368_v41 = vmax.f32 %v1304_v36, 0.0  ;;  %v1384_v42 = vmax.f32 %v1320_v37, 0.0 }
  0xde   : > { %v1337_v43 = vmax.f32 %v1273_v38, 0.0  ;;  %v1353_v44 = vmax.f32 %v1289_v39, 0.0 }
  0xdf   : > { %1432 = vst [vmem:[%s2001_s25 + $0x128] sm:$0xff] %v1368_v41 }
  0xe0   : > { %1448 = vst [vmem:[%s2001_s25 + $0x1a8] sm:$0xff] %v1384_v42  ;;  %v875_v45 = vpop.f32.mrf.mxu2  ;;  %v915_v47 = vpop.f32.mrf.mxu3 }
  0xe1   : > { %1401 = vst [vmem:[%s2001_s25 + $0x30] sm:$0xff] %v1337_v43  ;;  %v1177_v49 = vadd.f32 %v1992_v40, %v875_v45  ;;  %v1193_v50 = vadd.f32 %v1992_v40, %v915_v47  ;;  %v797_v51 = vpop.f32.mrf.mxu0  ;;  %v837_v53 = vpop.f32.mrf.mxu1  ;;  %v1244_v43 = vld [vmem:[%s1987_s20 + $0x148] sm:$0xff] }
  0xe2   : > { %1417 = vst [vmem:[%s2001_s25 + $0xb0] sm:$0xff] %v1353_v44  ;;  %v1146_v55 = vadd.f32 %v1992_v40, %v797_v51  ;;  %v1162_v56 = vadd.f32 %v1992_v40, %v837_v53  ;;  %v1260_v45 = vld [vmem:[%s1987_s20 + $0x1c8] sm:$0xff]  ;;  %v1229_v51 = vld [vmem:[%s1987_s20 + $0xd0] sm:$0xff] }
  0xe3   : > { %v1305_v57 = vadd.f32 %v1241_v46, %v1177_v49  ;;  %v1321_v58 = vadd.f32 %v1257_v48, %v1193_v50  ;;  %v1213_v49 = vld [vmem:[%s1987_s20 + $0x50] sm:$0xff] }
  0xe4   : > { %v1274_v59 = vadd.f32 %v1210_v52, %v1146_v55  ;;  %v1290_v60 = vadd.f32 %v1226_v54, %v1162_v56 }
  0xe5   : > { %v1369_v61 = vmax.f32 %v1305_v57, 0.0  ;;  %v1385_v62 = vmax.f32 %v1321_v58, 0.0 }
  0xe6   : > { %v1338_v63 = vmax.f32 %v1274_v59, 0.0  ;;  %v1354_v0 = vmax.f32 %v1290_v60, 0.0 }
  0xe7   : > { %1433 = vst [vmem:[%s2001_s25 + $0x130] sm:$0xff] %v1369_v61 }
  0xe8   : > { %1449 = vst [vmem:[%s2001_s25 + $0x1b0] sm:$0xff] %v1385_v62  ;;  %v877_v1 = vpop.f32.mrf.mxu2  ;;  %v917_v3 = vpop.f32.mrf.mxu3 }
  0xe9   : > { %1402 = vst [vmem:[%s2001_s25 + $0x38] sm:$0xff] %v1338_v63  ;;  %v1178_v5 = vadd.f32 %v1992_v40, %v877_v1  ;;  %v1194_v6 = vadd.f32 %v1992_v40, %v917_v3  ;;  %v800_v7 = vpop.f32.mrf.mxu0  ;;  %v840_v9 = vpop.f32.mrf.mxu1  ;;  %v1245_v63 = vld [vmem:[%s1987_s20 + $0x150] sm:$0xff] }
  0xea   : > { %1418 = vst [vmem:[%s2001_s25 + $0xb8] sm:$0xff] %v1354_v0  ;;  %v1147_v11 = vadd.f32 %v1992_v40, %v800_v7  ;;  %v1163_v12 = vadd.f32 %v1992_v40, %v840_v9  ;;  %v1261_v1 = vld [vmem:[%s1987_s20 + $0x1d0] sm:$0xff]  ;;  %v1230_v7 = vld [vmem:[%s1987_s20 + $0xd8] sm:$0xff] }
  0xeb   : > { %v1306_v13 = vadd.f32 %v1242_v2, %v1178_v5  ;;  %v1322_v14 = vadd.f32 %v1258_v4, %v1194_v6  ;;  %v1214_v5 = vld [vmem:[%s1987_s20 + $0x58] sm:$0xff] }
  0xec   : > { %v1275_v15 = vadd.f32 %v1211_v8, %v1147_v11  ;;  %v1291_v16 = vadd.f32 %v1227_v10, %v1163_v12 }
  0xed   : > { %v1370_v17 = vmax.f32 %v1306_v13, 0.0  ;;  %v1386_v18 = vmax.f32 %v1322_v14, 0.0 }
  0xee   : > { %v1339_v19 = vmax.f32 %v1275_v15, 0.0  ;;  %v1355_v20 = vmax.f32 %v1291_v16, 0.0 }
  0xef   : > { %1434 = vst [vmem:[%s2001_s25 + $0x138] sm:$0xff] %v1370_v17 }
  0xf0   : > { %1450 = vst [vmem:[%s2001_s25 + $0x1b8] sm:$0xff] %v1386_v18  ;;  %v880_v21 = vpop.f32.mrf.mxu2  ;;  %v920_v23 = vpop.f32.mrf.mxu3 }
  0xf1   : > { %1403 = vst [vmem:[%s2001_s25 + $0x40] sm:$0xff] %v1339_v19  ;;  %v1179_v25 = vadd.f32 %v1992_v40, %v880_v21  ;;  %v1195_v26 = vadd.f32 %v1992_v40, %v920_v23  ;;  %v802_v27 = vpop.f32.mrf.mxu0  ;;  %v842_v29 = vpop.f32.mrf.mxu1  ;;  %v1246_v19 = vld [vmem:[%s1987_s20 + $0x158] sm:$0xff] }
  0xf2   : > { %1419 = vst [vmem:[%s2001_s25 + $0xc0] sm:$0xff] %v1355_v20  ;;  %v1148_v31 = vadd.f32 %v1992_v40, %v802_v27  ;;  %v1164_v32 = vadd.f32 %v1992_v40, %v842_v29  ;;  %v1262_v21 = vld [vmem:[%s1987_s20 + $0x1d8] sm:$0xff]  ;;  %v1231_v27 = vld [vmem:[%s1987_s20 + $0xe0] sm:$0xff] }
  0xf3   : > { %v1307_v33 = vadd.f32 %v1243_v22, %v1179_v25  ;;  %v1323_v34 = vadd.f32 %v1259_v24, %v1195_v26  ;;  %v1215_v25 = vld [vmem:[%s1987_s20 + $0x60] sm:$0xff] }
  0xf4   : > { %v1276_v35 = vadd.f32 %v1212_v28, %v1148_v31  ;;  %v1292_v36 = vadd.f32 %v1228_v30, %v1164_v32 }
  0xf5   : > { %v1371_v37 = vmax.f32 %v1307_v33, 0.0  ;;  %v1387_v38 = vmax.f32 %v1323_v34, 0.0 }
  0xf6   : > { %v1340_v39 = vmax.f32 %v1276_v35, 0.0  ;;  %v1356_v41 = vmax.f32 %v1292_v36, 0.0 }
  0xf7   : > { %1435 = vst [vmem:[%s2001_s25 + $0x140] sm:$0xff] %v1371_v37 }
  0xf8   : > { %1451 = vst [vmem:[%s2001_s25 + $0x1c0] sm:$0xff] %v1387_v38  ;;  %v882_v42 = vpop.f32.mrf.mxu2  ;;  %v922_v44 = vpop.f32.mrf.mxu3 }
  0xf9   : > { %1404 = vst [vmem:[%s2001_s25 + $0x48] sm:$0xff] %v1340_v39  ;;  %v1180_v46 = vadd.f32 %v1992_v40, %v882_v42  ;;  %v1196_v47 = vadd.f32 %v1992_v40, %v922_v44  ;;  %v805_v48 = vpop.f32.mrf.mxu0  ;;  %v845_v50 = vpop.f32.mrf.mxu1  ;;  %v1247_v39 = vld [vmem:[%s1987_s20 + $0x160] sm:$0xff] }
  0xfa   : > { %1420 = vst [vmem:[%s2001_s25 + $0xc8] sm:$0xff] %v1356_v41  ;;  %v1149_v52 = vadd.f32 %v1992_v40, %v805_v48  ;;  %v1165_v53 = vadd.f32 %v1992_v40, %v845_v50  ;;  %v1263_v42 = vld [vmem:[%s1987_s20 + $0x1e0] sm:$0xff]  ;;  %v1232_v48 = vld [vmem:[%s1987_s20 + $0xe8] sm:$0xff] }
  0xfb   : > { %v1308_v54 = vadd.f32 %v1244_v43, %v1180_v46  ;;  %v1324_v55 = vadd.f32 %v1260_v45, %v1196_v47  ;;  %v1216_v46 = vld [vmem:[%s1987_s20 + $0x68] sm:$0xff] }
  0xfc   : > { %v1277_v56 = vadd.f32 %v1213_v49, %v1149_v52  ;;  %v1293_v57 = vadd.f32 %v1229_v51, %v1165_v53 }
  0xfd   : > { %v1372_v58 = vmax.f32 %v1308_v54, 0.0  ;;  %v1388_v59 = vmax.f32 %v1324_v55, 0.0 }
  0xfe   : > { %v1341_v60 = vmax.f32 %v1277_v56, 0.0  ;;  %v1357_v61 = vmax.f32 %v1293_v57, 0.0 }
  0xff   : > { %1436 = vst [vmem:[%s2001_s25 + $0x148] sm:$0xff] %v1372_v58 }
 0x100   : > { %1452 = vst [vmem:[%s2001_s25 + $0x1c8] sm:$0xff] %v1388_v59  ;;  %v885_v62 = vpop.f32.mrf.mxu2  ;;  %v925_v0 = vpop.f32.mrf.mxu3 }
 0x101   : > { %1405 = vst [vmem:[%s2001_s25 + $0x50] sm:$0xff] %v1341_v60  ;;  %v1181_v2 = vadd.f32 %v1992_v40, %v885_v62  ;;  %v1197_v3 = vadd.f32 %v1992_v40, %v925_v0  ;;  %v807_v4 = vpop.f32.mrf.mxu0  ;;  %v847_v6 = vpop.f32.mrf.mxu1  ;;  %v1248_v60 = vld [vmem:[%s1987_s20 + $0x168] sm:$0xff] }
 0x102   : > { %1421 = vst [vmem:[%s2001_s25 + $0xd0] sm:$0xff] %v1357_v61  ;;  %v1150_v8 = vadd.f32 %v1992_v40, %v807_v4  ;;  %v1166_v9 = vadd.f32 %v1992_v40, %v847_v6  ;;  %v1264_v62 = vld [vmem:[%s1987_s20 + $0x1e8] sm:$0xff]  ;;  %v1233_v4 = vld [vmem:[%s1987_s20 + $0xf0] sm:$0xff] }
 0x103   : > { %v1309_v10 = vadd.f32 %v1245_v63, %v1181_v2  ;;  %v1325_v11 = vadd.f32 %v1261_v1, %v1197_v3  ;;  %v1217_v2 = vld [vmem:[%s1987_s20 + $0x70] sm:$0xff] }
 0x104   : > { %v1278_v12 = vadd.f32 %v1214_v5, %v1150_v8  ;;  %v1294_v13 = vadd.f32 %v1230_v7, %v1166_v9 }
 0x105   : > { %v1373_v14 = vmax.f32 %v1309_v10, 0.0  ;;  %v1389_v15 = vmax.f32 %v1325_v11, 0.0 }
 0x106   : > { %v1342_v16 = vmax.f32 %v1278_v12, 0.0  ;;  %v1358_v17 = vmax.f32 %v1294_v13, 0.0 }
 0x107   : > { %1437 = vst [vmem:[%s2001_s25 + $0x150] sm:$0xff] %v1373_v14 }
 0x108   : > { %1453 = vst [vmem:[%s2001_s25 + $0x1d0] sm:$0xff] %v1389_v15  ;;  %v887_v18 = vpop.f32.mrf.mxu2  ;;  %v927_v20 = vpop.f32.mrf.mxu3 }
 0x109   : > { %1406 = vst [vmem:[%s2001_s25 + $0x58] sm:$0xff] %v1342_v16  ;;  %v1182_v22 = vadd.f32 %v1992_v40, %v887_v18  ;;  %v1198_v23 = vadd.f32 %v1992_v40, %v927_v20  ;;  %v810_v24 = vpop.f32.mrf.mxu0  ;;  %v850_v26 = vpop.f32.mrf.mxu1  ;;  %v1249_v16 = vld [vmem:[%s1987_s20 + $0x170] sm:$0xff] }
 0x10a   : > { %1422 = vst [vmem:[%s2001_s25 + $0xd8] sm:$0xff] %v1358_v17  ;;  %v1151_v28 = vadd.f32 %v1992_v40, %v810_v24  ;;  %v1167_v29 = vadd.f32 %v1992_v40, %v850_v26  ;;  %v1265_v18 = vld [vmem:[%s1987_s20 + $0x1f0] sm:$0xff]  ;;  %v1234_v24 = vld [vmem:[%s1987_s20 + $0xf8] sm:$0xff] }
 0x10b   : > { %v1310_v30 = vadd.f32 %v1246_v19, %v1182_v22  ;;  %v1326_v31 = vadd.f32 %v1262_v21, %v1198_v23  ;;  %v1218_v22 = vld [vmem:[%s1987_s20 + $0x78] sm:$0xff] }
 0x10c   : > { %v1279_v32 = vadd.f32 %v1215_v25, %v1151_v28  ;;  %v1295_v33 = vadd.f32 %v1231_v27, %v1167_v29 }
 0x10d   : > { %v1374_v34 = vmax.f32 %v1310_v30, 0.0  ;;  %v1390_v35 = vmax.f32 %v1326_v31, 0.0 }
 0x10e   : > { %v1343_v36 = vmax.f32 %v1279_v32, 0.0  ;;  %v1359_v37 = vmax.f32 %v1295_v33, 0.0 }
 0x10f   : > { %1438 = vst [vmem:[%s2001_s25 + $0x158] sm:$0xff] %v1374_v34 }
 0x110   : > { %1454 = vst [vmem:[%s2001_s25 + $0x1d8] sm:$0xff] %v1390_v35  ;;  %v890_v38 = vpop.f32.mrf.mxu2  ;;  %v930_v41 = vpop.f32.mrf.mxu3 }
 0x111   : > { %1407 = vst [vmem:[%s2001_s25 + $0x60] sm:$0xff] %v1343_v36  ;;  %v1183_v43 = vadd.f32 %v1992_v40, %v890_v38  ;;  %v1199_v44 = vadd.f32 %v1992_v40, %v930_v41  ;;  %v812_v45 = vpop.f32.mrf.mxu0  ;;  %v852_v47 = vpop.f32.mrf.mxu1  ;;  %v1250_v36 = vld [vmem:[%s1987_s20 + $0x178] sm:$0xff] }
 0x112   : > { %1423 = vst [vmem:[%s2001_s25 + $0xe0] sm:$0xff] %v1359_v37  ;;  %v1152_v49 = vadd.f32 %v1992_v40, %v812_v45  ;;  %v1168_v50 = vadd.f32 %v1992_v40, %v852_v47  ;;  %v1266_v38 = vld [vmem:[%s1987_s20 + $0x1f8] sm:$0xff] }
 0x113   : > { %v1311_v51 = vadd.f32 %v1247_v39, %v1183_v43  ;;  %v1327_v52 = vadd.f32 %v1263_v42, %v1199_v44 }
 0x114   : > { %v1280_v53 = vadd.f32 %v1216_v46, %v1152_v49  ;;  %v1296_v54 = vadd.f32 %v1232_v48, %v1168_v50 }
 0x115   : > { %v1375_v55 = vmax.f32 %v1311_v51, 0.0  ;;  %v1391_v56 = vmax.f32 %v1327_v52, 0.0 }
 0x116   : > { %v1344_v57 = vmax.f32 %v1280_v53, 0.0  ;;  %v1360_v58 = vmax.f32 %v1296_v54, 0.0 }
 0x117   : > { %1439 = vst [vmem:[%s2001_s25 + $0x160] sm:$0xff] %v1375_v55 }
 0x118   : > { %1455 = vst [vmem:[%s2001_s25 + $0x1e0] sm:$0xff] %v1391_v56  ;;  %v892_v59 = vpop.f32.mrf.mxu2  ;;  %v932_v61 = vpop.f32.mrf.mxu3 }
 0x119   : > { %1408 = vst [vmem:[%s2001_s25 + $0x68] sm:$0xff] %v1344_v57  ;;  %v1184_v63 = vadd.f32 %v1992_v40, %v892_v59  ;;  %v1200_v0 = vadd.f32 %v1992_v40, %v932_v61  ;;  %v815_v1 = vpop.f32.mrf.mxu0  ;;  %v855_v3 = vpop.f32.mrf.mxu1 }
 0x11a   : > { %1424 = vst [vmem:[%s2001_s25 + $0xe8] sm:$0xff] %v1360_v58  ;;  %v1153_v5 = vadd.f32 %v1992_v40, %v815_v1  ;;  %v1169_v6 = vadd.f32 %v1992_v40, %v855_v3 }
 0x11b   : > { %v1312_v7 = vadd.f32 %v1248_v60, %v1184_v63  ;;  %v1328_v8 = vadd.f32 %v1264_v62, %v1200_v0 }
 0x11c   : > { %v1281_v9 = vadd.f32 %v1217_v2, %v1153_v5  ;;  %v1297_v10 = vadd.f32 %v1233_v4, %v1169_v6 }
 0x11d   : > { %v1376_v11 = vmax.f32 %v1312_v7, 0.0  ;;  %v1392_v12 = vmax.f32 %v1328_v8, 0.0 }
 0x11e   : > { %v1345_v13 = vmax.f32 %v1281_v9, 0.0  ;;  %v1361_v14 = vmax.f32 %v1297_v10, 0.0 }
 0x11f   : > { %1440 = vst [vmem:[%s2001_s25 + $0x168] sm:$0xff] %v1376_v11 }
 0x120   : > { %1456 = vst [vmem:[%s2001_s25 + $0x1e8] sm:$0xff] %v1392_v12  ;;  %v895_v15 = vpop.f32.mrf.mxu2  ;;  %v935_v17 = vpop.f32.mrf.mxu3 }
 0x121   : > { %1409 = vst [vmem:[%s2001_s25 + $0x70] sm:$0xff] %v1345_v13  ;;  %v1185_v19 = vadd.f32 %v1992_v40, %v895_v15  ;;  %v1201_v20 = vadd.f32 %v1992_v40, %v935_v17  ;;  %v817_v21 = vpop.f32.mrf.mxu0  ;;  %v857_v23 = vpop.f32.mrf.mxu1 }
 0x122   : > { %1425 = vst [vmem:[%s2001_s25 + $0xf0] sm:$0xff] %v1361_v14  ;;  %v1154_v25 = vadd.f32 %v1992_v40, %v817_v21  ;;  %v1170_v26 = vadd.f32 %v1992_v40, %v857_v23 }
 0x123   : > { %v1313_v27 = vadd.f32 %v1249_v16, %v1185_v19  ;;  %v1329_v28 = vadd.f32 %v1265_v18, %v1201_v20 }
 0x124   : > { %v1282_v29 = vadd.f32 %v1218_v22, %v1154_v25  ;;  %v1298_v30 = vadd.f32 %v1234_v24, %v1170_v26 }
 0x125   : > { %v1377_v31 = vmax.f32 %v1313_v27, 0.0  ;;  %v1393_v32 = vmax.f32 %v1329_v28, 0.0 }
 0x126   : > { %v1346_v33 = vmax.f32 %v1282_v29, 0.0  ;;  %v1362_v34 = vmax.f32 %v1298_v30, 0.0 }
 0x127   : > { %1441 = vst [vmem:[%s2001_s25 + $0x170] sm:$0xff] %v1377_v31 }
 0x128   : > { %1457 = vst [vmem:[%s2001_s25 + $0x1f0] sm:$0xff] %v1393_v32  ;;  %v897_v35 = vpop.f32.mrf.mxu2  ;;  %v937_v37 = vpop.f32.mrf.mxu3 }
 0x129   : > { %1410 = vst [vmem:[%s2001_s25 + $0x78] sm:$0xff] %v1346_v33  ;;  %v1186_v39 = vadd.f32 %v1992_v40, %v897_v35  ;;  %v1202_v41 = vadd.f32 %v1992_v40, %v937_v37 }
 0x12a   : > { %1426 = vst [vmem:[%s2001_s25 + $0xf8] sm:$0xff] %v1362_v34 }
 0x12b   : > { %v1314_v42 = vadd.f32 %v1250_v36, %v1186_v39  ;;  %v1330_v43 = vadd.f32 %v1266_v38, %v1202_v41 }
 0x12d   : > { %v1378_v44 = vmax.f32 %v1314_v42, 0.0  ;;  %v1394_v45 = vmax.f32 %v1330_v43, 0.0 }
 0x12f   : > { %1442 = vst [vmem:[%s2001_s25 + $0x178] sm:$0xff] %v1378_v44 }
 0x130   : > { %1458 = vst [vmem:[%s2001_s25 + $0x1f8] sm:$0xff] %v1394_v45 }
 0x131 PF: > { %s14_s17 = sadd.s32 1, %s1871_s17   ;;  %s2205_s15 = smov %s1867_s16 }
 0x132   : > { %p11_p5 = scmp.ge.s32.totalorder %s14_s17, 4   ;;  %s2206_s16 = smov %s2208_s18 }
 0x134   :  { %13 = sbr.rel (!%p11_p5) target bundleno = 2 (0x2), region = 83 }

</bundles_post_ra>
